<compile_context>
chip_gen: v7x
topology: tpu7x:2x2x1
jax: 0.10.0
libtpu: 0.0.40
codegen_flags: <defaults>
</compile_context>

<pallas_src>
import functools

import jax
import jax.numpy as jnp
from jax.experimental import pallas as pl
from jax.experimental.pallas import tpu as pltpu

NEG_SLOPE = 0.2  # LeakyReLU slope used throughout the model.


# ----------------------------------------------------------------------------
# Glue: pad=1 + 2x2 space-to-depth + 4-tap channel concat.  Turns a 4x4/s2/p1
# conv into a single matmul against a (16*Cin, Cout) weight matrix, with all
# kernel-visible shapes (8,128)-aligned (no junk rows, no unaligned windows).
# ----------------------------------------------------------------------------
def s2d_patches(x):
    """(B, H, W, C) -> (B*Ho*Wo, 16*C) im2col patch matrix; Ho=H//2, Wo=W//2."""
    B, H, W, C = x.shape
    Ho, Wo = H // 2, W // 2
    xp = jnp.pad(x, ((0, 0), (1, 1), (1, 1), (0, 0)))
    xs = xp.reshape(B, Ho + 1, 2, Wo + 1, 2, C)
    xs = xs.transpose(0, 1, 3, 2, 4, 5).reshape(B, Ho + 1, Wo + 1, 4 * C)
    p = jnp.concatenate(
        [xs[:, ii:ii + Ho, jj:jj + Wo, :] for ii in (0, 1) for jj in (0, 1)],
        axis=-1)
    return p.reshape(B * Ho * Wo, 16 * C)


def _conv_weight(w):
    """PyTorch (Cout, Cin, 4, 4) conv weight -> (16*Cin, Cout) bf16 matrix.

    Row index = (2*ii+jj)*4*Cin + (2*di+dj)*Cin + ci, matching s2d_patches'
    channel order; it addresses kernel tap (kh, kw) = (2*ii+di, 2*jj+dj).
    """
    cout, cin = w.shape[:2]
    wr = w.reshape(cout, cin, 2, 2, 2, 2)          # (co, ci, ii, di, jj, dj)
    wt = wr.transpose(2, 4, 3, 5, 1, 0)            # (ii, jj, di, dj, ci, co)
    return wt.reshape(16 * cin, cout).astype(jnp.bfloat16)


def _pick_tb(batch, target):
    """Images per grid step: <= target, divides batch, keeps grid >= 2 (v7x)."""
    tb = max(1, min(target, max(1, batch // 2)))
    while batch % tb:
        tb -= 1
    return tb


# ----------------------------------------------------------------------------
# Kernel 1: conv (as one patch matmul) + bias + LeakyReLU, TB images per step.
# ----------------------------------------------------------------------------
def _conv_kernel(p_ref, w_ref, b_ref, o_ref, *, negative_slope):
    # p_ref: (TB*R, 16*Cin) bf16 ; w_ref: (16*Cin, Cout) bf16
    # b_ref: (1, Cout) f32       ; o_ref: (TB*R, Cout) bf16
    acc = jnp.dot(p_ref[...], w_ref[...], preferred_element_type=jnp.float32)
    acc = acc + b_ref[...]
    acc = jnp.where(acc > 0, acc, negative_slope * acc)
    o_ref[...] = acc.astype(o_ref.dtype)


def conv_lrelu(x, w_mat, bias, *, tb_target, negative_slope=NEG_SLOPE):
    """4x4 / stride-2 / pad-1 Conv2d + LeakyReLU.  NHWC bf16 in / NHWC bf16 out."""
    B, H, W, Cin = x.shape
    Ho, Wo = H // 2, W // 2
    R = Ho * Wo
    K = 16 * Cin
    Cout = w_mat.shape[1]
    tb = _pick_tb(B, tb_target)

    p = s2d_patches(x)                                     # (B*R, K) bf16
    kernel = functools.partial(_conv_kernel, negative_slope=negative_slope)
    out = pl.pallas_call(
        kernel,
        out_shape=jax.ShapeDtypeStruct((B * R, Cout), jnp.bfloat16),
        grid=(B // tb,),
        in_specs=[
            pl.BlockSpec((tb * R, K), lambda b: (b, 0)),
            # Weight/bias blocks have constant index maps -> resident across
            # the grid.  (On v5e, pipeline_mode=pl.Buffered(1) on these would
            # halve their VMEM footprint if larger TB is ever needed.)
            pl.BlockSpec((K, Cout), lambda b: (0, 0)),
            pl.BlockSpec((1, Cout), lambda b: (0, 0)),
        ],
        out_specs=pl.BlockSpec((tb * R, Cout), lambda b: (b, 0)),
        compiler_params=pltpu.CompilerParams(
            dimension_semantics=("parallel",)),
    )(p, w_mat, bias)
    return out.reshape(B, Ho, Wo, Cout)


# ----------------------------------------------------------------------------
# Kernel 2: fused head = conv4 (4x4/s2/p1, 256->512) + LeakyReLU + conv5
# (4x4/s1/p0 -> 1 scalar).  conv4 runs as a batched (TB*16, 4096) matmul and
# conv5 is a weighted reduction of the f32 accumulator (no HBM round-trip for
# conv4's activation, no N=1 matmul).
# ----------------------------------------------------------------------------
def _head_kernel(p_ref, w4_ref, b4_ref, w5_ref, b5_ref, o_ref, *, negative_slope):
    # p_ref : (TB*16, 16*C) bf16 conv4 patches for TB images
    # w4_ref: (16*C, 512) bf16 ; b4_ref: (1, 512) f32
    # w5_ref: (16, 512)   f32  ; b5_ref: (1, 1) f32 ; o_ref: (TB, 1, 1) f32
    npos, cout = w5_ref.shape
    acc = jnp.dot(p_ref[...], w4_ref[...], preferred_element_type=jnp.float32)
    acc = acc + b4_ref[...]
    acc = jnp.where(acc > 0, acc, negative_slope * acc)       # conv4 LeakyReLU
    tb = acc.shape[0] // npos
    r = acc.reshape(tb, npos, cout) * w5_ref[...]             # conv5 weighting
    red = jnp.sum(jnp.sum(r, axis=2, keepdims=True), axis=1, keepdims=True)
    o_ref[...] = red + b5_ref[...]


def head_conv45(x, w4_mat, b4, w5_mat, b5, *, tb_target=16,
                negative_slope=NEG_SLOPE):
    B, H, W, C = x.shape                                   # (B, 8, 8, 256)
    R = (H // 2) * (W // 2)                                # 16 output positions
    K = 16 * C                                             # 4096
    Cout4 = w4_mat.shape[1]                                # 512
    tb = _pick_tb(B, tb_target)

    p = s2d_patches(x)                                     # (B*16, 4096) bf16
    kernel = functools.partial(_head_kernel, negative_slope=negative_slope)
    out = pl.pallas_call(
        kernel,
        out_shape=jax.ShapeDtypeStruct((B, 1, 1), jnp.float32),
        grid=(B // tb,),
        in_specs=[
            pl.BlockSpec((tb * R, K), lambda b: (b, 0)),
            pl.BlockSpec((K, Cout4), lambda b: (0, 0)),
            pl.BlockSpec((1, Cout4), lambda b: (0, 0)),
            pl.BlockSpec((R, Cout4), lambda b: (0, 0)),
            pl.BlockSpec((1, 1), lambda b: (0, 0)),
        ],
        out_specs=pl.BlockSpec((tb, 1, 1), lambda b: (b, 0, 0)),
        compiler_params=pltpu.CompilerParams(
            dimension_semantics=("parallel",)),
    )(p, w4_mat, b4, w5_mat, b5)
    return out.reshape(B)


# ----------------------------------------------------------------------------
# Kernel 3: label-embedding Linear — one grid step (matmul + bias).
# ----------------------------------------------------------------------------
def _linear_kernel(x_ref, w_ref, b_ref, o_ref):
    acc = jnp.dot(x_ref[...], w_ref[...], preferred_element_type=jnp.float32)
    o_ref[...] = (acc + b_ref[...]).astype(o_ref.dtype)


def linear(x, w_t, b, *, out_dtype=jnp.bfloat16):
    """out = x @ w_t + b.  x:(M,K) bf16, w_t:(K,N) bf16 (pre-cast), b:(1,N) f32."""
    M, K = x.shape
    N = w_t.shape[1]
    return pl.pallas_call(
        _linear_kernel,
        out_shape=jax.ShapeDtypeStruct((M, N), out_dtype),
        grid=(1,),
        in_specs=[
            pl.BlockSpec((M, K), lambda i: (0, 0)),
            pl.BlockSpec((K, N), lambda i: (0, 0)),
            pl.BlockSpec((1, N), lambda i: (0, 0)),
        ],
        out_specs=pl.BlockSpec((M, N), lambda i: (0, 0)),
    )(x, w_t, b)


# ----------------------------------------------------------------------------
# Parameters (synthetic, PyTorch layout) + kernel-layout preparation.
# ----------------------------------------------------------------------------
def init_params(key, channels, embed_dim, num_classes):
    keys = jax.random.split(key, 12)

    def rnd(k, shape, scale=0.05):
        return (scale * jax.random.normal(k, shape)).astype(jnp.float32)

    return {
        "emb":     rnd(keys[0], (num_classes, embed_dim)),
        # nn.Linear weight stored pre-transposed: (in, out) = weight.T
        "lin_w_t": rnd(keys[1], (embed_dim, 64 * 64)),
        "lin_b":   rnd(keys[2], (64 * 64,)),
        "conv1_w": rnd(keys[3], (64, channels + 1, 4, 4)),
        "conv1_b": rnd(keys[4], (64,)),
        "conv2_w": rnd(keys[5], (128, 64, 4, 4)),
        "conv2_b": rnd(keys[6], (128,)),
        "conv3_w": rnd(keys[7], (256, 128, 4, 4)),
        "conv3_b": rnd(keys[8], (256,)),
        "conv4_w": rnd(keys[9], (512, 256, 4, 4)),
        "conv4_b": rnd(keys[10], (512,)),
        "conv5_w": rnd(keys[11], (1, 512, 4, 4)),
        "conv5_b": jnp.zeros((1,), jnp.float32),
    }


def prepare_params(p):
    """PyTorch-layout f32 params -> kernel-ready bf16 weights / f32 biases.

    All casts happen exactly once here; nothing is re-cast inside the forward.
    """
    def b2(v):
        return v.reshape(1, -1).astype(jnp.float32)

    return {
        "emb":     p["emb"],
        "lin_w_t": p["lin_w_t"].astype(jnp.bfloat16),
        "lin_b":   b2(p["lin_b"]),
        "c1_w": _conv_weight(p["conv1_w"]), "c1_b": b2(p["conv1_b"]),
        "c2_w": _conv_weight(p["conv2_w"]), "c2_b": b2(p["conv2_b"]),
        "c3_w": _conv_weight(p["conv3_w"]), "c3_b": b2(p["conv3_b"]),
        "c4_w": _conv_weight(p["conv4_w"]), "c4_b": b2(p["conv4_b"]),
        "c5_wm": p["conv5_w"][0].transpose(1, 2, 0).reshape(16, -1)
                 .astype(jnp.float32),
        "c5_b":  p["conv5_b"].reshape(1, 1).astype(jnp.float32),
    }


# ----------------------------------------------------------------------------
# Forward pass — mirrors Discriminator.forward(images, labels).
# ----------------------------------------------------------------------------
def discriminator_forward(kp, images, labels, *, with_intermediates=False):
    """images: (B, C, 64, 64) f32 (NCHW, PyTorch convention); labels: (B,) int."""
    B = images.shape[0]

    # TODO(synk): the nn.Embedding row gather stays in plain JAX (tiny lookup,
    # no clean Pallas equivalent); the Linear runs as a single-step Pallas matmul.
    # Note: the label feature map is produced in bf16 (reference uses f32) —
    # an intentional precision difference.
    emb = jnp.take(kp["emb"], labels, axis=0).astype(jnp.bfloat16)
    label_fm = linear(emb, kp["lin_w_t"], kp["lin_b"])        # (B, 4096) bf16
    label_fm = label_fm.reshape(B, 64, 64, 1)                 # NHWC, 1 channel

    # NCHW -> NHWC once at the input; bf16 activations from here on.
    x0 = jnp.concatenate(
        [images.transpose(0, 2, 3, 1).astype(jnp.bfloat16), label_fm], axis=-1)

    x1 = conv_lrelu(x0, kp["c1_w"], kp["c1_b"], tb_target=4)   # (B, 32, 32,  64)
    x2 = conv_lrelu(x1, kp["c2_w"], kp["c2_b"], tb_target=4)   # (B, 16, 16, 128)
    x3 = conv_lrelu(x2, kp["c3_w"], kp["c3_b"], tb_target=8)   # (B,  8,  8, 256)
    out = head_conv45(x3, kp["c4_w"], kp["c4_b"], kp["c5_wm"], kp["c5_b"],
                      tb_target=16)                            # (B,) f32
    if with_intermediates:
        return out, (x1, x2, x3)
    return out


# ----------------------------------------------------------------------------
# Pure-JAX f32 reference (lax.conv) for correctness checking.
# ----------------------------------------------------------------------------
def reference_forward(p, images, labels, *, with_intermediates=False):
    B = images.shape[0]
    emb = jnp.take(p["emb"], labels, axis=0)
    lf = (emb @ p["lin_w_t"] + p["lin_b"]).reshape(B, 1, 64, 64)
    x = jnp.concatenate([images, lf], axis=1)

    def conv(x, w, b, stride, pad):
        y = jax.lax.conv_general_dilated(
            x, w, (stride, stride), [(pad, pad), (pad, pad)],
            dimension_numbers=("NCHW", "OIHW", "NCHW"))
        return y + b.reshape(1, -1, 1, 1)

    x1 = jax.nn.leaky_relu(conv(x,  p["conv1_w"], p["conv1_b"], 2, 1), NEG_SLOPE)
    x2 = jax.nn.leaky_relu(conv(x1, p["conv2_w"], p["conv2_b"], 2, 1), NEG_SLOPE)
    x3 = jax.nn.leaky_relu(conv(x2, p["conv3_w"], p["conv3_b"], 2, 1), NEG_SLOPE)
    x4 = jax.nn.leaky_relu(conv(x3, p["conv4_w"], p["conv4_b"], 2, 1), NEG_SLOPE)
    out = conv(x4, p["conv5_w"], p["conv5_b"], 1, 0).reshape(-1)
    if with_intermediates:
        return out, (x1, x2, x3)
    return out


if __name__ == "__main__":
    key = jax.random.PRNGKey(0)
    k_p, k_i, k_l = jax.random.split(key, 3)

    # Spatial size must be 64x64 — fixed by Linear(embed_dim, 64*64) + reshape.
    B, channels, embed_dim, num_classes = 2, 3, 16, 10
    params = init_params(k_p, channels, embed_dim, num_classes)
    kparams = prepare_params(params)
    images = jax.random.normal(k_i, (B, channels, 64, 64), jnp.float32)
    labels = jax.random.randint(k_l, (B,), 0, num_classes)

    fwd = jax.jit(discriminator_forward)
    out = jax.block_until_ready(fwd(kparams, images, labels))
    assert out.shape == (B,), out.shape
    assert bool(jnp.all(jnp.isfinite(out)))

    # Per-layer + final validation against a pure-f32 lax.conv reference
    # (bf16 operands in the kernels -> loose-ish tolerances).
    out_k, acts_k = discriminator_forward(kparams, images, labels,
                                          with_intermediates=True)
    ref, acts_r = reference_forward(params, images, labels,
                                    with_intermediates=True)
    for idx, (ak, ar) in enumerate(zip(acts_k, acts_r), start=1):
        ak_nchw = ak.astype(jnp.float32).transpose(0, 3, 1, 2)
        err = float(jnp.max(jnp.abs(ak_nchw - ar)))
        scale = float(jnp.max(jnp.abs(ar)))
        assert err <= 0.05 * (scale + 1.0), \
            f"conv{idx} mismatch: max|err|={err}, max|ref|={scale}"
    err = float(jnp.max(jnp.abs(out_k - ref)))
    scale = float(jnp.max(jnp.abs(ref)))
    assert err <= 0.1 * (scale + 1.0), f"head mismatch: max|err|={err}, max|ref|={scale}"

    print("KERNEL_OK")
</pallas_src>

<mosaic_0001>
module attributes {stable_mosaic.version = 11 : i64} {
  func.func @_linear_kernel(%arg0: i32, %arg1: memref<2x16xbf16, #tpu.memory_space<vmem>>, %arg2: memref<16x4096xbf16, #tpu.memory_space<vmem>>, %arg3: memref<1x4096xf32, #tpu.memory_space<vmem>>, %arg4: memref<2x4096xbf16, #tpu.memory_space<vmem>>) attributes {dimension_semantics = [#tpu.dimension_semantics<arbitrary>], iteration_bounds = array<i64: 1>, scalar_prefetch = 0 : i64, scratch_operands = 0 : i64, tpu.core_type = #tpu.core_type<tc>, window_params = [{pipeline_mode = #tpu.pipeline_mode<synchronous>, transform_indices = @transform_0, window_bounds = array<i64: 2, 16>}, {pipeline_mode = #tpu.pipeline_mode<synchronous>, transform_indices = @transform_1, window_bounds = array<i64: 16, 4096>}, {pipeline_mode = #tpu.pipeline_mode<synchronous>, transform_indices = @transform_2, window_bounds = array<i64: 1, 4096>}, {pipeline_mode = #tpu.pipeline_mode<synchronous>, transform_indices = @transform_3, window_bounds = array<i64: 2, 4096>}]} {
    %c0 = arith.constant 0 : index
    %c0_0 = arith.constant 0 : index
    %0 = vector.load %arg1[%c0, %c0_0] : memref<2x16xbf16, #tpu.memory_space<vmem>>, vector<2x16xbf16>
    %c0_1 = arith.constant 0 : index
    %c0_2 = arith.constant 0 : index
    %1 = vector.load %arg2[%c0_1, %c0_2] : memref<16x4096xbf16, #tpu.memory_space<vmem>>, vector<16x4096xbf16>
    %cst = arith.constant dense<0.000000e+00> : vector<2x4096xf32>
    %2 = tpu.matmul %0, %1, %cst {dimension_numbers = #tpu.dot_dimension_numbers<[1], [0], [0], [1], [0, 0, 1, 1], [], []>} : vector<2x16xbf16>, vector<16x4096xbf16>, vector<2x4096xf32> -> vector<2x4096xf32>
    %c0_3 = arith.constant 0 : index
    %c0_4 = arith.constant 0 : index
    %3 = vector.load %arg3[%c0_3, %c0_4] : memref<1x4096xf32, #tpu.memory_space<vmem>>, vector<1x4096xf32>
    %4 = vector.broadcast %3 : vector<1x4096xf32> to vector<2x4096xf32>
    %5 = arith.addf %2, %4 : vector<2x4096xf32>
    %6 = arith.truncf %5 : vector<2x4096xf32> to vector<2x4096xbf16>
    %c0_5 = arith.constant 0 : index
    %c0_6 = arith.constant 0 : index
    %7 = vector.load %arg4[%c0_5, %c0_6] : memref<2x4096xbf16, #tpu.memory_space<vmem>>, vector<2x4096xbf16>
    tpu.vector_store %arg4[%c0_5, %c0_6], %6 {strides = array<i32>} : memref<2x4096xbf16, #tpu.memory_space<vmem>>, vector<2x4096xbf16>,
    return
  }
  func.func @transform_0(%arg0: i32) -> (i32, i32) {
    %c0_i32 = arith.constant 0 : i32
    %c0_i32_0 = arith.constant 0 : i32
    %c0_i32_1 = arith.constant 0 : i32
    return %c0_i32, %c0_i32_0 : i32, i32
  }
  func.func @transform_1(%arg0: i32) -> (i32, i32) {
    %c0_i32 = arith.constant 0 : i32
    %c0_i32_0 = arith.constant 0 : i32
    %c0_i32_1 = arith.constant 0 : i32
    return %c0_i32, %c0_i32_0 : i32, i32
  }
  func.func @transform_2(%arg0: i32) -> (i32, i32) {
    %c0_i32 = arith.constant 0 : i32
    %c0_i32_0 = arith.constant 0 : i32
    %c0_i32_1 = arith.constant 0 : i32
    return %c0_i32, %c0_i32_0 : i32, i32
  }
  func.func @transform_3(%arg0: i32) -> (i32, i32) {
    %c0_i32 = arith.constant 0 : i32
    %c0_i32_0 = arith.constant 0 : i32
    %c0_i32_1 = arith.constant 0 : i32
    return %c0_i32, %c0_i32_0 : i32, i32
  }
}

module attributes {stable_mosaic.version = 11 : i64} {
  func.func @_conv_kernel(%arg0: i32, %arg1: memref<1024x64xbf16, #tpu.memory_space<vmem>>, %arg2: memref<64x64xbf16, #tpu.memory_space<vmem>>, %arg3: memref<1x64xf32, #tpu.memory_space<vmem>>, %arg4: memref<1024x64xbf16, #tpu.memory_space<vmem>>) attributes {dimension_semantics = [#tpu.dimension_semantics<parallel>], iteration_bounds = array<i64: 2>, scalar_prefetch = 0 : i64, scratch_operands = 0 : i64, tpu.core_type = #tpu.core_type<tc>, window_params = [{transform_indices = @transform_0, window_bounds = array<i64: 1024, 64>}, {pipeline_mode = #tpu.pipeline_mode<synchronous>, transform_indices = @transform_1, window_bounds = array<i64: 64, 64>}, {pipeline_mode = #tpu.pipeline_mode<synchronous>, transform_indices = @transform_2, window_bounds = array<i64: 1, 64>}, {transform_indices = @transform_3, window_bounds = array<i64: 1024, 64>}]} {
    %c0 = arith.constant 0 : index
    %c0_0 = arith.constant 0 : index
    %0 = vector.load %arg1[%c0, %c0_0] : memref<1024x64xbf16, #tpu.memory_space<vmem>>, vector<1024x64xbf16>
    %c0_1 = arith.constant 0 : index
    %c0_2 = arith.constant 0 : index
    %1 = vector.load %arg2[%c0_1, %c0_2] : memref<64x64xbf16, #tpu.memory_space<vmem>>, vector<64x64xbf16>
    %cst = arith.constant dense<0.000000e+00> : vector<1024x64xf32>
    %2 = tpu.matmul %0, %1, %cst {dimension_numbers = #tpu.dot_dimension_numbers<[1], [0], [0], [1], [0, 0, 1, 1], [], []>} : vector<1024x64xbf16>, vector<64x64xbf16>, vector<1024x64xf32> -> vector<1024x64xf32>
    %c0_3 = arith.constant 0 : index
    %c0_4 = arith.constant 0 : index
    %3 = vector.load %arg3[%c0_3, %c0_4] : memref<1x64xf32, #tpu.memory_space<vmem>>, vector<1x64xf32>
    %4 = vector.broadcast %3 : vector<1x64xf32> to vector<1024x64xf32>
    %5 = arith.addf %2, %4 : vector<1024x64xf32>
    %cst_5 = arith.constant 0.000000e+00 : f32
    %6 = vector.broadcast %cst_5 : f32 to vector<1024x64xf32>
    %7 = arith.cmpf ogt, %5, %6 : vector<1024x64xf32>
    %cst_6 = arith.constant 2.000000e-01 : f32
    %8 = vector.broadcast %cst_6 : f32 to vector<1024x64xf32>
    %9 = arith.mulf %8, %5 : vector<1024x64xf32>
    %10 = arith.select %7, %5, %9 : vector<1024x64xi1>, vector<1024x64xf32>
    %11 = arith.truncf %10 : vector<1024x64xf32> to vector<1024x64xbf16>
    %c0_7 = arith.constant 0 : index
    %c0_8 = arith.constant 0 : index
    %12 = vector.load %arg4[%c0_7, %c0_8] : memref<1024x64xbf16, #tpu.memory_space<vmem>>, vector<1024x64xbf16>
    tpu.vector_store %arg4[%c0_7, %c0_8], %11 {strides = array<i32>} : memref<1024x64xbf16, #tpu.memory_space<vmem>>, vector<1024x64xbf16>,
    return
  }
  func.func @transform_0(%arg0: i32) -> (i32, i32) {
    %c0_i32 = arith.constant 0 : i32
    %c0_i32_0 = arith.constant 0 : i32
    return %arg0, %c0_i32 : i32, i32
  }
  func.func @transform_1(%arg0: i32) -> (i32, i32) {
    %c0_i32 = arith.constant 0 : i32
    %c0_i32_0 = arith.constant 0 : i32
    %c0_i32_1 = arith.constant 0 : i32
    return %c0_i32, %c0_i32_0 : i32, i32
  }
  func.func @transform_2(%arg0: i32) -> (i32, i32) {
    %c0_i32 = arith.constant 0 : i32
    %c0_i32_0 = arith.constant 0 : i32
    %c0_i32_1 = arith.constant 0 : i32
    return %c0_i32, %c0_i32_0 : i32, i32
  }
  func.func @transform_3(%arg0: i32) -> (i32, i32) {
    %c0_i32 = arith.constant 0 : i32
    %c0_i32_0 = arith.constant 0 : i32
    return %arg0, %c0_i32 : i32, i32
  }
}

module attributes {stable_mosaic.version = 11 : i64} {
  func.func @_conv_kernel(%arg0: i32, %arg1: memref<256x1024xbf16, #tpu.memory_space<vmem>>, %arg2: memref<1024x128xbf16, #tpu.memory_space<vmem>>, %arg3: memref<1x128xf32, #tpu.memory_space<vmem>>, %arg4: memref<256x128xbf16, #tpu.memory_space<vmem>>) attributes {dimension_semantics = [#tpu.dimension_semantics<parallel>], iteration_bounds = array<i64: 2>, scalar_prefetch = 0 : i64, scratch_operands = 0 : i64, tpu.core_type = #tpu.core_type<tc>, window_params = [{transform_indices = @transform_0, window_bounds = array<i64: 256, 1024>}, {pipeline_mode = #tpu.pipeline_mode<synchronous>, transform_indices = @transform_1, window_bounds = array<i64: 1024, 128>}, {pipeline_mode = #tpu.pipeline_mode<synchronous>, transform_indices = @transform_2, window_bounds = array<i64: 1, 128>}, {transform_indices = @transform_3, window_bounds = array<i64: 256, 128>}]} {
    %c0 = arith.constant 0 : index
    %c0_0 = arith.constant 0 : index
    %0 = vector.load %arg1[%c0, %c0_0] : memref<256x1024xbf16, #tpu.memory_space<vmem>>, vector<256x1024xbf16>
    %c0_1 = arith.constant 0 : index
    %c0_2 = arith.constant 0 : index
    %1 = vector.load %arg2[%c0_1, %c0_2] : memref<1024x128xbf16, #tpu.memory_space<vmem>>, vector<1024x128xbf16>
    %cst = arith.constant dense<0.000000e+00> : vector<256x128xf32>
    %2 = tpu.matmul %0, %1, %cst {dimension_numbers = #tpu.dot_dimension_numbers<[1], [0], [0], [1], [0, 0, 1, 1], [], []>} : vector<256x1024xbf16>, vector<1024x128xbf16>, vector<256x128xf32> -> vector<256x128xf32>
    %c0_3 = arith.constant 0 : index
    %c0_4 = arith.constant 0 : index
    %3 = vector.load %arg3[%c0_3, %c0_4] : memref<1x128xf32, #tpu.memory_space<vmem>>, vector<1x128xf32>
    %4 = vector.broadcast %3 : vector<1x128xf32> to vector<256x128xf32>
    %5 = arith.addf %2, %4 : vector<256x128xf32>
    %cst_5 = arith.constant 0.000000e+00 : f32
    %6 = vector.broadcast %cst_5 : f32 to vector<256x128xf32>
    %7 = arith.cmpf ogt, %5, %6 : vector<256x128xf32>
    %cst_6 = arith.constant 2.000000e-01 : f32
    %8 = vector.broadcast %cst_6 : f32 to vector<256x128xf32>
    %9 = arith.mulf %8, %5 : vector<256x128xf32>
    %10 = arith.select %7, %5, %9 : vector<256x128xi1>, vector<256x128xf32>
    %11 = arith.truncf %10 : vector<256x128xf32> to vector<256x128xbf16>
    %c0_7 = arith.constant 0 : index
    %c0_8 = arith.constant 0 : index
    %12 = vector.load %arg4[%c0_7, %c0_8] : memref<256x128xbf16, #tpu.memory_space<vmem>>, vector<256x128xbf16>
    tpu.vector_store %arg4[%c0_7, %c0_8], %11 {strides = array<i32>} : memref<256x128xbf16, #tpu.memory_space<vmem>>, vector<256x128xbf16>,
    return
  }
  func.func @transform_0(%arg0: i32) -> (i32, i32) {
    %c0_i32 = arith.constant 0 : i32
    %c0_i32_0 = arith.constant 0 : i32
    return %arg0, %c0_i32 : i32, i32
  }
  func.func @transform_1(%arg0: i32) -> (i32, i32) {
    %c0_i32 = arith.constant 0 : i32
    %c0_i32_0 = arith.constant 0 : i32
    %c0_i32_1 = arith.constant 0 : i32
    return %c0_i32, %c0_i32_0 : i32, i32
  }
  func.func @transform_2(%arg0: i32) -> (i32, i32) {
    %c0_i32 = arith.constant 0 : i32
    %c0_i32_0 = arith.constant 0 : i32
    %c0_i32_1 = arith.constant 0 : i32
    return %c0_i32, %c0_i32_0 : i32, i32
  }
  func.func @transform_3(%arg0: i32) -> (i32, i32) {
    %c0_i32 = arith.constant 0 : i32
    %c0_i32_0 = arith.constant 0 : i32
    return %arg0, %c0_i32 : i32, i32
  }
}

module attributes {stable_mosaic.version = 11 : i64} {
  func.func @_conv_kernel(%arg0: i32, %arg1: memref<64x2048xbf16, #tpu.memory_space<vmem>>, %arg2: memref<2048x256xbf16, #tpu.memory_space<vmem>>, %arg3: memref<1x256xf32, #tpu.memory_space<vmem>>, %arg4: memref<64x256xbf16, #tpu.memory_space<vmem>>) attributes {dimension_semantics = [#tpu.dimension_semantics<parallel>], iteration_bounds = array<i64: 2>, scalar_prefetch = 0 : i64, scratch_operands = 0 : i64, tpu.core_type = #tpu.core_type<tc>, window_params = [{transform_indices = @transform_0, window_bounds = array<i64: 64, 2048>}, {pipeline_mode = #tpu.pipeline_mode<synchronous>, transform_indices = @transform_1, window_bounds = array<i64: 2048, 256>}, {pipeline_mode = #tpu.pipeline_mode<synchronous>, transform_indices = @transform_2, window_bounds = array<i64: 1, 256>}, {transform_indices = @transform_3, window_bounds = array<i64: 64, 256>}]} {
    %c0 = arith.constant 0 : index
    %c0_0 = arith.constant 0 : index
    %0 = vector.load %arg1[%c0, %c0_0] : memref<64x2048xbf16, #tpu.memory_space<vmem>>, vector<64x2048xbf16>
    %c0_1 = arith.constant 0 : index
    %c0_2 = arith.constant 0 : index
    %1 = vector.load %arg2[%c0_1, %c0_2] : memref<2048x256xbf16, #tpu.memory_space<vmem>>, vector<2048x256xbf16>
    %cst = arith.constant dense<0.000000e+00> : vector<64x256xf32>
    %2 = tpu.matmul %0, %1, %cst {dimension_numbers = #tpu.dot_dimension_numbers<[1], [0], [0], [1], [0, 0, 1, 1], [], []>} : vector<64x2048xbf16>, vector<2048x256xbf16>, vector<64x256xf32> -> vector<64x256xf32>
    %c0_3 = arith.constant 0 : index
    %c0_4 = arith.constant 0 : index
    %3 = vector.load %arg3[%c0_3, %c0_4] : memref<1x256xf32, #tpu.memory_space<vmem>>, vector<1x256xf32>
    %4 = vector.broadcast %3 : vector<1x256xf32> to vector<64x256xf32>
    %5 = arith.addf %2, %4 : vector<64x256xf32>
    %cst_5 = arith.constant 0.000000e+00 : f32
    %6 = vector.broadcast %cst_5 : f32 to vector<64x256xf32>
    %7 = arith.cmpf ogt, %5, %6 : vector<64x256xf32>
    %cst_6 = arith.constant 2.000000e-01 : f32
    %8 = vector.broadcast %cst_6 : f32 to vector<64x256xf32>
    %9 = arith.mulf %8, %5 : vector<64x256xf32>
    %10 = arith.select %7, %5, %9 : vector<64x256xi1>, vector<64x256xf32>
    %11 = arith.truncf %10 : vector<64x256xf32> to vector<64x256xbf16>
    %c0_7 = arith.constant 0 : index
    %c0_8 = arith.constant 0 : index
    %12 = vector.load %arg4[%c0_7, %c0_8] : memref<64x256xbf16, #tpu.memory_space<vmem>>, vector<64x256xbf16>
    tpu.vector_store %arg4[%c0_7, %c0_8], %11 {strides = array<i32>} : memref<64x256xbf16, #tpu.memory_space<vmem>>, vector<64x256xbf16>,
    return
  }
  func.func @transform_0(%arg0: i32) -> (i32, i32) {
    %c0_i32 = arith.constant 0 : i32
    %c0_i32_0 = arith.constant 0 : i32
    return %arg0, %c0_i32 : i32, i32
  }
  func.func @transform_1(%arg0: i32) -> (i32, i32) {
    %c0_i32 = arith.constant 0 : i32
    %c0_i32_0 = arith.constant 0 : i32
    %c0_i32_1 = arith.constant 0 : i32
    return %c0_i32, %c0_i32_0 : i32, i32
  }
  func.func @transform_2(%arg0: i32) -> (i32, i32) {
    %c0_i32 = arith.constant 0 : i32
    %c0_i32_0 = arith.constant 0 : i32
    %c0_i32_1 = arith.constant 0 : i32
    return %c0_i32, %c0_i32_0 : i32, i32
  }
  func.func @transform_3(%arg0: i32) -> (i32, i32) {
    %c0_i32 = arith.constant 0 : i32
    %c0_i32_0 = arith.constant 0 : i32
    return %arg0, %c0_i32 : i32, i32
  }
}

module attributes {stable_mosaic.version = 11 : i64} {
  func.func @_head_kernel(%arg0: i32, %arg1: memref<16x4096xbf16, #tpu.memory_space<vmem>>, %arg2: memref<4096x512xbf16, #tpu.memory_space<vmem>>, %arg3: memref<1x512xf32, #tpu.memory_space<vmem>>, %arg4: memref<16x512xf32, #tpu.memory_space<vmem>>, %arg5: memref<1x1xf32, #tpu.memory_space<vmem>>, %arg6: memref<1x1x1xf32, #tpu.memory_space<vmem>>) attributes {dimension_semantics = [#tpu.dimension_semantics<parallel>], iteration_bounds = array<i64: 2>, scalar_prefetch = 0 : i64, scratch_operands = 0 : i64, tpu.core_type = #tpu.core_type<tc>, window_params = [{transform_indices = @transform_0, window_bounds = array<i64: 16, 4096>}, {pipeline_mode = #tpu.pipeline_mode<synchronous>, transform_indices = @transform_1, window_bounds = array<i64: 4096, 512>}, {pipeline_mode = #tpu.pipeline_mode<synchronous>, transform_indices = @transform_2, window_bounds = array<i64: 1, 512>}, {pipeline_mode = #tpu.pipeline_mode<synchronous>, transform_indices = @transform_3, window_bounds = array<i64: 16, 512>}, {pipeline_mode = #tpu.pipeline_mode<synchronous>, transform_indices = @transform_4, window_bounds = array<i64: 1, 1>}, {transform_indices = @transform_5, window_bounds = array<i64: 1, 1, 1>}]} {
    %c0 = arith.constant 0 : index
    %c0_0 = arith.constant 0 : index
    %0 = vector.load %arg1[%c0, %c0_0] : memref<16x4096xbf16, #tpu.memory_space<vmem>>, vector<16x4096xbf16>
    %c0_1 = arith.constant 0 : index
    %c0_2 = arith.constant 0 : index
    %1 = vector.load %arg2[%c0_1, %c0_2] : memref<4096x512xbf16, #tpu.memory_space<vmem>>, vector<4096x512xbf16>
    %cst = arith.constant dense<0.000000e+00> : vector<16x512xf32>
    %2 = tpu.matmul %0, %1, %cst {dimension_numbers = #tpu.dot_dimension_numbers<[1], [0], [0], [1], [0, 0, 1, 1], [], []>} : vector<16x4096xbf16>, vector<4096x512xbf16>, vector<16x512xf32> -> vector<16x512xf32>
    %c0_3 = arith.constant 0 : index
    %c0_4 = arith.constant 0 : index
    %3 = vector.load %arg3[%c0_3, %c0_4] : memref<1x512xf32, #tpu.memory_space<vmem>>, vector<1x512xf32>
    %4 = vector.broadcast %3 : vector<1x512xf32> to vector<16x512xf32>
    %5 = arith.addf %2, %4 : vector<16x512xf32>
    %cst_5 = arith.constant 0.000000e+00 : f32
    %6 = vector.broadcast %cst_5 : f32 to vector<16x512xf32>
    %7 = arith.cmpf ogt, %5, %6 : vector<16x512xf32>
    %cst_6 = arith.constant 2.000000e-01 : f32
    %8 = vector.broadcast %cst_6 : f32 to vector<16x512xf32>
    %9 = arith.mulf %8, %5 : vector<16x512xf32>
    %10 = arith.select %7, %5, %9 : vector<16x512xi1>, vector<16x512xf32>
    %11 = vector.shape_cast %10 : vector<16x512xf32> to vector<1x16x512xf32>
    %c0_7 = arith.constant 0 : index
    %c0_8 = arith.constant 0 : index
    %12 = vector.load %arg4[%c0_7, %c0_8] : memref<16x512xf32, #tpu.memory_space<vmem>>, vector<16x512xf32>
    %13 = vector.shape_cast %12 : vector<16x512xf32> to vector<1x16x512xf32>
    %14 = arith.mulf %11, %13 : vector<1x16x512xf32>
    %cst_9 = arith.constant dense<0.000000e+00> : vector<1x16xf32>
    %15 = vector.multi_reduction <add>, %14, %cst_9 [2] : vector<1x16x512xf32> to vector<1x16xf32>
    %16 = vector.shape_cast %15 : vector<1x16xf32> to vector<1x16x1xf32>
    %cst_10 = arith.constant dense<0.000000e+00> : vector<1x1xf32>
    %17 = vector.multi_reduction <add>, %16, %cst_10 [1] : vector<1x16x1xf32> to vector<1x1xf32>
    %18 = vector.shape_cast %17 : vector<1x1xf32> to vector<1x1x1xf32>
    %c0_11 = arith.constant 0 : index
    %c0_12 = arith.constant 0 : index
    %19 = vector.load %arg5[%c0_11, %c0_12] : memref<1x1xf32, #tpu.memory_space<vmem>>, vector<1x1xf32>
    %20 = vector.shape_cast %19 : vector<1x1xf32> to vector<1x1x1xf32>
    %21 = arith.addf %18, %20 : vector<1x1x1xf32>
    %c0_13 = arith.constant 0 : index
    %c0_14 = arith.constant 0 : index
    %c0_15 = arith.constant 0 : index
    %22 = vector.load %arg6[%c0_13, %c0_14, %c0_15] : memref<1x1x1xf32, #tpu.memory_space<vmem>>, vector<1x1x1xf32>
    tpu.vector_store %arg6[%c0_13, %c0_14, %c0_15], %21 {strides = array<i32>} : memref<1x1x1xf32, #tpu.memory_space<vmem>>, vector<1x1x1xf32>,
    return
  }
  func.func @transform_0(%arg0: i32) -> (i32, i32) {
    %c0_i32 = arith.constant 0 : i32
    %c0_i32_0 = arith.constant 0 : i32
    return %arg0, %c0_i32 : i32, i32
  }
  func.func @transform_1(%arg0: i32) -> (i32, i32) {
    %c0_i32 = arith.constant 0 : i32
    %c0_i32_0 = arith.constant 0 : i32
    %c0_i32_1 = arith.constant 0 : i32
    return %c0_i32, %c0_i32_0 : i32, i32
  }
  func.func @transform_2(%arg0: i32) -> (i32, i32) {
    %c0_i32 = arith.constant 0 : i32
    %c0_i32_0 = arith.constant 0 : i32
    %c0_i32_1 = arith.constant 0 : i32
    return %c0_i32, %c0_i32_0 : i32, i32
  }
  func.func @transform_3(%arg0: i32) -> (i32, i32) {
    %c0_i32 = arith.constant 0 : i32
    %c0_i32_0 = arith.constant 0 : i32
    %c0_i32_1 = arith.constant 0 : i32
    return %c0_i32, %c0_i32_0 : i32, i32
  }
  func.func @transform_4(%arg0: i32) -> (i32, i32) {
    %c0_i32 = arith.constant 0 : i32
    %c0_i32_0 = arith.constant 0 : i32
    %c0_i32_1 = arith.constant 0 : i32
    return %c0_i32, %c0_i32_0 : i32, i32
  }
  func.func @transform_5(%arg0: i32) -> (i32, i32, i32) {
    %c0_i32 = arith.constant 0 : i32
    %c0_i32_0 = arith.constant 0 : i32
    %c0_i32_1 = arith.constant 0 : i32
    return %arg0, %c0_i32, %c0_i32_0 : i32, i32, i32
  }
}

</mosaic_0001>

<bundles_post_ra>
// kernel: discriminator_forward.5
= control target key start
LH: loop header
LB: loop body
LE: loop exit
PB: predicated region body
PF: predicated region fallthrough
CT: control target
= control target key end

     0   :  { %8 = vsyncpa [#allocation3], 0  ;;  %s1643_s0 = inlined_call_operand.vmem [shape: bf16[2,16], index: 0, kind: input, shape index: {}]   ;;  %s1644_s1 = inlined_call_operand.hbm [shape: bf16[16,4096], index: 1, kind: input, shape index: {}]   ;;  %s1645_s2 = inlined_call_operand.hbm [shape: f32[1,4096], index: 2, kind: input, shape index: {}]   ;;  %s1646_s3 = inlined_call_operand.vmem [shape: bf16[2,4096], index: 3, kind: output, shape index: {}]  }
   0x1   :  { %9 = vsyncpa [#allocation5], 0  ;;  %s1454_s12 = smov [#allocation2]   ;;  %s1406_s16 = scalar_lea.hbm %s1644_s1, 4096 }
   0x2   :  { %s17_s13 = sshll.u32 %s1454_s12, 4  ;;  %p1407_p0 = scmp.ne.s32.totalorder %s1644_s1, %s1406_s16  ;;  %s18_s13 = int_to_ptr.vmem [resolvable:$true] %s17_s13 }
   0x3   :  { %p1410_p1 = scmp.lt.u32.totalorder %s1406_s16, %s1644_s1 }
   0x5   :  { %p1412_p2 = pnand %p1410_p1, %p1407_p0 }
   0x7   :  { %1415 = shalt.err (!%p1412_p2)
}
   0x8   :  { %s1416_s21 = scalar_lea.vmem %s18_s13, 4096  ;;  %p1421_p4 = scmp.lt.s32.totalorder %s18_s13, %s18_s13 }
   0x9   :  { %p1417_p3 = scmp.ne.s32.totalorder %s18_s13, %s1416_s21  ;;  %p1422_p5 = scmp.lt.s32.totalorder %s1416_s21, %s1416_s21 }
   0xb   :  { %p1423_p6 = por %p1422_p5, %p1421_p4 }
   0xd   :  { %p1424_p7 = pnand %p1423_p6, %p1417_p3 }
   0xf   :  { %1427 = shalt.err (!%p1424_p7)
}
  0x10   :  { %s1455_s22 = smov 2048   ;;  %s1456_s23 = smov 128  }
  0x11   :  { %23 = dma.hbm_to_vmem [thread:$0]  %s1644_s1, 4096, %s18_s13, [#allocation3], %s1455_s22, %s1455_s22, %s1456_s23  }
  0x12   :  { %s1457_s26 = smov [#allocation4]   ;;  %s1428_s30 = scalar_lea.hbm %s1645_s2, 512 }
  0x13   :  { %s30_s27 = sshll.u32 %s1457_s26, 4  ;;  %p1429_p8 = scmp.ne.s32.totalorder %s1645_s2, %s1428_s30  ;;  %s31_s27 = int_to_ptr.vmem [resolvable:$true] %s30_s27 }
  0x14   :  { %p1432_p9 = scmp.lt.u32.totalorder %s1428_s30, %s1645_s2 }
  0x16   :  { %p1434_p10 = pnand %p1432_p9, %p1429_p8 }
  0x18   :  { %1437 = shalt.err (!%p1434_p10)
}
  0x19   :  { %s1438_s8 = scalar_lea.vmem %s31_s27, 512  ;;  %p1443_p12 = scmp.lt.s32.totalorder %s31_s27, %s31_s27 }
  0x1a   :  { %p1439_p11 = scmp.ne.s32.totalorder %s31_s27, %s1438_s8  ;;  %p1444_p13 = scmp.lt.s32.totalorder %s1438_s8, %s1438_s8 }
  0x1c   :  { %p1445_p0 = por %p1444_p13, %p1443_p12 }
  0x1e   :  { %p1446_p1 = pnand %p1445_p0, %p1439_p11 }
  0x20   :  { %1449 = shalt.err (!%p1446_p1)
}
  0x21   :  { %33 = dma.hbm_to_vmem [thread:$0]  %s1645_s2, 512, %s31_s27, [#allocation5]  }
  0x22   :  { %1450 = dma.done.wait [#allocation3], 4096  }
  0x23   :  { %1451 = vsyncadd [#allocation3], 4294963200 }
  0x24   :  { %1452 = dma.done.wait [#allocation5], 512  }
  0x25   :  { %1453 = vsyncadd [#allocation5], 4294966784  ;;  %v1458_v0 = vmov 0   ;;  %v42_v1 = vld [vmem:[#allocation2] sm:$0xff]  ;;  %v43_v3 = vld [vmem:[#allocation2 + $0x8] sm:$0xff]  ;;  %vm402_vm0 = vcmask 130048  }
  0x26   :  { %438 = vmatprep.mubr.bf16.mxu0 %v1458_v0  ;;  %479 = vmatprep.mubr.bf16.mxu1 %v1458_v0  ;;  %v58_v2 = vld [vmem:[#allocation2 + $0x80] sm:$0xff]  ;;  %v59_v5 = vld [vmem:[#allocation2 + $0x88] sm:$0xff]  ;;  %v44_v7 = vld [vmem:[#allocation2 + $0x10] sm:$0xff] }
  0x27   :  { %v1337_v4 = vcombine.high %v42_v1, %v58_v2  ;;  %v1336_v6 = vcombine.low %v42_v1, %v58_v2  ;;  %v1339_v8 = vcombine.high %v43_v3, %v59_v5  ;;  %v1338_v9 = vcombine.low %v43_v3, %v59_v5  ;;  %v60_v10 = vld [vmem:[#allocation2 + $0x90] sm:$0xff]  ;;  %v45_v11 = vld [vmem:[#allocation2 + $0x18] sm:$0xff]  ;;  %v46_v15 = vld [vmem:[#allocation2 + $0x20] sm:$0xff] }
  0x28   :  { %v61_v12 = vld [vmem:[#allocation2 + $0x98] sm:$0xff]  ;;  %v1341_v13 = vcombine.high %v44_v7, %v60_v10  ;;  %v62_v16 = vld [vmem:[#allocation2 + $0xa0] sm:$0xff]  ;;  %v1340_v18 = vcombine.low %v44_v7, %v60_v10  ;;  %v47_v19 = vld [vmem:[#allocation2 + $0x28] sm:$0xff]  ;;  %v82_v3 = vlaneseq }
  0x29   :  { %406 = vmatprep.subr.bf16.mxu0 %v1337_v4  ;;  %v1343_v14 = vcombine.high %v45_v11, %v61_v12  ;;  %447 = vmatprep.subr.bf16.mxu1 %v1339_v8  ;;  %v1509_v17 = vld [vmem:[%s1643_s0] sm:$0x1]  ;;  %v63_v20 = vld [vmem:[#allocation2 + $0xa8] sm:$0xff]  ;;  %v1342_v21 = vcombine.low %v45_v11, %v61_v12  ;;  %v1345_v22 = vcombine.high %v46_v15, %v62_v16  ;;  %v48_v24 = vld [vmem:[#allocation2 + $0x30] sm:$0xff] }
  0x2a   :  { %407 = vmatpush1.bf16.msra.mxu0 %v1336_v6  ;;  %448 = vmatpush1.bf16.msra.mxu1 %v1338_v9  ;;  %v1347_v23 = vcombine.high %v47_v19, %v63_v20  ;;  %v64_v25 = vld [vmem:[#allocation2 + $0xb0] sm:$0xff]  ;;  %v1344_v26 = vcombine.low %v46_v15, %v62_v16  ;;  %v49_v27 = vld [vmem:[#allocation2 + $0x38] sm:$0xff]  ;;  %v1346_v29 = vcombine.low %v47_v19, %v63_v20  ;;  %v50_v32 = vld [vmem:[#allocation2 + $0x40] sm:$0xff]  ;;  %v83_v4 = vshrl.u32 %v82_v3, 7 }
  0x2b   :  { %488 = vmatprep.subr.bf16.mxu0 %v1341_v13  ;;  %529 = vmatprep.subr.bf16.mxu1 %v1343_v14  ;;  %v65_v28 = vld [vmem:[#allocation2 + $0xb8] sm:$0xff]  ;;  %v1349_v30 = vcombine.high %v48_v24, %v64_v25  ;;  %v66_v33 = vld [vmem:[#allocation2 + $0xc0] sm:$0xff]  ;;  %v1348_v34 = vcombine.low %v48_v24, %v64_v25  ;;  %v51_v35 = vld [vmem:[#allocation2 + $0x48] sm:$0xff]  ;;  %v1459_v6 = vmov 1966171168  }
  0x2c   :  { %v1351_v31 = vcombine.high %v49_v27, %v65_v28  ;;  %v67_v36 = vld [vmem:[#allocation2 + $0xc8] sm:$0xff]  ;;  %v1350_v37 = vcombine.low %v49_v27, %v65_v28  ;;  %v1353_v38 = vcombine.high %v50_v32, %v66_v33  ;;  %v52_v40 = vld [vmem:[#allocation2 + $0x50] sm:$0xff]  ;;  %v1352_v42 = vcombine.low %v50_v32, %v66_v33  ;;  %v53_v43 = vld [vmem:[#allocation2 + $0x58] sm:$0xff] }
  0x2d   :  { %1368 = vmatmul.mubr.msk.bf16.vlgmr.msra.gmra.mrb[0].mxu0 %vm402_vm0, %v1509_v17  ;;  %1369 = vmatmul.mubr.msk.bf16.vlgmr.msra.gmra.mrb[0].mxu1 %vm402_vm0, %v1509_v17  ;;  %v1355_v39 = vcombine.high %v51_v35, %v67_v36  ;;  %v68_v41 = vld [vmem:[#allocation2 + $0xd0] sm:$0xff]  ;;  %v69_v44 = vld [vmem:[#allocation2 + $0xd8] sm:$0xff]  ;;  %v1354_v45 = vcombine.low %v51_v35, %v67_v36  ;;  %v54_v48 = vld [vmem:[#allocation2 + $0x60] sm:$0xff]  ;;  %v1557_v5 = vsub.s32 0, %v83_v4  ;;  %v1131_v7 = vunpack.c.l.s4 %v1459_v6 }
  0x2e   :  { %489 = vmatpush1.bf16.msra.mxu0 %v1340_v18  ;;  %530 = vmatpush1.bf16.msra.mxu1 %v1342_v21  ;;  %v1357_v46 = vcombine.high %v52_v40, %v68_v41  ;;  %v1359_v47 = vcombine.high %v53_v43, %v69_v44  ;;  %v70_v49 = vld [vmem:[#allocation2 + $0xe0] sm:$0xff]  ;;  %v1356_v50 = vcombine.low %v52_v40, %v68_v41  ;;  %v55_v51 = vld [vmem:[#allocation2 + $0x68] sm:$0xff]  ;;  %v56_v56 = vld [vmem:[#allocation2 + $0x70] sm:$0xff]  ;;  %v1559_v9 = vsub.s32 2, %v83_v4 }
  0x2f   :  { %520 = vmatprep.mubr.bf16.mxu0 %v1458_v0  ;;  %561 = vmatprep.mubr.bf16.mxu1 %v1458_v0  ;;  %v71_v52 = vld [vmem:[#allocation2 + $0xe8] sm:$0xff]  ;;  %v1358_v53 = vcombine.low %v53_v43, %v69_v44  ;;  %v1361_v54 = vcombine.high %v54_v48, %v70_v49  ;;  %v72_v57 = vld [vmem:[#allocation2 + $0xf0] sm:$0xff]  ;;  %v1360_v58 = vcombine.low %v54_v48, %v70_v49  ;;  %v57_v59 = vld [vmem:[#allocation2 + $0x78] sm:$0xff]  ;;  %v1561_v10 = vsub.s32 1, %v83_v4 }
  0x30   :  { %570 = vmatprep.subr.bf16.mxu0 %v1345_v22  ;;  %611 = vmatprep.subr.bf16.mxu1 %v1347_v23  ;;  %v1363_v55 = vcombine.high %v55_v51, %v71_v52  ;;  %v73_v60 = vld [vmem:[#allocation2 + $0xf8] sm:$0xff]  ;;  %v1362_v61 = vcombine.low %v55_v51, %v71_v52  ;;  %v1365_v62 = vcombine.high %v56_v56, %v72_v57  ;;  %v74_v8 = vld [vmem:[#allocation4] sm:$0xff]  ;;  %v1563_v11 = vsub.s32 3, %v83_v4 }
  0x31   :  { %v1367_v63 = vcombine.high %v57_v59, %v73_v60  ;;  %v1364_v1 = vcombine.low %v56_v56, %v72_v57  ;;  %v1366_v2 = vcombine.low %v57_v59, %v73_v60  ;;  %v1132_v12 = vunpack.c.0.s8 %v1131_v7 }
  0x32   :  { %v93_v13 = vrot.slane %v74_v8, %v1559_v9  ;;  %v89_v14 = vrot.slane %v74_v8, %v1561_v10  ;;  %v97_v15 = vrot.slane %v74_v8, %v1563_v11  ;;  %v1571_v21 = vsub.s32 4, %v83_v4 }
  0x33   :  { %v1569_v20 = vsub.s32 %v1132_v12, %v83_v4  ;;  %v1575_v27 = vsub.s32 5, %v83_v4 }
  0x34   :  { %v101_v35 = vrot.slane %v74_v8, %v1571_v21 }
  0x35   :  { %1370 = vmatmul.mubr.msk.bf16.vlgmr.msra.gmra.mrb[4].mxu0 %vm402_vm0, %v1509_v17  ;;  %1371 = vmatmul.mubr.msk.bf16.vlgmr.msra.gmra.mrb[4].mxu1 %vm402_vm0, %v1509_v17 }
  0x36   :  { %571 = vmatpush1.bf16.msra.mxu0 %v1344_v26  ;;  %612 = vmatpush1.bf16.msra.mxu1 %v1346_v29  ;;  %v1573_v26 = vsub.s32 6, %v83_v4 }
  0x37   :  { %602 = vmatprep.mubr.bf16.mxu0 %v1458_v0  ;;  %643 = vmatprep.mubr.bf16.mxu1 %v1458_v0 }
  0x38   :  { %652 = vmatprep.subr.bf16.mxu0 %v1349_v30  ;;  %693 = vmatprep.subr.bf16.mxu1 %v1351_v31  ;;  %v1577_v31 = vsub.s32 7, %v83_v4 }
  0x3a   :  { %v113_v40 = vrot.slane %v74_v8, %v1577_v31 }
  0x3d   :  { %1372 = vmatmul.mubr.msk.bf16.vlgmr.msra.gmra.mrb[8].mxu0 %vm402_vm0, %v1509_v17  ;;  %1373 = vmatmul.mubr.msk.bf16.vlgmr.msra.gmra.mrb[8].mxu1 %vm402_vm0, %v1509_v17 }
  0x3e   :  { %653 = vmatpush1.bf16.msra.mxu0 %v1348_v34  ;;  %694 = vmatpush1.bf16.msra.mxu1 %v1350_v37  ;;  %v109_v37 = vrot.slane %v74_v8, %v1573_v26 }
  0x3f   :  { %684 = vmatprep.mubr.bf16.mxu0 %v1458_v0  ;;  %725 = vmatprep.mubr.bf16.mxu1 %v1458_v0 }
  0x40   :  { %734 = vmatprep.subr.bf16.mxu0 %v1353_v38  ;;  %775 = vmatprep.subr.bf16.mxu1 %v1355_v39  ;;  %v105_v38 = vrot.slane %v74_v8, %v1575_v27 }
  0x45   :  { %1374 = vmatmul.mubr.msk.bf16.vlgmr.msra.gmra.mrb[12].mxu0 %vm402_vm0, %v1509_v17  ;;  %1375 = vmatmul.mubr.msk.bf16.vlgmr.msra.gmra.mrb[12].mxu1 %vm402_vm0, %v1509_v17 }
  0x46   :  { %735 = vmatpush1.bf16.msra.mxu0 %v1352_v42  ;;  %776 = vmatpush1.bf16.msra.mxu1 %v1354_v45 }
  0x47   :  { %766 = vmatprep.mubr.bf16.mxu0 %v1458_v0  ;;  %807 = vmatprep.mubr.bf16.mxu1 %v1458_v0 }
  0x48   :  { %816 = vmatprep.subr.bf16.mxu0 %v1357_v46  ;;  %857 = vmatprep.subr.bf16.mxu1 %v1359_v47 }
  0x4d   :  { %1376 = vmatmul.mubr.msk.bf16.vlgmr.msra.gmra.mrb[16].mxu0 %vm402_vm0, %v1509_v17  ;;  %1377 = vmatmul.mubr.msk.bf16.vlgmr.msra.gmra.mrb[16].mxu1 %vm402_vm0, %v1509_v17 }
  0x4e   :  { %817 = vmatpush1.bf16.msra.mxu0 %v1356_v50  ;;  %858 = vmatpush1.bf16.msra.mxu1 %v1358_v53  ;;  %v75_v50 = vld [vmem:[#allocation4 + $0x8] sm:$0xff] }
  0x4f   :  { %848 = vmatprep.mubr.bf16.mxu0 %v1458_v0  ;;  %889 = vmatprep.mubr.bf16.mxu1 %v1458_v0  ;;  %v117_v57 = vrot.slane %v75_v50, %v1557_v5  ;;  %v125_v59 = vrot.slane %v75_v50, %v1559_v9  ;;  %v121_v60 = vrot.slane %v75_v50, %v1561_v10 }
  0x50   :  { %898 = vmatprep.subr.bf16.mxu0 %v1361_v54  ;;  %939 = vmatprep.subr.bf16.mxu1 %v1363_v55 }
  0x55   :  { %1378 = vmatmul.mubr.msk.bf16.vlgmr.msra.gmra.mrb[20].mxu0 %vm402_vm0, %v1509_v17  ;;  %1379 = vmatmul.mubr.msk.bf16.vlgmr.msra.gmra.mrb[20].mxu1 %vm402_vm0, %v1509_v17 }
  0x56   :  { %899 = vmatpush1.bf16.msra.mxu0 %v1360_v58  ;;  %940 = vmatpush1.bf16.msra.mxu1 %v1362_v61 }
  0x57   :  { %930 = vmatprep.mubr.bf16.mxu0 %v1458_v0  ;;  %971 = vmatprep.mubr.bf16.mxu1 %v1458_v0 }
  0x58   :  { %980 = vmatprep.subr.bf16.mxu0 %v1365_v62  ;;  %1021 = vmatprep.subr.bf16.mxu1 %v1367_v63  ;;  %v129_v62 = vrot.slane %v75_v50, %v1563_v11 }
  0x5d   :  { %1380 = vmatmul.mubr.msk.bf16.vlgmr.msra.gmra.mrb[24].mxu0 %vm402_vm0, %v1509_v17  ;;  %1381 = vmatmul.mubr.msk.bf16.vlgmr.msra.gmra.mrb[24].mxu1 %vm402_vm0, %v1509_v17 }
  0x5e   :  { %981 = vmatpush1.bf16.msra.mxu0 %v1364_v1  ;;  %1022 = vmatpush1.bf16.msra.mxu1 %v1366_v2 }
  0x5f   :  { %1012 = vmatprep.mubr.bf16.mxu0 %v1458_v0  ;;  %1053 = vmatprep.mubr.bf16.mxu1 %v1458_v0  ;;  %v85_v0 = vrot.slane %v74_v8, %v1557_v5 }
  0x65   :  { %1382 = vmatmul.mubr.msk.bf16.vlgmr.msra.gmra.mrb[28].mxu0 %vm402_vm0, %v1509_v17  ;;  %1383 = vmatmul.mubr.msk.bf16.vlgmr.msra.gmra.mrb[28].mxu1 %vm402_vm0, %v1509_v17 }
 0x100   :  { %v440_v16 = vpop.f32.mrb[0].mxu0  ;;  %v481_v18 = vpop.f32.mrb[0].mxu1 }
 0x101   :  { %v441_v17 = vadd.f32 %v440_v16, %v85_v0  ;;  %v442_v19 = vpop.f32.mrb[1].mxu0  ;;  %v482_v22 = vadd.f32 %v481_v18, %v93_v13  ;;  %v483_v24 = vpop.f32.mrb[1].mxu1 }
 0x102   :  { %v443_v23 = vadd.f32 %v442_v19, %v89_v14  ;;  %v444_v25 = vpop.f32.mrb[2].mxu0  ;;  %v484_v28 = vadd.f32 %v483_v24, %v97_v15  ;;  %v485_v29 = vpop.f32.mrb[2].mxu1 }
 0x103   :  { %v445_v30 = vpop.f32.mrb[3].mxu0  ;;  %v486_v33 = vpop.f32.mrb[3].mxu1  ;;  %v141_v25 = vrot.slane %v75_v50, %v1573_v26 }
 0x104   :  { %v1384_v32 = vpack.c.bf16 %v443_v23, %v441_v17  ;;  %v1385_v34 = vpack.c.bf16 %v484_v28, %v482_v22  ;;  %v133_v23 = vrot.slane %v75_v50, %v1571_v21  ;;  %v137_v28 = vrot.slane %v75_v50, %v1575_v27 }
 0x105   :  { %v145_v30 = vrot.slane %v75_v50, %v1577_v31 }
 0x106   :  { %v1136_v36 = vrot.slane %v1384_v32, %v1569_v20  ;;  %v1143_v39 = vrot.slane %v1385_v34, %v1569_v20 }
 0x108   :  { %v522_v41 = vpop.f32.mrb[4].mxu0  ;;  %v1158_v42 = vcombine.low %v1136_v36, %v1143_v39  ;;  %v563_v44 = vpop.f32.mrb[4].mxu1 }
 0x109   :  { %v523_v43 = vadd.f32 %v522_v41, %v101_v35  ;;  %v524_v45 = vpop.f32.mrb[5].mxu0  ;;  %v564_v46 = vadd.f32 %v563_v44, %v109_v37  ;;  %v565_v48 = vpop.f32.mrb[5].mxu1  ;;  %v76_v41 = vld [vmem:[#allocation4 + $0x10] sm:$0xff] }
 0x10a   :  { %v525_v47 = vadd.f32 %v524_v45, %v105_v38  ;;  %v526_v49 = vpop.f32.mrb[6].mxu0  ;;  %v566_v51 = vadd.f32 %v565_v48, %v113_v40  ;;  %v567_v52 = vpop.f32.mrb[6].mxu1  ;;  %v1166_v12 = vrot.slane %v1158_v42, %v1569_v20  ;;  %v149_v48 = vrot.slane %v76_v41, %v1557_v5 }
 0x10b   :  { %v527_v53 = vpop.f32.mrb[7].mxu0  ;;  %v568_v55 = vpop.f32.mrb[7].mxu1  ;;  %v157_v50 = vrot.slane %v76_v41, %v1559_v9 }
 0x10c   :  { %v1386_v54 = vpack.c.bf16 %v525_v47, %v523_v43  ;;  %v1387_v56 = vpack.c.bf16 %v566_v51, %v564_v46  ;;  %v153_v51 = vrot.slane %v76_v41, %v1561_v10  ;;  %v161_v53 = vrot.slane %v76_v41, %v1563_v11 }
 0x10e   :  { %v1150_v58 = vrot.slane %v1386_v54, %v1569_v20  ;;  %v1157_v61 = vrot.slane %v1387_v56, %v1569_v20 }
 0x110   :  { %v604_v63 = vpop.f32.mrb[8].mxu0  ;;  %v1159_v1 = vcombine.low %v1150_v58, %v1157_v61  ;;  %v645_v3 = vpop.f32.mrb[8].mxu1 }
 0x111   :  { %v605_v2 = vadd.f32 %v604_v63, %v117_v57  ;;  %v606_v4 = vpop.f32.mrb[9].mxu0  ;;  %v646_v6 = vadd.f32 %v645_v3, %v125_v59  ;;  %v647_v8 = vpop.f32.mrb[9].mxu1 }
 0x112   :  { %v607_v7 = vadd.f32 %v606_v4, %v121_v60  ;;  %v608_v0 = vpop.f32.mrb[10].mxu0  ;;  %v1173_v13 = vrot.slane %v1159_v1, %v1569_v20  ;;  %v648_v14 = vadd.f32 %v647_v8, %v129_v62  ;;  %v649_v15 = vpop.f32.mrb[10].mxu1 }
 0x113   :  { %v609_v16 = vpop.f32.mrb[11].mxu0  ;;  %v650_v18 = vpop.f32.mrb[11].mxu1  ;;  %v169_v15 = vrot.slane %v76_v41, %v1575_v27 }
 0x114   :  { %v1388_v17 = vpack.c.bf16 %v607_v7, %v605_v2  ;;  %v1174_v19 = vcombine.low %v1166_v12, %v1173_v13  ;;  %v1389_v22 = vpack.c.bf16 %v648_v14, %v646_v6  ;;  %v165_v12 = vrot.slane %v76_v41, %v1571_v21 }
 0x115   :  { %v173_v14 = vrot.slane %v76_v41, %v1573_v26 }
 0x116   :  { %v1185_v24 = vrot.slane %v1388_v17, %v1569_v20  ;;  %1326 = vst [vmem:[%s1646_s3] sm:$0xff] %v1174_v19  ;;  %v1192_v29 = vrot.slane %v1389_v22, %v1569_v20  ;;  %v177_v17 = vrot.slane %v76_v41, %v1577_v31 }
 0x118   :  { %v686_v32 = vpop.f32.mrb[12].mxu0  ;;  %v1207_v33 = vcombine.low %v1185_v24, %v1192_v29  ;;  %v727_v35 = vpop.f32.mrb[12].mxu1 }
 0x119   :  { %v687_v34 = vadd.f32 %v686_v32, %v133_v23  ;;  %v688_v36 = vpop.f32.mrb[13].mxu0  ;;  %v728_v37 = vadd.f32 %v727_v35, %v141_v25  ;;  %v729_v39 = vpop.f32.mrb[13].mxu1  ;;  %v77_v32 = vld [vmem:[#allocation4 + $0x18] sm:$0xff] }
 0x11a   :  { %v689_v38 = vadd.f32 %v688_v36, %v137_v28  ;;  %v690_v40 = vpop.f32.mrb[14].mxu0  ;;  %v730_v42 = vadd.f32 %v729_v39, %v145_v30  ;;  %v731_v43 = vpop.f32.mrb[14].mxu1  ;;  %v1215_v63 = vrot.slane %v1207_v33, %v1569_v20  ;;  %v181_v39 = vrot.slane %v77_v32, %v1557_v5 }
 0x11b   :  { %v691_v44 = vpop.f32.mrb[15].mxu0  ;;  %v732_v46 = vpop.f32.mrb[15].mxu1  ;;  %v189_v41 = vrot.slane %v77_v32, %v1559_v9 }
 0x11c   :  { %v1390_v45 = vpack.c.bf16 %v689_v38, %v687_v34  ;;  %v1391_v47 = vpack.c.bf16 %v730_v42, %v728_v37  ;;  %v185_v42 = vrot.slane %v77_v32, %v1561_v10  ;;  %v193_v44 = vrot.slane %v77_v32, %v1563_v11 }
 0x11e   :  { %v1199_v49 = vrot.slane %v1390_v45, %v1569_v20  ;;  %v1206_v52 = vrot.slane %v1391_v47, %v1569_v20 }
 0x120   :  { %v768_v54 = vpop.f32.mrb[16].mxu0  ;;  %v1208_v55 = vcombine.low %v1199_v49, %v1206_v52  ;;  %v809_v57 = vpop.f32.mrb[16].mxu1 }
 0x121   :  { %v769_v56 = vadd.f32 %v768_v54, %v149_v48  ;;  %v770_v58 = vpop.f32.mrb[17].mxu0  ;;  %v810_v59 = vadd.f32 %v809_v57, %v157_v50  ;;  %v811_v61 = vpop.f32.mrb[17].mxu1 }
 0x122   :  { %v771_v60 = vadd.f32 %v770_v58, %v153_v51  ;;  %v772_v62 = vpop.f32.mrb[18].mxu0  ;;  %v1222_v1 = vrot.slane %v1208_v55, %v1569_v20  ;;  %v812_v2 = vadd.f32 %v811_v61, %v161_v53  ;;  %v813_v3 = vpop.f32.mrb[18].mxu1  ;;  %v205_v61 = vrot.slane %v77_v32, %v1573_v26 }
 0x123   :  { %v773_v4 = vpop.f32.mrb[19].mxu0  ;;  %v814_v7 = vpop.f32.mrb[19].mxu1  ;;  %v201_v62 = vrot.slane %v77_v32, %v1575_v27 }
 0x124   :  { %v1392_v6 = vpack.c.bf16 %v771_v60, %v769_v56  ;;  %v1223_v8 = vcombine.low %v1215_v63, %v1222_v1  ;;  %v1393_v0 = vpack.c.bf16 %v812_v2, %v810_v59  ;;  %v197_v59 = vrot.slane %v77_v32, %v1571_v21 }
 0x125   :  { %v209_v1 = vrot.slane %v77_v32, %v1577_v31 }
 0x126   :  { %v1234_v13 = vrot.slane %v1392_v6, %v1569_v20  ;;  %1327 = vst [vmem:[%s1646_s3 + $0x8] sm:$0xff] %v1223_v8  ;;  %v1241_v16 = vrot.slane %v1393_v0, %v1569_v20 }
 0x128   :  { %v850_v18 = vpop.f32.mrb[20].mxu0  ;;  %v1256_v19 = vcombine.low %v1234_v13, %v1241_v16  ;;  %v891_v23 = vpop.f32.mrb[20].mxu1 }
 0x129   :  { %v851_v22 = vadd.f32 %v850_v18, %v165_v12  ;;  %v852_v24 = vpop.f32.mrb[21].mxu0  ;;  %v892_v25 = vadd.f32 %v891_v23, %v173_v14  ;;  %v893_v29 = vpop.f32.mrb[21].mxu1 }
 0x12a   :  { %v853_v28 = vadd.f32 %v852_v24, %v169_v15  ;;  %v854_v30 = vpop.f32.mrb[22].mxu0  ;;  %v894_v33 = vadd.f32 %v893_v29, %v177_v17  ;;  %v895_v34 = vpop.f32.mrb[22].mxu1  ;;  %v1264_v5 = vrot.slane %v1256_v19, %v1569_v20 }
 0x12b   :  { %v855_v35 = vpop.f32.mrb[23].mxu0  ;;  %v896_v37 = vpop.f32.mrb[23].mxu1 }
 0x12c   :  { %v1394_v36 = vpack.c.bf16 %v853_v28, %v851_v22  ;;  %v1395_v38 = vpack.c.bf16 %v894_v33, %v892_v25 }
 0x12e   :  { %v1248_v40 = vrot.slane %v1394_v36, %v1569_v20  ;;  %v1255_v43 = vrot.slane %v1395_v38, %v1569_v20 }
 0x130   :  { %v932_v45 = vpop.f32.mrb[24].mxu0  ;;  %v1257_v46 = vcombine.low %v1248_v40, %v1255_v43  ;;  %v973_v48 = vpop.f32.mrb[24].mxu1 }
 0x131   :  { %v933_v47 = vadd.f32 %v932_v45, %v181_v39  ;;  %v934_v49 = vpop.f32.mrb[25].mxu0  ;;  %v974_v50 = vadd.f32 %v973_v48, %v189_v41  ;;  %v975_v52 = vpop.f32.mrb[25].mxu1 }
 0x132   :  { %v935_v51 = vadd.f32 %v934_v49, %v185_v42  ;;  %v936_v53 = vpop.f32.mrb[26].mxu0  ;;  %v1271_v54 = vrot.slane %v1257_v46, %v1569_v20  ;;  %v976_v9 = vadd.f32 %v975_v52, %v193_v44  ;;  %v977_v55 = vpop.f32.mrb[26].mxu1 }
 0x133   :  { %v937_v10 = vpop.f32.mrb[27].mxu0  ;;  %v978_v57 = vpop.f32.mrb[27].mxu1 }
 0x134   :  { %v1396_v56 = vpack.c.bf16 %v935_v51, %v933_v47  ;;  %v1272_v58 = vcombine.low %v1264_v5, %v1271_v54  ;;  %v1397_v11 = vpack.c.bf16 %v976_v9, %v974_v50 }
 0x136   :  { %v1283_v60 = vrot.slane %v1396_v56, %v1569_v20  ;;  %1328 = vst [vmem:[%s1646_s3 + $0x10] sm:$0xff] %v1272_v58  ;;  %v1290_v63 = vrot.slane %v1397_v11, %v1569_v20 }
 0x138   :  { %v1014_v2 = vpop.f32.mrb[28].mxu0  ;;  %v1305_v3 = vcombine.low %v1283_v60, %v1290_v63  ;;  %v1055_v6 = vpop.f32.mrb[28].mxu1 }
 0x139   :  { %v1015_v4 = vadd.f32 %v1014_v2, %v197_v59  ;;  %v1016_v7 = vpop.f32.mrb[29].mxu0  ;;  %v1056_v21 = vadd.f32 %v1055_v6, %v205_v61  ;;  %v1057_v0 = vpop.f32.mrb[29].mxu1 }
 0x13a   :  { %v1017_v8 = vadd.f32 %v1016_v7, %v201_v62  ;;  %v1018_v12 = vpop.f32.mrb[30].mxu0  ;;  %v1058_v26 = vadd.f32 %v1057_v0, %v209_v1  ;;  %v1059_v13 = vpop.f32.mrb[30].mxu1  ;;  %v1313_v19 = vrot.slane %v1305_v3, %v1569_v20 }
 0x13b   :  { %v1019_v27 = vpop.f32.mrb[31].mxu0  ;;  %v1060_v15 = vpop.f32.mrb[31].mxu1 }
 0x13c   :  { %v1398_v14 = vpack.c.bf16 %v1017_v8, %v1015_v4  ;;  %v1399_v16 = vpack.c.bf16 %v1058_v26, %v1056_v21 }
 0x13e   :  { %v1297_v17 = vrot.slane %v1398_v14, %v1569_v20  ;;  %v1304_v18 = vrot.slane %v1399_v16, %v1569_v20 }
 0x140   :  { %v1306_v31 = vcombine.low %v1297_v17, %v1304_v18 }
 0x142   :  { %v1320_v22 = vrot.slane %v1306_v31, %v1569_v20 }
 0x144   :  { %v1321_v23 = vcombine.low %v1313_v19, %v1320_v22 }
 0x146   :  { %1329 = vst [vmem:[%s1646_s3 + $0x18] sm:$0xff] %v1321_v23 }
 0x147   :  { %1334 = vsyncpa [#allocation3], 1 }
 0x148   :  { %1335 = vsyncpa [#allocation5], 1 }

// kernel: discriminator_forward.6
= control target key start
LH: loop header
LB: loop body
LE: loop exit
PB: predicated region body
PF: predicated region fallthrough
CT: control target
= control target key end

     0   :  { %s3198_s12 = smov 0   ;;  %s4035_s0 = inlined_call_operand.vmem [shape: bf16[2048,64], index: 0, kind: input, shape index: {}]   ;;  %s4036_s1 = inlined_call_operand.vmem [shape: bf16[64,64], index: 1, kind: input, shape index: {}]   ;;  %s4037_s2 = inlined_call_operand.vmem [shape: f32[1,64], index: 2, kind: input, shape index: {}]   ;;  %s4038_s3 = inlined_call_operand.vmem [shape: bf16[2048,64], index: 3, kind: output, shape index: {}]  }
   0x1 LB: > { %s2481_s13 = sadd.s32 4294967295, %s3176_s12   ;;  %p2485_p0 = scmp.ge.s32.totalorder %s3176_s12, 1  ;;  %s3176_s12 = sphi %s3198_s12, %s13_s12  }
   0x2   : > { %p138_p1 = scmp.lt.s32.totalorder %s3176_s12, 3 }
   0x4   : > { %p139_p2 = pnand %p2485_p0, %p138_p1 }
   0x5   : > { %v3101_v0 = vld [vmem:[%s4036_s1] sm:$0xff] (!%p139_p2)   ;;  %s2486_s16 = sshll.u32 (!%p139_p2), %s2481_s13, 7  ;;  %v3102_v1 = vld [vmem:[%s4036_s1 + $0x8] sm:$0xff] (!%p139_p2)   ;;  %v3103_v2 = vld [vmem:[%s4036_s1 + $0x10] sm:$0xff] (!%p139_p2)   ;;  %vm662_vm0 = vcmask (!%p139_p2), 523264   ;;  %vm2296_vm1 = vcmask (!%p139_p2), 519168  }
   0x6   : > { %142 = sbr.rel (%p139_p2) target bundleno = 400 (0x190), region = 32  ;;  %p163_p3 = scmp.lt.s32.totalorder (!%p139_p2), %s2486_s16, 255  ;;  %2949 = vmatprep.subr.bf16.mxu0 (!%p139_p2), %v3101_v0  ;;  %3085 = vmatprep.subr.bf16.mxu1 (!%p139_p2), %v3101_v0  ;;  %v3104_v3 = vld [vmem:[%s4036_s1 + $0x18] sm:$0xff] (!%p139_p2)  }
   0x7   : > { %2950 = vmatpush3.bf16.msra.mxu0 (!%p139_p2), %v3101_v0  ;;  %3089 = vmatpush3.bf16.msra.mxu1 (!%p139_p2), %v3101_v0 }
   0x8   : > { %2951 = vmatprep.subr.bf16.mxu0 (!%p139_p2), %v3102_v1  ;;  %3086 = vmatprep.subr.bf16.mxu1 (!%p139_p2), %v3102_v1 }
   0xb   : > { %2952 = vmatpush3.bf16.msra.mxu0 (!%p139_p2), %v3102_v1  ;;  %3090 = vmatpush3.bf16.msra.mxu1 (!%p139_p2), %v3102_v1 }
   0xc   : > { %2953 = vmatprep.subr.bf16.mxu0 (!%p139_p2), %v3103_v2  ;;  %3087 = vmatprep.subr.bf16.mxu1 (!%p139_p2), %v3103_v2 }
   0xd   : > { %s4040_s16 = smov (!%p163_p3, %s2486_s16), 255 }
   0xe   : > { %s2487_s21 = sshll.u32 %s4040_s16, 2 }
   0xf   : > { %s3226_s26 = scalar_lea.vmem %s4035_s0, %s2487_s21  ;;  %2954 = vmatpush3.bf16.msra.mxu0 %v3103_v2  ;;  %3091 = vmatpush3.bf16.msra.mxu1 %v3103_v2  ;;  %s3370_s4 = scalar_lea.vmem %s4038_s3, %s2487_s21 }
  0x10   : > { %v3105_v4 = vld [vmem:[%s3226_s26] sm:$0xff]   ;;  %2955 = vmatprep.subr.bf16.mxu0 %v3104_v3  ;;  %3088 = vmatprep.subr.bf16.mxu1 %v3104_v3  ;;  %v3107_v6 = vld [vmem:[%s3226_s26 + $0x8] sm:$0xff]   ;;  %v3109_v8 = vld [vmem:[%s3226_s26 + $0x10] sm:$0xff]  }
  0x11   : > { %v3106_v5 = vld [vmem:[%s3226_s26 + $0x100] sm:$0xff]   ;;  %2957 = vmatprep.mubr.msk.bf16.mxu0 %vm662_vm0, %v3105_v4  ;;  %v3108_v7 = vld [vmem:[%s3226_s26 + $0x108] sm:$0xff]   ;;  %v3110_v9 = vld [vmem:[%s3226_s26 + $0x110] sm:$0xff]  }
  0x12   : > { %3021 = vmatprep.mubr.msk.bf16.mxu1 %vm662_vm0, %v3106_v5  ;;  %v3111_v10 = vld [vmem:[%s3226_s26 + $0x18] sm:$0xff]   ;;  %v3113_v12 = vld [vmem:[%s3226_s26 + $0x20] sm:$0xff]   ;;  %v3115_v14 = vld [vmem:[%s3226_s26 + $0x28] sm:$0xff]  }
  0x13   : > { %2956 = vmatpush3.bf16.msra.mxu0 %v3104_v3  ;;  %3092 = vmatpush3.bf16.msra.mxu1 %v3104_v3  ;;  %v3112_v11 = vld [vmem:[%s3226_s26 + $0x118] sm:$0xff]   ;;  %v3114_v13 = vld [vmem:[%s3226_s26 + $0x120] sm:$0xff]   ;;  %v3116_v15 = vld [vmem:[%s3226_s26 + $0x128] sm:$0xff]  }
  0x14   : > { %v3117_v16 = vld [vmem:[%s3226_s26 + $0x30] sm:$0xff]   ;;  %v3119_v18 = vld [vmem:[%s3226_s26 + $0x38] sm:$0xff]   ;;  %v3121_v20 = vld [vmem:[%s3226_s26 + $0x40] sm:$0xff]  }
  0x15   : > { %v3118_v17 = vld [vmem:[%s3226_s26 + $0x130] sm:$0xff]   ;;  %v3120_v19 = vld [vmem:[%s3226_s26 + $0x138] sm:$0xff]   ;;  %v3122_v21 = vld [vmem:[%s3226_s26 + $0x140] sm:$0xff]  }
  0x16   : > { %2958 = vmatmul.mubr.msk.bf16.vlgmr.msra.gmra.mrb[0].mxu0 %vm662_vm0, %v3107_v6  ;;  %3022 = vmatmul.mubr.msk.bf16.vlgmr.msra.gmra.mrb[0].mxu1 %vm662_vm0, %v3108_v7  ;;  %v3123_v22 = vld [vmem:[%s3226_s26 + $0x48] sm:$0xff]   ;;  %v3125_v24 = vld [vmem:[%s3226_s26 + $0x50] sm:$0xff]   ;;  %v3127_v26 = vld [vmem:[%s3226_s26 + $0x58] sm:$0xff]  }
  0x17   : > { %2961 = vmatprep.mubr.msk.bf16.mxu0 %vm662_vm0, %v3109_v8  ;;  %3025 = vmatprep.mubr.msk.bf16.mxu1 %vm662_vm0, %v3110_v9  ;;  %v3124_v23 = vld [vmem:[%s3226_s26 + $0x148] sm:$0xff]   ;;  %v3126_v25 = vld [vmem:[%s3226_s26 + $0x150] sm:$0xff]   ;;  %v3128_v27 = vld [vmem:[%s3226_s26 + $0x158] sm:$0xff]  }
  0x18   : > { %v3129_v28 = vld [vmem:[%s3226_s26 + $0x60] sm:$0xff]   ;;  %v3131_v30 = vld [vmem:[%s3226_s26 + $0x68] sm:$0xff]   ;;  %v3133_v32 = vld [vmem:[%s3226_s26 + $0x70] sm:$0xff]  }
  0x19   : > { %v3130_v29 = vld [vmem:[%s3226_s26 + $0x160] sm:$0xff]   ;;  %v3132_v31 = vld [vmem:[%s3226_s26 + $0x168] sm:$0xff]   ;;  %v3134_v33 = vld [vmem:[%s3226_s26 + $0x170] sm:$0xff]  }
  0x1a   : > { %v3135_v34 = vld [vmem:[%s3226_s26 + $0x78] sm:$0xff]   ;;  %v3137_v36 = vld [vmem:[%s3226_s26 + $0x80] sm:$0xff]   ;;  %v3139_v38 = vld [vmem:[%s3226_s26 + $0x88] sm:$0xff]  }
  0x1b   : > { %v3136_v35 = vld [vmem:[%s3226_s26 + $0x178] sm:$0xff]   ;;  %v3138_v37 = vld [vmem:[%s3226_s26 + $0x180] sm:$0xff]   ;;  %v3140_v39 = vld [vmem:[%s3226_s26 + $0x188] sm:$0xff]  }
  0x1c   : > { %v3141_v40 = vld [vmem:[%s3226_s26 + $0x90] sm:$0xff]   ;;  %v3143_v42 = vld [vmem:[%s3226_s26 + $0x98] sm:$0xff]   ;;  %v3145_v44 = vld [vmem:[%s3226_s26 + $0xa0] sm:$0xff]  }
  0x1d   : > { %v3142_v41 = vld [vmem:[%s3226_s26 + $0x190] sm:$0xff]   ;;  %v3144_v43 = vld [vmem:[%s3226_s26 + $0x198] sm:$0xff]   ;;  %v3146_v45 = vld [vmem:[%s3226_s26 + $0x1a0] sm:$0xff]  }
  0x1e   : > { %2962 = vmatmul.mubr.msk.bf16.gmra.mrb[4].mxu0 %vm662_vm0, %v3111_v10  ;;  %3026 = vmatmul.mubr.msk.bf16.gmra.mrb[4].mxu1 %vm662_vm0, %v3112_v11  ;;  %v3147_v46 = vld [vmem:[%s3226_s26 + $0xa8] sm:$0xff]   ;;  %v3149_v48 = vld [vmem:[%s3226_s26 + $0xb0] sm:$0xff]   ;;  %v3151_v50 = vld [vmem:[%s3226_s26 + $0xb8] sm:$0xff]  }
  0x1f   : > { %2965 = vmatprep.mubr.msk.bf16.mxu0 %vm662_vm0, %v3113_v12  ;;  %3029 = vmatprep.mubr.msk.bf16.mxu1 %vm662_vm0, %v3114_v13  ;;  %v3148_v47 = vld [vmem:[%s3226_s26 + $0x1a8] sm:$0xff]   ;;  %v3150_v49 = vld [vmem:[%s3226_s26 + $0x1b0] sm:$0xff]   ;;  %v3152_v51 = vld [vmem:[%s3226_s26 + $0x1b8] sm:$0xff]  }
  0x20   : > { %v3153_v52 = vld [vmem:[%s3226_s26 + $0xc0] sm:$0xff]   ;;  %v3155_v54 = vld [vmem:[%s3226_s26 + $0xc8] sm:$0xff]   ;;  %v3157_v56 = vld [vmem:[%s3226_s26 + $0xd0] sm:$0xff]  }
  0x21   : > { %v3154_v53 = vld [vmem:[%s3226_s26 + $0x1c0] sm:$0xff]   ;;  %v3156_v55 = vld [vmem:[%s3226_s26 + $0x1c8] sm:$0xff]   ;;  %v3158_v57 = vld [vmem:[%s3226_s26 + $0x1d0] sm:$0xff]  }
  0x22   : > { %v3159_v58 = vld [vmem:[%s3226_s26 + $0xd8] sm:$0xff]   ;;  %v3161_v60 = vld [vmem:[%s3226_s26 + $0xe0] sm:$0xff]   ;;  %v3163_v62 = vld [vmem:[%s3226_s26 + $0xe8] sm:$0xff]  }
  0x23   : > { %v3160_v59 = vld [vmem:[%s3226_s26 + $0x1d8] sm:$0xff]   ;;  %v3162_v61 = vld [vmem:[%s3226_s26 + $0x1e0] sm:$0xff]   ;;  %v3164_v63 = vld [vmem:[%s3226_s26 + $0x1e8] sm:$0xff]  }
  0x24   : > { %v3165_v0 = vld [vmem:[%s3226_s26 + $0xf0] sm:$0xff]   ;;  %v3167_v2 = vld [vmem:[%s3226_s26 + $0xf8] sm:$0xff]   ;;  %v3359_v4 = vld [vmem:[%s4037_s2] ss:$0 sm:$0xff] }
  0x25   : > { %v3166_v1 = vld [vmem:[%s3226_s26 + $0x1f0] sm:$0xff]   ;;  %v3168_v3 = vld [vmem:[%s3226_s26 + $0x1f8] sm:$0xff]  }
  0x26   : > { %2966 = vmatmul.mubr.msk.bf16.gmra.mrb[8].mxu0 %vm662_vm0, %v3115_v14  ;;  %3030 = vmatmul.mubr.msk.bf16.gmra.mrb[8].mxu1 %vm662_vm0, %v3116_v15 }
  0x27   : > { %2969 = vmatprep.mubr.msk.bf16.mxu0 %vm662_vm0, %v3117_v16  ;;  %3033 = vmatprep.mubr.msk.bf16.mxu1 %vm662_vm0, %v3118_v17 }
  0x2e   : > { %2970 = vmatmul.mubr.msk.bf16.gmra.mrb[12].mxu0 %vm662_vm0, %v3119_v18  ;;  %3034 = vmatmul.mubr.msk.bf16.gmra.mrb[12].mxu1 %vm662_vm0, %v3120_v19 }
  0x2f   : > { %2973 = vmatprep.mubr.msk.bf16.mxu0 %vm662_vm0, %v3121_v20  ;;  %3037 = vmatprep.mubr.msk.bf16.mxu1 %vm662_vm0, %v3122_v21 }
  0x36   : > { %2974 = vmatmul.mubr.msk.bf16.gmra.mrb[16].mxu0 %vm662_vm0, %v3123_v22  ;;  %3038 = vmatmul.mubr.msk.bf16.gmra.mrb[16].mxu1 %vm662_vm0, %v3124_v23 }
  0x37   : > { %2977 = vmatprep.mubr.msk.bf16.mxu0 %vm662_vm0, %v3125_v24  ;;  %3041 = vmatprep.mubr.msk.bf16.mxu1 %vm662_vm0, %v3126_v25 }
  0x3e   : > { %2978 = vmatmul.mubr.msk.bf16.gmra.mrb[20].mxu0 %vm662_vm0, %v3127_v26  ;;  %3042 = vmatmul.mubr.msk.bf16.gmra.mrb[20].mxu1 %vm662_vm0, %v3128_v27 }
  0x3f   : > { %2981 = vmatprep.mubr.msk.bf16.mxu0 %vm662_vm0, %v3129_v28  ;;  %3045 = vmatprep.mubr.msk.bf16.mxu1 %vm662_vm0, %v3130_v29 }
  0x46   : > { %2982 = vmatmul.mubr.msk.bf16.gmra.mrb[24].mxu0 %vm662_vm0, %v3131_v30  ;;  %3046 = vmatmul.mubr.msk.bf16.gmra.mrb[24].mxu1 %vm662_vm0, %v3132_v31 }
  0x47   : > { %2985 = vmatprep.mubr.msk.bf16.mxu0 %vm662_vm0, %v3133_v32  ;;  %3049 = vmatprep.mubr.msk.bf16.mxu1 %vm662_vm0, %v3134_v33 }
  0x4e   : > { %2986 = vmatmul.mubr.msk.bf16.gmra.mrb[28].mxu0 %vm662_vm0, %v3135_v34  ;;  %3050 = vmatmul.mubr.msk.bf16.gmra.mrb[28].mxu1 %vm662_vm0, %v3136_v35 }
  0x4f   : > { %2989 = vmatprep.mubr.msk.bf16.mxu0 %vm662_vm0, %v3137_v36  ;;  %3053 = vmatprep.mubr.msk.bf16.mxu1 %vm662_vm0, %v3138_v37 }
  0x56   : > { %2990 = vmatmul.mubr.msk.bf16.gmra.mrb[32].mxu0 %vm662_vm0, %v3139_v38  ;;  %3054 = vmatmul.mubr.msk.bf16.gmra.mrb[32].mxu1 %vm662_vm0, %v3140_v39 }
  0x57   : > { %2993 = vmatprep.mubr.msk.bf16.mxu0 %vm662_vm0, %v3141_v40  ;;  %3057 = vmatprep.mubr.msk.bf16.mxu1 %vm662_vm0, %v3142_v41 }
  0x5e   : > { %2994 = vmatmul.mubr.msk.bf16.gmra.mrb[36].mxu0 %vm662_vm0, %v3143_v42  ;;  %3058 = vmatmul.mubr.msk.bf16.gmra.mrb[36].mxu1 %vm662_vm0, %v3144_v43 }
  0x5f   : > { %2997 = vmatprep.mubr.msk.bf16.mxu0 %vm662_vm0, %v3145_v44  ;;  %3061 = vmatprep.mubr.msk.bf16.mxu1 %vm662_vm0, %v3146_v45 }
  0x66   : > { %2998 = vmatmul.mubr.msk.bf16.gmra.mrb[40].mxu0 %vm662_vm0, %v3147_v46  ;;  %3062 = vmatmul.mubr.msk.bf16.gmra.mrb[40].mxu1 %vm662_vm0, %v3148_v47 }
  0x67   : > { %3001 = vmatprep.mubr.msk.bf16.mxu0 %vm662_vm0, %v3149_v48  ;;  %3065 = vmatprep.mubr.msk.bf16.mxu1 %vm662_vm0, %v3150_v49 }
  0x6e   : > { %3002 = vmatmul.mubr.msk.bf16.gmra.mrb[44].mxu0 %vm662_vm0, %v3151_v50  ;;  %3066 = vmatmul.mubr.msk.bf16.gmra.mrb[44].mxu1 %vm662_vm0, %v3152_v51 }
  0x6f   : > { %3005 = vmatprep.mubr.msk.bf16.mxu0 %vm662_vm0, %v3153_v52  ;;  %3069 = vmatprep.mubr.msk.bf16.mxu1 %vm662_vm0, %v3154_v53 }
  0x76   : > { %3006 = vmatmul.mubr.msk.bf16.gmra.mrb[48].mxu0 %vm662_vm0, %v3155_v54  ;;  %3070 = vmatmul.mubr.msk.bf16.gmra.mrb[48].mxu1 %vm662_vm0, %v3156_v55 }
  0x77   : > { %3009 = vmatprep.mubr.msk.bf16.mxu0 %vm662_vm0, %v3157_v56  ;;  %3073 = vmatprep.mubr.msk.bf16.mxu1 %vm662_vm0, %v3158_v57 }
  0x7e   : > { %3010 = vmatmul.mubr.msk.bf16.gmra.mrb[52].mxu0 %vm662_vm0, %v3159_v58  ;;  %3074 = vmatmul.mubr.msk.bf16.gmra.mrb[52].mxu1 %vm662_vm0, %v3160_v59 }
  0x7f   : > { %3013 = vmatprep.mubr.msk.bf16.mxu0 %vm662_vm0, %v3161_v60  ;;  %3077 = vmatprep.mubr.msk.bf16.mxu1 %vm662_vm0, %v3162_v61 }
  0x86   : > { %3014 = vmatmul.mubr.msk.bf16.gmra.mrb[56].mxu0 %vm662_vm0, %v3163_v62  ;;  %3078 = vmatmul.mubr.msk.bf16.gmra.mrb[56].mxu1 %vm662_vm0, %v3164_v63 }
  0x87   : > { %3017 = vmatprep.mubr.msk.bf16.mxu0 %vm662_vm0, %v3165_v0  ;;  %3081 = vmatprep.mubr.msk.bf16.mxu1 %vm662_vm0, %v3166_v1 }
  0x8e   : > { %3018 = vmatmul.mubr.msk.bf16.gmra.mrb[60].mxu0 %vm662_vm0, %v3167_v2  ;;  %3082 = vmatmul.mubr.msk.bf16.gmra.mrb[60].mxu1 %vm662_vm0, %v3168_v3 }
  0xe9   : > { %v2959_v5 = vpop.f32.mrb[0].mxu0  ;;  %v3023_v6 = vpop.f32.mrb[0].mxu1 }
  0xea   : > { %v898_v7 = vadd.f32 %v2959_v5, %v3359_v4  ;;  %v1154_v8 = vadd.f32 %v3023_v6, %v3359_v4  ;;  %v889_v9 = vpop.f32.mrb[1].mxu0  ;;  %v1145_v10 = vpop.f32.mrb[1].mxu1 }
  0xeb   : > { %v890_v11 = vadd.f32 %v3359_v4, %v889_v9  ;;  %v1146_v12 = vadd.f32 %v3359_v4, %v1145_v10  ;;  %v2960_v13 = vpop.f32.mrb[2].mxu0  ;;  %v3024_v14 = vpop.f32.mrb[2].mxu1 }
  0xec   : > { %vm1402_vm2 = vcmp.gt.f32.partialorder %v898_v7, 0.0  ;;  %v1530_v15 = vmul.f32 0.2, %v898_v7  ;;  %vm1466_vm3 = vcmp.gt.f32.partialorder %v1154_v8, 0.0  ;;  %v1594_v16 = vmul.f32 0.2, %v1154_v8 }
  0xed   : > { %vm1400_vm4 = vcmp.gt.f32.partialorder %v890_v11, 0.0  ;;  %v1528_v17 = vmul.f32 0.2, %v890_v11  ;;  %vm1464_vm5 = vcmp.gt.f32.partialorder %v1146_v12, 0.0  ;;  %v1592_v18 = vmul.f32 0.2, %v1146_v12 }
  0xee   : > { %v1658_v19 = vsel %vm1402_vm2, %v898_v7, %v1530_v15  ;;  %v1722_v20 = vsel %vm1466_vm3, %v1154_v8, %v1594_v16  ;;  %v901_v21 = vadd.f32 %v2960_v13, %v3359_v4  ;;  %v1157_v22 = vadd.f32 %v3024_v14, %v3359_v4  ;;  %v892_v23 = vpop.f32.mrb[3].mxu0  ;;  %v1148_v24 = vpop.f32.mrb[3].mxu1 }
  0xef   : > { %v2755_v25 = vpack.c.bf16 %v1658_v19, %v1658_v19  ;;  %v2819_v26 = vpack.c.bf16 %v1722_v20, %v1722_v20  ;;  %v1656_v27 = vsel %vm1400_vm4, %v890_v11, %v1528_v17  ;;  %v1720_v28 = vsel %vm1464_vm5, %v1146_v12, %v1592_v18 }
  0xf0   : > { %v2753_v29 = vpack.c.bf16 %v1656_v27, %v1656_v27  ;;  %v2817_v30 = vpack.c.bf16 %v1720_v28, %v1720_v28  ;;  %vm1403_vm6 = vcmp.gt.f32.partialorder %v901_v21, 0.0  ;;  %v1531_v31 = vmul.f32 0.2, %v901_v21 }
  0xf1   : > { %2299 = vst.msk [vmem:[%s3370_s4 + $0x8] sm:$0xf] %vm2296_vm1, %v2755_v25  ;;  %2363 = vst.msk [vmem:[%s3370_s4 + $0x108] sm:$0xf] %vm2296_vm1, %v2819_v26  ;;  %vm1467_vm7 = vcmp.gt.f32.partialorder %v1157_v22, 0.0  ;;  %v893_v33 = vadd.f32 %v3359_v4, %v892_v23  ;;  %v1149_v34 = vadd.f32 %v3359_v4, %v1148_v24  ;;  %v2963_v35 = vpop.f32.mrb[4].mxu0 }
  0xf2   : > { %v1595_v32 = vmul.f32 0.2, %v1157_v22  ;;  %v3027_v36 = vpop.f32.mrb[4].mxu1  ;;  %2297 = vst.msk [vmem:[%s3370_s4] sm:$0xf] %vm2296_vm1, %v2753_v29  ;;  %v1659_v37 = vsel %vm1403_vm6, %v901_v21, %v1531_v31  ;;  %v914_v38 = vadd.f32 %v2963_v35, %v3359_v4  ;;  %v905_v40 = vpop.f32.mrb[5].mxu0 }
  0xf3   : > { %2361 = vst.msk [vmem:[%s3370_s4 + $0x100] sm:$0xf] %vm2296_vm1, %v2817_v30  ;;  %v1170_v39 = vadd.f32 %v3027_v36, %v3359_v4  ;;  %v1161_v41 = vpop.f32.mrb[5].mxu1  ;;  %v2756_v42 = vpack.c.bf16 %v1659_v37, %v1659_v37  ;;  %vm1401_vm8 = vcmp.gt.f32.partialorder %v893_v33, 0.0  ;;  %v1529_v44 = vmul.f32 0.2, %v893_v33 }
  0xf4   : > { %v1723_v43 = vsel %vm1467_vm7, %v1157_v22, %v1595_v32  ;;  %v2964_v45 = vpop.f32.mrb[6].mxu0  ;;  %v3028_v46 = vpop.f32.mrb[6].mxu1  ;;  %vm1465_vm9 = vcmp.gt.f32.partialorder %v1149_v34, 0.0  ;;  %v1593_v48 = vmul.f32 0.2, %v1149_v34  ;;  %vm1406_vm10 = vcmp.gt.f32.partialorder %v914_v38, 0.0 }
  0xf5   : > { %v2820_v47 = vpack.c.bf16 %v1723_v43, %v1723_v43  ;;  %v908_v49 = vpop.f32.mrb[7].mxu0  ;;  %v1164_v50 = vpop.f32.mrb[7].mxu1  ;;  %2300 = vst.msk [vmem:[%s3370_s4 + $0xc] sm:$0xf] %vm2296_vm1, %v2756_v42  ;;  %v1657_v51 = vsel %vm1401_vm8, %v893_v33, %v1529_v44  ;;  %v1534_v52 = vmul.f32 0.2, %v914_v38  ;;  %v906_v56 = vadd.f32 %v3359_v4, %v905_v40 }
  0xf6   : > { %vm1470_vm11 = vcmp.gt.f32.partialorder %v1170_v39, 0.0  ;;  %v1598_v53 = vmul.f32 0.2, %v1170_v39  ;;  %v2754_v54 = vpack.c.bf16 %v1657_v51, %v1657_v51  ;;  %v1721_v55 = vsel %vm1465_vm9, %v1149_v34, %v1593_v48 }
  0xf7   : > { %2364 = vst.msk [vmem:[%s3370_s4 + $0x10c] sm:$0xf] %vm2296_vm1, %v2820_v47  ;;  %v1162_v57 = vadd.f32 %v3359_v4, %v1161_v41  ;;  %v2818_v58 = vpack.c.bf16 %v1721_v55, %v1721_v55  ;;  %v1662_v59 = vsel %vm1406_vm10, %v914_v38, %v1534_v52  ;;  %v917_v61 = vadd.f32 %v2964_v45, %v3359_v4 }
  0xf8   : > { %v1726_v60 = vsel %vm1470_vm11, %v1170_v39, %v1598_v53  ;;  %2298 = vst.msk [vmem:[%s3370_s4 + $0x4] sm:$0xf] %vm2296_vm1, %v2754_v54  ;;  %v2759_v62 = vpack.c.bf16 %v1662_v59, %v1662_v59  ;;  %vm1404_vm12 = vcmp.gt.f32.partialorder %v906_v56, 0.0  ;;  %v1532_v0 = vmul.f32 0.2, %v906_v56 }
  0xf9   : > { %v2823_v63 = vpack.c.bf16 %v1726_v60, %v1726_v60  ;;  %2362 = vst.msk [vmem:[%s3370_s4 + $0x104] sm:$0xf] %vm2296_vm1, %v2818_v58  ;;  %vm1468_vm13 = vcmp.gt.f32.partialorder %v1162_v57, 0.0  ;;  %v1596_v1 = vmul.f32 0.2, %v1162_v57  ;;  %vm1407_vm14 = vcmp.gt.f32.partialorder %v917_v61, 0.0 }
  0xfa   : > { %v1535_v2 = vmul.f32 0.2, %v917_v61  ;;  %2303 = vst.msk [vmem:[%s3370_s4 + $0x18] sm:$0xf] %vm2296_vm1, %v2759_v62  ;;  %v1660_v3 = vsel %vm1404_vm12, %v906_v56, %v1532_v0  ;;  %v1173_v5 = vadd.f32 %v3028_v46, %v3359_v4  ;;  %v909_v6 = vadd.f32 %v3359_v4, %v908_v49  ;;  %v2967_v8 = vpop.f32.mrb[8].mxu0  ;;  %v3031_v9 = vpop.f32.mrb[8].mxu1 }
  0xfb   : > { %2367 = vst.msk [vmem:[%s3370_s4 + $0x118] sm:$0xf] %vm2296_vm1, %v2823_v63  ;;  %v1165_v7 = vadd.f32 %v3359_v4, %v1164_v50  ;;  %v2757_v10 = vpack.c.bf16 %v1660_v3, %v1660_v3  ;;  %v1724_v11 = vsel %vm1468_vm13, %v1162_v57, %v1596_v1  ;;  %v930_v13 = vadd.f32 %v2967_v8, %v3359_v4  ;;  %v921_v14 = vpop.f32.mrb[9].mxu0  ;;  %v1177_v15 = vpop.f32.mrb[9].mxu1 }
  0xfc   : > { %v1663_v12 = vsel %vm1407_vm14, %v917_v61, %v1535_v2  ;;  %v2821_v16 = vpack.c.bf16 %v1724_v11, %v1724_v11  ;;  %vm1471_vm15 = vcmp.gt.f32.partialorder %v1173_v5, 0.0  ;;  %v1599_v18 = vmul.f32 0.2, %v1173_v5  ;;  %v2968_v19 = vpop.f32.mrb[10].mxu0  ;;  %v3032_v20 = vpop.f32.mrb[10].mxu1 }
  0xfd   : > { %v2760_v17 = vpack.c.bf16 %v1663_v12, %v1663_v12  ;;  %2301 = vst.msk [vmem:[%s3370_s4 + $0x10] sm:$0xf] %vm2296_vm1, %v2757_v10  ;;  %vm1405_vm0 = vcmp.gt.f32.partialorder %v909_v6, 0.0  ;;  %v1533_v21 = vmul.f32 0.2, %v909_v6  ;;  %vm1469_vm2 = vcmp.gt.f32.partialorder %v1165_v7, 0.0 }
  0xfe   : > { %v1597_v22 = vmul.f32 0.2, %v1165_v7  ;;  %2365 = vst.msk [vmem:[%s3370_s4 + $0x110] sm:$0xf] %vm2296_vm1, %v2821_v16  ;;  %v1727_v23 = vsel %vm1471_vm15, %v1173_v5, %v1599_v18  ;;  %vm1410_vm3 = vcmp.gt.f32.partialorder %v930_v13, 0.0  ;;  %v1186_v25 = vadd.f32 %v3031_v9, %v3359_v4  ;;  %v924_v26 = vpop.f32.mrb[11].mxu0 }
  0xff   : > { %2304 = vst.msk [vmem:[%s3370_s4 + $0x1c] sm:$0xf] %vm2296_vm1, %v2760_v17  ;;  %v1538_v24 = vmul.f32 0.2, %v930_v13  ;;  %v1180_v27 = vpop.f32.mrb[11].mxu1  ;;  %v2824_v28 = vpack.c.bf16 %v1727_v23, %v1727_v23  ;;  %v1661_v29 = vsel %vm1405_vm0, %v909_v6, %v1533_v21  ;;  %v922_v31 = vadd.f32 %v3359_v4, %v921_v14 }
 0x100   : > { %v1725_v30 = vsel %vm1469_vm2, %v1165_v7, %v1597_v22  ;;  %v2758_v32 = vpack.c.bf16 %v1661_v29, %v1661_v29  ;;  %vm1474_vm4 = vcmp.gt.f32.partialorder %v1186_v25, 0.0  ;;  %v1602_v36 = vmul.f32 0.2, %v1186_v25 }
 0x101   : > { %v2822_v33 = vpack.c.bf16 %v1725_v30, %v1725_v30  ;;  %v1666_v34 = vsel %vm1410_vm3, %v930_v13, %v1538_v24  ;;  %2368 = vst.msk [vmem:[%s3370_s4 + $0x11c] sm:$0xf] %vm2296_vm1, %v2824_v28  ;;  %vm1408_vm5 = vcmp.gt.f32.partialorder %v922_v31, 0.0  ;;  %v1536_v37 = vmul.f32 0.2, %v922_v31  ;;  %v2971_v38 = vpop.f32.mrb[12].mxu0 }
 0x102   : > { %v2763_v35 = vpack.c.bf16 %v1666_v34, %v1666_v34  ;;  %2302 = vst.msk [vmem:[%s3370_s4 + $0x14] sm:$0xf] %vm2296_vm1, %v2758_v32  ;;  %v1178_v39 = vadd.f32 %v3359_v4, %v1177_v15  ;;  %v933_v40 = vadd.f32 %v2968_v19, %v3359_v4  ;;  %v1189_v41 = vadd.f32 %v3032_v20, %v3359_v4  ;;  %v3035_v43 = vpop.f32.mrb[12].mxu1  ;;  %v937_v44 = vpop.f32.mrb[13].mxu0 }
 0x103   : > { %2366 = vst.msk [vmem:[%s3370_s4 + $0x114] sm:$0xf] %vm2296_vm1, %v2822_v33  ;;  %v925_v42 = vadd.f32 %v3359_v4, %v924_v26  ;;  %v1730_v45 = vsel %vm1474_vm4, %v1186_v25, %v1602_v36  ;;  %v1664_v46 = vsel %vm1408_vm5, %v922_v31, %v1536_v37  ;;  %v1181_v47 = vadd.f32 %v3359_v4, %v1180_v27  ;;  %v1193_v49 = vpop.f32.mrb[13].mxu1  ;;  %v2972_v50 = vpop.f32.mrb[14].mxu0 }
 0x104   : > { %2307 = vst.msk [vmem:[%s3370_s4 + $0x28] sm:$0xf] %vm2296_vm1, %v2763_v35  ;;  %v946_v48 = vadd.f32 %v2971_v38, %v3359_v4  ;;  %v2827_v51 = vpack.c.bf16 %v1730_v45, %v1730_v45  ;;  %v2761_v52 = vpack.c.bf16 %v1664_v46, %v1664_v46  ;;  %vm1472_vm6 = vcmp.gt.f32.partialorder %v1178_v39, 0.0  ;;  %v3036_v54 = vpop.f32.mrb[14].mxu1  ;;  %v940_v55 = vpop.f32.mrb[15].mxu0 }
 0x105   : > { %v1600_v53 = vmul.f32 0.2, %v1178_v39  ;;  %vm1411_vm7 = vcmp.gt.f32.partialorder %v933_v40, 0.0  ;;  %v1539_v56 = vmul.f32 0.2, %v933_v40  ;;  %vm1475_vm8 = vcmp.gt.f32.partialorder %v1189_v41, 0.0 }
 0x106   : > { %v1603_v57 = vmul.f32 0.2, %v1189_v41  ;;  %2371 = vst.msk [vmem:[%s3370_s4 + $0x128] sm:$0xf] %vm2296_vm1, %v2827_v51  ;;  %2305 = vst.msk [vmem:[%s3370_s4 + $0x20] sm:$0xf] %vm2296_vm1, %v2761_v52  ;;  %v1202_v8 = vadd.f32 %v3035_v43, %v3359_v4  ;;  %v938_v12 = vadd.f32 %v3359_v4, %v937_v44  ;;  %v1194_v13 = vadd.f32 %v3359_v4, %v1193_v49 }
 0x107   : > { %v1728_v58 = vsel %vm1472_vm6, %v1178_v39, %v1600_v53  ;;  %vm1409_vm9 = vcmp.gt.f32.partialorder %v925_v42, 0.0  ;;  %v1537_v59 = vmul.f32 0.2, %v925_v42  ;;  %vm1473_vm10 = vcmp.gt.f32.partialorder %v1181_v47, 0.0  ;;  %v1196_v60 = vpop.f32.mrb[15].mxu1 }
 0x108   : > { %v2825_v61 = vpack.c.bf16 %v1728_v58, %v1728_v58  ;;  %v1667_v62 = vsel %vm1411_vm7, %v933_v40, %v1539_v56  ;;  %v1731_v63 = vsel %vm1475_vm8, %v1189_v41, %v1603_v57  ;;  %v1601_v0 = vmul.f32 0.2, %v1181_v47 }
 0x109   : > { %v2764_v1 = vpack.c.bf16 %v1667_v62, %v1667_v62  ;;  %v2828_v2 = vpack.c.bf16 %v1731_v63, %v1731_v63  ;;  %v1665_v3 = vsel %vm1409_vm9, %v925_v42, %v1537_v59  ;;  %vm1414_vm11 = vcmp.gt.f32.partialorder %v946_v48, 0.0  ;;  %v2975_v9 = vpop.f32.mrb[16].mxu0  ;;  %v3039_v10 = vpop.f32.mrb[16].mxu1 }
 0x10a   : > { %2369 = vst.msk [vmem:[%s3370_s4 + $0x120] sm:$0xf] %vm2296_vm1, %v2825_v61  ;;  %v2762_v5 = vpack.c.bf16 %v1665_v3, %v1665_v3  ;;  %v1729_v6 = vsel %vm1473_vm10, %v1181_v47, %v1601_v0  ;;  %v1542_v7 = vmul.f32 0.2, %v946_v48  ;;  %v949_v14 = vadd.f32 %v2972_v50, %v3359_v4  ;;  %v953_v15 = vpop.f32.mrb[17].mxu0  ;;  %v1209_v16 = vpop.f32.mrb[17].mxu1 }
 0x10b   : > { %2308 = vst.msk [vmem:[%s3370_s4 + $0x2c] sm:$0xf] %vm2296_vm1, %v2764_v1  ;;  %2372 = vst.msk [vmem:[%s3370_s4 + $0x12c] sm:$0xf] %vm2296_vm1, %v2828_v2  ;;  %v2826_v11 = vpack.c.bf16 %v1729_v6, %v1729_v6  ;;  %vm1478_vm12 = vcmp.gt.f32.partialorder %v1202_v8, 0.0  ;;  %v1205_v19 = vadd.f32 %v3036_v54, %v3359_v4  ;;  %v3446_v20 = vpop.f32.mrb[18].mxu0  ;;  %v941_v35 = vadd.f32 %v3359_v4, %v940_v55 }
 0x10c   : > { %2306 = vst.msk [vmem:[%s3370_s4 + $0x24] sm:$0xf] %vm2296_vm1, %v2762_v5  ;;  %v1670_v17 = vsel %vm1414_vm11, %v946_v48, %v1542_v7  ;;  %v1606_v18 = vmul.f32 0.2, %v1202_v8  ;;  %v3448_v21 = vpop.f32.mrb[18].mxu1  ;;  %vm1412_vm13 = vcmp.gt.f32.partialorder %v938_v12, 0.0  ;;  %v1197_v39 = vadd.f32 %v3359_v4, %v1196_v60 }
 0x10d   : > { %2370 = vst.msk [vmem:[%s3370_s4 + $0x124] sm:$0xf] %vm2296_vm1, %v2826_v11  ;;  %v2767_v22 = vpack.c.bf16 %v1670_v17, %v1670_v17  ;;  %v1540_v23 = vmul.f32 0.2, %v938_v12  ;;  %vm1476_vm14 = vcmp.gt.f32.partialorder %v1194_v13, 0.0  ;;  %v3452_v24 = vpop.f32.mrb[19].mxu0  ;;  %v962_v42 = vadd.f32 %v2975_v9, %v3359_v4 }
 0x10e   : > { %v3454_v25 = vpop.f32.mrb[19].mxu1  ;;  %v1734_v26 = vsel %vm1478_vm12, %v1202_v8, %v1606_v18  ;;  %v1604_v27 = vmul.f32 0.2, %v1194_v13  ;;  %vm1415_vm15 = vcmp.gt.f32.partialorder %v949_v14, 0.0  ;;  %v1543_v28 = vmul.f32 0.2, %v949_v14 }
 0x10f   : > { %2311 = vst.msk [vmem:[%s3370_s4 + $0x38] sm:$0xf] %vm2296_vm1, %v2767_v22  ;;  %v2831_v29 = vpack.c.bf16 %v1734_v26, %v1734_v26  ;;  %v1668_v30 = vsel %vm1412_vm13, %v938_v12, %v1540_v23  ;;  %vm1479_vm0 = vcmp.gt.f32.partialorder %v1205_v19, 0.0  ;;  %v1607_v31 = vmul.f32 0.2, %v1205_v19 }
 0x110   : > { %v2765_v32 = vpack.c.bf16 %v1668_v30, %v1668_v30  ;;  %v1732_v33 = vsel %vm1476_vm14, %v1194_v13, %v1604_v27  ;;  %v1671_v34 = vsel %vm1415_vm15, %v949_v14, %v1543_v28  ;;  %vm1413_vm2 = vcmp.gt.f32.partialorder %v941_v35, 0.0 }
 0x111   : > { %2375 = vst.msk [vmem:[%s3370_s4 + $0x138] sm:$0xf] %vm2296_vm1, %v2831_v29  ;;  %v2829_v36 = vpack.c.bf16 %v1732_v33, %v1732_v33  ;;  %v2768_v37 = vpack.c.bf16 %v1671_v34, %v1671_v34  ;;  %v1735_v38 = vsel %vm1479_vm0, %v1205_v19, %v1607_v31  ;;  %v1541_v41 = vmul.f32 0.2, %v941_v35  ;;  %v2979_v43 = vpop.f32.mrb[20].mxu0  ;;  %v3043_v44 = vpop.f32.mrb[20].mxu1 }
 0x112   : > { %2309 = vst.msk [vmem:[%s3370_s4 + $0x30] sm:$0xf] %vm2296_vm1, %v2765_v32  ;;  %v2832_v40 = vpack.c.bf16 %v1735_v38, %v1735_v38  ;;  %vm1477_vm3 = vcmp.gt.f32.partialorder %v1197_v39, 0.0  ;;  %v1605_v45 = vmul.f32 0.2, %v1197_v39  ;;  %v1218_v46 = vadd.f32 %v3039_v10, %v3359_v4  ;;  %v969_v48 = vpop.f32.mrb[21].mxu0 }
 0x113   : > { %2373 = vst.msk [vmem:[%s3370_s4 + $0x130] sm:$0xf] %vm2296_vm1, %v2829_v36  ;;  %2312 = vst.msk [vmem:[%s3370_s4 + $0x3c] sm:$0xf] %vm2296_vm1, %v2768_v37  ;;  %v954_v47 = vadd.f32 %v3359_v4, %v953_v15  ;;  %v3471_v49 = vpop.f32.mrb[21].mxu1  ;;  %v1669_v50 = vsel %vm1413_vm2, %v941_v35, %v1541_v41  ;;  %vm1418_vm4 = vcmp.gt.f32.partialorder %v962_v42, 0.0  ;;  %v1210_v52 = vadd.f32 %v3359_v4, %v1209_v16 }
 0x114   : > { %2376 = vst.msk [vmem:[%s3370_s4 + $0x13c] sm:$0xf] %vm2296_vm1, %v2832_v40  ;;  %v1546_v51 = vmul.f32 0.2, %v962_v42  ;;  %v3476_v53 = vpop.f32.mrb[22].mxu0  ;;  %v3478_v54 = vpop.f32.mrb[22].mxu1  ;;  %v2766_v55 = vpack.c.bf16 %v1669_v50, %v1669_v50  ;;  %v1733_v56 = vsel %vm1477_vm3, %v1197_v39, %v1605_v45  ;;  %v965_v5 = vadd.f32 %v3446_v20, %v3359_v4 }
 0x115   : > { %vm1482_vm5 = vcmp.gt.f32.partialorder %v1218_v46, 0.0  ;;  %v1610_v57 = vmul.f32 0.2, %v1218_v46  ;;  %v3480_v58 = vpop.f32.mrb[23].mxu0  ;;  %v3482_v59 = vpop.f32.mrb[23].mxu1  ;;  %v2830_v60 = vpack.c.bf16 %v1733_v56, %v1733_v56  ;;  %vm1416_vm6 = vcmp.gt.f32.partialorder %v954_v47, 0.0 }
 0x116   : > { %v1674_v61 = vsel %vm1418_vm4, %v962_v42, %v1546_v51  ;;  %v1544_v62 = vmul.f32 0.2, %v954_v47  ;;  %2310 = vst.msk [vmem:[%s3370_s4 + $0x34] sm:$0xf] %vm2296_vm1, %v2766_v55  ;;  %vm1480_vm7 = vcmp.gt.f32.partialorder %v1210_v52, 0.0  ;;  %v1221_v6 = vadd.f32 %v3448_v21, %v3359_v4 }
 0x117   : > { %v2771_v63 = vpack.c.bf16 %v1674_v61, %v1674_v61  ;;  %v1738_v0 = vsel %vm1482_vm5, %v1218_v46, %v1610_v57  ;;  %v1608_v1 = vmul.f32 0.2, %v1210_v52  ;;  %2374 = vst.msk [vmem:[%s3370_s4 + $0x134] sm:$0xf] %vm2296_vm1, %v2830_v60  ;;  %v957_v9 = vadd.f32 %v3359_v4, %v3452_v24 }
 0x118   : > { %v2835_v2 = vpack.c.bf16 %v1738_v0, %v1738_v0  ;;  %v1672_v3 = vsel %vm1416_vm6, %v954_v47, %v1544_v62  ;;  %v1213_v10 = vadd.f32 %v3359_v4, %v3454_v25  ;;  %vm1419_vm8 = vcmp.gt.f32.partialorder %v965_v5, 0.0 }
 0x119   : > { %2315 = vst.msk [vmem:[%s3370_s4 + $0x48] sm:$0xf] %vm2296_vm1, %v2771_v63  ;;  %v2769_v7 = vpack.c.bf16 %v1672_v3, %v1672_v3  ;;  %v1736_v8 = vsel %vm1480_vm7, %v1210_v52, %v1608_v1  ;;  %v1547_v12 = vmul.f32 0.2, %v965_v5  ;;  %vm1483_vm9 = vcmp.gt.f32.partialorder %v1221_v6, 0.0  ;;  %v3500_v13 = vpop.f32.mrb[24].mxu0 }
 0x11a   : > { %2379 = vst.msk [vmem:[%s3370_s4 + $0x148] sm:$0xf] %vm2296_vm1, %v2835_v2  ;;  %v2833_v11 = vpack.c.bf16 %v1736_v8, %v1736_v8  ;;  %v3502_v14 = vpop.f32.mrb[24].mxu1  ;;  %v1611_v15 = vmul.f32 0.2, %v1221_v6  ;;  %vm1417_vm10 = vcmp.gt.f32.partialorder %v957_v9, 0.0  ;;  %v978_v19 = vadd.f32 %v2979_v43, %v3359_v4 }
 0x11b   : > { %2313 = vst.msk [vmem:[%s3370_s4 + $0x40] sm:$0xf] %vm2296_vm1, %v2769_v7  ;;  %v1545_v16 = vmul.f32 0.2, %v957_v9  ;;  %vm1481_vm11 = vcmp.gt.f32.partialorder %v1213_v10, 0.0  ;;  %v1675_v17 = vsel %vm1419_vm8, %v965_v5, %v1547_v12  ;;  %v1234_v20 = vadd.f32 %v3043_v44, %v3359_v4  ;;  %v3510_v21 = vpop.f32.mrb[25].mxu0 }
 0x11c   : > { %2377 = vst.msk [vmem:[%s3370_s4 + $0x140] sm:$0xf] %vm2296_vm1, %v2833_v11  ;;  %v1609_v18 = vmul.f32 0.2, %v1213_v10  ;;  %v3512_v22 = vpop.f32.mrb[25].mxu1  ;;  %v2772_v23 = vpack.c.bf16 %v1675_v17, %v1675_v17  ;;  %v1739_v24 = vsel %vm1483_vm9, %v1221_v6, %v1611_v15  ;;  %v970_v26 = vadd.f32 %v3359_v4, %v969_v48  ;;  %v3516_v27 = vpop.f32.mrb[26].mxu0 }
 0x11d   : > { %v1673_v25 = vsel %vm1417_vm10, %v957_v9, %v1545_v16  ;;  %v3518_v28 = vpop.f32.mrb[26].mxu1  ;;  %v2836_v29 = vpack.c.bf16 %v1739_v24, %v1739_v24  ;;  %vm1422_vm12 = vcmp.gt.f32.partialorder %v978_v19, 0.0  ;;  %v3521_v32 = vpop.f32.mrb[27].mxu0  ;;  %v1550_v35 = vmul.f32 0.2, %v978_v19 }
 0x11e   : > { %v2770_v30 = vpack.c.bf16 %v1673_v25, %v1673_v25  ;;  %v1737_v31 = vsel %vm1481_vm11, %v1213_v10, %v1609_v18  ;;  %v3523_v33 = vpop.f32.mrb[27].mxu1  ;;  %2316 = vst.msk [vmem:[%s3370_s4 + $0x4c] sm:$0xf] %vm2296_vm1, %v2772_v23  ;;  %vm1486_vm13 = vcmp.gt.f32.partialorder %v1234_v20, 0.0  ;;  %v1614_v36 = vmul.f32 0.2, %v1234_v20 }
 0x11f   : > { %v2834_v34 = vpack.c.bf16 %v1737_v31, %v1737_v31  ;;  %2380 = vst.msk [vmem:[%s3370_s4 + $0x14c] sm:$0xf] %vm2296_vm1, %v2836_v29  ;;  %vm1420_vm14 = vcmp.gt.f32.partialorder %v970_v26, 0.0  ;;  %v1548_v37 = vmul.f32 0.2, %v970_v26  ;;  %v1226_v38 = vadd.f32 %v3359_v4, %v3471_v49 }
 0x120   : > { %2314 = vst.msk [vmem:[%s3370_s4 + $0x44] sm:$0xf] %vm2296_vm1, %v2770_v30  ;;  %v981_v39 = vadd.f32 %v3476_v53, %v3359_v4  ;;  %v1678_v40 = vsel %vm1422_vm12, %v978_v19, %v1550_v35  ;;  %v1742_v41 = vsel %vm1486_vm13, %v1234_v20, %v1614_v36  ;;  %v1237_v42 = vadd.f32 %v3478_v54, %v3359_v4 }
 0x121   : > { %2378 = vst.msk [vmem:[%s3370_s4 + $0x144] sm:$0xf] %vm2296_vm1, %v2834_v34  ;;  %v973_v43 = vadd.f32 %v3359_v4, %v3480_v58  ;;  %v2775_v44 = vpack.c.bf16 %v1678_v40, %v1678_v40  ;;  %v2839_v45 = vpack.c.bf16 %v1742_v41, %v1742_v41  ;;  %v1676_v46 = vsel %vm1420_vm14, %v970_v26, %v1548_v37  ;;  %v3541_v47 = vpop.f32.mrb[28].mxu0  ;;  %v3543_v48 = vpop.f32.mrb[28].mxu1 }
 0x122   : > { %vm1484_vm15 = vcmp.gt.f32.partialorder %v1226_v38, 0.0  ;;  %v2773_v49 = vpack.c.bf16 %v1676_v46, %v1676_v46  ;;  %v1612_v50 = vmul.f32 0.2, %v1226_v38  ;;  %vm1423_vm0 = vcmp.gt.f32.partialorder %v981_v39, 0.0  ;;  %v3545_v52 = vpop.f32.mrb[29].mxu0  ;;  %v3557_v60 = vpop.f32.mrb[29].mxu1 }
 0x123   : > { %v1551_v51 = vmul.f32 0.2, %v981_v39  ;;  %2319 = vst.msk [vmem:[%s3370_s4 + $0x58] sm:$0xf] %vm2296_vm1, %v2775_v44  ;;  %2383 = vst.msk [vmem:[%s3370_s4 + $0x158] sm:$0xf] %vm2296_vm1, %v2839_v45  ;;  %v1229_v57 = vadd.f32 %v3359_v4, %v3482_v59  ;;  %v994_v58 = vadd.f32 %v3500_v13, %v3359_v4  ;;  %v1250_v9 = vadd.f32 %v3502_v14, %v3359_v4 }
 0x124   : > { %vm1487_vm2 = vcmp.gt.f32.partialorder %v1237_v42, 0.0  ;;  %v1615_v53 = vmul.f32 0.2, %v1237_v42  ;;  %vm1421_vm3 = vcmp.gt.f32.partialorder %v973_v43, 0.0  ;;  %v1549_v54 = vmul.f32 0.2, %v973_v43 }
 0x125   : > { %2317 = vst.msk [vmem:[%s3370_s4 + $0x50] sm:$0xf] %vm2296_vm1, %v2773_v49  ;;  %v1740_v55 = vsel %vm1484_vm15, %v1226_v38, %v1612_v50  ;;  %v1679_v56 = vsel %vm1423_vm0, %v981_v39, %v1551_v51  ;;  %v3559_v61 = vpop.f32.mrb[30].mxu0  ;;  %v3561_v2 = vpop.f32.mrb[30].mxu1  ;;  %vm1485_vm4 = vcmp.gt.f32.partialorder %v1229_v57, 0.0  ;;  %vm1426_vm5 = vcmp.gt.f32.partialorder %v994_v58, 0.0 }
 0x126   : > { %v2837_v62 = vpack.c.bf16 %v1740_v55, %v1740_v55  ;;  %v2776_v63 = vpack.c.bf16 %v1679_v56, %v1679_v56  ;;  %v1743_v0 = vsel %vm1487_vm2, %v1237_v42, %v1615_v53  ;;  %v1677_v1 = vsel %vm1421_vm3, %v973_v43, %v1549_v54  ;;  %v3563_v3 = vpop.f32.mrb[31].mxu0  ;;  %v3565_v7 = vpop.f32.mrb[31].mxu1 }
 0x127   : > { %v2840_v5 = vpack.c.bf16 %v1743_v0, %v1743_v0  ;;  %v2774_v59 = vpack.c.bf16 %v1677_v1, %v1677_v1  ;;  %v1613_v6 = vmul.f32 0.2, %v1229_v57  ;;  %v1554_v8 = vmul.f32 0.2, %v994_v58 }
 0x128   : > { %2381 = vst.msk [vmem:[%s3370_s4 + $0x150] sm:$0xf] %vm2296_vm1, %v2837_v62  ;;  %2320 = vst.msk [vmem:[%s3370_s4 + $0x5c] sm:$0xf] %vm2296_vm1, %v2776_v63  ;;  %v986_v10 = vadd.f32 %v3359_v4, %v3510_v21  ;;  %v1242_v12 = vadd.f32 %v3359_v4, %v3512_v22  ;;  %v997_v13 = vadd.f32 %v3516_v27, %v3359_v4  ;;  %vm1490_vm6 = vcmp.gt.f32.partialorder %v1250_v9, 0.0 }
 0x129   : > { %2384 = vst.msk [vmem:[%s3370_s4 + $0x15c] sm:$0xf] %vm2296_vm1, %v2840_v5  ;;  %2318 = vst.msk [vmem:[%s3370_s4 + $0x54] sm:$0xf] %vm2296_vm1, %v2774_v59  ;;  %v1741_v11 = vsel %vm1485_vm4, %v1229_v57, %v1613_v6  ;;  %v1253_v15 = vadd.f32 %v3518_v28, %v3359_v4  ;;  %v1682_v14 = vsel %vm1426_vm5, %v994_v58, %v1554_v8  ;;  %v1618_v17 = vmul.f32 0.2, %v1250_v9 }
 0x12a   : > { %v2838_v16 = vpack.c.bf16 %v1741_v11, %v1741_v11  ;;  %v3585_v18 = vpop.f32.mrb[32].mxu0  ;;  %v3587_v19 = vpop.f32.mrb[32].mxu1  ;;  %v2779_v20 = vpack.c.bf16 %v1682_v14, %v1682_v14  ;;  %vm1424_vm7 = vcmp.gt.f32.partialorder %v986_v10, 0.0  ;;  %v1552_v21 = vmul.f32 0.2, %v986_v10 }
 0x12b   : > { %vm1488_vm8 = vcmp.gt.f32.partialorder %v1242_v12, 0.0  ;;  %v3589_v22 = vpop.f32.mrb[33].mxu0  ;;  %v3591_v23 = vpop.f32.mrb[33].mxu1  ;;  %v1746_v24 = vsel %vm1490_vm6, %v1250_v9, %v1618_v17  ;;  %v1616_v25 = vmul.f32 0.2, %v1242_v12  ;;  %vm1427_vm9 = vcmp.gt.f32.partialorder %v997_v13, 0.0 }
 0x12c   : > { %2382 = vst.msk [vmem:[%s3370_s4 + $0x154] sm:$0xf] %vm2296_vm1, %v2838_v16  ;;  %v1555_v26 = vmul.f32 0.2, %v997_v13  ;;  %v3595_v27 = vpop.f32.mrb[34].mxu0  ;;  %v2843_v28 = vpack.c.bf16 %v1746_v24, %v1746_v24  ;;  %v1680_v29 = vsel %vm1424_vm7, %v986_v10, %v1552_v21  ;;  %vm1491_vm10 = vcmp.gt.f32.partialorder %v1253_v15, 0.0 }
 0x12d   : > { %2323 = vst.msk [vmem:[%s3370_s4 + $0x68] sm:$0xf] %vm2296_vm1, %v2779_v20  ;;  %v1619_v30 = vmul.f32 0.2, %v1253_v15  ;;  %v3599_v31 = vpop.f32.mrb[34].mxu1  ;;  %v3601_v34 = vpop.f32.mrb[35].mxu0  ;;  %v2777_v35 = vpack.c.bf16 %v1680_v29, %v1680_v29  ;;  %v1744_v36 = vsel %vm1488_vm8, %v1242_v12, %v1616_v25  ;;  %v989_v38 = vadd.f32 %v3359_v4, %v3521_v32 }
 0x12e   : > { %v1683_v37 = vsel %vm1427_vm9, %v997_v13, %v1555_v26  ;;  %v3606_v39 = vpop.f32.mrb[35].mxu1  ;;  %2387 = vst.msk [vmem:[%s3370_s4 + $0x168] sm:$0xf] %vm2296_vm1, %v2843_v28  ;;  %v2841_v40 = vpack.c.bf16 %v1744_v36, %v1744_v36  ;;  %v1245_v43 = vadd.f32 %v3359_v4, %v3523_v33  ;;  %v1010_v46 = vadd.f32 %v3541_v47, %v3359_v4 }
 0x12f   : > { %v2780_v41 = vpack.c.bf16 %v1683_v37, %v1683_v37  ;;  %v1747_v42 = vsel %vm1491_vm10, %v1253_v15, %v1619_v30  ;;  %2321 = vst.msk [vmem:[%s3370_s4 + $0x60] sm:$0xf] %vm2296_vm1, %v2777_v35  ;;  %vm1425_vm11 = vcmp.gt.f32.partialorder %v989_v38, 0.0  ;;  %v1553_v45 = vmul.f32 0.2, %v989_v38 }
 0x130   : > { %v2844_v44 = vpack.c.bf16 %v1747_v42, %v1747_v42  ;;  %2385 = vst.msk [vmem:[%s3370_s4 + $0x160] sm:$0xf] %vm2296_vm1, %v2841_v40  ;;  %vm1489_vm12 = vcmp.gt.f32.partialorder %v1245_v43, 0.0  ;;  %v1617_v32 = vmul.f32 0.2, %v1245_v43  ;;  %v1266_v49 = vadd.f32 %v3543_v48, %v3359_v4 }
 0x131   : > { %2324 = vst.msk [vmem:[%s3370_s4 + $0x6c] sm:$0xf] %vm2296_vm1, %v2780_v41  ;;  %v1002_v33 = vadd.f32 %v3359_v4, %v3545_v52  ;;  %v1681_v50 = vsel %vm1425_vm11, %v989_v38, %v1553_v45  ;;  %vm1430_vm13 = vcmp.gt.f32.partialorder %v1010_v46, 0.0  ;;  %v1558_v51 = vmul.f32 0.2, %v1010_v46  ;;  %v3628_v53 = vpop.f32.mrb[36].mxu0 }
 0x132   : > { %2388 = vst.msk [vmem:[%s3370_s4 + $0x16c] sm:$0xf] %vm2296_vm1, %v2844_v44  ;;  %v1258_v47 = vadd.f32 %v3359_v4, %v3557_v60  ;;  %v3630_v54 = vpop.f32.mrb[36].mxu1  ;;  %v2778_v55 = vpack.c.bf16 %v1681_v50, %v1681_v50  ;;  %v1745_v56 = vsel %vm1489_vm12, %v1245_v43, %v1617_v32  ;;  %vm1494_vm14 = vcmp.gt.f32.partialorder %v1266_v49, 0.0  ;;  %v3632_v57 = vpop.f32.mrb[37].mxu0 }
 0x133   : > { %v1622_v48 = vmul.f32 0.2, %v1266_v49  ;;  %v3634_v52 = vpop.f32.mrb[37].mxu1  ;;  %v2842_v58 = vpack.c.bf16 %v1745_v56, %v1745_v56  ;;  %v1686_v62 = vsel %vm1430_vm13, %v1010_v46, %v1558_v51  ;;  %vm1428_vm15 = vcmp.gt.f32.partialorder %v1002_v33, 0.0  ;;  %v3636_v0 = vpop.f32.mrb[38].mxu0 }
 0x134   : > { %v1556_v63 = vmul.f32 0.2, %v1002_v33  ;;  %v3638_v60 = vpop.f32.mrb[38].mxu1  ;;  %2322 = vst.msk [vmem:[%s3370_s4 + $0x64] sm:$0xf] %vm2296_vm1, %v2778_v55  ;;  %v2783_v1 = vpack.c.bf16 %v1686_v62, %v1686_v62  ;;  %vm1492_vm0 = vcmp.gt.f32.partialorder %v1258_v47, 0.0  ;;  %v1013_v11 = vadd.f32 %v3559_v61, %v3359_v4 }
 0x135   : > { %v1750_v5 = vsel %vm1494_vm14, %v1266_v49, %v1622_v48  ;;  %v1620_v59 = vmul.f32 0.2, %v1258_v47  ;;  %v3642_v6 = vpop.f32.mrb[39].mxu0  ;;  %v3644_v8 = vpop.f32.mrb[39].mxu1  ;;  %2386 = vst.msk [vmem:[%s3370_s4 + $0x164] sm:$0xf] %vm2296_vm1, %v2842_v58  ;;  %v1269_v12 = vadd.f32 %v3561_v2, %v3359_v4  ;;  %v1005_v16 = vadd.f32 %v3359_v4, %v3563_v3 }
 0x136   : > { %v2847_v9 = vpack.c.bf16 %v1750_v5, %v1750_v5  ;;  %v1684_v10 = vsel %vm1428_vm15, %v1002_v33, %v1556_v63  ;;  %2327 = vst.msk [vmem:[%s3370_s4 + $0x78] sm:$0xf] %vm2296_vm1, %v2783_v1  ;;  %v1261_v14 = vadd.f32 %v3359_v4, %v3565_v7  ;;  %vm1431_vm2 = vcmp.gt.f32.partialorder %v1013_v11, 0.0 }
 0x137   : > { %v2781_v13 = vpack.c.bf16 %v1684_v10, %v1684_v10  ;;  %v1748_v15 = vsel %vm1492_vm0, %v1258_v47, %v1620_v59  ;;  %v1559_v20 = vmul.f32 0.2, %v1013_v11  ;;  %vm1495_vm3 = vcmp.gt.f32.partialorder %v1269_v12, 0.0 }
 0x138   : > { %2391 = vst.msk [vmem:[%s3370_s4 + $0x178] sm:$0xf] %vm2296_vm1, %v2847_v9  ;;  %v2845_v17 = vpack.c.bf16 %v1748_v15, %v1748_v15  ;;  %v1623_v61 = vmul.f32 0.2, %v1269_v12  ;;  %vm1429_vm4 = vcmp.gt.f32.partialorder %v1005_v16, 0.0  ;;  %vm1493_vm5 = vcmp.gt.f32.partialorder %v1261_v14, 0.0 }
 0x139   : > { %2325 = vst.msk [vmem:[%s3370_s4 + $0x70] sm:$0xf] %vm2296_vm1, %v2781_v13  ;;  %v1557_v2 = vmul.f32 0.2, %v1005_v16  ;;  %v1687_v21 = vsel %vm1431_vm2, %v1013_v11, %v1559_v20  ;;  %v1621_v24 = vmul.f32 0.2, %v1261_v14  ;;  %v1026_v3 = vadd.f32 %v3585_v18, %v3359_v4 }
 0x13a   : > { %2389 = vst.msk [vmem:[%s3370_s4 + $0x170] sm:$0xf] %vm2296_vm1, %v2845_v17  ;;  %v1282_v7 = vadd.f32 %v3587_v19, %v3359_v4  ;;  %v3668_v25 = vpop.f32.mrb[40].mxu0  ;;  %v3670_v26 = vpop.f32.mrb[40].mxu1  ;;  %v2784_v28 = vpack.c.bf16 %v1687_v21, %v1687_v21  ;;  %v1751_v29 = vsel %vm1495_vm3, %v1269_v12, %v1623_v61  ;;  %v1018_v35 = vadd.f32 %v3359_v4, %v3589_v22  ;;  %v3733_v61 = vld [vmem:[%s4037_s2] ss:$0 sm:$0xff] }
 0x13b   : > { %v1685_v30 = vsel %vm1429_vm4, %v1005_v16, %v1557_v2  ;;  %v3674_v36 = vpop.f32.mrb[41].mxu0  ;;  %v3676_v37 = vpop.f32.mrb[41].mxu1  ;;  %v2848_v18 = vpack.c.bf16 %v1751_v29, %v1751_v29  ;;  %v1749_v19 = vsel %vm1493_vm5, %v1261_v14, %v1621_v24  ;;  %vm1434_vm6 = vcmp.gt.f32.partialorder %v1026_v3, 0.0 }
 0x13c   : > { %v2782_v38 = vpack.c.bf16 %v1685_v30, %v1685_v30  ;;  %v3679_v40 = vpop.f32.mrb[42].mxu0  ;;  %v3681_v41 = vpop.f32.mrb[42].mxu1  ;;  %2328 = vst.msk [vmem:[%s3370_s4 + $0x7c] sm:$0xf] %vm2296_vm1, %v2784_v28  ;;  %v2846_v42 = vpack.c.bf16 %v1749_v19, %v1749_v19  ;;  %v1562_v43 = vmul.f32 0.2, %v1026_v3  ;;  %v1274_v46 = vadd.f32 %v3359_v4, %v3591_v23 }
 0x13d   : > { %vm1498_vm7 = vcmp.gt.f32.partialorder %v1282_v7, 0.0  ;;  %v1626_v22 = vmul.f32 0.2, %v1282_v7  ;;  %v3685_v44 = vpop.f32.mrb[43].mxu0  ;;  %2392 = vst.msk [vmem:[%s3370_s4 + $0x17c] sm:$0xf] %vm2296_vm1, %v2848_v18  ;;  %v1029_v32 = vadd.f32 %v3595_v27, %v3359_v4  ;;  %v1285_v51 = vadd.f32 %v3599_v31, %v3359_v4 }
 0x13e   : > { %2326 = vst.msk [vmem:[%s3370_s4 + $0x74] sm:$0xf] %vm2296_vm1, %v2782_v38  ;;  %vm1432_vm8 = vcmp.gt.f32.partialorder %v1018_v35, 0.0  ;;  %v1560_v45 = vmul.f32 0.2, %v1018_v35  ;;  %v3695_v49 = vpop.f32.mrb[43].mxu1  ;;  %v1690_v33 = vsel %vm1434_vm6, %v1026_v3, %v1562_v43  ;;  %v1021_v47 = vadd.f32 %v3359_v4, %v3601_v34 }
 0x13f   : > { %2390 = vst.msk [vmem:[%s3370_s4 + $0x174] sm:$0xf] %vm2296_vm1, %v2846_v42  ;;  %v1754_v50 = vsel %vm1498_vm7, %v1282_v7, %v1626_v22  ;;  %v2787_v23 = vpack.c.bf16 %v1690_v33, %v1690_v33  ;;  %vm1496_vm9 = vcmp.gt.f32.partialorder %v1274_v46, 0.0  ;;  %v1624_v48 = vmul.f32 0.2, %v1274_v46 }
 0x140   : > { %v2851_v55 = vpack.c.bf16 %v1754_v50, %v1754_v50  ;;  %v1688_v56 = vsel %vm1432_vm8, %v1018_v35, %v1560_v45  ;;  %vm1435_vm10 = vcmp.gt.f32.partialorder %v1029_v32, 0.0  ;;  %v1563_v58 = vmul.f32 0.2, %v1029_v32 }
 0x141   : > { %v2785_v27 = vpack.c.bf16 %v1688_v56, %v1688_v56  ;;  %2331 = vst.msk [vmem:[%s3370_s4 + $0x88] sm:$0xf] %vm2296_vm1, %v2787_v23  ;;  %vm1499_vm11 = vcmp.gt.f32.partialorder %v1285_v51, 0.0  ;;  %v1627_v62 = vmul.f32 0.2, %v1285_v51  ;;  %vm1433_vm12 = vcmp.gt.f32.partialorder %v1021_v47, 0.0 }
 0x142   : > { %2395 = vst.msk [vmem:[%s3370_s4 + $0x188] sm:$0xf] %vm2296_vm1, %v2851_v55  ;;  %v1561_v31 = vmul.f32 0.2, %v1021_v47  ;;  %v1752_v63 = vsel %vm1496_vm9, %v1274_v46, %v1624_v48  ;;  %v1691_v34 = vsel %vm1435_vm10, %v1029_v32, %v1563_v58  ;;  %v1277_v1 = vadd.f32 %v3359_v4, %v3606_v39  ;;  %v3714_v59 = vpop.f32.mrb[44].mxu0  ;;  %v3716_v9 = vpop.f32.mrb[44].mxu1 }
 0x143   : > { %2329 = vst.msk [vmem:[%s3370_s4 + $0x80] sm:$0xf] %vm2296_vm1, %v2785_v27  ;;  %v1042_v5 = vadd.f32 %v3628_v53, %v3359_v4  ;;  %v2849_v10 = vpack.c.bf16 %v1752_v63, %v1752_v63  ;;  %v2788_v11 = vpack.c.bf16 %v1691_v34, %v1691_v34  ;;  %v1755_v12 = vsel %vm1499_vm11, %v1285_v51, %v1627_v62  ;;  %v3718_v15 = vpop.f32.mrb[45].mxu0  ;;  %v3720_v16 = vpop.f32.mrb[45].mxu1 }
 0x144   : > { %v1689_v13 = vsel %vm1433_vm12, %v1021_v47, %v1561_v31  ;;  %v2852_v14 = vpack.c.bf16 %v1755_v12, %v1755_v12  ;;  %vm1497_vm13 = vcmp.gt.f32.partialorder %v1277_v1, 0.0  ;;  %v1625_v17 = vmul.f32 0.2, %v1277_v1  ;;  %v3722_v4 = vpop.f32.mrb[46].mxu0  ;;  %v3724_v53 = vpop.f32.mrb[46].mxu1 }
 0x145   : > { %v2786_v39 = vpack.c.bf16 %v1689_v13, %v1689_v13  ;;  %2393 = vst.msk [vmem:[%s3370_s4 + $0x180] sm:$0xf] %vm2296_vm1, %v2849_v10  ;;  %2332 = vst.msk [vmem:[%s3370_s4 + $0x8c] sm:$0xf] %vm2296_vm1, %v2788_v11  ;;  %vm1438_vm14 = vcmp.gt.f32.partialorder %v1042_v5, 0.0  ;;  %v1298_v2 = vadd.f32 %v3733_v61, %v3630_v54  ;;  %v1034_v21 = vadd.f32 %v3733_v61, %v3632_v57  ;;  %v3739_v24 = vpop.f32.mrb[47].mxu0 }
 0x146   : > { %v1566_v20 = vmul.f32 0.2, %v1042_v5  ;;  %v3741_v3 = vpop.f32.mrb[47].mxu1  ;;  %2396 = vst.msk [vmem:[%s3370_s4 + $0x18c] sm:$0xf] %vm2296_vm1, %v2852_v14  ;;  %v1753_v7 = vsel %vm1497_vm13, %v1277_v1, %v1625_v17  ;;  %v1290_v28 = vadd.f32 %v3733_v61, %v3634_v52  ;;  %v1045_v29 = vadd.f32 %v3733_v61, %v3636_v0 }
 0x147   : > { %2330 = vst.msk [vmem:[%s3370_s4 + $0x84] sm:$0xf] %vm2296_vm1, %v2786_v39  ;;  %v1301_v54 = vadd.f32 %v3733_v61, %v3638_v60  ;;  %v2850_v57 = vpack.c.bf16 %v1753_v7, %v1753_v7  ;;  %vm1502_vm15 = vcmp.gt.f32.partialorder %v1298_v2, 0.0  ;;  %v1630_v35 = vmul.f32 0.2, %v1298_v2 }
 0x148   : > { %v1694_v30 = vsel %vm1438_vm14, %v1042_v5, %v1566_v20  ;;  %vm1436_vm0 = vcmp.gt.f32.partialorder %v1034_v21, 0.0  ;;  %v1564_v38 = vmul.f32 0.2, %v1034_v21  ;;  %vm1500_vm2 = vcmp.gt.f32.partialorder %v1290_v28, 0.0 }
 0x149   : > { %v2791_v18 = vpack.c.bf16 %v1694_v30, %v1694_v30  ;;  %2394 = vst.msk [vmem:[%s3370_s4 + $0x184] sm:$0xf] %vm2296_vm1, %v2850_v57  ;;  %v1758_v19 = vsel %vm1502_vm15, %v1298_v2, %v1630_v35  ;;  %v1628_v42 = vmul.f32 0.2, %v1290_v28  ;;  %vm1439_vm3 = vcmp.gt.f32.partialorder %v1045_v29, 0.0  ;;  %v3755_v0 = vpop.f32.mrb[48].mxu0 }
 0x14a   : > { %v1567_v52 = vmul.f32 0.2, %v1045_v29  ;;  %v2855_v60 = vpack.c.bf16 %v1758_v19, %v1758_v19  ;;  %v1692_v43 = vsel %vm1436_vm0, %v1034_v21, %v1564_v38  ;;  %vm1503_vm4 = vcmp.gt.f32.partialorder %v1301_v54, 0.0  ;;  %v3759_v45 = vpop.f32.mrb[48].mxu1  ;;  %v3761_v46 = vpop.f32.mrb[49].mxu0 }
 0x14b   : > { %2335 = vst.msk [vmem:[%s3370_s4 + $0x98] sm:$0xf] %vm2296_vm1, %v2791_v18  ;;  %v1631_v22 = vmul.f32 0.2, %v1301_v54  ;;  %v2789_v32 = vpack.c.bf16 %v1692_v43, %v1692_v43  ;;  %v1756_v33 = vsel %vm1500_vm2, %v1290_v28, %v1628_v42  ;;  %v1037_v51 = vadd.f32 %v3733_v61, %v3642_v6  ;;  %v3765_v47 = vpop.f32.mrb[49].mxu1  ;;  %v3767_v23 = vpop.f32.mrb[50].mxu0 }
 0x14c   : > { %v1695_v50 = vsel %vm1439_vm3, %v1045_v29, %v1567_v52  ;;  %2399 = vst.msk [vmem:[%s3370_s4 + $0x198] sm:$0xf] %vm2296_vm1, %v2855_v60  ;;  %v2853_v55 = vpack.c.bf16 %v1756_v33, %v1756_v33  ;;  %v1293_v48 = vadd.f32 %v3733_v61, %v3644_v8  ;;  %v3773_v58 = vpop.f32.mrb[50].mxu1  ;;  %v3775_v62 = vpop.f32.mrb[51].mxu0  ;;  %v1058_v63 = vadd.f32 %v3733_v61, %v3668_v25 }
 0x14d   : > { %v2792_v56 = vpack.c.bf16 %v1695_v50, %v1695_v50  ;;  %v1759_v27 = vsel %vm1503_vm4, %v1301_v54, %v1631_v22  ;;  %2333 = vst.msk [vmem:[%s3370_s4 + $0x90] sm:$0xf] %vm2296_vm1, %v2789_v32  ;;  %vm1437_vm5 = vcmp.gt.f32.partialorder %v1037_v51, 0.0  ;;  %v1565_v31 = vmul.f32 0.2, %v1037_v51  ;;  %v3781_v34 = vpop.f32.mrb[51].mxu1 }
 0x14e   : > { %v2856_v6 = vpack.c.bf16 %v1759_v27, %v1759_v27  ;;  %2397 = vst.msk [vmem:[%s3370_s4 + $0x190] sm:$0xf] %vm2296_vm1, %v2853_v55  ;;  %vm1501_vm6 = vcmp.gt.f32.partialorder %v1293_v48, 0.0  ;;  %v1629_v8 = vmul.f32 0.2, %v1293_v48  ;;  %v1314_v1 = vadd.f32 %v3733_v61, %v3670_v26 }
 0x14f   : > { %2336 = vst.msk [vmem:[%s3370_s4 + $0x9c] sm:$0xf] %vm2296_vm1, %v2792_v56  ;;  %v1050_v5 = vadd.f32 %v3733_v61, %v3674_v36  ;;  %v1693_v10 = vsel %vm1437_vm5, %v1037_v51, %v1565_v31  ;;  %vm1442_vm7 = vcmp.gt.f32.partialorder %v1058_v63, 0.0  ;;  %v1570_v25 = vmul.f32 0.2, %v1058_v63 }
 0x150   : > { %2400 = vst.msk [vmem:[%s3370_s4 + $0x19c] sm:$0xf] %vm2296_vm1, %v2856_v6  ;;  %v1306_v11 = vadd.f32 %v3733_v61, %v3676_v37  ;;  %v2790_v12 = vpack.c.bf16 %v1693_v10, %v1693_v10  ;;  %v1757_v13 = vsel %vm1501_vm6, %v1293_v48, %v1629_v8  ;;  %vm1506_vm8 = vcmp.gt.f32.partialorder %v1314_v1, 0.0 }
 0x151   : > { %v1634_v14 = vmul.f32 0.2, %v1314_v1  ;;  %v2854_v39 = vpack.c.bf16 %v1757_v13, %v1757_v13  ;;  %v1698_v17 = vsel %vm1442_vm7, %v1058_v63, %v1570_v25  ;;  %vm1440_vm9 = vcmp.gt.f32.partialorder %v1050_v5, 0.0  ;;  %v3795_v20 = vpop.f32.mrb[52].mxu0  ;;  %v3797_v36 = vpop.f32.mrb[52].mxu1 }
 0x152   : > { %v1568_v26 = vmul.f32 0.2, %v1050_v5  ;;  %2334 = vst.msk [vmem:[%s3370_s4 + $0x94] sm:$0xf] %vm2296_vm1, %v2790_v12  ;;  %v2795_v2 = vpack.c.bf16 %v1698_v17, %v1698_v17  ;;  %vm1504_vm10 = vcmp.gt.f32.partialorder %v1306_v11, 0.0  ;;  %v3801_v7 = vpop.f32.mrb[53].mxu0  ;;  %v1061_v57 = vadd.f32 %v3733_v61, %v3679_v40 }
 0x153   : > { %v1762_v21 = vsel %vm1506_vm8, %v1314_v1, %v1634_v14  ;;  %v1632_v37 = vmul.f32 0.2, %v1306_v11  ;;  %v3803_v28 = vpop.f32.mrb[53].mxu1  ;;  %2398 = vst.msk [vmem:[%s3370_s4 + $0x194] sm:$0xf] %vm2296_vm1, %v2854_v39  ;;  %v1317_v30 = vadd.f32 %v3733_v61, %v3681_v41  ;;  %v3811_v35 = vpop.f32.mrb[54].mxu0  ;;  %v1053_v42 = vadd.f32 %v3733_v61, %v3685_v44 }
 0x154   : > { %v2859_v29 = vpack.c.bf16 %v1762_v21, %v1762_v21  ;;  %v1696_v54 = vsel %vm1440_vm9, %v1050_v5, %v1568_v26  ;;  %v3813_v18 = vpop.f32.mrb[54].mxu1  ;;  %2339 = vst.msk [vmem:[%s3370_s4 + $0xa8] sm:$0xf] %vm2296_vm1, %v2795_v2  ;;  %v1309_v52 = vadd.f32 %v3733_v61, %v3695_v49  ;;  %v3821_v40 = vpop.f32.mrb[55].mxu0  ;;  %vm1443_vm11 = vcmp.gt.f32.partialorder %v1061_v57, 0.0 }
 0x155   : > { %v2793_v38 = vpack.c.bf16 %v1696_v54, %v1696_v54  ;;  %v1760_v19 = vsel %vm1504_vm10, %v1306_v11, %v1632_v37  ;;  %v3823_v60 = vpop.f32.mrb[55].mxu1  ;;  %v1571_v43 = vmul.f32 0.2, %v1061_v57  ;;  %vm1507_vm12 = vcmp.gt.f32.partialorder %v1317_v30, 0.0 }
 0x156   : > { %2403 = vst.msk [vmem:[%s3370_s4 + $0x1a8] sm:$0xf] %vm2296_vm1, %v2859_v29  ;;  %v2857_v41 = vpack.c.bf16 %v1760_v19, %v1760_v19  ;;  %v1635_v22 = vmul.f32 0.2, %v1317_v30  ;;  %vm1441_vm13 = vcmp.gt.f32.partialorder %v1053_v42, 0.0  ;;  %vm1505_vm14 = vcmp.gt.f32.partialorder %v1309_v52, 0.0 }
 0x157   : > { %2337 = vst.msk [vmem:[%s3370_s4 + $0xa0] sm:$0xf] %vm2296_vm1, %v2793_v38  ;;  %v1569_v32 = vmul.f32 0.2, %v1053_v42  ;;  %v1699_v44 = vsel %vm1443_vm11, %v1061_v57, %v1571_v43  ;;  %v1633_v49 = vmul.f32 0.2, %v1309_v52  ;;  %v1074_v33 = vadd.f32 %v3733_v61, %v3714_v59 }
 0x158   : > { %2401 = vst.msk [vmem:[%s3370_s4 + $0x1a0] sm:$0xf] %vm2296_vm1, %v2857_v41  ;;  %v1330_v50 = vadd.f32 %v3733_v61, %v3716_v9  ;;  %v2796_v51 = vpack.c.bf16 %v1699_v44, %v1699_v44  ;;  %v1763_v55 = vsel %vm1507_vm12, %v1317_v30, %v1635_v22  ;;  %v1066_v27 = vadd.f32 %v3733_v61, %v3718_v15 }
 0x159   : > { %v1697_v56 = vsel %vm1441_vm13, %v1053_v42, %v1569_v32  ;;  %v2860_v48 = vpack.c.bf16 %v1763_v55, %v1763_v55  ;;  %v1761_v31 = vsel %vm1505_vm14, %v1309_v52, %v1633_v49  ;;  %vm1446_vm15 = vcmp.gt.f32.partialorder %v1074_v33, 0.0  ;;  %v3837_v63 = vpop.f32.mrb[56].mxu0  ;;  %v3839_v8 = vpop.f32.mrb[56].mxu1 }
 0x15a   : > { %v2794_v6 = vpack.c.bf16 %v1697_v56, %v1697_v56  ;;  %2340 = vst.msk [vmem:[%s3370_s4 + $0xac] sm:$0xf] %vm2296_vm1, %v2796_v51  ;;  %v2858_v59 = vpack.c.bf16 %v1761_v31, %v1761_v31  ;;  %v1574_v9 = vmul.f32 0.2, %v1074_v33  ;;  %vm1510_vm0 = vcmp.gt.f32.partialorder %v1330_v50, 0.0  ;;  %v3843_v5 = vpop.f32.mrb[57].mxu0 }
 0x15b   : > { %v1638_v1 = vmul.f32 0.2, %v1330_v50  ;;  %2404 = vst.msk [vmem:[%s3370_s4 + $0x1ac] sm:$0xf] %vm2296_vm1, %v2860_v48  ;;  %vm1444_vm2 = vcmp.gt.f32.partialorder %v1066_v27, 0.0  ;;  %v1322_v10 = vadd.f32 %v3733_v61, %v3720_v16  ;;  %v1077_v25 = vadd.f32 %v3733_v61, %v3722_v4  ;;  %v3853_v11 = vpop.f32.mrb[57].mxu1 }
 0x15c   : > { %2338 = vst.msk [vmem:[%s3370_s4 + $0xa4] sm:$0xf] %vm2296_vm1, %v2794_v6  ;;  %v1572_v15 = vmul.f32 0.2, %v1066_v27  ;;  %v3855_v12 = vpop.f32.mrb[58].mxu0  ;;  %v1702_v13 = vsel %vm1446_vm15, %v1074_v33, %v1574_v9  ;;  %v1333_v39 = vadd.f32 %v3733_v61, %v3724_v53  ;;  %v1069_v16 = vadd.f32 %v3733_v61, %v3739_v24  ;;  %v3864_v17 = vpop.f32.mrb[58].mxu1 }
 0x15d   : > { %2402 = vst.msk [vmem:[%s3370_s4 + $0x1a4] sm:$0xf] %vm2296_vm1, %v2858_v59  ;;  %v1766_v14 = vsel %vm1510_vm0, %v1330_v50, %v1638_v1  ;;  %v3866_v4 = vpop.f32.mrb[59].mxu0  ;;  %v2799_v26 = vpack.c.bf16 %v1702_v13, %v1702_v13  ;;  %vm1508_vm3 = vcmp.gt.f32.partialorder %v1322_v10, 0.0  ;;  %v3868_v37 = vpop.f32.mrb[59].mxu1  ;;  %vm1447_vm4 = vcmp.gt.f32.partialorder %v1077_v25, 0.0 }
 0x15e   : > { %v2863_v2 = vpack.c.bf16 %v1766_v14, %v1766_v14  ;;  %v1700_v21 = vsel %vm1444_vm2, %v1066_v27, %v1572_v15  ;;  %v1636_v54 = vmul.f32 0.2, %v1322_v10  ;;  %v1575_v57 = vmul.f32 0.2, %v1077_v25 }
 0x15f   : > { %v2797_v29 = vpack.c.bf16 %v1700_v21, %v1700_v21  ;;  %2343 = vst.msk [vmem:[%s3370_s4 + $0xb8] sm:$0xf] %vm2296_vm1, %v2799_v26  ;;  %vm1511_vm5 = vcmp.gt.f32.partialorder %v1333_v39, 0.0  ;;  %v1639_v53 = vmul.f32 0.2, %v1333_v39  ;;  %vm1445_vm6 = vcmp.gt.f32.partialorder %v1069_v16, 0.0 }
 0x160   : > { %2407 = vst.msk [vmem:[%s3370_s4 + $0x1b8] sm:$0xf] %vm2296_vm1, %v2863_v2  ;;  %v1573_v24 = vmul.f32 0.2, %v1069_v16  ;;  %v1764_v30 = vsel %vm1508_vm3, %v1322_v10, %v1636_v54  ;;  %v1703_v38 = vsel %vm1447_vm4, %v1077_v25, %v1575_v57  ;;  %v1325_v19 = vadd.f32 %v3733_v61, %v3741_v3 }
 0x161   : > { %2341 = vst.msk [vmem:[%s3370_s4 + $0xb0] sm:$0xf] %vm2296_vm1, %v2797_v29  ;;  %v1090_v42 = vadd.f32 %v3733_v61, %v3755_v0  ;;  %v2861_v52 = vpack.c.bf16 %v1764_v30, %v1764_v30  ;;  %v2800_v41 = vpack.c.bf16 %v1703_v38, %v1703_v38  ;;  %v1767_v43 = vsel %vm1511_vm5, %v1333_v39, %v1639_v53  ;;  %v3880_v32 = vpop.f32.mrb[60].mxu0  ;;  %v3882_v44 = vpop.f32.mrb[60].mxu1 }
 0x162   : > { %v1701_v22 = vsel %vm1445_vm6, %v1069_v16, %v1573_v24  ;;  %v2864_v49 = vpack.c.bf16 %v1767_v43, %v1767_v43  ;;  %vm1509_vm7 = vcmp.gt.f32.partialorder %v1325_v19, 0.0  ;;  %v1637_v50 = vmul.f32 0.2, %v1325_v19  ;;  %v3884_v51 = vpop.f32.mrb[61].mxu0  ;;  %v3886_v3 = vpop.f32.mrb[61].mxu1 }
 0x163   : > { %v2798_v33 = vpack.c.bf16 %v1701_v22, %v1701_v22  ;;  %2405 = vst.msk [vmem:[%s3370_s4 + $0x1b0] sm:$0xf] %vm2296_vm1, %v2861_v52  ;;  %2344 = vst.msk [vmem:[%s3370_s4 + $0xbc] sm:$0xf] %vm2296_vm1, %v2800_v41  ;;  %vm1450_vm8 = vcmp.gt.f32.partialorder %v1090_v42, 0.0  ;;  %v1346_v55 = vadd.f32 %v3733_v61, %v3759_v45  ;;  %v1082_v56 = vadd.f32 %v3733_v61, %v3761_v46  ;;  %v3896_v27 = vpop.f32.mrb[62].mxu0 }
 0x164   : > { %v1578_v0 = vmul.f32 0.2, %v1090_v42  ;;  %v3898_v48 = vpop.f32.mrb[62].mxu1  ;;  %2408 = vst.msk [vmem:[%s3370_s4 + $0x1bc] sm:$0xf] %vm2296_vm1, %v2864_v49  ;;  %v1765_v6 = vsel %vm1509_vm7, %v1325_v19, %v1637_v50  ;;  %v1338_v31 = vadd.f32 %v3733_v61, %v3765_v47  ;;  %v1093_v59 = vadd.f32 %v3733_v61, %v3767_v23  ;;  %v3910_v46 = vpop.f32.mrb[63].mxu0 }
 0x165   : > { %2342 = vst.msk [vmem:[%s3370_s4 + $0xb4] sm:$0xf] %vm2296_vm1, %v2798_v33  ;;  %v1349_v45 = vadd.f32 %v3733_v61, %v3773_v58  ;;  %v3912_v9 = vpop.f32.mrb[63].mxu1  ;;  %v2862_v1 = vpack.c.bf16 %v1765_v6, %v1765_v6  ;;  %vm1514_vm9 = vcmp.gt.f32.partialorder %v1346_v55, 0.0  ;;  %v1642_v10 = vmul.f32 0.2, %v1346_v55 }
 0x166   : > { %v1706_v15 = vsel %vm1450_vm8, %v1090_v42, %v1578_v0  ;;  %vm1448_vm10 = vcmp.gt.f32.partialorder %v1082_v56, 0.0  ;;  %v1576_v13 = vmul.f32 0.2, %v1082_v56  ;;  %vm1512_vm11 = vcmp.gt.f32.partialorder %v1338_v31, 0.0 }
 0x167   : > { %v2803_v25 = vpack.c.bf16 %v1706_v15, %v1706_v15  ;;  %2406 = vst.msk [vmem:[%s3370_s4 + $0x1b4] sm:$0xf] %vm2296_vm1, %v2862_v1  ;;  %v1770_v47 = vsel %vm1514_vm9, %v1346_v55, %v1642_v10  ;;  %v1640_v23 = vmul.f32 0.2, %v1338_v31  ;;  %vm1451_vm12 = vcmp.gt.f32.partialorder %v1093_v59, 0.0 }
 0x168   : > { %v1579_v58 = vmul.f32 0.2, %v1093_v59  ;;  %v2867_v14 = vpack.c.bf16 %v1770_v47, %v1770_v47  ;;  %v1704_v39 = vsel %vm1448_vm10, %v1082_v56, %v1576_v13  ;;  %vm1515_vm13 = vcmp.gt.f32.partialorder %v1349_v45, 0.0 }
 0x169   : > { %2347 = vst.msk [vmem:[%s3370_s4 + $0xc8] sm:$0xf] %vm2296_vm1, %v2803_v25  ;;  %v1643_v16 = vmul.f32 0.2, %v1349_v45  ;;  %v2801_v26 = vpack.c.bf16 %v1704_v39, %v1704_v39  ;;  %v1768_v2 = vsel %vm1512_vm11, %v1338_v31, %v1640_v23  ;;  %v1085_v29 = vadd.f32 %v3733_v61, %v3775_v62 }
 0x16a   : > { %v1707_v21 = vsel %vm1451_vm12, %v1093_v59, %v1579_v58  ;;  %2411 = vst.msk [vmem:[%s3370_s4 + $0x1c8] sm:$0xf] %vm2296_vm1, %v2867_v14  ;;  %v2865_v54 = vpack.c.bf16 %v1768_v2, %v1768_v2  ;;  %v1341_v24 = vadd.f32 %v3733_v61, %v3781_v34  ;;  %v1106_v19 = vadd.f32 %v3733_v61, %v3795_v20 }
 0x16b   : > { %v2804_v57 = vpack.c.bf16 %v1707_v21, %v1707_v21  ;;  %v1771_v53 = vsel %vm1515_vm13, %v1349_v45, %v1643_v16  ;;  %2345 = vst.msk [vmem:[%s3370_s4 + $0xc0] sm:$0xf] %vm2296_vm1, %v2801_v26  ;;  %vm1449_vm14 = vcmp.gt.f32.partialorder %v1085_v29, 0.0  ;;  %v1577_v38 = vmul.f32 0.2, %v1085_v29 }
 0x16c   : > { %v2868_v30 = vpack.c.bf16 %v1771_v53, %v1771_v53  ;;  %2409 = vst.msk [vmem:[%s3370_s4 + $0x1c0] sm:$0xf] %vm2296_vm1, %v2865_v54  ;;  %vm1513_vm15 = vcmp.gt.f32.partialorder %v1341_v24, 0.0  ;;  %v1641_v62 = vmul.f32 0.2, %v1341_v24  ;;  %v1362_v42 = vadd.f32 %v3733_v61, %v3797_v36 }
 0x16d   : > { %2348 = vst.msk [vmem:[%s3370_s4 + $0xcc] sm:$0xf] %vm2296_vm1, %v2804_v57  ;;  %v1098_v34 = vadd.f32 %v3733_v61, %v3801_v7  ;;  %v1705_v52 = vsel %vm1449_vm14, %v1085_v29, %v1577_v38  ;;  %vm1454_vm0 = vcmp.gt.f32.partialorder %v1106_v19, 0.0  ;;  %v1582_v41 = vmul.f32 0.2, %v1106_v19 }
 0x16e   : > { %2412 = vst.msk [vmem:[%s3370_s4 + $0x1cc] sm:$0xf] %vm2296_vm1, %v2868_v30  ;;  %v1354_v20 = vadd.f32 %v3733_v61, %v3803_v28  ;;  %v2802_v43 = vpack.c.bf16 %v1705_v52, %v1705_v52  ;;  %v1769_v22 = vsel %vm1513_vm15, %v1341_v24, %v1641_v62  ;;  %vm1518_vm2 = vcmp.gt.f32.partialorder %v1362_v42, 0.0 }
 0x16f   : > { %v1646_v49 = vmul.f32 0.2, %v1362_v42  ;;  %v2866_v33 = vpack.c.bf16 %v1769_v22, %v1769_v22  ;;  %v1710_v50 = vsel %vm1454_vm0, %v1106_v19, %v1582_v41  ;;  %vm1452_vm3 = vcmp.gt.f32.partialorder %v1098_v34, 0.0 }
 0x170   : > { %v1580_v36 = vmul.f32 0.2, %v1098_v34  ;;  %2346 = vst.msk [vmem:[%s3370_s4 + $0xc4] sm:$0xf] %vm2296_vm1, %v2802_v43  ;;  %v2807_v7 = vpack.c.bf16 %v1710_v50, %v1710_v50  ;;  %vm1516_vm4 = vcmp.gt.f32.partialorder %v1354_v20, 0.0  ;;  %v1109_v6 = vadd.f32 %v3733_v61, %v3811_v35 }
 0x171   : > { %v1774_v0 = vsel %vm1518_vm2, %v1362_v42, %v1646_v49  ;;  %v1644_v55 = vmul.f32 0.2, %v1354_v20  ;;  %2410 = vst.msk [vmem:[%s3370_s4 + $0x1c4] sm:$0xf] %vm2296_vm1, %v2866_v33  ;;  %v1365_v31 = vadd.f32 %v3733_v61, %v3813_v18  ;;  %v1101_v1 = vadd.f32 %v3733_v61, %v3821_v40 }
 0x172   : > { %v2871_v28 = vpack.c.bf16 %v1774_v0, %v1774_v0  ;;  %v1708_v56 = vsel %vm1452_vm3, %v1098_v34, %v1580_v36  ;;  %2351 = vst.msk [vmem:[%s3370_s4 + $0xd8] sm:$0xf] %vm2296_vm1, %v2807_v7  ;;  %v1357_v15 = vadd.f32 %v3733_v61, %v3823_v60  ;;  %vm1455_vm5 = vcmp.gt.f32.partialorder %v1109_v6, 0.0 }
 0x173   : > { %v2805_v59 = vpack.c.bf16 %v1708_v56, %v1708_v56  ;;  %v1772_v45 = vsel %vm1516_vm4, %v1354_v20, %v1644_v55  ;;  %v1583_v25 = vmul.f32 0.2, %v1109_v6  ;;  %vm1519_vm6 = vcmp.gt.f32.partialorder %v1365_v31, 0.0 }
 0x174   : > { %2415 = vst.msk [vmem:[%s3370_s4 + $0x1d8] sm:$0xf] %vm2296_vm1, %v2871_v28  ;;  %v2869_v10 = vpack.c.bf16 %v1772_v45, %v1772_v45  ;;  %v1647_v35 = vmul.f32 0.2, %v1365_v31  ;;  %vm1453_vm7 = vcmp.gt.f32.partialorder %v1101_v1, 0.0  ;;  %vm1517_vm8 = vcmp.gt.f32.partialorder %v1357_v15, 0.0 }
 0x175   : > { %2349 = vst.msk [vmem:[%s3370_s4 + $0xd0] sm:$0xf] %vm2296_vm1, %v2805_v59  ;;  %v1581_v18 = vmul.f32 0.2, %v1101_v1  ;;  %v1711_v13 = vsel %vm1455_vm5, %v1109_v6, %v1583_v25  ;;  %v1645_v40 = vmul.f32 0.2, %v1357_v15  ;;  %v1122_v60 = vadd.f32 %v3733_v61, %v3837_v63 }
 0x176   : > { %2413 = vst.msk [vmem:[%s3370_s4 + $0x1d0] sm:$0xf] %vm2296_vm1, %v2869_v10  ;;  %v1378_v47 = vadd.f32 %v3733_v61, %v3839_v8  ;;  %v2808_v23 = vpack.c.bf16 %v1711_v13, %v1711_v13  ;;  %v1775_v58 = vsel %vm1519_vm6, %v1365_v31, %v1647_v35  ;;  %v1114_v39 = vadd.f32 %v3733_v61, %v3843_v5 }
 0x177   : > { %v1709_v14 = vsel %vm1453_vm7, %v1101_v1, %v1581_v18  ;;  %v2872_v16 = vpack.c.bf16 %v1775_v58, %v1775_v58  ;;  %v1773_v2 = vsel %vm1517_vm8, %v1357_v15, %v1645_v40  ;;  %vm1458_vm9 = vcmp.gt.f32.partialorder %v1122_v60, 0.0 }
 0x178   : > { %v2806_v26 = vpack.c.bf16 %v1709_v14, %v1709_v14  ;;  %2352 = vst.msk [vmem:[%s3370_s4 + $0xdc] sm:$0xf] %vm2296_vm1, %v2808_v23  ;;  %v2870_v21 = vpack.c.bf16 %v1773_v2, %v1773_v2  ;;  %v1586_v29 = vmul.f32 0.2, %v1122_v60  ;;  %vm1522_vm10 = vcmp.gt.f32.partialorder %v1378_v47, 0.0 }
 0x179   : > { %v1650_v63 = vmul.f32 0.2, %v1378_v47  ;;  %2416 = vst.msk [vmem:[%s3370_s4 + $0x1dc] sm:$0xf] %vm2296_vm1, %v2872_v16  ;;  %vm1456_vm11 = vcmp.gt.f32.partialorder %v1114_v39, 0.0  ;;  %v1370_v5 = vadd.f32 %v3733_v61, %v3853_v11  ;;  %v1125_v54 = vadd.f32 %v3733_v61, %v3855_v12 }
 0x17a   : > { %2350 = vst.msk [vmem:[%s3370_s4 + $0xd4] sm:$0xf] %vm2296_vm1, %v2806_v26  ;;  %v1584_v8 = vmul.f32 0.2, %v1114_v39  ;;  %2414 = vst.msk [vmem:[%s3370_s4 + $0x1d4] sm:$0xf] %vm2296_vm1, %v2870_v21  ;;  %v1714_v57 = vsel %vm1458_vm9, %v1122_v60, %v1586_v29  ;;  %v1381_v24 = vadd.f32 %v3733_v61, %v3864_v17  ;;  %v1117_v30 = vadd.f32 %v3733_v61, %v3866_v4 }
 0x17b   : > { %v1778_v53 = vsel %vm1522_vm10, %v1378_v47, %v1650_v63  ;;  %v2811_v38 = vpack.c.bf16 %v1714_v57, %v1714_v57  ;;  %vm1520_vm12 = vcmp.gt.f32.partialorder %v1370_v5, 0.0  ;;  %v1648_v42 = vmul.f32 0.2, %v1370_v5 }
 0x17c   : > { %v2875_v19 = vpack.c.bf16 %v1778_v53, %v1778_v53  ;;  %v1712_v62 = vsel %vm1456_vm11, %v1114_v39, %v1584_v8  ;;  %vm1459_vm13 = vcmp.gt.f32.partialorder %v1125_v54, 0.0  ;;  %v1587_v34 = vmul.f32 0.2, %v1125_v54 }
 0x17d   : > { %v2809_v11 = vpack.c.bf16 %v1712_v62, %v1712_v62  ;;  %2355 = vst.msk [vmem:[%s3370_s4 + $0xe8] sm:$0xf] %vm2296_vm1, %v2811_v38  ;;  %vm1523_vm14 = vcmp.gt.f32.partialorder %v1381_v24, 0.0  ;;  %v1651_v12 = vmul.f32 0.2, %v1381_v24  ;;  %vm1457_vm15 = vcmp.gt.f32.partialorder %v1117_v30, 0.0 }
 0x17e   : > { %2419 = vst.msk [vmem:[%s3370_s4 + $0x1e8] sm:$0xf] %vm2296_vm1, %v2875_v19  ;;  %v1585_v17 = vmul.f32 0.2, %v1117_v30  ;;  %v1776_v4 = vsel %vm1520_vm12, %v1370_v5, %v1648_v42  ;;  %v1715_v52 = vsel %vm1459_vm13, %v1125_v54, %v1587_v34  ;;  %v1373_v41 = vadd.f32 %v3733_v61, %v3868_v37 }
 0x17f   : > { %2353 = vst.msk [vmem:[%s3370_s4 + $0xe0] sm:$0xf] %vm2296_vm1, %v2809_v11  ;;  %v1138_v20 = vadd.f32 %v3733_v61, %v3880_v32  ;;  %v2873_v43 = vpack.c.bf16 %v1776_v4, %v1776_v4  ;;  %v2812_v22 = vpack.c.bf16 %v1715_v52, %v1715_v52  ;;  %v1779_v49 = vsel %vm1523_vm14, %v1381_v24, %v1651_v12 }
 0x180   : > { %v1713_v33 = vsel %vm1457_vm15, %v1117_v30, %v1585_v17  ;;  %v2876_v50 = vpack.c.bf16 %v1779_v49, %v1779_v49  ;;  %vm1521_vm0 = vcmp.gt.f32.partialorder %v1373_v41, 0.0  ;;  %v1649_v7 = vmul.f32 0.2, %v1373_v41 }
 0x181   : > { %v2810_v36 = vpack.c.bf16 %v1713_v33, %v1713_v33  ;;  %2417 = vst.msk [vmem:[%s3370_s4 + $0x1e0] sm:$0xf] %vm2296_vm1, %v2873_v43  ;;  %2356 = vst.msk [vmem:[%s3370_s4 + $0xec] sm:$0xf] %vm2296_vm1, %v2812_v22  ;;  %vm1462_vm2 = vcmp.gt.f32.partialorder %v1138_v20, 0.0  ;;  %v1394_v37 = vadd.f32 %v3733_v61, %v3882_v44  ;;  %v1130_v32 = vadd.f32 %v3733_v61, %v3884_v51 }
 0x182   : > { %v1590_v0 = vmul.f32 0.2, %v1138_v20  ;;  %2420 = vst.msk [vmem:[%s3370_s4 + $0x1ec] sm:$0xf] %vm2296_vm1, %v2876_v50  ;;  %v1777_v55 = vsel %vm1521_vm0, %v1373_v41, %v1649_v7  ;;  %v1386_v28 = vadd.f32 %v3733_v61, %v3886_v3  ;;  %v1141_v56 = vadd.f32 %v3733_v61, %v3896_v27 }
 0x183   : > { %2354 = vst.msk [vmem:[%s3370_s4 + $0xe4] sm:$0xf] %vm2296_vm1, %v2810_v36  ;;  %v1397_v6 = vadd.f32 %v3733_v61, %v3898_v48  ;;  %v2874_v44 = vpack.c.bf16 %v1777_v55, %v1777_v55  ;;  %vm1526_vm3 = vcmp.gt.f32.partialorder %v1394_v37, 0.0  ;;  %v1654_v59 = vmul.f32 0.2, %v1394_v37 }
 0x184   : > { %v1718_v31 = vsel %vm1462_vm2, %v1138_v20, %v1590_v0  ;;  %vm1460_vm4 = vcmp.gt.f32.partialorder %v1130_v32, 0.0  ;;  %v1588_v45 = vmul.f32 0.2, %v1130_v32  ;;  %vm1524_vm5 = vcmp.gt.f32.partialorder %v1386_v28, 0.0 }
 0x185   : > { %v2815_v51 = vpack.c.bf16 %v1718_v31, %v1718_v31  ;;  %2418 = vst.msk [vmem:[%s3370_s4 + $0x1e4] sm:$0xf] %vm2296_vm1, %v2874_v44  ;;  %v1782_v1 = vsel %vm1526_vm3, %v1394_v37, %v1654_v59  ;;  %v1652_v3 = vmul.f32 0.2, %v1386_v28  ;;  %vm1463_vm6 = vcmp.gt.f32.partialorder %v1141_v56, 0.0 }
 0x186   : > { %v1591_v15 = vmul.f32 0.2, %v1141_v56  ;;  %v2879_v27 = vpack.c.bf16 %v1782_v1, %v1782_v1  ;;  %v1716_v48 = vsel %vm1460_vm4, %v1130_v32, %v1588_v45  ;;  %vm1527_vm7 = vcmp.gt.f32.partialorder %v1397_v6, 0.0 }
 0x187   : > { %2359 = vst.msk [vmem:[%s3370_s4 + $0xf8] sm:$0xf] %vm2296_vm1, %v2815_v51  ;;  %v1655_v10 = vmul.f32 0.2, %v1397_v6  ;;  %v2813_v25 = vpack.c.bf16 %v1716_v48, %v1716_v48  ;;  %v1780_v35 = vsel %vm1524_vm5, %v1386_v28, %v1652_v3  ;;  %v1133_v13 = vadd.f32 %v3733_v61, %v3910_v46 }
 0x188   : > { %v1719_v18 = vsel %vm1463_vm6, %v1141_v56, %v1591_v15  ;;  %2423 = vst.msk [vmem:[%s3370_s4 + $0x1f8] sm:$0xf] %vm2296_vm1, %v2879_v27  ;;  %v2877_v40 = vpack.c.bf16 %v1780_v35, %v1780_v35  ;;  %v1389_v23 = vadd.f32 %v3733_v61, %v3912_v9 }
 0x189   : > { %v2816_v60 = vpack.c.bf16 %v1719_v18, %v1719_v18  ;;  %v1783_v47 = vsel %vm1527_vm7, %v1397_v6, %v1655_v10  ;;  %2357 = vst.msk [vmem:[%s3370_s4 + $0xf0] sm:$0xf] %vm2296_vm1, %v2813_v25  ;;  %vm1461_vm8 = vcmp.gt.f32.partialorder %v1133_v13, 0.0  ;;  %v1589_v14 = vmul.f32 0.2, %v1133_v13 }
 0x18a   : > { %v2880_v58 = vpack.c.bf16 %v1783_v47, %v1783_v47  ;;  %2421 = vst.msk [vmem:[%s3370_s4 + $0x1f0] sm:$0xf] %vm2296_vm1, %v2877_v40  ;;  %vm1525_vm9 = vcmp.gt.f32.partialorder %v1389_v23, 0.0  ;;  %v1653_v46 = vmul.f32 0.2, %v1389_v23 }
 0x18b   : > { %2360 = vst.msk [vmem:[%s3370_s4 + $0xfc] sm:$0xf] %vm2296_vm1, %v2816_v60  ;;  %v1717_v39 = vsel %vm1461_vm8, %v1133_v13, %v1589_v14 }
 0x18c   : > { %2424 = vst.msk [vmem:[%s3370_s4 + $0x1fc] sm:$0xf] %vm2296_vm1, %v2880_v58  ;;  %v2814_v16 = vpack.c.bf16 %v1717_v39, %v1717_v39  ;;  %v1781_v26 = vsel %vm1525_vm9, %v1389_v23, %v1653_v46 }
 0x18d   : > { %v2878_v2 = vpack.c.bf16 %v1781_v26, %v1781_v26 }
 0x18e   : > { %2358 = vst.msk [vmem:[%s3370_s4 + $0xf4] sm:$0xf] %vm2296_vm1, %v2814_v16 }
 0x18f   : > { %2422 = vst.msk [vmem:[%s3370_s4 + $0x1f4] sm:$0xf] %vm2296_vm1, %v2878_v2 }
 0x190 PF: > { %s13_s12 = sadd.s32 1, %s3176_s12  }
 0x191   : > { %p10_p4 = scmp.ge.s32.totalorder %s13_s12, 4  }
 0x193   :  { %12 = sbr.rel (!%p10_p4) target bundleno = 1 (0x1), region = 62 }

// kernel: discriminator_forward.7
= control target key start
LH: loop header
LB: loop body
LE: loop exit
PB: predicated region body
PF: predicated region fallthrough
CT: control target
= control target key end

     0   :  { %s3334_s12 = smov 0   ;;  %s3830_s0 = inlined_call_operand.vmem [shape: bf16[512,1024], index: 0, kind: input, shape index: {}]   ;;  %s3831_s1 = inlined_call_operand.vmem [shape: bf16[1024,128], index: 1, kind: input, shape index: {}]   ;;  %s3832_s2 = inlined_call_operand.vmem [shape: f32[1,128], index: 2, kind: input, shape index: {}]   ;;  %s3833_s3 = inlined_call_operand.vmem [shape: bf16[512,128], index: 3, kind: output, shape index: {}]  }
   0x1 LB: > { %s2421_s13 = sadd.s32 4294967295, %s3312_s12   ;;  %p2425_p0 = scmp.ge.s32.totalorder %s3312_s12, 1  ;;  %s3312_s12 = sphi %s3334_s12, %s13_s12  }
   0x2   : > { %p139_p1 = scmp.lt.s32.totalorder %s3312_s12, 3 }
   0x4   : > { %p140_p2 = pnand %p2425_p0, %p139_p1 }
   0x5   : > { %v3242_v0 = vld [vmem:[%s3831_s1 + $0x40] sm:$0xff] (!%p140_p2)   ;;  %v3246_v4 = vld [vmem:[%s3831_s1 + $0x48] sm:$0xff] (!%p140_p2)   ;;  %v3250_v8 = vld [vmem:[%s3831_s1 + $0x50] sm:$0xff] (!%p140_p2)   ;;  %s2426_s21 = sshll.u32 (!%p140_p2), %s2421_s13, 5 }
   0x6   : > { %143 = sbr.rel (%p140_p2) target bundleno = 514 (0x202), region = 32  ;;  %v3243_v1 = vld [vmem:[%s3831_s1 + $0xc0] sm:$0xff] (!%p140_p2)   ;;  %2786 = vmatprep.subr.bf16.mxu0 (!%p140_p2), %v3242_v0  ;;  %v3247_v5 = vld [vmem:[%s3831_s1 + $0xc8] sm:$0xff] (!%p140_p2)   ;;  %v3251_v9 = vld [vmem:[%s3831_s1 + $0xd0] sm:$0xff] (!%p140_p2)   ;;  %p165_p3 = scmp.lt.s32.totalorder (!%p140_p2), %s2426_s21, 63 }
   0x7   : > { %v3244_v2 = vld [vmem:[%s3831_s1] sm:$0xff] (!%p140_p2)   ;;  %2898 = vmatprep.subr.bf16.mxu1 (!%p140_p2), %v3243_v1  ;;  %v3248_v6 = vld [vmem:[%s3831_s1 + $0x8] sm:$0xff] (!%p140_p2)   ;;  %v3252_v10 = vld [vmem:[%s3831_s1 + $0x10] sm:$0xff] (!%p140_p2)  }
   0x8   : > { %v3245_v3 = vld [vmem:[%s3831_s1 + $0x80] sm:$0xff] (!%p140_p2)   ;;  %2787 = vmatpush3.bf16.msra.mxu0 (!%p140_p2), %v3244_v2  ;;  %v3249_v7 = vld [vmem:[%s3831_s1 + $0x88] sm:$0xff] (!%p140_p2)   ;;  %v3253_v11 = vld [vmem:[%s3831_s1 + $0x90] sm:$0xff] (!%p140_p2)  }
   0x9   : > { %2899 = vmatpush3.bf16.msra.mxu1 (!%p140_p2), %v3245_v3  ;;  %2788 = vmatprep.subr.bf16.mxu0 (!%p140_p2), %v3246_v4  ;;  %v3254_v12 = vld [vmem:[%s3831_s1 + $0x58] sm:$0xff] (!%p140_p2)   ;;  %v3258_v16 = vld [vmem:[%s3831_s1 + $0x60] sm:$0xff] (!%p140_p2)   ;;  %v3262_v20 = vld [vmem:[%s3831_s1 + $0x68] sm:$0xff] (!%p140_p2)  }
   0xa   : > { %2900 = vmatprep.subr.bf16.mxu1 (!%p140_p2), %v3247_v5  ;;  %v3255_v13 = vld [vmem:[%s3831_s1 + $0xd8] sm:$0xff] (!%p140_p2)   ;;  %v3259_v17 = vld [vmem:[%s3831_s1 + $0xe0] sm:$0xff] (!%p140_p2)   ;;  %v3263_v21 = vld [vmem:[%s3831_s1 + $0xe8] sm:$0xff] (!%p140_p2)  }
   0xb   : > { %v3256_v14 = vld [vmem:[%s3831_s1 + $0x18] sm:$0xff] (!%p140_p2)   ;;  %v3260_v18 = vld [vmem:[%s3831_s1 + $0x20] sm:$0xff] (!%p140_p2)   ;;  %v3264_v22 = vld [vmem:[%s3831_s1 + $0x28] sm:$0xff] (!%p140_p2)  }
   0xc   : > { %2789 = vmatpush3.bf16.msra.mxu0 (!%p140_p2), %v3248_v6  ;;  %v3257_v15 = vld [vmem:[%s3831_s1 + $0x98] sm:$0xff] (!%p140_p2)   ;;  %v3261_v19 = vld [vmem:[%s3831_s1 + $0xa0] sm:$0xff] (!%p140_p2)   ;;  %v3265_v23 = vld [vmem:[%s3831_s1 + $0xa8] sm:$0xff] (!%p140_p2)  }
   0xd   : > { %2901 = vmatpush3.bf16.msra.mxu1 %v3249_v7  ;;  %2790 = vmatprep.subr.bf16.mxu0 %v3250_v8  ;;  %s3835_s21 = smov (!%p165_p3, %s2426_s21), 63  ;;  %v3266_v24 = vld [vmem:[%s3831_s1 + $0x70] sm:$0xff]   ;;  %v3270_v28 = vld [vmem:[%s3831_s1 + $0x78] sm:$0xff]   ;;  %v3274_v40 = vld [vmem:[%s3831_s1 + $0x140] sm:$0xff]  }
   0xe   : > { %2902 = vmatprep.subr.bf16.mxu1 %v3251_v9  ;;  %v3267_v25 = vld [vmem:[%s3831_s1 + $0xf0] sm:$0xff]   ;;  %s2658_s18 = sshll.u32 %s3835_s21, 5  ;;  %v3271_v29 = vld [vmem:[%s3831_s1 + $0xf8] sm:$0xff]   ;;  %v3275_v41 = vld [vmem:[%s3831_s1 + $0x100] sm:$0xff]  }
   0xf   : > { %v3268_v26 = vld [vmem:[%s3831_s1 + $0x30] sm:$0xff]   ;;  %s3440_s28 = scalar_lea.vmem %s3830_s0, %s2658_s18  ;;  %v3272_v30 = vld [vmem:[%s3831_s1 + $0x38] sm:$0xff]   ;;  %v3276_v42 = vld [vmem:[%s3831_s1 + $0x1c0] sm:$0xff]  }
  0x10   : > { %2791 = vmatpush3.bf16.msra.mxu0 %v3252_v10  ;;  %v3269_v27 = vld [vmem:[%s3831_s1 + $0xb0] sm:$0xff]   ;;  %v3273_v31 = vld [vmem:[%s3831_s1 + $0xb8] sm:$0xff]   ;;  %v178_v32 = vld [vmem:[%s3440_s28] sm:$0xff] }
  0x11   : > { %2903 = vmatpush3.bf16.msra.mxu1 %v3253_v11  ;;  %2792 = vmatprep.subr.bf16.mxu0 %v3254_v12  ;;  %v182_v33 = vld [vmem:[%s3440_s28 + $0x20] sm:$0xff]  ;;  %v179_v34 = vld [vmem:[%s3440_s28 + $0x8] sm:$0xff]  ;;  %v3282_v2 = vld [vmem:[%s3831_s1 + $0x150] sm:$0xff]  }
  0x12   : > { %2904 = vmatprep.subr.bf16.mxu1 %v3255_v13  ;;  %v2432_v35 = vcombine.low %v178_v32, %v182_v33  ;;  %v2433_v36 = vcombine.high %v178_v32, %v182_v33  ;;  %v183_v37 = vld [vmem:[%s3440_s28 + $0x28] sm:$0xff]  ;;  %v3277_v43 = vld [vmem:[%s3831_s1 + $0x180] sm:$0xff]   ;;  %v3283_v4 = vld [vmem:[%s3831_s1 + $0x110] sm:$0xff]  }
  0x13   : > { %v2434_v38 = vcombine.low %v179_v34, %v183_v37  ;;  %v2435_v39 = vcombine.high %v179_v34, %v183_v37  ;;  %v186_v44 = vld [vmem:[%s3440_s28 + $0x40] sm:$0xff]  ;;  %v187_v47 = vld [vmem:[%s3440_s28 + $0x48] sm:$0xff]  ;;  %v3284_v7 = vld [vmem:[%s3831_s1 + $0x1d0] sm:$0xff]  }
  0x14   : > { %2793 = vmatpush3.bf16.msra.mxu0 %v3256_v14  ;;  %1497 = vmatprep.mubr.bf16.mxu0 %v2433_v36  ;;  %v190_v45 = vld [vmem:[%s3440_s28 + $0x60] sm:$0xff]  ;;  %v191_v48 = vld [vmem:[%s3440_s28 + $0x68] sm:$0xff]  ;;  %v3285_v9 = vld [vmem:[%s3831_s1 + $0x190] sm:$0xff]  }
  0x15   : > { %2905 = vmatpush3.bf16.msra.mxu1 %v3257_v15  ;;  %2794 = vmatprep.subr.bf16.mxu0 %v3258_v16  ;;  %v2441_v46 = vcombine.high %v186_v44, %v190_v45  ;;  %v194_v49 = vld [vmem:[%s3440_s28 + $0x80] sm:$0xff]  ;;  %v2443_v50 = vcombine.high %v187_v47, %v191_v48  ;;  %v195_v52 = vld [vmem:[%s3440_s28 + $0x88] sm:$0xff]  ;;  %v2440_v54 = vcombine.low %v186_v44, %v190_v45  ;;  %v3286_v14 = vld [vmem:[%s3831_s1 + $0x158] sm:$0xff]  }
  0x16   : > { %2906 = vmatprep.subr.bf16.mxu1 %v3259_v17  ;;  %1658 = vmatprep.mubr.bf16.mxu1 %v2435_v39  ;;  %v198_v51 = vld [vmem:[%s3440_s28 + $0xa0] sm:$0xff]  ;;  %v199_v53 = vld [vmem:[%s3440_s28 + $0xa8] sm:$0xff]  ;;  %v2442_v56 = vcombine.low %v187_v47, %v191_v48  ;;  %v3287_v15 = vld [vmem:[%s3831_s1 + $0x118] sm:$0xff]  }
  0x17   : > { %v3278_v55 = vld [vmem:[%s3831_s1 + $0x148] sm:$0xff]   ;;  %v2449_v57 = vcombine.high %v194_v49, %v198_v51  ;;  %v2451_v59 = vcombine.high %v195_v52, %v199_v53  ;;  %v202_v62 = vld [vmem:[%s3440_s28 + $0xc0] sm:$0xff]  ;;  %v2448_v3 = vcombine.low %v194_v49, %v198_v51  ;;  %v2450_v5 = vcombine.low %v195_v52, %v199_v53  ;;  %v3288_v17 = vld [vmem:[%s3831_s1 + $0x1d8] sm:$0xff]  }
  0x18   : > { %2795 = vmatpush3.bf16.msra.mxu0 %v3260_v18  ;;  %v3279_v58 = vld [vmem:[%s3831_s1 + $0x108] sm:$0xff]   ;;  %v206_v63 = vld [vmem:[%s3440_s28 + $0xe0] sm:$0xff]  ;;  %v3299_v47 = vld [vmem:[%s3831_s1 + $0x130] sm:$0xff]  }
  0x19   : > { %2907 = vmatpush3.bf16.msra.mxu1 %v3261_v19  ;;  %2796 = vmatprep.subr.bf16.mxu0 %v3262_v20  ;;  %v3280_v60 = vld [vmem:[%s3831_s1 + $0x1c8] sm:$0xff]   ;;  %v2457_v6 = vcombine.high %v202_v62, %v206_v63  ;;  %v210_v10 = vld [vmem:[%s3440_s28 + $0x100] sm:$0xff]  ;;  %v2456_v16 = vcombine.low %v202_v62, %v206_v63  ;;  %v3289_v20 = vld [vmem:[%s3831_s1 + $0x198] sm:$0xff]  }
  0x1a   : > { %2908 = vmatprep.subr.bf16.mxu1 %v3263_v21  ;;  %v3281_v61 = vld [vmem:[%s3831_s1 + $0x188] sm:$0xff]   ;;  %v214_v11 = vld [vmem:[%s3440_s28 + $0x120] sm:$0xff]  ;;  %v3300_v48 = vld [vmem:[%s3831_s1 + $0x1f0] sm:$0xff]  }
  0x1b   : > { %v203_v0 = vld [vmem:[%s3440_s28 + $0xc8] sm:$0xff]  ;;  %v2465_v19 = vcombine.high %v210_v10, %v214_v11  ;;  %v3301_v49 = vld [vmem:[%s3831_s1 + $0x1b0] sm:$0xff]   ;;  %v238_v51 = vld [vmem:[%s3440_s28 + $0x1e0] sm:$0xff] }
  0x1c   : > { %2797 = vmatpush3.bf16.msra.mxu0 %v3264_v22  ;;  %v207_v1 = vld [vmem:[%s3440_s28 + $0xe8] sm:$0xff]  ;;  %v218_v22 = vld [vmem:[%s3440_s28 + $0x140] sm:$0xff] }
  0x1d   : > { %2909 = vmatpush3.bf16.msra.mxu1 %v3265_v23  ;;  %2798 = vmatprep.subr.bf16.mxu0 %v3266_v24  ;;  %v2459_v8 = vcombine.high %v203_v0, %v207_v1  ;;  %v211_v12 = vld [vmem:[%s3440_s28 + $0x108] sm:$0xff]  ;;  %v2458_v18 = vcombine.low %v203_v0, %v207_v1  ;;  %v222_v23 = vld [vmem:[%s3440_s28 + $0x160] sm:$0xff] }
  0x1e   : > { %2910 = vmatprep.subr.bf16.mxu1 %v3267_v25  ;;  %v215_v13 = vld [vmem:[%s3440_s28 + $0x128] sm:$0xff]  ;;  %v3290_v24 = vld [vmem:[%s3831_s1 + $0x160] sm:$0xff]   ;;  %v2473_v32 = vcombine.high %v218_v22, %v222_v23 }
  0x1f   : > { %v2467_v21 = vcombine.high %v211_v12, %v215_v13  ;;  %v219_v25 = vld [vmem:[%s3440_s28 + $0x148] sm:$0xff]  ;;  %v242_v62 = vld [vmem:[%s3440_s28 + $0x200] sm:$0xff] }
  0x20   : > { %2799 = vmatpush3.bf16.msra.mxu0 %v3268_v26  ;;  %v223_v26 = vld [vmem:[%s3440_s28 + $0x168] sm:$0xff]  ;;  %v246_v63 = vld [vmem:[%s3440_s28 + $0x220] sm:$0xff] }
  0x21   : > { %2911 = vmatpush3.bf16.msra.mxu1 %v3269_v27  ;;  %2800 = vmatprep.subr.bf16.mxu0 %v3270_v28  ;;  %v3291_v27 = vld [vmem:[%s3831_s1 + $0x120] sm:$0xff]   ;;  %v2475_v33 = vcombine.high %v219_v25, %v223_v26  ;;  %v3294_v34 = vld [vmem:[%s3831_s1 + $0x168] sm:$0xff]  }
  0x22   : > { %2912 = vmatprep.subr.bf16.mxu1 %v3271_v29  ;;  %v3292_v28 = vld [vmem:[%s3831_s1 + $0x1e0] sm:$0xff]   ;;  %v3295_v36 = vld [vmem:[%s3831_s1 + $0x128] sm:$0xff]  }
  0x23   : > { %v3293_v29 = vld [vmem:[%s3831_s1 + $0x1a0] sm:$0xff]   ;;  %v3296_v37 = vld [vmem:[%s3831_s1 + $0x1e8] sm:$0xff]  }
  0x24   : > { %2801 = vmatpush3.bf16.msra.mxu0 %v3272_v30  ;;  %v2464_v30 = vcombine.low %v210_v10, %v214_v11  ;;  %v3297_v39 = vld [vmem:[%s3831_s1 + $0x1a8] sm:$0xff]   ;;  %v2496_v10 = vcombine.low %v242_v62, %v246_v63 }
  0x25   : > { %2913 = vmatpush3.bf16.msra.mxu1 %v3273_v31  ;;  %3010 = vmatprep.subr.bf16.mxu0 %v3274_v40  ;;  %v2466_v31 = vcombine.low %v211_v12, %v215_v13  ;;  %v227_v40 = vld [vmem:[%s3440_s28 + $0x188] sm:$0xff] }
  0x26   : > { %3122 = vmatprep.subr.bf16.mxu1 %v3276_v42  ;;  %v2472_v42 = vcombine.low %v218_v22, %v222_v23  ;;  %v235_v52 = vld [vmem:[%s3440_s28 + $0x1c8] sm:$0xff]  ;;  %v266_v22 = vld [vmem:[%s3440_s28 + $0x2c0] sm:$0xff] }
  0x27   : > { %1498 = vmatmul.mubr.bf16.vlgmr.msra.gmra.mrb[0].mxu0 %v2432_v35  ;;  %v226_v35 = vld [vmem:[%s3440_s28 + $0x180] sm:$0xff]  ;;  %v239_v53 = vld [vmem:[%s3440_s28 + $0x1e8] sm:$0xff] }
  0x28   : > { %1659 = vmatmul.mubr.bf16.vlgmr.msra.gmra.mrb[0].mxu1 %v2434_v38  ;;  %3011 = vmatpush3.bf16.msra.mxu0 %v3275_v41  ;;  %v230_v38 = vld [vmem:[%s3440_s28 + $0x1a0] sm:$0xff]  ;;  %v231_v41 = vld [vmem:[%s3440_s28 + $0x1a8] sm:$0xff] }
  0x29   : > { %3123 = vmatpush3.bf16.msra.mxu1 %v3277_v43  ;;  %1505 = vmatprep.mubr.bf16.mxu0 %v2441_v46  ;;  %v2474_v43 = vcombine.low %v219_v25, %v223_v26  ;;  %v2481_v44 = vcombine.high %v226_v35, %v230_v38  ;;  %v2483_v45 = vcombine.high %v227_v40, %v231_v41  ;;  %v3298_v46 = vld [vmem:[%s3831_s1 + $0x170] sm:$0xff]   ;;  %v243_v0 = vld [vmem:[%s3440_s28 + $0x208] sm:$0xff]  ;;  %v270_v23 = vld [vmem:[%s3440_s28 + $0x2e0] sm:$0xff] }
  0x2a   : > { %1666 = vmatprep.mubr.bf16.mxu1 %v2443_v50  ;;  %3012 = vmatprep.subr.bf16.mxu0 %v3278_v55  ;;  %v234_v50 = vld [vmem:[%s3440_s28 + $0x1c0] sm:$0xff]  ;;  %v3302_v55 = vld [vmem:[%s3831_s1 + $0x178] sm:$0xff]   ;;  %v247_v1 = vld [vmem:[%s3440_s28 + $0x228] sm:$0xff] }
  0x2b   : > { %3124 = vmatprep.subr.bf16.mxu1 %v3280_v60  ;;  %v3304_v60 = vld [vmem:[%s3831_s1 + $0x1f8] sm:$0xff]   ;;  %v2498_v11 = vcombine.low %v243_v0, %v247_v1  ;;  %v271_v25 = vld [vmem:[%s3440_s28 + $0x2e8] sm:$0xff] }
  0x2c   : > { %3013 = vmatpush3.bf16.msra.mxu0 %v3279_v58  ;;  %v3303_v58 = vld [vmem:[%s3831_s1 + $0x138] sm:$0xff]  }
  0x2d   : > { %3125 = vmatpush3.bf16.msra.mxu1 %v3281_v61  ;;  %3014 = vmatprep.subr.bf16.mxu0 %v3282_v2  ;;  %v3305_v61 = vld [vmem:[%s3831_s1 + $0x1b8] sm:$0xff]   ;;  %v2488_v2 = vcombine.low %v234_v50, %v238_v51 }
  0x2e   : > { %3126 = vmatprep.subr.bf16.mxu1 %v3284_v7  ;;  %v254_v7 = vld [vmem:[%s3440_s28 + $0x260] sm:$0xff] }
  0x2f   : > { %1506 = vmatmul.mubr.bf16.gmra.mrb[4].mxu0 %v2440_v54  ;;  %v2480_v54 = vcombine.low %v226_v35, %v230_v38  ;;  %v282_v38 = vld [vmem:[%s3440_s28 + $0x340] sm:$0xff] }
  0x30   : > { %1667 = vmatmul.mubr.bf16.gmra.mrb[4].mxu1 %v2442_v56  ;;  %1513 = vmatprep.mubr.bf16.mxu0 %v2449_v57  ;;  %v2482_v56 = vcombine.low %v227_v40, %v231_v41  ;;  %v2489_v57 = vcombine.high %v234_v50, %v238_v51  ;;  %v283_v40 = vld [vmem:[%s3440_s28 + $0x348] sm:$0xff] }
  0x31   : > { %1674 = vmatprep.mubr.bf16.mxu1 %v2451_v59  ;;  %3015 = vmatpush3.bf16.msra.mxu0 %v3283_v4  ;;  %v2491_v59 = vcombine.high %v235_v52, %v239_v53  ;;  %v2497_v4 = vcombine.high %v242_v62, %v246_v63  ;;  %v287_v41 = vld [vmem:[%s3440_s28 + $0x368] sm:$0xff]  ;;  %v180_v62 = vld [vmem:[%s3440_s28 + $0x10] sm:$0xff] }
  0x32   : > { %3127 = vmatpush3.bf16.msra.mxu1 %v3285_v9  ;;  %3016 = vmatprep.subr.bf16.mxu0 %v3286_v14  ;;  %v255_v9 = vld [vmem:[%s3440_s28 + $0x268] sm:$0xff]  ;;  %v258_v14 = vld [vmem:[%s3440_s28 + $0x280] sm:$0xff]  ;;  %v2538_v51 = vcombine.low %v283_v40, %v287_v41  ;;  %v184_v63 = vld [vmem:[%s3440_s28 + $0x30] sm:$0xff] }
  0x33   : > { %3128 = vmatprep.subr.bf16.mxu1 %v3288_v17  ;;  %v263_v17 = vld [vmem:[%s3440_s28 + $0x2a8] sm:$0xff] }
  0x35   : > { %3017 = vmatpush3.bf16.msra.mxu0 %v3287_v15  ;;  %v262_v15 = vld [vmem:[%s3440_s28 + $0x2a0] sm:$0xff] }
  0x36   : > { %3129 = vmatpush3.bf16.msra.mxu1 %v3289_v20  ;;  %3018 = vmatprep.subr.bf16.mxu0 %v3290_v24  ;;  %v2513_v20 = vcombine.high %v258_v14, %v262_v15  ;;  %v267_v24 = vld [vmem:[%s3440_s28 + $0x2c8] sm:$0xff]  ;;  %v2512_v26 = vcombine.low %v258_v14, %v262_v15  ;;  %v196_v14 = vld [vmem:[%s3440_s28 + $0x90] sm:$0xff] }
  0x37   : > { %1514 = vmatmul.mubr.bf16.gmra.mrb[8].mxu0 %v2448_v3  ;;  %3130 = vmatprep.subr.bf16.mxu1 %v3292_v28  ;;  %v2490_v3 = vcombine.low %v235_v52, %v239_v53  ;;  %v2521_v28 = vcombine.high %v266_v22, %v270_v23  ;;  %v2522_v35 = vcombine.low %v267_v24, %v271_v25  ;;  %v200_v15 = vld [vmem:[%s3440_s28 + $0xb0] sm:$0xff] }
  0x38   : > { %1675 = vmatmul.mubr.bf16.gmra.mrb[8].mxu1 %v2450_v5  ;;  %1521 = vmatprep.mubr.bf16.mxu0 %v2457_v6  ;;  %v2499_v5 = vcombine.high %v243_v0, %v247_v1  ;;  %v250_v6 = vld [vmem:[%s3440_s28 + $0x240] sm:$0xff]  ;;  %v181_v0 = vld [vmem:[%s3440_s28 + $0x18] sm:$0xff] }
  0x39   : > { %1682 = vmatprep.mubr.bf16.mxu1 %v2459_v8  ;;  %3019 = vmatpush3.bf16.msra.mxu0 %v3291_v27  ;;  %v251_v8 = vld [vmem:[%s3440_s28 + $0x248] sm:$0xff]  ;;  %v2505_v12 = vcombine.high %v250_v6, %v254_v7  ;;  %v185_v1 = vld [vmem:[%s3440_s28 + $0x38] sm:$0xff] }
  0x3a   : > { %3131 = vmatpush3.bf16.msra.mxu1 %v3293_v29  ;;  %3020 = vmatprep.subr.bf16.mxu0 %v3294_v34  ;;  %v2507_v13 = vcombine.high %v251_v8, %v255_v9  ;;  %v2523_v29 = vcombine.high %v267_v24, %v271_v25  ;;  %v2520_v34 = vcombine.low %v266_v22, %v270_v23  ;;  %v204_v22 = vld [vmem:[%s3440_s28 + $0xd0] sm:$0xff]  ;;  %v205_v24 = vld [vmem:[%s3440_s28 + $0xd8] sm:$0xff] }
  0x3b   : > { %3132 = vmatprep.subr.bf16.mxu1 %v3296_v37  ;;  %v208_v23 = vld [vmem:[%s3440_s28 + $0xf0] sm:$0xff]  ;;  %v209_v25 = vld [vmem:[%s3440_s28 + $0xf8] sm:$0xff] }
  0x3d   : > { %3021 = vmatpush3.bf16.msra.mxu0 %v3295_v36 }
  0x3e   : > { %3133 = vmatpush3.bf16.msra.mxu1 %v3297_v39  ;;  %3022 = vmatprep.subr.bf16.mxu0 %v3298_v46  ;;  %v286_v39 = vld [vmem:[%s3440_s28 + $0x360] sm:$0xff] }
  0x3f   : > { %1522 = vmatmul.mubr.bf16.gmra.mrb[12].mxu0 %v2456_v16  ;;  %3134 = vmatprep.subr.bf16.mxu1 %v3300_v48  ;;  %v259_v16 = vld [vmem:[%s3440_s28 + $0x288] sm:$0xff]  ;;  %v290_v46 = vld [vmem:[%s3440_s28 + $0x380] sm:$0xff]  ;;  %v2536_v50 = vcombine.low %v282_v38, %v286_v39 }
  0x40   : > { %1683 = vmatmul.mubr.bf16.gmra.mrb[12].mxu1 %v2458_v18  ;;  %1529 = vmatprep.mubr.bf16.mxu0 %v2465_v19  ;;  %v2504_v18 = vcombine.low %v250_v6, %v254_v7  ;;  %v2506_v19 = vcombine.low %v251_v8, %v255_v9  ;;  %v2514_v27 = vcombine.low %v259_v16, %v263_v17  ;;  %v291_v48 = vld [vmem:[%s3440_s28 + $0x388] sm:$0xff]  ;;  %v188_v6 = vld [vmem:[%s3440_s28 + $0x50] sm:$0xff]  ;;  %v189_v8 = vld [vmem:[%s3440_s28 + $0x58] sm:$0xff] }
  0x41   : > { %1690 = vmatprep.mubr.bf16.mxu1 %v2467_v21  ;;  %3023 = vmatpush3.bf16.msra.mxu0 %v3299_v47  ;;  %v2515_v21 = vcombine.high %v259_v16, %v263_v17  ;;  %v294_v47 = vld [vmem:[%s3440_s28 + $0x3a0] sm:$0xff]  ;;  %v192_v7 = vld [vmem:[%s3440_s28 + $0x70] sm:$0xff]  ;;  %v193_v9 = vld [vmem:[%s3440_s28 + $0x78] sm:$0xff] }
  0x42   : > { %3135 = vmatpush3.bf16.msra.mxu1 %v3301_v49  ;;  %3024 = vmatprep.subr.bf16.mxu0 %v3302_v55  ;;  %v295_v49 = vld [vmem:[%s3440_s28 + $0x3a8] sm:$0xff]  ;;  %v2545_v52 = vcombine.high %v290_v46, %v294_v47  ;;  %v302_v55 = vld [vmem:[%s3440_s28 + $0x3e0] sm:$0xff]  ;;  %v197_v16 = vld [vmem:[%s3440_s28 + $0x98] sm:$0xff] }
  0x43   : > { %3136 = vmatprep.subr.bf16.mxu1 %v3304_v60  ;;  %v2547_v53 = vcombine.high %v291_v48, %v295_v49  ;;  %v201_v17 = vld [vmem:[%s3440_s28 + $0xb8] sm:$0xff] }
  0x45   : > { %3025 = vmatpush3.bf16.msra.mxu0 %v3303_v58  ;;  %v2544_v58 = vcombine.low %v290_v46, %v294_v47  ;;  %v228_v46 = vld [vmem:[%s3440_s28 + $0x190] sm:$0xff] }
  0x46   : > { %3137 = vmatpush3.bf16.msra.mxu1 %v3305_v61  ;;  %v232_v47 = vld [vmem:[%s3440_s28 + $0x1b0] sm:$0xff] }
  0x47   : > { %1530 = vmatmul.mubr.bf16.gmra.mrb[16].mxu0 %v2464_v30  ;;  %v274_v30 = vld [vmem:[%s3440_s28 + $0x300] sm:$0xff] }
  0x48   : > { %1691 = vmatmul.mubr.bf16.gmra.mrb[16].mxu1 %v2466_v31  ;;  %1537 = vmatprep.mubr.bf16.mxu0 %v2473_v32  ;;  %v278_v31 = vld [vmem:[%s3440_s28 + $0x320] sm:$0xff]  ;;  %v275_v32 = vld [vmem:[%s3440_s28 + $0x308] sm:$0xff] }
  0x49   : > { %1698 = vmatprep.mubr.bf16.mxu1 %v2475_v33  ;;  %v279_v33 = vld [vmem:[%s3440_s28 + $0x328] sm:$0xff]  ;;  %v2529_v36 = vcombine.high %v274_v30, %v278_v31 }
  0x4a   : > { %v2531_v37 = vcombine.high %v275_v32, %v279_v33 }
  0x4f   : > { %1538 = vmatmul.mubr.bf16.gmra.mrb[20].mxu0 %v2472_v42  ;;  %v2528_v42 = vcombine.low %v274_v30, %v278_v31  ;;  %v212_v30 = vld [vmem:[%s3440_s28 + $0x110] sm:$0xff] }
  0x50   : > { %1699 = vmatmul.mubr.bf16.gmra.mrb[20].mxu1 %v2474_v43  ;;  %1545 = vmatprep.mubr.bf16.mxu0 %v2481_v44  ;;  %v2530_v43 = vcombine.low %v275_v32, %v279_v33  ;;  %v2537_v44 = vcombine.high %v282_v38, %v286_v39  ;;  %v216_v31 = vld [vmem:[%s3440_s28 + $0x130] sm:$0xff]  ;;  %v213_v32 = vld [vmem:[%s3440_s28 + $0x118] sm:$0xff] }
  0x51   : > { %1706 = vmatprep.mubr.bf16.mxu1 %v2483_v45  ;;  %v2539_v45 = vcombine.high %v283_v40, %v287_v41  ;;  %v217_v33 = vld [vmem:[%s3440_s28 + $0x138] sm:$0xff]  ;;  %v220_v38 = vld [vmem:[%s3440_s28 + $0x150] sm:$0xff] }
  0x52   : > { %v224_v39 = vld [vmem:[%s3440_s28 + $0x170] sm:$0xff]  ;;  %v221_v40 = vld [vmem:[%s3440_s28 + $0x158] sm:$0xff] }
  0x53   : > { %v225_v41 = vld [vmem:[%s3440_s28 + $0x178] sm:$0xff] }
  0x57   : > { %1546 = vmatmul.mubr.bf16.gmra.mrb[24].mxu0 %v2480_v54  ;;  %v298_v54 = vld [vmem:[%s3440_s28 + $0x3c0] sm:$0xff] }
  0x58   : > { %1707 = vmatmul.mubr.bf16.gmra.mrb[24].mxu1 %v2482_v56  ;;  %1553 = vmatprep.mubr.bf16.mxu0 %v2489_v57  ;;  %v299_v56 = vld [vmem:[%s3440_s28 + $0x3c8] sm:$0xff]  ;;  %v2553_v60 = vcombine.high %v298_v54, %v302_v55 }
  0x59   : > { %1714 = vmatprep.mubr.bf16.mxu1 %v2491_v59  ;;  %v303_v57 = vld [vmem:[%s3440_s28 + $0x3e8] sm:$0xff]  ;;  %v2546_v59 = vcombine.low %v291_v48, %v295_v49  ;;  %v229_v48 = vld [vmem:[%s3440_s28 + $0x198] sm:$0xff] }
  0x5a   : > { %v2555_v61 = vcombine.high %v299_v56, %v303_v57  ;;  %v233_v49 = vld [vmem:[%s3440_s28 + $0x1b8] sm:$0xff] }
  0x5f   : > { %1554 = vmatmul.mubr.bf16.gmra.mrb[28].mxu0 %v2488_v2  ;;  %v2552_v2 = vcombine.low %v298_v54, %v302_v55  ;;  %v236_v54 = vld [vmem:[%s3440_s28 + $0x1d0] sm:$0xff] }
  0x60   : > { %1715 = vmatmul.mubr.bf16.gmra.mrb[28].mxu1 %v2490_v3  ;;  %1561 = vmatprep.mubr.bf16.mxu0 %v2497_v4  ;;  %v2554_v3 = vcombine.low %v299_v56, %v303_v57  ;;  %v2437_v4 = vcombine.high %v180_v62, %v184_v63  ;;  %v240_v55 = vld [vmem:[%s3440_s28 + $0x1f0] sm:$0xff]  ;;  %v237_v56 = vld [vmem:[%s3440_s28 + $0x1d8] sm:$0xff] }
  0x61   : > { %1722 = vmatprep.mubr.bf16.mxu1 %v2499_v5  ;;  %v2439_v5 = vcombine.high %v181_v0, %v185_v1  ;;  %v241_v57 = vld [vmem:[%s3440_s28 + $0x1f8] sm:$0xff] }
  0x67   : > { %1562 = vmatmul.mubr.bf16.gmra.mrb[32].mxu0 %v2496_v10  ;;  %v2436_v10 = vcombine.low %v180_v62, %v184_v63  ;;  %v244_v62 = vld [vmem:[%s3440_s28 + $0x210] sm:$0xff] }
  0x68   : > { %1723 = vmatmul.mubr.bf16.gmra.mrb[32].mxu1 %v2498_v11  ;;  %1569 = vmatprep.mubr.bf16.mxu0 %v2505_v12  ;;  %v2438_v11 = vcombine.low %v181_v0, %v185_v1  ;;  %v2445_v12 = vcombine.high %v188_v6, %v192_v7  ;;  %v248_v63 = vld [vmem:[%s3440_s28 + $0x230] sm:$0xff]  ;;  %v245_v0 = vld [vmem:[%s3440_s28 + $0x218] sm:$0xff] }
  0x69   : > { %1730 = vmatprep.mubr.bf16.mxu1 %v2507_v13  ;;  %v2447_v13 = vcombine.high %v189_v8, %v193_v9  ;;  %v249_v1 = vld [vmem:[%s3440_s28 + $0x238] sm:$0xff] }
  0x6f   : > { %1570 = vmatmul.mubr.bf16.gmra.mrb[36].mxu0 %v2504_v18  ;;  %v2444_v18 = vcombine.low %v188_v6, %v192_v7  ;;  %v252_v6 = vld [vmem:[%s3440_s28 + $0x250] sm:$0xff] }
  0x70   : > { %1731 = vmatmul.mubr.bf16.gmra.mrb[36].mxu1 %v2506_v19  ;;  %1577 = vmatprep.mubr.bf16.mxu0 %v2513_v20  ;;  %v2446_v19 = vcombine.low %v189_v8, %v193_v9  ;;  %v2453_v20 = vcombine.high %v196_v14, %v200_v15  ;;  %v256_v7 = vld [vmem:[%s3440_s28 + $0x270] sm:$0xff]  ;;  %v253_v8 = vld [vmem:[%s3440_s28 + $0x258] sm:$0xff] }
  0x71   : > { %1738 = vmatprep.mubr.bf16.mxu1 %v2515_v21  ;;  %v2455_v21 = vcombine.high %v197_v16, %v201_v17  ;;  %v257_v9 = vld [vmem:[%s3440_s28 + $0x278] sm:$0xff] }
  0x77   : > { %1578 = vmatmul.mubr.bf16.gmra.mrb[40].mxu0 %v2512_v26  ;;  %v2452_v26 = vcombine.low %v196_v14, %v200_v15  ;;  %v260_v14 = vld [vmem:[%s3440_s28 + $0x290] sm:$0xff] }
  0x78   : > { %1739 = vmatmul.mubr.bf16.gmra.mrb[40].mxu1 %v2514_v27  ;;  %1585 = vmatprep.mubr.bf16.mxu0 %v2521_v28  ;;  %v2454_v27 = vcombine.low %v197_v16, %v201_v17  ;;  %v2461_v28 = vcombine.high %v204_v22, %v208_v23  ;;  %v264_v15 = vld [vmem:[%s3440_s28 + $0x2b0] sm:$0xff]  ;;  %v261_v16 = vld [vmem:[%s3440_s28 + $0x298] sm:$0xff] }
  0x79   : > { %1746 = vmatprep.mubr.bf16.mxu1 %v2523_v29  ;;  %v2463_v29 = vcombine.high %v205_v24, %v209_v25  ;;  %v265_v17 = vld [vmem:[%s3440_s28 + $0x2b8] sm:$0xff] }
  0x7f   : > { %1586 = vmatmul.mubr.bf16.gmra.mrb[44].mxu0 %v2520_v34  ;;  %v2460_v34 = vcombine.low %v204_v22, %v208_v23  ;;  %v268_v22 = vld [vmem:[%s3440_s28 + $0x2d0] sm:$0xff] }
  0x80   : > { %1747 = vmatmul.mubr.bf16.gmra.mrb[44].mxu1 %v2522_v35  ;;  %1593 = vmatprep.mubr.bf16.mxu0 %v2529_v36  ;;  %v2462_v35 = vcombine.low %v205_v24, %v209_v25  ;;  %v2469_v36 = vcombine.high %v212_v30, %v216_v31  ;;  %v272_v23 = vld [vmem:[%s3440_s28 + $0x2f0] sm:$0xff]  ;;  %v269_v24 = vld [vmem:[%s3440_s28 + $0x2d8] sm:$0xff] }
  0x81   : > { %1754 = vmatprep.mubr.bf16.mxu1 %v2531_v37  ;;  %v2471_v37 = vcombine.high %v213_v32, %v217_v33  ;;  %v273_v25 = vld [vmem:[%s3440_s28 + $0x2f8] sm:$0xff] }
  0x87   : > { %1594 = vmatmul.mubr.bf16.gmra.mrb[48].mxu0 %v2528_v42  ;;  %v2468_v42 = vcombine.low %v212_v30, %v216_v31  ;;  %v276_v30 = vld [vmem:[%s3440_s28 + $0x310] sm:$0xff] }
  0x88   : > { %1755 = vmatmul.mubr.bf16.gmra.mrb[48].mxu1 %v2530_v43  ;;  %1601 = vmatprep.mubr.bf16.mxu0 %v2537_v44  ;;  %v2470_v43 = vcombine.low %v213_v32, %v217_v33  ;;  %v2477_v44 = vcombine.high %v220_v38, %v224_v39  ;;  %v280_v31 = vld [vmem:[%s3440_s28 + $0x330] sm:$0xff]  ;;  %v277_v33 = vld [vmem:[%s3440_s28 + $0x318] sm:$0xff] }
  0x89   : > { %1762 = vmatprep.mubr.bf16.mxu1 %v2539_v45  ;;  %v2479_v45 = vcombine.high %v221_v40, %v225_v41 }
  0x8f   : > { %1602 = vmatmul.mubr.bf16.gmra.mrb[52].mxu0 %v2536_v50  ;;  %v2476_v50 = vcombine.low %v220_v38, %v224_v39  ;;  %v2524_v38 = vcombine.low %v268_v22, %v272_v23 }
  0x90   : > { %1763 = vmatmul.mubr.bf16.gmra.mrb[52].mxu1 %v2538_v51  ;;  %1609 = vmatprep.mubr.bf16.mxu0 %v2545_v52  ;;  %v2478_v51 = vcombine.low %v221_v40, %v225_v41  ;;  %v2485_v52 = vcombine.high %v228_v46, %v232_v47 }
  0x91   : > { %1770 = vmatprep.mubr.bf16.mxu1 %v2547_v53  ;;  %v2487_v53 = vcombine.high %v229_v48, %v233_v49 }
  0x97   : > { %1610 = vmatmul.mubr.bf16.gmra.mrb[56].mxu0 %v2544_v58  ;;  %v2484_v58 = vcombine.low %v228_v46, %v232_v47 }
  0x98   : > { %1771 = vmatmul.mubr.bf16.gmra.mrb[56].mxu1 %v2546_v59  ;;  %1617 = vmatprep.mubr.bf16.mxu0 %v2553_v60  ;;  %v2486_v59 = vcombine.low %v229_v48, %v233_v49  ;;  %v2493_v60 = vcombine.high %v236_v54, %v240_v55 }
  0x99   : > { %1778 = vmatprep.mubr.bf16.mxu1 %v2555_v61  ;;  %v2495_v61 = vcombine.high %v237_v56, %v241_v57 }
  0x9f   : > { %1618 = vmatmul.mubr.bf16.gmra.mrb[60].mxu0 %v2552_v2  ;;  %v2492_v2 = vcombine.low %v236_v54, %v240_v55  ;;  %v284_v54 = vld [vmem:[%s3440_s28 + $0x350] sm:$0xff] }
  0xa0   : > { %1779 = vmatmul.mubr.bf16.gmra.mrb[60].mxu1 %v2554_v3  ;;  %1819 = vmatprep.mubr.bf16.mxu0 %v2437_v4  ;;  %v2494_v3 = vcombine.low %v237_v56, %v241_v57  ;;  %v2501_v4 = vcombine.high %v244_v62, %v248_v63  ;;  %v288_v55 = vld [vmem:[%s3440_s28 + $0x370] sm:$0xff] }
  0xa1   : > { %1980 = vmatprep.mubr.bf16.mxu1 %v2439_v5  ;;  %v2503_v5 = vcombine.high %v245_v0, %v249_v1 }
  0xa7   : > { %1820 = vmatmul.mubr.bf16.vlgmr.msra.gmra.mrb[64].mxu0 %v2436_v10  ;;  %v2500_v10 = vcombine.low %v244_v62, %v248_v63  ;;  %v2532_v62 = vcombine.low %v276_v30, %v280_v31 }
  0xa8   : > { %1981 = vmatmul.mubr.bf16.vlgmr.msra.gmra.mrb[64].mxu1 %v2438_v11  ;;  %1827 = vmatprep.mubr.bf16.mxu0 %v2445_v12  ;;  %v2502_v11 = vcombine.low %v245_v0, %v249_v1  ;;  %v2509_v12 = vcombine.high %v252_v6, %v256_v7 }
  0xa9   : > { %1988 = vmatprep.mubr.bf16.mxu1 %v2447_v13  ;;  %v2511_v13 = vcombine.high %v253_v8, %v257_v9 }
  0xaf   : > { %1828 = vmatmul.mubr.bf16.gmra.mrb[68].mxu0 %v2444_v18  ;;  %v2508_v18 = vcombine.low %v252_v6, %v256_v7 }
  0xb0   : > { %1989 = vmatmul.mubr.bf16.gmra.mrb[68].mxu1 %v2446_v19  ;;  %1835 = vmatprep.mubr.bf16.mxu0 %v2453_v20  ;;  %v2510_v19 = vcombine.low %v253_v8, %v257_v9  ;;  %v2517_v20 = vcombine.high %v260_v14, %v264_v15 }
  0xb1   : > { %1996 = vmatprep.mubr.bf16.mxu1 %v2455_v21  ;;  %v2519_v21 = vcombine.high %v261_v16, %v265_v17 }
  0xb7   : > { %1836 = vmatmul.mubr.bf16.gmra.mrb[72].mxu0 %v2452_v26  ;;  %v2516_v26 = vcombine.low %v260_v14, %v264_v15  ;;  %v292_v14 = vld [vmem:[%s3440_s28 + $0x390] sm:$0xff] }
  0xb8   : > { %1997 = vmatmul.mubr.bf16.gmra.mrb[72].mxu1 %v2454_v27  ;;  %1843 = vmatprep.mubr.bf16.mxu0 %v2461_v28  ;;  %v2518_v27 = vcombine.low %v261_v16, %v265_v17  ;;  %v2525_v28 = vcombine.high %v268_v22, %v272_v23  ;;  %v296_v15 = vld [vmem:[%s3440_s28 + $0x3b0] sm:$0xff]  ;;  %v2540_v22 = vcombine.low %v284_v54, %v288_v55 }
  0xb9   : > { %2004 = vmatprep.mubr.bf16.mxu1 %v2463_v29  ;;  %v2527_v29 = vcombine.high %v269_v24, %v273_v25 }
  0xbf   : > { %1844 = vmatmul.mubr.bf16.gmra.mrb[76].mxu0 %v2460_v34  ;;  %v281_v34 = vld [vmem:[%s3440_s28 + $0x338] sm:$0xff] }
  0xc0   : > { %2005 = vmatmul.mubr.bf16.gmra.mrb[76].mxu1 %v2462_v35  ;;  %1851 = vmatprep.mubr.bf16.mxu0 %v2469_v36  ;;  %v3663_v36 = vld [vmem:[%s3832_s2] ss:$0 sm:$0xff]  ;;  %v2535_v47 = vcombine.high %v277_v33, %v281_v34 }
  0xc1   : > { %2012 = vmatprep.mubr.bf16.mxu1 %v2471_v37 }
  0xc7   : > { %1852 = vmatmul.mubr.bf16.gmra.mrb[80].mxu0 %v2468_v42  ;;  %v2526_v42 = vcombine.low %v269_v24, %v273_v25 }
  0xc8   : > { %2013 = vmatmul.mubr.bf16.gmra.mrb[80].mxu1 %v2470_v43  ;;  %1859 = vmatprep.mubr.bf16.mxu0 %v2477_v44  ;;  %v2533_v43 = vcombine.high %v276_v30, %v280_v31 }
  0xc9   : > { %2020 = vmatprep.mubr.bf16.mxu1 %v2479_v45 }
  0xcf   : > { %1860 = vmatmul.mubr.bf16.gmra.mrb[84].mxu0 %v2476_v50 }
  0xd0   : > { %2021 = vmatmul.mubr.bf16.gmra.mrb[84].mxu1 %v2478_v51  ;;  %1867 = vmatprep.mubr.bf16.mxu0 %v2485_v52 }
  0xd1   : > { %2028 = vmatprep.mubr.bf16.mxu1 %v2487_v53 }
  0xd7   : > { %1868 = vmatmul.mubr.bf16.gmra.mrb[88].mxu0 %v2484_v58  ;;  %v285_v58 = vld [vmem:[%s3440_s28 + $0x358] sm:$0xff] }
  0xd8   : > { %2029 = vmatmul.mubr.bf16.gmra.mrb[88].mxu1 %v2486_v59  ;;  %1875 = vmatprep.mubr.bf16.mxu0 %v2493_v60  ;;  %v289_v59 = vld [vmem:[%s3440_s28 + $0x378] sm:$0xff] }
  0xd9   : > { %2036 = vmatprep.mubr.bf16.mxu1 %v2495_v61  ;;  %v2543_v7 = vcombine.high %v285_v58, %v289_v59 }
  0xdf   : > { %1876 = vmatmul.mubr.bf16.gmra.mrb[92].mxu0 %v2492_v2  ;;  %v2534_v2 = vcombine.low %v277_v33, %v281_v34 }
  0xe0   : > { %2037 = vmatmul.mubr.bf16.gmra.mrb[92].mxu1 %v2494_v3  ;;  %1883 = vmatprep.mubr.bf16.mxu0 %v2501_v4  ;;  %v2541_v3 = vcombine.high %v284_v54, %v288_v55 }
  0xe1   : > { %2044 = vmatprep.mubr.bf16.mxu1 %v2503_v5 }
  0xe7   : > { %1884 = vmatmul.mubr.bf16.gmra.mrb[96].mxu0 %v2500_v10 }
  0xe8   : > { %2045 = vmatmul.mubr.bf16.gmra.mrb[96].mxu1 %v2502_v11  ;;  %1891 = vmatprep.mubr.bf16.mxu0 %v2509_v12 }
  0xe9   : > { %2052 = vmatprep.mubr.bf16.mxu1 %v2511_v13 }
  0xef   : > { %1892 = vmatmul.mubr.bf16.gmra.mrb[100].mxu0 %v2508_v18  ;;  %v293_v18 = vld [vmem:[%s3440_s28 + $0x398] sm:$0xff] }
  0xf0   : > { %2053 = vmatmul.mubr.bf16.gmra.mrb[100].mxu1 %v2510_v19  ;;  %1899 = vmatprep.mubr.bf16.mxu0 %v2517_v20  ;;  %v297_v19 = vld [vmem:[%s3440_s28 + $0x3b8] sm:$0xff] }
  0xf1   : > { %2060 = vmatprep.mubr.bf16.mxu1 %v2519_v21  ;;  %v2551_v31 = vcombine.high %v293_v18, %v297_v19 }
  0xf7   : > { %1900 = vmatmul.mubr.bf16.gmra.mrb[104].mxu0 %v2516_v26  ;;  %v2542_v26 = vcombine.low %v285_v58, %v289_v59 }
  0xf8   : > { %2061 = vmatmul.mubr.bf16.gmra.mrb[104].mxu1 %v2518_v27  ;;  %1907 = vmatprep.mubr.bf16.mxu0 %v2525_v28  ;;  %v2549_v27 = vcombine.high %v292_v14, %v296_v15 }
  0xf9   : > { %2068 = vmatprep.mubr.bf16.mxu1 %v2527_v29 }
  0xfa   : > { %v2802_v32 = vpop.f32.mrb[0].mxu0 }
  0xfb   : > { %v2914_v35 = vpop.f32.mrb[0].mxu1  ;;  %v2803_v37 = vpop.f32.mrb[1].mxu0 }
  0xfc   : > { %v2804_v39 = vadd.f32 %v2803_v37, %v2802_v32  ;;  %v2915_v40 = vpop.f32.mrb[1].mxu1  ;;  %v2805_v41 = vpop.f32.mrb[2].mxu0 }
  0xfd   : > { %v2916_v44 = vadd.f32 %v2915_v40, %v2914_v35  ;;  %v2917_v45 = vpop.f32.mrb[2].mxu1  ;;  %v2806_v46 = vpop.f32.mrb[3].mxu0  ;;  %v304_v40 = vld [vmem:[%s3440_s28 + $0x3f0] sm:$0xff] }
  0xfe   : > { %v1500_v48 = vadd.f32 %v2804_v39, %v3663_v36  ;;  %v2807_v49 = vadd.f32 %v2806_v46, %v2805_v41  ;;  %v2918_v50 = vpop.f32.mrb[3].mxu1  ;;  %v300_v39 = vld [vmem:[%s3440_s28 + $0x3d0] sm:$0xff] }
  0xff   : > { %v2919_v51 = vadd.f32 %v2918_v50, %v2917_v45  ;;  %1908 = vmatmul.mubr.bf16.gmra.mrb[108].mxu0 %v2524_v38 }
 0x100   : > { %v3666_v52 = vadd.f32 %v2916_v44, %v1500_v48  ;;  %v1503_v53 = vadd.f32 %v2807_v49, %v3663_v36  ;;  %2069 = vmatmul.mubr.bf16.gmra.mrb[108].mxu1 %v2526_v42  ;;  %1915 = vmatprep.mubr.bf16.mxu0 %v2533_v43  ;;  %v301_v43 = vld [vmem:[%s3440_s28 + $0x3d8] sm:$0xff] }
 0x101   : > { %2076 = vmatprep.mubr.bf16.mxu1 %v2535_v47  ;;  %v305_v44 = vld [vmem:[%s3440_s28 + $0x3f8] sm:$0xff]  ;;  %v2548_v47 = vcombine.low %v292_v14, %v296_v15  ;;  %s2430_s28 = sshll.u32 %s3835_s21, 2 }
 0x102   : > { %v3671_v56 = vadd.f32 %v2919_v51, %v1503_v53  ;;  %v2808_v57 = vpop.f32.mrb[4].mxu0  ;;  %v2550_v51 = vcombine.low %v293_v18, %v297_v19  ;;  %v2557_v53 = vcombine.high %v300_v39, %v304_v40  ;;  %v2559_v58 = vcombine.high %v301_v43, %v305_v44  ;;  %s3779_s29 = scalar_lea.vmem %s3833_s3, %s2430_s28 }
 0x103   : > { %v2920_v60 = vpop.f32.mrb[4].mxu1  ;;  %v2809_v61 = vpop.f32.mrb[5].mxu0 }
 0x104   : > { %v2810_v63 = vadd.f32 %v2809_v61, %v2808_v57  ;;  %v2921_v0 = vpop.f32.mrb[5].mxu1  ;;  %v2811_v1 = vpop.f32.mrb[6].mxu0 }
 0x105   : > { %v2922_v4 = vadd.f32 %v2921_v0, %v2920_v60  ;;  %v2923_v5 = vpop.f32.mrb[6].mxu1  ;;  %v2812_v6 = vpop.f32.mrb[7].mxu0 }
 0x106   : > { %v1508_v8 = vadd.f32 %v2810_v63, %v3663_v36  ;;  %v2813_v9 = vadd.f32 %v2812_v6, %v2811_v1  ;;  %v2924_v10 = vpop.f32.mrb[7].mxu1 }
 0x107   : > { %v2925_v11 = vadd.f32 %v2924_v10, %v2923_v5  ;;  %1916 = vmatmul.mubr.bf16.gmra.mrb[112].mxu0 %v2532_v62  ;;  %v2556_v5 = vcombine.low %v300_v39, %v304_v40 }
 0x108   : > { %v3676_v12 = vadd.f32 %v2922_v4, %v1508_v8  ;;  %v1511_v13 = vadd.f32 %v2813_v9, %v3663_v36  ;;  %2077 = vmatmul.mubr.bf16.gmra.mrb[112].mxu1 %v2534_v2  ;;  %1923 = vmatprep.mubr.bf16.mxu0 %v2541_v3  ;;  %v2558_v9 = vcombine.low %v301_v43, %v305_v44 }
 0x109   : > { %2084 = vmatprep.mubr.bf16.mxu1 %v2543_v7 }
 0x10a   : > { %v3681_v16 = vadd.f32 %v2925_v11, %v1511_v13  ;;  %v2814_v17 = vpop.f32.mrb[8].mxu0 }
 0x10b   : > { %v2926_v20 = vpop.f32.mrb[8].mxu1  ;;  %v2815_v21 = vpop.f32.mrb[9].mxu0 }
 0x10c   : > { %v2816_v23 = vadd.f32 %v2815_v21, %v2814_v17  ;;  %v2927_v24 = vpop.f32.mrb[9].mxu1  ;;  %v2817_v25 = vpop.f32.mrb[10].mxu0 }
 0x10d   : > { %v2928_v28 = vadd.f32 %v2927_v24, %v2926_v20  ;;  %v2929_v29 = vpop.f32.mrb[10].mxu1  ;;  %v2818_v30 = vpop.f32.mrb[11].mxu0 }
 0x10e   : > { %v1516_v32 = vadd.f32 %v2816_v23, %v3663_v36  ;;  %v2819_v33 = vadd.f32 %v2818_v30, %v2817_v25  ;;  %v2930_v34 = vpop.f32.mrb[11].mxu1 }
 0x10f   : > { %v2931_v35 = vadd.f32 %v2930_v34, %v2929_v29  ;;  %1924 = vmatmul.mubr.bf16.gmra.mrb[116].mxu0 %v2540_v22 }
 0x110   : > { %v3686_v37 = vadd.f32 %v2928_v28, %v1516_v32  ;;  %v1519_v38 = vadd.f32 %v2819_v33, %v3663_v36  ;;  %2085 = vmatmul.mubr.bf16.gmra.mrb[116].mxu1 %v2542_v26  ;;  %1931 = vmatprep.mubr.bf16.mxu0 %v2549_v27 }
 0x111   : > { %2092 = vmatprep.mubr.bf16.mxu1 %v2551_v31 }
 0x112   : > { %v3691_v41 = vadd.f32 %v2931_v35, %v1519_v38  ;;  %v2820_v42 = vpop.f32.mrb[12].mxu0 }
 0x113   : > { %v2932_v45 = vpop.f32.mrb[12].mxu1  ;;  %v2821_v46 = vpop.f32.mrb[13].mxu0 }
 0x114   : > { %v2822_v48 = vadd.f32 %v2821_v46, %v2820_v42  ;;  %v2933_v49 = vpop.f32.mrb[13].mxu1  ;;  %v2823_v50 = vpop.f32.mrb[14].mxu0 }
 0x115   : > { %v2934_v54 = vadd.f32 %v2933_v49, %v2932_v45  ;;  %v2935_v55 = vpop.f32.mrb[14].mxu1  ;;  %v2824_v57 = vpop.f32.mrb[15].mxu0 }
 0x116   : > { %v1524_v59 = vadd.f32 %v2822_v48, %v3663_v36  ;;  %v2825_v60 = vadd.f32 %v2824_v57, %v2823_v50  ;;  %v2936_v61 = vpop.f32.mrb[15].mxu1 }
 0x117   : > { %v2937_v62 = vadd.f32 %v2936_v61, %v2935_v55  ;;  %1932 = vmatmul.mubr.bf16.gmra.mrb[120].mxu0 %v2548_v47 }
 0x118   : > { %v3696_v63 = vadd.f32 %v2934_v54, %v1524_v59  ;;  %v1527_v0 = vadd.f32 %v2825_v60, %v3663_v36  ;;  %2093 = vmatmul.mubr.bf16.gmra.mrb[120].mxu1 %v2550_v51  ;;  %1939 = vmatprep.mubr.bf16.mxu0 %v2557_v53 }
 0x119   : > { %2100 = vmatprep.mubr.bf16.mxu1 %v2559_v58 }
 0x11a   : > { %v3699_v1 = vadd.f32 %v2937_v62, %v1527_v0  ;;  %v2826_v2 = vpop.f32.mrb[16].mxu0 }
 0x11b   : > { %v2938_v3 = vpop.f32.mrb[16].mxu1  ;;  %v2827_v4 = vpop.f32.mrb[17].mxu0 }
 0x11c   : > { %v2828_v6 = vadd.f32 %v2827_v4, %v2826_v2  ;;  %v2939_v7 = vpop.f32.mrb[17].mxu1  ;;  %v2829_v8 = vpop.f32.mrb[18].mxu0 }
 0x11d   : > { %v2940_v10 = vadd.f32 %v2939_v7, %v2938_v3  ;;  %v2941_v11 = vpop.f32.mrb[18].mxu1  ;;  %v2830_v13 = vpop.f32.mrb[19].mxu0 }
 0x11e   : > { %v1532_v14 = vadd.f32 %v2828_v6, %v3663_v36  ;;  %v2831_v15 = vadd.f32 %v2830_v13, %v2829_v8  ;;  %v2942_v17 = vpop.f32.mrb[19].mxu1 }
 0x11f   : > { %v2943_v18 = vadd.f32 %v2942_v17, %v2941_v11  ;;  %1940 = vmatmul.mubr.bf16.gmra.mrb[124].mxu0 %v2556_v5 }
 0x120   : > { %v3702_v19 = vadd.f32 %v2940_v10, %v1532_v14  ;;  %v1535_v20 = vadd.f32 %v2831_v15, %v3663_v36  ;;  %2101 = vmatmul.mubr.bf16.gmra.mrb[124].mxu1 %v2558_v9 }
 0x122   : > { %v3705_v21 = vadd.f32 %v2943_v18, %v1535_v20  ;;  %v2832_v22 = vpop.f32.mrb[20].mxu0 }
 0x123   : > { %v2944_v23 = vpop.f32.mrb[20].mxu1  ;;  %v2833_v24 = vpop.f32.mrb[21].mxu0 }
 0x124   : > { %v2834_v25 = vadd.f32 %v2833_v24, %v2832_v22  ;;  %v2945_v26 = vpop.f32.mrb[21].mxu1  ;;  %v2835_v27 = vpop.f32.mrb[22].mxu0 }
 0x125   : > { %v2946_v28 = vadd.f32 %v2945_v26, %v2944_v23  ;;  %v2947_v29 = vpop.f32.mrb[22].mxu1  ;;  %v2836_v30 = vpop.f32.mrb[23].mxu0 }
 0x126   : > { %v1540_v31 = vadd.f32 %v2834_v25, %v3663_v36  ;;  %v2837_v32 = vadd.f32 %v2836_v30, %v2835_v27  ;;  %v2948_v33 = vpop.f32.mrb[23].mxu1 }
 0x127   : > { %v2949_v34 = vadd.f32 %v2948_v33, %v2947_v29 }
 0x128   : > { %v3708_v35 = vadd.f32 %v2946_v28, %v1540_v31  ;;  %v1543_v38 = vadd.f32 %v2837_v32, %v3663_v36 }
 0x12a   : > { %v3711_v39 = vadd.f32 %v2949_v34, %v1543_v38  ;;  %v2838_v40 = vpop.f32.mrb[24].mxu0 }
 0x12b   : > { %v2950_v42 = vpop.f32.mrb[24].mxu1  ;;  %v2839_v43 = vpop.f32.mrb[25].mxu0 }
 0x12c   : > { %v2840_v44 = vadd.f32 %v2839_v43, %v2838_v40  ;;  %v2951_v45 = vpop.f32.mrb[25].mxu1  ;;  %v2841_v46 = vpop.f32.mrb[26].mxu0 }
 0x12d   : > { %v2952_v47 = vadd.f32 %v2951_v45, %v2950_v42  ;;  %v2953_v48 = vpop.f32.mrb[26].mxu1  ;;  %v2842_v49 = vpop.f32.mrb[27].mxu0 }
 0x12e   : > { %v1548_v50 = vadd.f32 %v2840_v44, %v3663_v36  ;;  %v2843_v51 = vadd.f32 %v2842_v49, %v2841_v46  ;;  %v2954_v53 = vpop.f32.mrb[27].mxu1 }
 0x12f   : > { %v2955_v54 = vadd.f32 %v2954_v53, %v2953_v48 }
 0x130   : > { %v3714_v55 = vadd.f32 %v2952_v47, %v1548_v50  ;;  %v1551_v57 = vadd.f32 %v2843_v51, %v3663_v36 }
 0x132   : > { %v3717_v58 = vadd.f32 %v2955_v54, %v1551_v57  ;;  %v2844_v59 = vpop.f32.mrb[28].mxu0 }
 0x133   : > { %v2956_v60 = vpop.f32.mrb[28].mxu1  ;;  %v2845_v61 = vpop.f32.mrb[29].mxu0 }
 0x134   : > { %v2846_v62 = vadd.f32 %v2845_v61, %v2844_v59  ;;  %v2957_v0 = vpop.f32.mrb[29].mxu1  ;;  %v2847_v2 = vpop.f32.mrb[30].mxu0 }
 0x135   : > { %v2958_v3 = vadd.f32 %v2957_v0, %v2956_v60  ;;  %v2959_v4 = vpop.f32.mrb[30].mxu1  ;;  %v2848_v5 = vpop.f32.mrb[31].mxu0 }
 0x136   : > { %v1556_v6 = vadd.f32 %v2846_v62, %v3663_v36  ;;  %v2849_v7 = vadd.f32 %v2848_v5, %v2847_v2  ;;  %v2960_v8 = vpop.f32.mrb[31].mxu1 }
 0x137   : > { %v2961_v9 = vadd.f32 %v2960_v8, %v2959_v4 }
 0x138   : > { %v3720_v10 = vadd.f32 %v2958_v3, %v1556_v6  ;;  %v1559_v11 = vadd.f32 %v2849_v7, %v3663_v36 }
 0x13a   : > { %v3723_v13 = vadd.f32 %v2961_v9, %v1559_v11  ;;  %v2850_v14 = vpop.f32.mrb[32].mxu0 }
 0x13b   : > { %v2962_v15 = vpop.f32.mrb[32].mxu1  ;;  %v2851_v17 = vpop.f32.mrb[33].mxu0 }
 0x13c   : > { %v2852_v18 = vadd.f32 %v2851_v17, %v2850_v14  ;;  %v2963_v20 = vpop.f32.mrb[33].mxu1  ;;  %v2853_v22 = vpop.f32.mrb[34].mxu0 }
 0x13d   : > { %v2964_v23 = vadd.f32 %v2963_v20, %v2962_v15  ;;  %v2965_v24 = vpop.f32.mrb[34].mxu1  ;;  %v2854_v25 = vpop.f32.mrb[35].mxu0 }
 0x13e   : > { %v1564_v26 = vadd.f32 %v2852_v18, %v3663_v36  ;;  %v2855_v27 = vadd.f32 %v2854_v25, %v2853_v22  ;;  %v2966_v28 = vpop.f32.mrb[35].mxu1 }
 0x13f   : > { %v2967_v29 = vadd.f32 %v2966_v28, %v2965_v24 }
 0x140   : > { %v3726_v30 = vadd.f32 %v2964_v23, %v1564_v26  ;;  %v1567_v31 = vadd.f32 %v2855_v27, %v3663_v36 }
 0x142   : > { %v3729_v32 = vadd.f32 %v2967_v29, %v1567_v31  ;;  %v2856_v33 = vpop.f32.mrb[36].mxu0 }
 0x143   : > { %v2968_v34 = vpop.f32.mrb[36].mxu1  ;;  %v2857_v38 = vpop.f32.mrb[37].mxu0 }
 0x144   : > { %v2858_v40 = vadd.f32 %v2857_v38, %v2856_v33  ;;  %v2969_v42 = vpop.f32.mrb[37].mxu1  ;;  %v2859_v43 = vpop.f32.mrb[38].mxu0 }
 0x145   : > { %v2970_v44 = vadd.f32 %v2969_v42, %v2968_v34  ;;  %v2971_v45 = vpop.f32.mrb[38].mxu1  ;;  %v2860_v46 = vpop.f32.mrb[39].mxu0 }
 0x146   : > { %v1572_v47 = vadd.f32 %v2858_v40, %v3663_v36  ;;  %v2861_v48 = vadd.f32 %v2860_v46, %v2859_v43  ;;  %v2972_v49 = vpop.f32.mrb[39].mxu1 }
 0x147   : > { %v2973_v50 = vadd.f32 %v2972_v49, %v2971_v45 }
 0x148   : > { %v3732_v51 = vadd.f32 %v2970_v44, %v1572_v47  ;;  %v1575_v53 = vadd.f32 %v2861_v48, %v3663_v36 }
 0x14a   : > { %v3735_v54 = vadd.f32 %v2973_v50, %v1575_v53  ;;  %v2862_v57 = vpop.f32.mrb[40].mxu0 }
 0x14b   : > { %v2974_v59 = vpop.f32.mrb[40].mxu1  ;;  %v2863_v60 = vpop.f32.mrb[41].mxu0 }
 0x14c   : > { %v2864_v61 = vadd.f32 %v2863_v60, %v2862_v57  ;;  %v2975_v62 = vpop.f32.mrb[41].mxu1  ;;  %v2865_v0 = vpop.f32.mrb[42].mxu0 }
 0x14d   : > { %v2976_v2 = vadd.f32 %v2975_v62, %v2974_v59  ;;  %v2977_v3 = vpop.f32.mrb[42].mxu1  ;;  %v2866_v4 = vpop.f32.mrb[43].mxu0 }
 0x14e   : > { %v1580_v5 = vadd.f32 %v2864_v61, %v3663_v36  ;;  %v2867_v6 = vadd.f32 %v2866_v4, %v2865_v0  ;;  %v2978_v7 = vpop.f32.mrb[43].mxu1 }
 0x14f   : > { %v2979_v8 = vadd.f32 %v2978_v7, %v2977_v3 }
 0x150   : > { %v3738_v9 = vadd.f32 %v2976_v2, %v1580_v5  ;;  %v1583_v11 = vadd.f32 %v2867_v6, %v3663_v36 }
 0x152   : > { %v3741_v14 = vadd.f32 %v2979_v8, %v1583_v11  ;;  %v2868_v15 = vpop.f32.mrb[44].mxu0 }
 0x153   : > { %v2980_v17 = vpop.f32.mrb[44].mxu1  ;;  %v2869_v18 = vpop.f32.mrb[45].mxu0 }
 0x154   : > { %v2870_v20 = vadd.f32 %v2869_v18, %v2868_v15  ;;  %v2981_v22 = vpop.f32.mrb[45].mxu1  ;;  %v2871_v23 = vpop.f32.mrb[46].mxu0 }
 0x155   : > { %v2982_v24 = vadd.f32 %v2981_v22, %v2980_v17  ;;  %v2983_v25 = vpop.f32.mrb[46].mxu1  ;;  %v2872_v26 = vpop.f32.mrb[47].mxu0 }
 0x156   : > { %v1588_v27 = vadd.f32 %v2870_v20, %v3663_v36  ;;  %v2873_v28 = vadd.f32 %v2872_v26, %v2871_v23  ;;  %v2984_v29 = vpop.f32.mrb[47].mxu1 }
 0x157   : > { %v2985_v31 = vadd.f32 %v2984_v29, %v2983_v25 }
 0x158   : > { %v3744_v33 = vadd.f32 %v2982_v24, %v1588_v27  ;;  %v1591_v34 = vadd.f32 %v2873_v28, %v3663_v36 }
 0x15a   : > { %v3747_v38 = vadd.f32 %v2985_v31, %v1591_v34  ;;  %v2874_v40 = vpop.f32.mrb[48].mxu0 }
 0x15b   : > { %v2986_v42 = vpop.f32.mrb[48].mxu1  ;;  %v2875_v43 = vpop.f32.mrb[49].mxu0 }
 0x15c   : > { %v2876_v44 = vadd.f32 %v2875_v43, %v2874_v40  ;;  %v2987_v45 = vpop.f32.mrb[49].mxu1  ;;  %v2877_v46 = vpop.f32.mrb[50].mxu0 }
 0x15d   : > { %v2988_v47 = vadd.f32 %v2987_v45, %v2986_v42  ;;  %v2989_v48 = vpop.f32.mrb[50].mxu1  ;;  %v2878_v49 = vpop.f32.mrb[51].mxu0 }
 0x15e   : > { %v1596_v50 = vadd.f32 %v2876_v44, %v3663_v36  ;;  %v2879_v53 = vadd.f32 %v2878_v49, %v2877_v46  ;;  %v2990_v57 = vpop.f32.mrb[51].mxu1 }
 0x15f   : > { %v2991_v59 = vadd.f32 %v2990_v57, %v2989_v48 }
 0x160   : > { %v3750_v60 = vadd.f32 %v2988_v47, %v1596_v50  ;;  %v1599_v61 = vadd.f32 %v2879_v53, %v3663_v36 }
 0x162   : > { %v3753_v62 = vadd.f32 %v2991_v59, %v1599_v61  ;;  %v2880_v0 = vpop.f32.mrb[52].mxu0 }
 0x163   : > { %v2992_v2 = vpop.f32.mrb[52].mxu1  ;;  %v2881_v3 = vpop.f32.mrb[53].mxu0 }
 0x164   : > { %v2882_v4 = vadd.f32 %v2881_v3, %v2880_v0  ;;  %v2993_v5 = vpop.f32.mrb[53].mxu1  ;;  %v2883_v6 = vpop.f32.mrb[54].mxu0 }
 0x165   : > { %v2994_v7 = vadd.f32 %v2993_v5, %v2992_v2  ;;  %v2995_v8 = vpop.f32.mrb[54].mxu1  ;;  %v2884_v11 = vpop.f32.mrb[55].mxu0 }
 0x166   : > { %v1604_v15 = vadd.f32 %v2882_v4, %v3663_v36  ;;  %v2885_v17 = vadd.f32 %v2884_v11, %v2883_v6  ;;  %v2996_v18 = vpop.f32.mrb[55].mxu1 }
 0x167   : > { %v2997_v20 = vadd.f32 %v2996_v18, %v2995_v8 }
 0x168   : > { %v3756_v22 = vadd.f32 %v2994_v7, %v1604_v15  ;;  %v1607_v23 = vadd.f32 %v2885_v17, %v3663_v36 }
 0x16a   : > { %v3759_v24 = vadd.f32 %v2997_v20, %v1607_v23  ;;  %v2886_v25 = vpop.f32.mrb[56].mxu0 }
 0x16b   : > { %v2998_v26 = vpop.f32.mrb[56].mxu1  ;;  %v2887_v27 = vpop.f32.mrb[57].mxu0 }
 0x16c   : > { %v2888_v28 = vadd.f32 %v2887_v27, %v2886_v25  ;;  %v2999_v29 = vpop.f32.mrb[57].mxu1  ;;  %v2889_v31 = vpop.f32.mrb[58].mxu0 }
 0x16d   : > { %v3000_v34 = vadd.f32 %v2999_v29, %v2998_v26  ;;  %v3001_v40 = vpop.f32.mrb[58].mxu1  ;;  %v2890_v42 = vpop.f32.mrb[59].mxu0 }
 0x16e   : > { %v1612_v43 = vadd.f32 %v2888_v28, %v3663_v36  ;;  %v2891_v44 = vadd.f32 %v2890_v42, %v2889_v31  ;;  %v3002_v45 = vpop.f32.mrb[59].mxu1 }
 0x16f   : > { %v3003_v46 = vadd.f32 %v3002_v45, %v3001_v40 }
 0x170   : > { %v3762_v47 = vadd.f32 %v3000_v34, %v1612_v43  ;;  %v1615_v48 = vadd.f32 %v2891_v44, %v3663_v36 }
 0x172   : > { %v3765_v49 = vadd.f32 %v3003_v46, %v1615_v48  ;;  %v2892_v50 = vpop.f32.mrb[60].mxu0 }
 0x173   : > { %v3004_v53 = vpop.f32.mrb[60].mxu1  ;;  %v2893_v57 = vpop.f32.mrb[61].mxu0 }
 0x174   : > { %v2894_v59 = vadd.f32 %v2893_v57, %v2892_v50  ;;  %v3005_v61 = vpop.f32.mrb[61].mxu1  ;;  %v2895_v0 = vpop.f32.mrb[62].mxu0 }
 0x175   : > { %v3006_v2 = vadd.f32 %v3005_v61, %v3004_v53  ;;  %v3007_v3 = vpop.f32.mrb[62].mxu1  ;;  %v2896_v4 = vpop.f32.mrb[63].mxu0 }
 0x176   : > { %v1620_v5 = vadd.f32 %v2894_v59, %v3663_v36  ;;  %v2897_v6 = vadd.f32 %v2896_v4, %v2895_v0  ;;  %v3008_v7 = vpop.f32.mrb[63].mxu1 }
 0x177   : > { %v3009_v8 = vadd.f32 %v3008_v7, %v3007_v3 }
 0x178   : > { %v3768_v11 = vadd.f32 %v3006_v2, %v1620_v5  ;;  %v1623_v15 = vadd.f32 %v2897_v6, %v3663_v36 }
 0x17a   : > { %v3771_v17 = vadd.f32 %v3009_v8, %v1623_v15  ;;  %v3026_v18 = vpop.f32.mrb[64].mxu0 }
 0x17b   : > { %v3138_v20 = vpop.f32.mrb[64].mxu1  ;;  %v3027_v23 = vpop.f32.mrb[65].mxu0 }
 0x17c   : > { %v3028_v25 = vadd.f32 %v3027_v23, %v3026_v18  ;;  %v3139_v26 = vpop.f32.mrb[65].mxu1  ;;  %v3029_v27 = vpop.f32.mrb[66].mxu0 }
 0x17d   : > { %v3140_v28 = vadd.f32 %v3139_v26, %v3138_v20  ;;  %v3141_v29 = vpop.f32.mrb[66].mxu1  ;;  %v3030_v31 = vpop.f32.mrb[67].mxu0 }
 0x17e   : > { %v1822_v34 = vadd.f32 %v3028_v25, %v3666_v52  ;;  %v3031_v40 = vadd.f32 %v3030_v31, %v3029_v27  ;;  %v3142_v42 = vpop.f32.mrb[67].mxu1 }
 0x17f   : > { %v3143_v43 = vadd.f32 %v3142_v42, %v3141_v29 }
 0x180   : > { %v1983_v44 = vadd.f32 %v3140_v28, %v1822_v34  ;;  %v1825_v36 = vadd.f32 %v3031_v40, %v3671_v56 }
 0x182   : > { %v2141_v45 = vmul.f32 0.2, %v1983_v44  ;;  %v1986_v46 = vadd.f32 %v3143_v43, %v1825_v36  ;;  %v3032_v48 = vpop.f32.mrb[68].mxu0  ;;  %vm2109_vm0 = vcmp.gt.f32.partialorder %v1983_v44, 0.0 }
 0x183   : > { %v3144_v50 = vpop.f32.mrb[68].mxu1  ;;  %v3033_v53 = vpop.f32.mrb[69].mxu0 }
 0x184   : > { %vm2110_vm1 = vcmp.gt.f32.partialorder %v1986_v46, 0.0  ;;  %v2142_v57 = vmul.f32 0.2, %v1986_v46  ;;  %v3034_v59 = vadd.f32 %v3033_v53, %v3032_v48  ;;  %v3145_v61 = vpop.f32.mrb[69].mxu1  ;;  %v3035_v0 = vpop.f32.mrb[70].mxu0  ;;  %v2173_v4 = vsel %vm2109_vm0, %v1983_v44, %v2141_v45 }
 0x185   : > { %v3146_v2 = vadd.f32 %v3145_v61, %v3144_v50  ;;  %v3147_v52 = vpop.f32.mrb[70].mxu1  ;;  %v3036_v3 = vpop.f32.mrb[71].mxu0 }
 0x186   : > { %v2174_v56 = vsel %vm2110_vm1, %v1986_v46, %v2142_v57  ;;  %v1830_v5 = vadd.f32 %v3034_v59, %v3676_v12  ;;  %v3037_v6 = vadd.f32 %v3036_v3, %v3035_v0  ;;  %v3148_v7 = vpop.f32.mrb[71].mxu1 }
 0x187   : > { %v2694_v8 = vpack.c.bf16 %v2174_v56, %v2173_v4  ;;  %v3149_v15 = vadd.f32 %v3148_v7, %v3147_v52 }
 0x188   : > { %v1991_v18 = vadd.f32 %v3146_v2, %v1830_v5  ;;  %v1833_v20 = vadd.f32 %v3037_v6, %v3681_v16 }
 0x189   : > { %2695 = vst [vmem:[%s3779_s29] sm:$0xff] %v2694_v8  }
 0x18a   : > { %v2143_v23 = vmul.f32 0.2, %v1991_v18  ;;  %v1994_v25 = vadd.f32 %v3149_v15, %v1833_v20  ;;  %v3038_v26 = vpop.f32.mrb[72].mxu0  ;;  %vm2111_vm2 = vcmp.gt.f32.partialorder %v1991_v18, 0.0 }
 0x18b   : > { %v3150_v27 = vpop.f32.mrb[72].mxu1  ;;  %v3039_v28 = vpop.f32.mrb[73].mxu0 }
 0x18c   : > { %vm2112_vm3 = vcmp.gt.f32.partialorder %v1994_v25, 0.0  ;;  %v2144_v29 = vmul.f32 0.2, %v1994_v25  ;;  %v3040_v31 = vadd.f32 %v3039_v28, %v3038_v26  ;;  %v3151_v34 = vpop.f32.mrb[73].mxu1  ;;  %v3041_v12 = vpop.f32.mrb[74].mxu0  ;;  %v2175_v44 = vsel %vm2111_vm2, %v1991_v18, %v2143_v23 }
 0x18d   : > { %v3152_v40 = vadd.f32 %v3151_v34, %v3150_v27  ;;  %v3153_v42 = vpop.f32.mrb[74].mxu1  ;;  %v3042_v43 = vpop.f32.mrb[75].mxu0 }
 0x18e   : > { %v2176_v36 = vsel %vm2112_vm3, %v1994_v25, %v2144_v29  ;;  %v1838_v16 = vadd.f32 %v3040_v31, %v3686_v37  ;;  %v3043_v45 = vadd.f32 %v3042_v43, %v3041_v12  ;;  %v3154_v46 = vpop.f32.mrb[75].mxu1 }
 0x18f   : > { %v2699_v48 = vpack.c.bf16 %v2176_v36, %v2175_v44  ;;  %v3155_v50 = vadd.f32 %v3154_v46, %v3153_v42 }
 0x190   : > { %v1999_v53 = vadd.f32 %v3152_v40, %v1838_v16  ;;  %v1841_v57 = vadd.f32 %v3043_v45, %v3691_v41 }
 0x191   : > { %2771 = vst [vmem:[%s3779_s29 + $0x8] sm:$0xff] %v2699_v48  }
 0x192   : > { %v2145_v59 = vmul.f32 0.2, %v1999_v53  ;;  %v2002_v61 = vadd.f32 %v3155_v50, %v1841_v57  ;;  %v3044_v0 = vpop.f32.mrb[76].mxu0  ;;  %vm2113_vm4 = vcmp.gt.f32.partialorder %v1999_v53, 0.0 }
 0x193   : > { %v3156_v2 = vpop.f32.mrb[76].mxu1  ;;  %v3045_v52 = vpop.f32.mrb[77].mxu0 }
 0x194   : > { %vm2114_vm5 = vcmp.gt.f32.partialorder %v2002_v61, 0.0  ;;  %v2146_v3 = vmul.f32 0.2, %v2002_v61  ;;  %v3046_v4 = vadd.f32 %v3045_v52, %v3044_v0  ;;  %v3157_v56 = vpop.f32.mrb[77].mxu1  ;;  %v3047_v37 = vpop.f32.mrb[78].mxu0  ;;  %v2177_v8 = vsel %vm2113_vm4, %v1999_v53, %v2145_v59 }
 0x195   : > { %v3158_v5 = vadd.f32 %v3157_v56, %v3156_v2  ;;  %v3159_v6 = vpop.f32.mrb[78].mxu1  ;;  %v3048_v7 = vpop.f32.mrb[79].mxu0 }
 0x196   : > { %v2178_v15 = vsel %vm2114_vm5, %v2002_v61, %v2146_v3  ;;  %v1846_v41 = vadd.f32 %v3046_v4, %v3696_v63  ;;  %v3049_v18 = vadd.f32 %v3048_v7, %v3047_v37  ;;  %v3160_v20 = vpop.f32.mrb[79].mxu1 }
 0x197   : > { %v2704_v23 = vpack.c.bf16 %v2178_v15, %v2177_v8  ;;  %v3161_v25 = vadd.f32 %v3160_v20, %v3159_v6 }
 0x198   : > { %v2007_v26 = vadd.f32 %v3158_v5, %v1846_v41  ;;  %v1849_v27 = vadd.f32 %v3049_v18, %v3699_v1 }
 0x199   : > { %2772 = vst [vmem:[%s3779_s29 + $0x10] sm:$0xff] %v2704_v23  }
 0x19a   : > { %v2147_v28 = vmul.f32 0.2, %v2007_v26  ;;  %v2010_v29 = vadd.f32 %v3161_v25, %v1849_v27  ;;  %v3050_v31 = vpop.f32.mrb[80].mxu0  ;;  %vm2115_vm6 = vcmp.gt.f32.partialorder %v2007_v26, 0.0 }
 0x19b   : > { %v3162_v34 = vpop.f32.mrb[80].mxu1  ;;  %v3051_v12 = vpop.f32.mrb[81].mxu0 }
 0x19c   : > { %vm2116_vm7 = vcmp.gt.f32.partialorder %v2010_v29, 0.0  ;;  %v2148_v40 = vmul.f32 0.2, %v2010_v29  ;;  %v3052_v42 = vadd.f32 %v3051_v12, %v3050_v31  ;;  %v3163_v43 = vpop.f32.mrb[81].mxu1  ;;  %v3053_v63 = vpop.f32.mrb[82].mxu0  ;;  %v2179_v45 = vsel %vm2115_vm6, %v2007_v26, %v2147_v28 }
 0x19d   : > { %v3164_v44 = vadd.f32 %v3163_v43, %v3162_v34  ;;  %v3165_v36 = vpop.f32.mrb[82].mxu1  ;;  %v3054_v16 = vpop.f32.mrb[83].mxu0 }
 0x19e   : > { %v2180_v46 = vsel %vm2116_vm7, %v2010_v29, %v2148_v40  ;;  %v1854_v1 = vadd.f32 %v3052_v42, %v3702_v19  ;;  %v3055_v48 = vadd.f32 %v3054_v16, %v3053_v63  ;;  %v3166_v50 = vpop.f32.mrb[83].mxu1 }
 0x19f   : > { %v2709_v53 = vpack.c.bf16 %v2180_v46, %v2179_v45  ;;  %v3167_v57 = vadd.f32 %v3166_v50, %v3165_v36 }
 0x1a0   : > { %v2015_v59 = vadd.f32 %v3164_v44, %v1854_v1  ;;  %v1857_v61 = vadd.f32 %v3055_v48, %v3705_v21 }
 0x1a1   : > { %2773 = vst [vmem:[%s3779_s29 + $0x18] sm:$0xff] %v2709_v53  }
 0x1a2   : > { %v2149_v0 = vmul.f32 0.2, %v2015_v59  ;;  %v2018_v2 = vadd.f32 %v3167_v57, %v1857_v61  ;;  %v3056_v52 = vpop.f32.mrb[84].mxu0  ;;  %vm2117_vm8 = vcmp.gt.f32.partialorder %v2015_v59, 0.0 }
 0x1a3   : > { %v3168_v3 = vpop.f32.mrb[84].mxu1  ;;  %v3057_v4 = vpop.f32.mrb[85].mxu0 }
 0x1a4   : > { %vm2118_vm9 = vcmp.gt.f32.partialorder %v2018_v2, 0.0  ;;  %v2150_v56 = vmul.f32 0.2, %v2018_v2  ;;  %v3058_v37 = vadd.f32 %v3057_v4, %v3056_v52  ;;  %v3169_v5 = vpop.f32.mrb[85].mxu1  ;;  %v3059_v19 = vpop.f32.mrb[86].mxu0  ;;  %v2181_v15 = vsel %vm2117_vm8, %v2015_v59, %v2149_v0 }
 0x1a5   : > { %v3170_v6 = vadd.f32 %v3169_v5, %v3168_v3  ;;  %v3171_v7 = vpop.f32.mrb[86].mxu1  ;;  %v3060_v8 = vpop.f32.mrb[87].mxu0 }
 0x1a6   : > { %v2182_v41 = vsel %vm2118_vm9, %v2018_v2, %v2150_v56  ;;  %v1862_v21 = vadd.f32 %v3058_v37, %v3708_v35  ;;  %v3061_v18 = vadd.f32 %v3060_v8, %v3059_v19  ;;  %v3172_v20 = vpop.f32.mrb[87].mxu1 }
 0x1a7   : > { %v2714_v23 = vpack.c.bf16 %v2182_v41, %v2181_v15  ;;  %v3173_v25 = vadd.f32 %v3172_v20, %v3171_v7 }
 0x1a8   : > { %v2023_v26 = vadd.f32 %v3170_v6, %v1862_v21  ;;  %v1865_v27 = vadd.f32 %v3061_v18, %v3711_v39 }
 0x1a9   : > { %2774 = vst [vmem:[%s3779_s29 + $0x20] sm:$0xff] %v2714_v23  }
 0x1aa   : > { %v2151_v28 = vmul.f32 0.2, %v2023_v26  ;;  %v2026_v29 = vadd.f32 %v3173_v25, %v1865_v27  ;;  %v3062_v31 = vpop.f32.mrb[88].mxu0  ;;  %vm2119_vm10 = vcmp.gt.f32.partialorder %v2023_v26, 0.0 }
 0x1ab   : > { %v3174_v34 = vpop.f32.mrb[88].mxu1  ;;  %v3063_v12 = vpop.f32.mrb[89].mxu0 }
 0x1ac   : > { %vm2120_vm11 = vcmp.gt.f32.partialorder %v2026_v29, 0.0  ;;  %v2152_v40 = vmul.f32 0.2, %v2026_v29  ;;  %v3064_v42 = vadd.f32 %v3063_v12, %v3062_v31  ;;  %v3175_v43 = vpop.f32.mrb[89].mxu1  ;;  %v3065_v35 = vpop.f32.mrb[90].mxu0  ;;  %v2183_v16 = vsel %vm2119_vm10, %v2023_v26, %v2151_v28 }
 0x1ad   : > { %v3176_v63 = vadd.f32 %v3175_v43, %v3174_v34  ;;  %v3177_v44 = vpop.f32.mrb[90].mxu1  ;;  %v3066_v36 = vpop.f32.mrb[91].mxu0 }
 0x1ae   : > { %v2184_v45 = vsel %vm2120_vm11, %v2026_v29, %v2152_v40  ;;  %v1870_v39 = vadd.f32 %v3064_v42, %v3714_v55  ;;  %v3067_v46 = vadd.f32 %v3066_v36, %v3065_v35  ;;  %v3178_v1 = vpop.f32.mrb[91].mxu1 }
 0x1af   : > { %v2719_v48 = vpack.c.bf16 %v2184_v45, %v2183_v16  ;;  %v3179_v50 = vadd.f32 %v3178_v1, %v3177_v44 }
 0x1b0   : > { %v2031_v53 = vadd.f32 %v3176_v63, %v1870_v39  ;;  %v1873_v57 = vadd.f32 %v3067_v46, %v3717_v58 }
 0x1b1   : > { %2775 = vst [vmem:[%s3779_s29 + $0x28] sm:$0xff] %v2719_v48  }
 0x1b2   : > { %v2153_v59 = vmul.f32 0.2, %v2031_v53  ;;  %v2034_v61 = vadd.f32 %v3179_v50, %v1873_v57  ;;  %v3068_v0 = vpop.f32.mrb[92].mxu0  ;;  %vm2121_vm12 = vcmp.gt.f32.partialorder %v2031_v53, 0.0 }
 0x1b3   : > { %v3180_v2 = vpop.f32.mrb[92].mxu1  ;;  %v3069_v52 = vpop.f32.mrb[93].mxu0 }
 0x1b4   : > { %vm2122_vm13 = vcmp.gt.f32.partialorder %v2034_v61, 0.0  ;;  %v2154_v3 = vmul.f32 0.2, %v2034_v61  ;;  %v3070_v4 = vadd.f32 %v3069_v52, %v3068_v0  ;;  %v3181_v56 = vpop.f32.mrb[93].mxu1  ;;  %v3071_v55 = vpop.f32.mrb[94].mxu0  ;;  %v2185_v6 = vsel %vm2121_vm12, %v2031_v53, %v2153_v59 }
 0x1b5   : > { %v3182_v37 = vadd.f32 %v3181_v56, %v3180_v2  ;;  %v3183_v5 = vpop.f32.mrb[94].mxu1  ;;  %v3072_v19 = vpop.f32.mrb[95].mxu0 }
 0x1b6   : > { %v2186_v7 = vsel %vm2122_vm13, %v2034_v61, %v2154_v3  ;;  %v1878_v58 = vadd.f32 %v3070_v4, %v3720_v10  ;;  %v3073_v8 = vadd.f32 %v3072_v19, %v3071_v55  ;;  %v3184_v15 = vpop.f32.mrb[95].mxu1 }
 0x1b7   : > { %v2724_v41 = vpack.c.bf16 %v2186_v7, %v2185_v6  ;;  %v3185_v21 = vadd.f32 %v3184_v15, %v3183_v5 }
 0x1b8   : > { %v2039_v18 = vadd.f32 %v3182_v37, %v1878_v58  ;;  %v1881_v20 = vadd.f32 %v3073_v8, %v3723_v13 }
 0x1b9   : > { %2776 = vst [vmem:[%s3779_s29 + $0x30] sm:$0xff] %v2724_v41  }
 0x1ba   : > { %v2155_v23 = vmul.f32 0.2, %v2039_v18  ;;  %v2042_v25 = vadd.f32 %v3185_v21, %v1881_v20  ;;  %v3074_v26 = vpop.f32.mrb[96].mxu0  ;;  %vm2123_vm14 = vcmp.gt.f32.partialorder %v2039_v18, 0.0 }
 0x1bb   : > { %v3186_v27 = vpop.f32.mrb[96].mxu1  ;;  %v3075_v28 = vpop.f32.mrb[97].mxu0 }
 0x1bc   : > { %vm2124_vm15 = vcmp.gt.f32.partialorder %v2042_v25, 0.0  ;;  %v2156_v29 = vmul.f32 0.2, %v2042_v25  ;;  %v3076_v31 = vadd.f32 %v3075_v28, %v3074_v26  ;;  %v3187_v34 = vpop.f32.mrb[97].mxu1  ;;  %v3077_v10 = vpop.f32.mrb[98].mxu0  ;;  %v2187_v43 = vsel %vm2123_vm14, %v2039_v18, %v2155_v23 }
 0x1bd   : > { %v3188_v12 = vadd.f32 %v3187_v34, %v3186_v27  ;;  %v3189_v40 = vpop.f32.mrb[98].mxu1  ;;  %v3078_v42 = vpop.f32.mrb[99].mxu0 }
 0x1be   : > { %v2188_v35 = vsel %vm2124_vm15, %v2042_v25, %v2156_v29  ;;  %v1886_v13 = vadd.f32 %v3076_v31, %v3726_v30  ;;  %v3079_v63 = vadd.f32 %v3078_v42, %v3077_v10  ;;  %v3190_v44 = vpop.f32.mrb[99].mxu1 }
 0x1bf   : > { %v2729_v36 = vpack.c.bf16 %v2188_v35, %v2187_v43  ;;  %v3191_v16 = vadd.f32 %v3190_v44, %v3189_v40 }
 0x1c0   : > { %v2047_v45 = vadd.f32 %v3188_v12, %v1886_v13  ;;  %v1889_v39 = vadd.f32 %v3079_v63, %v3729_v32 }
 0x1c1   : > { %2777 = vst [vmem:[%s3779_s29 + $0x38] sm:$0xff] %v2729_v36  }
 0x1c2   : > { %v2157_v46 = vmul.f32 0.2, %v2047_v45  ;;  %v2050_v1 = vadd.f32 %v3191_v16, %v1889_v39  ;;  %v3080_v48 = vpop.f32.mrb[100].mxu0  ;;  %vm2125_vm0 = vcmp.gt.f32.partialorder %v2047_v45, 0.0 }
 0x1c3   : > { %v3192_v50 = vpop.f32.mrb[100].mxu1  ;;  %v3081_v53 = vpop.f32.mrb[101].mxu0 }
 0x1c4   : > { %vm2126_vm1 = vcmp.gt.f32.partialorder %v2050_v1, 0.0  ;;  %v2158_v57 = vmul.f32 0.2, %v2050_v1  ;;  %v3082_v59 = vadd.f32 %v3081_v53, %v3080_v48  ;;  %v3193_v61 = vpop.f32.mrb[101].mxu1  ;;  %v3083_v30 = vpop.f32.mrb[102].mxu0  ;;  %v2189_v3 = vsel %vm2125_vm0, %v2047_v45, %v2157_v46 }
 0x1c5   : > { %v3194_v0 = vadd.f32 %v3193_v61, %v3192_v50  ;;  %v3195_v2 = vpop.f32.mrb[102].mxu1  ;;  %v3084_v52 = vpop.f32.mrb[103].mxu0 }
 0x1c6   : > { %v2190_v4 = vsel %vm2126_vm1, %v2050_v1, %v2158_v57  ;;  %v1894_v32 = vadd.f32 %v3082_v59, %v3732_v51  ;;  %v3085_v56 = vadd.f32 %v3084_v52, %v3083_v30  ;;  %v3196_v55 = vpop.f32.mrb[103].mxu1 }
 0x1c7   : > { %v2734_v37 = vpack.c.bf16 %v2190_v4, %v2189_v3  ;;  %v3197_v5 = vadd.f32 %v3196_v55, %v3195_v2 }
 0x1c8   : > { %v2055_v19 = vadd.f32 %v3194_v0, %v1894_v32  ;;  %v1897_v6 = vadd.f32 %v3085_v56, %v3735_v54 }
 0x1c9   : > { %2778 = vst [vmem:[%s3779_s29 + $0x40] sm:$0xff] %v2734_v37  }
 0x1ca   : > { %v2159_v7 = vmul.f32 0.2, %v2055_v19  ;;  %v2058_v58 = vadd.f32 %v3197_v5, %v1897_v6  ;;  %v3086_v8 = vpop.f32.mrb[104].mxu0  ;;  %vm2127_vm2 = vcmp.gt.f32.partialorder %v2055_v19, 0.0 }
 0x1cb   : > { %v3198_v15 = vpop.f32.mrb[104].mxu1  ;;  %v3087_v41 = vpop.f32.mrb[105].mxu0 }
 0x1cc   : > { %vm2128_vm3 = vcmp.gt.f32.partialorder %v2058_v58, 0.0  ;;  %v2160_v21 = vmul.f32 0.2, %v2058_v58  ;;  %v3088_v18 = vadd.f32 %v3087_v41, %v3086_v8  ;;  %v3199_v20 = vpop.f32.mrb[105].mxu1  ;;  %v3089_v51 = vpop.f32.mrb[106].mxu0  ;;  %v2191_v27 = vsel %vm2127_vm2, %v2055_v19, %v2159_v7 }
 0x1cd   : > { %v3200_v23 = vadd.f32 %v3199_v20, %v3198_v15  ;;  %v3201_v25 = vpop.f32.mrb[106].mxu1  ;;  %v3090_v26 = vpop.f32.mrb[107].mxu0 }
 0x1ce   : > { %v2192_v28 = vsel %vm2128_vm3, %v2058_v58, %v2160_v21  ;;  %v1902_v54 = vadd.f32 %v3088_v18, %v3738_v9  ;;  %v3091_v29 = vadd.f32 %v3090_v26, %v3089_v51  ;;  %v3202_v31 = vpop.f32.mrb[107].mxu1 }
 0x1cf   : > { %v2739_v34 = vpack.c.bf16 %v2192_v28, %v2191_v27  ;;  %v3203_v10 = vadd.f32 %v3202_v31, %v3201_v25 }
 0x1d0   : > { %v2063_v12 = vadd.f32 %v3200_v23, %v1902_v54  ;;  %v1905_v40 = vadd.f32 %v3091_v29, %v3741_v14 }
 0x1d1   : > { %2779 = vst [vmem:[%s3779_s29 + $0x48] sm:$0xff] %v2739_v34  }
 0x1d2   : > { %v2161_v42 = vmul.f32 0.2, %v2063_v12  ;;  %v2066_v43 = vadd.f32 %v3203_v10, %v1905_v40  ;;  %v3092_v35 = vpop.f32.mrb[108].mxu0  ;;  %vm2129_vm4 = vcmp.gt.f32.partialorder %v2063_v12, 0.0 }
 0x1d3   : > { %v3204_v13 = vpop.f32.mrb[108].mxu1  ;;  %v3093_v63 = vpop.f32.mrb[109].mxu0 }
 0x1d4   : > { %vm2130_vm5 = vcmp.gt.f32.partialorder %v2066_v43, 0.0  ;;  %v2162_v44 = vmul.f32 0.2, %v2066_v43  ;;  %v3094_v36 = vadd.f32 %v3093_v63, %v3092_v35  ;;  %v3205_v16 = vpop.f32.mrb[109].mxu1  ;;  %v3095_v9 = vpop.f32.mrb[110].mxu0  ;;  %v2193_v1 = vsel %vm2129_vm4, %v2063_v12, %v2161_v42 }
 0x1d5   : > { %v3206_v45 = vadd.f32 %v3205_v16, %v3204_v13  ;;  %v3207_v39 = vpop.f32.mrb[110].mxu1  ;;  %v3096_v46 = vpop.f32.mrb[111].mxu0 }
 0x1d6   : > { %v2194_v48 = vsel %vm2130_vm5, %v2066_v43, %v2162_v44  ;;  %v1910_v14 = vadd.f32 %v3094_v36, %v3744_v33  ;;  %v3097_v50 = vadd.f32 %v3096_v46, %v3095_v9  ;;  %v3208_v53 = vpop.f32.mrb[111].mxu1 }
 0x1d7   : > { %v2744_v57 = vpack.c.bf16 %v2194_v48, %v2193_v1  ;;  %v3209_v59 = vadd.f32 %v3208_v53, %v3207_v39 }
 0x1d8   : > { %v2071_v61 = vadd.f32 %v3206_v45, %v1910_v14  ;;  %v1913_v30 = vadd.f32 %v3097_v50, %v3747_v38 }
 0x1d9   : > { %2780 = vst [vmem:[%s3779_s29 + $0x50] sm:$0xff] %v2744_v57  }
 0x1da   : > { %v2163_v0 = vmul.f32 0.2, %v2071_v61  ;;  %v2074_v2 = vadd.f32 %v3209_v59, %v1913_v30  ;;  %v3098_v52 = vpop.f32.mrb[112].mxu0  ;;  %vm2131_vm6 = vcmp.gt.f32.partialorder %v2071_v61, 0.0 }
 0x1db   : > { %v3210_v3 = vpop.f32.mrb[112].mxu1  ;;  %v3099_v4 = vpop.f32.mrb[113].mxu0 }
 0x1dc   : > { %vm2132_vm7 = vcmp.gt.f32.partialorder %v2074_v2, 0.0  ;;  %v2164_v32 = vmul.f32 0.2, %v2074_v2  ;;  %v3100_v56 = vadd.f32 %v3099_v4, %v3098_v52  ;;  %v3211_v55 = vpop.f32.mrb[113].mxu1  ;;  %v3101_v33 = vpop.f32.mrb[114].mxu0  ;;  %v2195_v6 = vsel %vm2131_vm6, %v2071_v61, %v2163_v0 }
 0x1dd   : > { %v3212_v37 = vadd.f32 %v3211_v55, %v3210_v3  ;;  %v3213_v5 = vpop.f32.mrb[114].mxu1  ;;  %v3102_v19 = vpop.f32.mrb[115].mxu0 }
 0x1de   : > { %v2196_v7 = vsel %vm2132_vm7, %v2074_v2, %v2164_v32  ;;  %v1918_v38 = vadd.f32 %v3100_v56, %v3750_v60  ;;  %v3103_v58 = vadd.f32 %v3102_v19, %v3101_v33  ;;  %v3214_v8 = vpop.f32.mrb[115].mxu1 }
 0x1df   : > { %v2749_v15 = vpack.c.bf16 %v2196_v7, %v2195_v6  ;;  %v3215_v41 = vadd.f32 %v3214_v8, %v3213_v5 }
 0x1e0   : > { %v2079_v21 = vadd.f32 %v3212_v37, %v1918_v38  ;;  %v1921_v18 = vadd.f32 %v3103_v58, %v3753_v62 }
 0x1e1   : > { %2781 = vst [vmem:[%s3779_s29 + $0x58] sm:$0xff] %v2749_v15  }
 0x1e2   : > { %v2165_v20 = vmul.f32 0.2, %v2079_v21  ;;  %v2082_v51 = vadd.f32 %v3215_v41, %v1921_v18  ;;  %v3104_v23 = vpop.f32.mrb[116].mxu0  ;;  %vm2133_vm8 = vcmp.gt.f32.partialorder %v2079_v21, 0.0 }
 0x1e3   : > { %v3216_v25 = vpop.f32.mrb[116].mxu1  ;;  %v3105_v26 = vpop.f32.mrb[117].mxu0 }
 0x1e4   : > { %vm2134_vm9 = vcmp.gt.f32.partialorder %v2082_v51, 0.0  ;;  %v2166_v27 = vmul.f32 0.2, %v2082_v51  ;;  %v3106_v28 = vadd.f32 %v3105_v26, %v3104_v23  ;;  %v3217_v54 = vpop.f32.mrb[117].mxu1  ;;  %v3107_v60 = vpop.f32.mrb[118].mxu0  ;;  %v2197_v10 = vsel %vm2133_vm8, %v2079_v21, %v2165_v20 }
 0x1e5   : > { %v3218_v29 = vadd.f32 %v3217_v54, %v3216_v25  ;;  %v3219_v31 = vpop.f32.mrb[118].mxu1  ;;  %v3108_v34 = vpop.f32.mrb[119].mxu0 }
 0x1e6   : > { %v2198_v12 = vsel %vm2134_vm9, %v2082_v51, %v2166_v27  ;;  %v1926_v62 = vadd.f32 %v3106_v28, %v3756_v22  ;;  %v3109_v40 = vadd.f32 %v3108_v34, %v3107_v60  ;;  %v3220_v42 = vpop.f32.mrb[119].mxu1 }
 0x1e7   : > { %v2754_v43 = vpack.c.bf16 %v2198_v12, %v2197_v10  ;;  %v3221_v35 = vadd.f32 %v3220_v42, %v3219_v31 }
 0x1e8   : > { %v2087_v13 = vadd.f32 %v3218_v29, %v1926_v62  ;;  %v1929_v63 = vadd.f32 %v3109_v40, %v3759_v24 }
 0x1e9   : > { %2782 = vst [vmem:[%s3779_s29 + $0x60] sm:$0xff] %v2754_v43  }
 0x1ea   : > { %v2167_v44 = vmul.f32 0.2, %v2087_v13  ;;  %v2090_v36 = vadd.f32 %v3221_v35, %v1929_v63  ;;  %v3110_v16 = vpop.f32.mrb[120].mxu0  ;;  %vm2135_vm10 = vcmp.gt.f32.partialorder %v2087_v13, 0.0 }
 0x1eb   : > { %v3222_v9 = vpop.f32.mrb[120].mxu1  ;;  %v3111_v45 = vpop.f32.mrb[121].mxu0 }
 0x1ec   : > { %vm2136_vm11 = vcmp.gt.f32.partialorder %v2090_v36, 0.0  ;;  %v2168_v39 = vmul.f32 0.2, %v2090_v36  ;;  %v3112_v46 = vadd.f32 %v3111_v45, %v3110_v16  ;;  %v3223_v1 = vpop.f32.mrb[121].mxu1  ;;  %v3113_v22 = vpop.f32.mrb[122].mxu0  ;;  %v2199_v53 = vsel %vm2135_vm10, %v2087_v13, %v2167_v44 }
 0x1ed   : > { %v3224_v48 = vadd.f32 %v3223_v1, %v3222_v9  ;;  %v3225_v14 = vpop.f32.mrb[122].mxu1  ;;  %v3114_v50 = vpop.f32.mrb[123].mxu0 }
 0x1ee   : > { %v2200_v57 = vsel %vm2136_vm11, %v2090_v36, %v2168_v39  ;;  %v1934_v24 = vadd.f32 %v3112_v46, %v3762_v47  ;;  %v3115_v59 = vadd.f32 %v3114_v50, %v3113_v22  ;;  %v3226_v61 = vpop.f32.mrb[123].mxu1 }
 0x1ef   : > { %v2759_v30 = vpack.c.bf16 %v2200_v57, %v2199_v53  ;;  %v3227_v0 = vadd.f32 %v3226_v61, %v3225_v14 }
 0x1f0   : > { %v2095_v2 = vadd.f32 %v3224_v48, %v1934_v24  ;;  %v1937_v52 = vadd.f32 %v3115_v59, %v3765_v49 }
 0x1f1   : > { %2783 = vst [vmem:[%s3779_s29 + $0x68] sm:$0xff] %v2759_v30  }
 0x1f2   : > { %v2169_v3 = vmul.f32 0.2, %v2095_v2  ;;  %v2098_v4 = vadd.f32 %v3227_v0, %v1937_v52  ;;  %v3116_v32 = vpop.f32.mrb[124].mxu0  ;;  %vm2137_vm12 = vcmp.gt.f32.partialorder %v2095_v2, 0.0 }
 0x1f3   : > { %v3228_v56 = vpop.f32.mrb[124].mxu1  ;;  %v3117_v55 = vpop.f32.mrb[125].mxu0 }
 0x1f4   : > { %vm2138_vm13 = vcmp.gt.f32.partialorder %v2098_v4, 0.0  ;;  %v2170_v33 = vmul.f32 0.2, %v2098_v4  ;;  %v3118_v37 = vadd.f32 %v3117_v55, %v3116_v32  ;;  %v3229_v5 = vpop.f32.mrb[125].mxu1  ;;  %v3119_v47 = vpop.f32.mrb[126].mxu0  ;;  %v2201_v38 = vsel %vm2137_vm12, %v2095_v2, %v2169_v3 }
 0x1f5   : > { %v3230_v19 = vadd.f32 %v3229_v5, %v3228_v56  ;;  %v3231_v6 = vpop.f32.mrb[126].mxu1  ;;  %v3120_v7 = vpop.f32.mrb[127].mxu0 }
 0x1f6   : > { %v2202_v58 = vsel %vm2138_vm13, %v2098_v4, %v2170_v33  ;;  %v1942_v49 = vadd.f32 %v3118_v37, %v3768_v11  ;;  %v3121_v8 = vadd.f32 %v3120_v7, %v3119_v47  ;;  %v3232_v15 = vpop.f32.mrb[127].mxu1 }
 0x1f7   : > { %v2764_v41 = vpack.c.bf16 %v2202_v58, %v2201_v38  ;;  %v3233_v21 = vadd.f32 %v3232_v15, %v3231_v6 }
 0x1f8   : > { %v2103_v18 = vadd.f32 %v3230_v19, %v1942_v49  ;;  %v1945_v20 = vadd.f32 %v3121_v8, %v3771_v17 }
 0x1f9   : > { %2784 = vst [vmem:[%s3779_s29 + $0x70] sm:$0xff] %v2764_v41  }
 0x1fa   : > { %v2171_v51 = vmul.f32 0.2, %v2103_v18  ;;  %v2106_v23 = vadd.f32 %v3233_v21, %v1945_v20  ;;  %vm2139_vm14 = vcmp.gt.f32.partialorder %v2103_v18, 0.0 }
 0x1fc   : > { %vm2140_vm15 = vcmp.gt.f32.partialorder %v2106_v23, 0.0  ;;  %v2172_v25 = vmul.f32 0.2, %v2106_v23  ;;  %v2203_v26 = vsel %vm2139_vm14, %v2103_v18, %v2171_v51 }
 0x1fe   : > { %v2204_v27 = vsel %vm2140_vm15, %v2106_v23, %v2172_v25 }
 0x1ff   : > { %v2769_v28 = vpack.c.bf16 %v2204_v27, %v2203_v26 }
 0x201   : > { %2785 = vst [vmem:[%s3779_s29 + $0x78] sm:$0xff] %v2769_v28  }
 0x202 PF: > { %s13_s12 = sadd.s32 1, %s3312_s12  }
 0x203   : > { %p10_p4 = scmp.ge.s32.totalorder %s13_s12, 4  }
 0x205   :  { %12 = sbr.rel (!%p10_p4) target bundleno = 1 (0x1), region = 62 }

// kernel: discriminator_forward.8
= control target key start
LH: loop header
LB: loop body
LE: loop exit
PB: predicated region body
PF: predicated region fallthrough
CT: control target
= control target key end

     0   :  { %s3756_s12 = smov 0   ;;  %s4694_s0 = inlined_call_operand.vmem [shape: bf16[128,2048], index: 0, kind: input, shape index: {}]   ;;  %s4695_s1 = inlined_call_operand.vmem [shape: bf16[2048,256], index: 1, kind: input, shape index: {}]   ;;  %s4696_s2 = inlined_call_operand.vmem [shape: f32[1,256], index: 2, kind: input, shape index: {}]   ;;  %s4697_s3 = inlined_call_operand.vmem [shape: bf16[128,256], index: 3, kind: output, shape index: {}]  }
   0x1 LB: > { %s2857_s13 = sadd.s32 4294967295, %s3734_s12   ;;  %p2861_p0 = scmp.ge.s32.totalorder %s3734_s12, 1  ;;  %s3734_s12 = sphi %s3756_s12, %s13_s12  }
   0x2   : > { %p139_p1 = scmp.lt.s32.totalorder %s3734_s12, 3 }
   0x4   : > { %p140_p2 = pnand %p2861_p0, %p139_p1 }
   0x5   : > { %v3344_v0 = vld [vmem:[%s4695_s1 + $0x4] ss:$8 sps:$4 sm:$0xff] (!%p140_p2)   ;;  %v3348_v2 = vld [vmem:[%s4695_s1] ss:$8 sps:$4 sm:$0xff] (!%p140_p2)   ;;  %v3350_v4 = vld [vmem:[%s4695_s1 + $0x14] ss:$8 sps:$4 sm:$0xff] (!%p140_p2)  }
   0x6   : > { %143 = sbr.rel (%p140_p2) target bundleno = 511 (0x1ff), region = 32  ;;  %v3346_v1 = vld [vmem:[%s4695_s1 + $0x404] ss:$8 sps:$4 sm:$0xff] (!%p140_p2)   ;;  %2111 = vmatprep.subr.bf16.mxu1 (!%p140_p2), %v3344_v0  ;;  %v3349_v3 = vld [vmem:[%s4695_s1 + $0x400] ss:$8 sps:$4 sm:$0xff] (!%p140_p2)   ;;  %s2862_s24 = sshll.u32 (!%p140_p2), %s2857_s13, 3 }
   0x7   : > { %2403 = vmatprep.subr.bf16.mxu0 (!%p140_p2), %v3346_v1  ;;  %2112 = vmatpush1.bf16.msra.mxu1 (!%p140_p2), %v3348_v2  ;;  %v3352_v5 = vld [vmem:[%s4695_s1 + $0x414] ss:$8 sps:$4 sm:$0xff] (!%p140_p2)   ;;  %v3354_v6 = vld [vmem:[%s4695_s1 + $0x10] ss:$8 sps:$4 sm:$0xff] (!%p140_p2)   ;;  %v3356_v8 = vld [vmem:[%s4695_s1 + $0x24] ss:$8 sps:$4 sm:$0xff] (!%p140_p2)  }
   0x8   : > { %2404 = vmatpush1.bf16.msra.mxu0 (!%p140_p2), %v3349_v3  ;;  %2113 = vmatprep.subr.bf16.mxu1 (!%p140_p2), %v3350_v4  ;;  %v3355_v7 = vld [vmem:[%s4695_s1 + $0x410] ss:$8 sps:$4 sm:$0xff] (!%p140_p2)   ;;  %v3358_v9 = vld [vmem:[%s4695_s1 + $0x424] ss:$8 sps:$4 sm:$0xff] (!%p140_p2)   ;;  %v3360_v10 = vld [vmem:[%s4695_s1 + $0x20] ss:$8 sps:$4 sm:$0xff] (!%p140_p2)  }
   0x9   : > { %2405 = vmatprep.subr.bf16.mxu0 (!%p140_p2), %v3352_v5  ;;  %v3361_v11 = vld [vmem:[%s4695_s1 + $0x420] ss:$8 sps:$4 sm:$0xff] (!%p140_p2)   ;;  %v3362_v12 = vld [vmem:[%s4695_s1 + $0x34] ss:$8 sps:$4 sm:$0xff] (!%p140_p2)   ;;  %v3366_v14 = vld [vmem:[%s4695_s1 + $0x30] ss:$8 sps:$4 sm:$0xff] (!%p140_p2)  }
   0xa   : > { %v3364_v13 = vld [vmem:[%s4695_s1 + $0x434] ss:$8 sps:$4 sm:$0xff] (!%p140_p2)   ;;  %v3367_v15 = vld [vmem:[%s4695_s1 + $0x430] ss:$8 sps:$4 sm:$0xff] (!%p140_p2)   ;;  %v3368_v16 = vld [vmem:[%s4695_s1 + $0x44] ss:$8 sps:$4 sm:$0xff] (!%p140_p2)  }
   0xb   : > { %2114 = vmatpush1.bf16.msra.mxu1 (!%p140_p2), %v3354_v6  ;;  %v3370_v17 = vld [vmem:[%s4695_s1 + $0x444] ss:$8 sps:$4 sm:$0xff] (!%p140_p2)   ;;  %v3372_v18 = vld [vmem:[%s4695_s1 + $0x40] ss:$8 sps:$4 sm:$0xff] (!%p140_p2)   ;;  %v3374_v20 = vld [vmem:[%s4695_s1 + $0x54] ss:$8 sps:$4 sm:$0xff] (!%p140_p2)  }
   0xc   : > { %2406 = vmatpush1.bf16.msra.mxu0 (!%p140_p2), %v3355_v7  ;;  %2115 = vmatprep.subr.bf16.mxu1 (!%p140_p2), %v3356_v8  ;;  %v3373_v19 = vld [vmem:[%s4695_s1 + $0x440] ss:$8 sps:$4 sm:$0xff] (!%p140_p2)   ;;  %v3376_v21 = vld [vmem:[%s4695_s1 + $0x454] ss:$8 sps:$4 sm:$0xff] (!%p140_p2)   ;;  %v3378_v22 = vld [vmem:[%s4695_s1 + $0x50] ss:$8 sps:$4 sm:$0xff] (!%p140_p2)  }
   0xd   : > { %2407 = vmatprep.subr.bf16.mxu0 %v3358_v9  ;;  %v3379_v23 = vld [vmem:[%s4695_s1 + $0x450] ss:$8 sps:$4 sm:$0xff]   ;;  %v3380_v24 = vld [vmem:[%s4695_s1 + $0x64] ss:$8 sps:$4 sm:$0xff]   ;;  %v3384_v26 = vld [vmem:[%s4695_s1 + $0x60] ss:$8 sps:$4 sm:$0xff]  }
   0xe   : > { %v3382_v25 = vld [vmem:[%s4695_s1 + $0x464] ss:$8 sps:$4 sm:$0xff]   ;;  %v3385_v27 = vld [vmem:[%s4695_s1 + $0x460] ss:$8 sps:$4 sm:$0xff]   ;;  %v3386_v28 = vld [vmem:[%s4695_s1 + $0x74] ss:$8 sps:$4 sm:$0xff]  }
   0xf   : > { %2116 = vmatpush1.bf16.msra.mxu1 %v3360_v10  ;;  %v3388_v29 = vld [vmem:[%s4695_s1 + $0x474] ss:$8 sps:$4 sm:$0xff]   ;;  %v3390_v30 = vld [vmem:[%s4695_s1 + $0x70] ss:$8 sps:$4 sm:$0xff]   ;;  %v3392_v32 = vld [vmem:[%s4695_s1 + $0x84] ss:$8 sps:$4 sm:$0xff]  }
  0x10   : > { %2408 = vmatpush1.bf16.msra.mxu0 %v3361_v11  ;;  %2117 = vmatprep.subr.bf16.mxu1 %v3362_v12  ;;  %v3391_v31 = vld [vmem:[%s4695_s1 + $0x470] ss:$8 sps:$4 sm:$0xff]   ;;  %p166_p3 = scmp.lt.s32.totalorder %s2862_s24, 15  ;;  %v3394_v33 = vld [vmem:[%s4695_s1 + $0x484] ss:$8 sps:$4 sm:$0xff]  }
  0x11   : > { %2409 = vmatprep.subr.bf16.mxu0 %v3364_v13  ;;  %v3396_v34 = vld [vmem:[%s4695_s1 + $0x80] ss:$8 sps:$4 sm:$0xff]   ;;  %v3398_v36 = vld [vmem:[%s4695_s1 + $0x94] ss:$8 sps:$4 sm:$0xff]   ;;  %v3402_v38 = vld [vmem:[%s4695_s1 + $0x90] ss:$8 sps:$4 sm:$0xff]  }
  0x12   : > { %v3397_v35 = vld [vmem:[%s4695_s1 + $0x480] ss:$8 sps:$4 sm:$0xff]   ;;  %s4699_s24 = smov (!%p166_p3, %s2862_s24), 15  ;;  %v3400_v37 = vld [vmem:[%s4695_s1 + $0x494] ss:$8 sps:$4 sm:$0xff]  }
  0x13   : > { %2118 = vmatpush1.bf16.msra.mxu1 %v3366_v14  ;;  %v3403_v39 = vld [vmem:[%s4695_s1 + $0x490] ss:$8 sps:$4 sm:$0xff]   ;;  %v3404_v40 = vld [vmem:[%s4695_s1 + $0xa4] ss:$8 sps:$4 sm:$0xff]   ;;  %s3198_s21 = sshll.u32 %s4699_s24, 6 }
  0x14   : > { %2410 = vmatpush1.bf16.msra.mxu0 %v3367_v15  ;;  %2119 = vmatprep.subr.bf16.mxu1 %v3368_v16  ;;  %v3406_v41 = vld [vmem:[%s4695_s1 + $0x4a4] ss:$8 sps:$4 sm:$0xff]   ;;  %v3408_v42 = vld [vmem:[%s4695_s1 + $0xa0] ss:$8 sps:$4 sm:$0xff]   ;;  %s3904_s4 = scalar_lea.vmem %s4694_s0, %s3198_s21  ;;  %v3410_v44 = vld [vmem:[%s4695_s1 + $0xb4] ss:$8 sps:$4 sm:$0xff]  }
  0x15   : > { %2411 = vmatprep.subr.bf16.mxu0 %v3370_v17  ;;  %v3409_v43 = vld [vmem:[%s4695_s1 + $0x4a0] ss:$8 sps:$4 sm:$0xff]   ;;  %v3412_v45 = vld [vmem:[%s4695_s1 + $0x4b4] ss:$8 sps:$4 sm:$0xff]   ;;  %v3414_v46 = vld [vmem:[%s4695_s1 + $0xb0] ss:$8 sps:$4 sm:$0xff]  }
  0x16   : > { %v3415_v47 = vld [vmem:[%s4695_s1 + $0x4b0] ss:$8 sps:$4 sm:$0xff]   ;;  %v179_v48 = vld [vmem:[%s3904_s4] sm:$0xff]  ;;  %v3422_v58 = vld [vmem:[%s4695_s1 + $0xd4] ss:$8 sps:$4 sm:$0xff]  }
  0x17   : > { %2120 = vmatpush1.bf16.msra.mxu1 %v3372_v18  ;;  %v187_v49 = vld [vmem:[%s3904_s4 + $0x40] sm:$0xff]  ;;  %v3424_v59 = vld [vmem:[%s4695_s1 + $0x4d4] ss:$8 sps:$4 sm:$0xff]   ;;  %v3426_v60 = vld [vmem:[%s4695_s1 + $0xd0] ss:$8 sps:$4 sm:$0xff]  }
  0x18   : > { %2412 = vmatpush1.bf16.msra.mxu0 %v3373_v19  ;;  %2121 = vmatprep.subr.bf16.mxu1 %v3374_v20  ;;  %v3416_v50 = vld [vmem:[%s4695_s1 + $0xc4] ss:$8 sps:$4 sm:$0xff]   ;;  %v2869_v52 = vcombine.high %v179_v48, %v187_v49  ;;  %v3420_v56 = vld [vmem:[%s4695_s1 + $0xc0] ss:$8 sps:$4 sm:$0xff]   ;;  %v3427_v61 = vld [vmem:[%s4695_s1 + $0x4d0] ss:$8 sps:$4 sm:$0xff]   ;;  %v2868_v8 = vcombine.low %v179_v48, %v187_v49 }
  0x19   : > { %2413 = vmatprep.subr.bf16.mxu0 %v3376_v21  ;;  %v3418_v51 = vld [vmem:[%s4695_s1 + $0x4c4] ss:$8 sps:$4 sm:$0xff]   ;;  %v3421_v57 = vld [vmem:[%s4695_s1 + $0x4c0] ss:$8 sps:$4 sm:$0xff]   ;;  %v3434_v2 = vld [vmem:[%s4695_s1 + $0xf4] ss:$8 sps:$4 sm:$0xff]  }
  0x1a   : > { %v183_v53 = vld [vmem:[%s3904_s4 + $0x20] sm:$0xff]  ;;  %2143 = vmatprep.mubr.bf16.mxu1 %v2869_v52  ;;  %v3436_v3 = vld [vmem:[%s4695_s1 + $0x4f4] ss:$8 sps:$4 sm:$0xff]   ;;  %v3438_v4 = vld [vmem:[%s4695_s1 + $0xf0] ss:$8 sps:$4 sm:$0xff]  }
  0x1b   : > { %2122 = vmatpush1.bf16.msra.mxu1 %v3378_v22  ;;  %v191_v54 = vld [vmem:[%s3904_s4 + $0x60] sm:$0xff]  ;;  %v3439_v5 = vld [vmem:[%s4695_s1 + $0x4f0] ss:$8 sps:$4 sm:$0xff]   ;;  %v3448_v12 = vld [vmem:[%s4695_s1 + $0x114] ss:$8 sps:$4 sm:$0xff]  }
  0x1c   : > { %2414 = vmatpush1.bf16.msra.mxu0 %v3379_v23  ;;  %2123 = vmatprep.subr.bf16.mxu1 %v3380_v24  ;;  %v2877_v55 = vcombine.high %v183_v53, %v191_v54  ;;  %v3428_v62 = vld [vmem:[%s4695_s1 + $0xe4] ss:$8 sps:$4 sm:$0xff]   ;;  %v3432_v0 = vld [vmem:[%s4695_s1 + $0xe0] ss:$8 sps:$4 sm:$0xff]   ;;  %v2876_v10 = vcombine.low %v183_v53, %v191_v54  ;;  %v3451_v13 = vld [vmem:[%s4695_s1 + $0x514] ss:$8 sps:$4 sm:$0xff]  }
  0x1d   : > { %2415 = vmatprep.subr.bf16.mxu0 %v3382_v25  ;;  %v3430_v63 = vld [vmem:[%s4695_s1 + $0x4e4] ss:$8 sps:$4 sm:$0xff]   ;;  %v3433_v1 = vld [vmem:[%s4695_s1 + $0x4e0] ss:$8 sps:$4 sm:$0xff]   ;;  %v3446_v14 = vld [vmem:[%s4695_s1 + $0x110] ss:$8 sps:$4 sm:$0xff]  }
  0x1e   : > { %2435 = vmatprep.mubr.bf16.mxu0 %v2877_v55  ;;  %v3442_v6 = vld [vmem:[%s4695_s1 + $0x104] ss:$8 sps:$4 sm:$0xff]   ;;  %v3440_v9 = vld [vmem:[%s4695_s1 + $0x100] ss:$8 sps:$4 sm:$0xff]   ;;  %v3449_v15 = vld [vmem:[%s4695_s1 + $0x510] ss:$8 sps:$4 sm:$0xff]  }
  0x1f   : > { %2124 = vmatpush1.bf16.msra.mxu1 %v3384_v26  ;;  %v3445_v7 = vld [vmem:[%s4695_s1 + $0x504] ss:$8 sps:$4 sm:$0xff]   ;;  %v3443_v11 = vld [vmem:[%s4695_s1 + $0x500] ss:$8 sps:$4 sm:$0xff]   ;;  %v3460_v22 = vld [vmem:[%s4695_s1 + $0x134] ss:$8 sps:$4 sm:$0xff]  }
  0x20   : > { %2416 = vmatpush1.bf16.msra.mxu0 %v3385_v27  ;;  %2125 = vmatprep.subr.bf16.mxu1 %v3386_v28  ;;  %v3454_v16 = vld [vmem:[%s4695_s1 + $0x124] ss:$8 sps:$4 sm:$0xff]   ;;  %v3452_v18 = vld [vmem:[%s4695_s1 + $0x120] ss:$8 sps:$4 sm:$0xff]   ;;  %v3463_v23 = vld [vmem:[%s4695_s1 + $0x534] ss:$8 sps:$4 sm:$0xff]  }
  0x21   : > { %2417 = vmatprep.subr.bf16.mxu0 %v3388_v29  ;;  %v3457_v17 = vld [vmem:[%s4695_s1 + $0x524] ss:$8 sps:$4 sm:$0xff]   ;;  %v3455_v19 = vld [vmem:[%s4695_s1 + $0x520] ss:$8 sps:$4 sm:$0xff]   ;;  %v3458_v29 = vld [vmem:[%s4695_s1 + $0x130] ss:$8 sps:$4 sm:$0xff]  }
  0x22   : > { %v195_v20 = vld [vmem:[%s3904_s4 + $0x80] sm:$0xff] }
  0x23   : > { %2126 = vmatpush1.bf16.msra.mxu1 %v3390_v30  ;;  %v203_v21 = vld [vmem:[%s3904_s4 + $0xc0] sm:$0xff]  ;;  %v3461_v30 = vld [vmem:[%s4695_s1 + $0x530] ss:$8 sps:$4 sm:$0xff]  }
  0x24   : > { %2418 = vmatpush1.bf16.msra.mxu0 %v3391_v31  ;;  %2127 = vmatprep.subr.bf16.mxu1 %v3392_v32  ;;  %v2885_v24 = vcombine.high %v195_v20, %v203_v21  ;;  %v199_v25 = vld [vmem:[%s3904_s4 + $0xa0] sm:$0xff]  ;;  %v2884_v26 = vcombine.low %v195_v20, %v203_v21  ;;  %v3506_v20 = vld [vmem:[%s4695_s1 + $0x1b0] ss:$8 sps:$4 sm:$0xff]  }
  0x25   : > { %2419 = vmatprep.subr.bf16.mxu0 %v3394_v33  ;;  %v207_v27 = vld [vmem:[%s3904_s4 + $0xe0] sm:$0xff]  ;;  %v3509_v21 = vld [vmem:[%s4695_s1 + $0x5b0] ss:$8 sps:$4 sm:$0xff]  }
  0x26   : > { %v2893_v28 = vcombine.high %v199_v25, %v207_v27  ;;  %v2892_v31 = vcombine.low %v199_v25, %v207_v27  ;;  %v3466_v32 = vld [vmem:[%s4695_s1 + $0x144] ss:$8 sps:$4 sm:$0xff]   ;;  %v3476_v55 = vld [vmem:[%s4695_s1 + $0x160] ss:$8 sps:$4 sm:$0xff]   ;;  %v3523_v27 = vld [vmem:[%s4695_s1 + $0x5d4] ss:$8 sps:$4 sm:$0xff]  }
  0x27   : > { %2128 = vmatpush1.bf16.msra.mxu1 %v3396_v34  ;;  %v3469_v33 = vld [vmem:[%s4695_s1 + $0x544] ss:$8 sps:$4 sm:$0xff]   ;;  %v3515_v25 = vld [vmem:[%s4695_s1 + $0x5c0] ss:$8 sps:$4 sm:$0xff]  }
  0x28   : > { %2420 = vmatpush1.bf16.msra.mxu0 %v3397_v35  ;;  %2129 = vmatprep.subr.bf16.mxu1 %v3398_v36  ;;  %v211_v34 = vld [vmem:[%s3904_s4 + $0x100] sm:$0xff] }
  0x29   : > { %2421 = vmatprep.subr.bf16.mxu0 %v3400_v37  ;;  %v219_v35 = vld [vmem:[%s3904_s4 + $0x140] sm:$0xff] }
  0x2a   : > { %v3464_v36 = vld [vmem:[%s4695_s1 + $0x140] ss:$8 sps:$4 sm:$0xff]   ;;  %v2901_v37 = vcombine.high %v211_v34, %v219_v35 }
  0x2b   : > { %2130 = vmatpush1.bf16.msra.mxu1 %v3402_v38  ;;  %v3467_v38 = vld [vmem:[%s4695_s1 + $0x540] ss:$8 sps:$4 sm:$0xff]  }
  0x2c   : > { %2422 = vmatpush1.bf16.msra.mxu0 %v3403_v39  ;;  %2131 = vmatprep.subr.bf16.mxu1 %v3404_v40  ;;  %v215_v39 = vld [vmem:[%s3904_s4 + $0x120] sm:$0xff] }
  0x2d   : > { %2423 = vmatprep.subr.bf16.mxu0 %v3406_v41  ;;  %v223_v40 = vld [vmem:[%s3904_s4 + $0x160] sm:$0xff]  ;;  %v2900_v41 = vcombine.low %v211_v34, %v219_v35  ;;  %v3532_v34 = vld [vmem:[%s4695_s1 + $0x1f4] ss:$8 sps:$4 sm:$0xff]  }
  0x2e   : > { %v227_v48 = vld [vmem:[%s3904_s4 + $0x180] sm:$0xff]  ;;  %v3535_v35 = vld [vmem:[%s4695_s1 + $0x5f4] ss:$8 sps:$4 sm:$0xff]  }
  0x2f   : > { %2132 = vmatpush1.bf16.msra.mxu1 %v3408_v42  ;;  %v3472_v42 = vld [vmem:[%s4695_s1 + $0x154] ss:$8 sps:$4 sm:$0xff]   ;;  %v235_v49 = vld [vmem:[%s3904_s4 + $0x1c0] sm:$0xff] }
  0x30   : > { %2424 = vmatpush1.bf16.msra.mxu0 %v3409_v43  ;;  %2133 = vmatprep.subr.bf16.mxu1 %v3410_v44  ;;  %v2909_v43 = vcombine.high %v215_v39, %v223_v40  ;;  %v3475_v44 = vld [vmem:[%s4695_s1 + $0x554] ss:$8 sps:$4 sm:$0xff]   ;;  %v2917_v52 = vcombine.high %v227_v48, %v235_v49  ;;  %v231_v53 = vld [vmem:[%s3904_s4 + $0x1a0] sm:$0xff] }
  0x31   : > { %2425 = vmatprep.subr.bf16.mxu0 %v3412_v45  ;;  %v3470_v45 = vld [vmem:[%s4695_s1 + $0x150] ss:$8 sps:$4 sm:$0xff]   ;;  %v239_v54 = vld [vmem:[%s3904_s4 + $0x1e0] sm:$0xff] }
  0x33   : > { %2134 = vmatpush1.bf16.msra.mxu1 %v3414_v46  ;;  %v3473_v46 = vld [vmem:[%s4695_s1 + $0x550] ss:$8 sps:$4 sm:$0xff]  }
  0x34   : > { %2426 = vmatpush1.bf16.msra.mxu0 %v3415_v47  ;;  %2135 = vmatprep.subr.bf16.mxu1 %v3416_v50  ;;  %v2908_v47 = vcombine.low %v215_v39, %v223_v40  ;;  %v3478_v50 = vld [vmem:[%s4695_s1 + $0x164] ss:$8 sps:$4 sm:$0xff]   ;;  %v3536_v40 = vld [vmem:[%s4695_s1 + $0x200] ss:$8 sps:$4 sm:$0xff]  }
  0x35   : > { %2427 = vmatprep.subr.bf16.mxu0 %v3418_v51  ;;  %v3481_v51 = vld [vmem:[%s4695_s1 + $0x564] ss:$8 sps:$4 sm:$0xff]  }
  0x36   : > { %v3541_v39 = vld [vmem:[%s4695_s1 + $0x604] ss:$8 sps:$4 sm:$0xff]  }
  0x37   : > { %2136 = vmatpush1.bf16.msra.mxu1 %v3420_v56  ;;  %v3479_v56 = vld [vmem:[%s4695_s1 + $0x560] ss:$8 sps:$4 sm:$0xff]  }
  0x38   : > { %2428 = vmatpush1.bf16.msra.mxu0 %v3421_v57  ;;  %2137 = vmatprep.subr.bf16.mxu1 %v3422_v58  ;;  %v2925_v57 = vcombine.high %v231_v53, %v239_v54  ;;  %v2916_v58 = vcombine.low %v227_v48, %v235_v49  ;;  %v3544_v48 = vld [vmem:[%s4695_s1 + $0x214] ss:$8 sps:$4 sm:$0xff]  }
  0x39   : > { %2429 = vmatprep.subr.bf16.mxu0 %v3424_v59  ;;  %v3484_v59 = vld [vmem:[%s4695_s1 + $0x174] ss:$8 sps:$4 sm:$0xff]  }
  0x3a   : > { %v3547_v49 = vld [vmem:[%s4695_s1 + $0x614] ss:$8 sps:$4 sm:$0xff]  }
  0x3b   : > { %2138 = vmatpush1.bf16.msra.mxu1 %v3426_v60  ;;  %v3487_v60 = vld [vmem:[%s4695_s1 + $0x574] ss:$8 sps:$4 sm:$0xff]  }
  0x3c   : > { %2430 = vmatpush1.bf16.msra.mxu0 %v3427_v61  ;;  %2139 = vmatprep.subr.bf16.mxu1 %v3428_v62  ;;  %v3482_v61 = vld [vmem:[%s4695_s1 + $0x170] ss:$8 sps:$4 sm:$0xff]  }
  0x3d   : > { %2431 = vmatprep.subr.bf16.mxu0 %v3430_v63  ;;  %v3485_v62 = vld [vmem:[%s4695_s1 + $0x570] ss:$8 sps:$4 sm:$0xff]   ;;  %v4079_v63 = vld [vmem:[%s3904_s4 + $0x8] sm:$0xff] }
  0x3f   : > { %2140 = vmatpush1.bf16.msra.mxu1 %v3432_v0  ;;  %v2924_v0 = vcombine.low %v231_v53, %v239_v54  ;;  %v3545_v53 = vld [vmem:[%s4695_s1 + $0x610] ss:$8 sps:$4 sm:$0xff]   ;;  %v3550_v54 = vld [vmem:[%s4695_s1 + $0x224] ss:$8 sps:$4 sm:$0xff]  }
  0x40   : > { %2432 = vmatpush1.bf16.msra.mxu0 %v3433_v1  ;;  %2141 = vmatprep.subr.bf16.mxu1 %v3434_v2  ;;  %v4082_v1 = vld [vmem:[%s3904_s4 + $0x48] sm:$0xff] }
  0x41   : > { %2433 = vmatprep.subr.bf16.mxu0 %v3436_v3  ;;  %v3490_v2 = vld [vmem:[%s4695_s1 + $0x184] ss:$8 sps:$4 sm:$0xff]  }
  0x42   : > { %v3493_v3 = vld [vmem:[%s4695_s1 + $0x584] ss:$8 sps:$4 sm:$0xff]  }
  0x43   : > { %2142 = vmatpush1.bf16.msra.mxu1 %v3438_v4  ;;  %v2871_v4 = vcombine.high %v4079_v63, %v4082_v1 }
  0x44   : > { %2434 = vmatpush1.bf16.msra.mxu0 %v3439_v5  ;;  %2184 = vmatprep.subr.bf16.mxu1 %v3442_v6  ;;  %v4093_v5 = vld [vmem:[%s3904_s4 + $0x28] sm:$0xff] }
  0x45   : > { %2476 = vmatprep.subr.bf16.mxu0 %v3445_v7  ;;  %v4096_v6 = vld [vmem:[%s3904_s4 + $0x68] sm:$0xff] }
  0x46   : > { %2144 = vmatmul.mubr.bf16.vlgmr.msra.gmra.mrb[0].mxu1 %v2868_v8  ;;  %v2879_v7 = vcombine.high %v4093_v5, %v4096_v6  ;;  %v3488_v8 = vld [vmem:[%s4695_s1 + $0x180] ss:$8 sps:$4 sm:$0xff]  }
  0x47   : > { %2436 = vmatmul.mubr.bf16.vlgmr.msra.gmra.mrb[0].mxu0 %v2876_v10  ;;  %2185 = vmatpush1.bf16.msra.mxu1 %v3440_v9  ;;  %v3491_v9 = vld [vmem:[%s4695_s1 + $0x580] ss:$8 sps:$4 sm:$0xff]   ;;  %v3496_v10 = vld [vmem:[%s4695_s1 + $0x194] ss:$8 sps:$4 sm:$0xff]  }
  0x48   : > { %2477 = vmatpush1.bf16.msra.mxu0 %v3443_v11  ;;  %2186 = vmatprep.subr.bf16.mxu1 %v3448_v12  ;;  %v3499_v11 = vld [vmem:[%s4695_s1 + $0x594] ss:$8 sps:$4 sm:$0xff]   ;;  %v3494_v12 = vld [vmem:[%s4695_s1 + $0x190] ss:$8 sps:$4 sm:$0xff]  }
  0x49   : > { %2478 = vmatprep.subr.bf16.mxu0 %v3451_v13  ;;  %2153 = vmatprep.mubr.bf16.mxu1 %v2885_v24  ;;  %v3497_v13 = vld [vmem:[%s4695_s1 + $0x590] ss:$8 sps:$4 sm:$0xff]   ;;  %v3512_v24 = vld [vmem:[%s4695_s1 + $0x1c0] ss:$8 sps:$4 sm:$0xff]  }
  0x4a   : > { %2445 = vmatprep.mubr.bf16.mxu0 %v2893_v28  ;;  %v3518_v28 = vld [vmem:[%s4695_s1 + $0x1d0] ss:$8 sps:$4 sm:$0xff]  }
  0x4b   : > { %2187 = vmatpush1.bf16.msra.mxu1 %v3446_v14  ;;  %v3502_v14 = vld [vmem:[%s4695_s1 + $0x1a4] ss:$8 sps:$4 sm:$0xff]  }
  0x4c   : > { %2479 = vmatpush1.bf16.msra.mxu0 %v3449_v15  ;;  %2188 = vmatprep.subr.bf16.mxu1 %v3454_v16  ;;  %v3505_v15 = vld [vmem:[%s4695_s1 + $0x5a4] ss:$8 sps:$4 sm:$0xff]   ;;  %v3500_v16 = vld [vmem:[%s4695_s1 + $0x1a0] ss:$8 sps:$4 sm:$0xff]  }
  0x4d   : > { %2480 = vmatprep.subr.bf16.mxu0 %v3457_v17  ;;  %v3503_v17 = vld [vmem:[%s4695_s1 + $0x5a0] ss:$8 sps:$4 sm:$0xff]  }
  0x4e   : > { %2154 = vmatmul.mubr.bf16.gmra.mrb[4].mxu1 %v2884_v26  ;;  %v3520_v26 = vld [vmem:[%s4695_s1 + $0x1d4] ss:$8 sps:$4 sm:$0xff]  }
  0x4f   : > { %2189 = vmatpush1.bf16.msra.mxu1 %v3452_v18  ;;  %2446 = vmatmul.mubr.bf16.gmra.mrb[4].mxu0 %v2892_v31  ;;  %v3508_v18 = vld [vmem:[%s4695_s1 + $0x1b4] ss:$8 sps:$4 sm:$0xff]   ;;  %v3529_v31 = vld [vmem:[%s4695_s1 + $0x5e4] ss:$8 sps:$4 sm:$0xff]  }
  0x50   : > { %2481 = vmatpush1.bf16.msra.mxu0 %v3455_v19  ;;  %2190 = vmatprep.subr.bf16.mxu1 %v3460_v22  ;;  %v3511_v19 = vld [vmem:[%s4695_s1 + $0x5b4] ss:$8 sps:$4 sm:$0xff]   ;;  %v3514_v22 = vld [vmem:[%s4695_s1 + $0x1c4] ss:$8 sps:$4 sm:$0xff]  }
  0x51   : > { %2482 = vmatprep.subr.bf16.mxu0 %v3463_v23  ;;  %2163 = vmatprep.mubr.bf16.mxu1 %v2901_v37  ;;  %v3517_v23 = vld [vmem:[%s4695_s1 + $0x5c4] ss:$8 sps:$4 sm:$0xff]   ;;  %v3533_v37 = vld [vmem:[%s4695_s1 + $0x5f0] ss:$8 sps:$4 sm:$0xff]  }
  0x52   : > { %2455 = vmatprep.mubr.bf16.mxu0 %v2909_v43  ;;  %v2870_v43 = vcombine.low %v4079_v63, %v4082_v1  ;;  %v224_v63 = vld [vmem:[%s3904_s4 + $0x168] sm:$0xff]  ;;  %v3559_v1 = vld [vmem:[%s4695_s1 + $0x634] ss:$8 sps:$4 sm:$0xff]  }
  0x53   : > { %2191 = vmatpush1.bf16.msra.mxu1 %v3458_v29  ;;  %v3521_v29 = vld [vmem:[%s4695_s1 + $0x5d0] ss:$8 sps:$4 sm:$0xff]  }
  0x54   : > { %2483 = vmatpush1.bf16.msra.mxu0 %v3461_v30  ;;  %2192 = vmatprep.subr.bf16.mxu1 %v3466_v32  ;;  %v3526_v30 = vld [vmem:[%s4695_s1 + $0x1e4] ss:$8 sps:$4 sm:$0xff]   ;;  %v3524_v32 = vld [vmem:[%s4695_s1 + $0x1e0] ss:$8 sps:$4 sm:$0xff]  }
  0x55   : > { %2484 = vmatprep.subr.bf16.mxu0 %v3469_v33  ;;  %v3527_v33 = vld [vmem:[%s4695_s1 + $0x5e0] ss:$8 sps:$4 sm:$0xff]  }
  0x56   : > { %2164 = vmatmul.mubr.bf16.gmra.mrb[8].mxu1 %v2900_v41  ;;  %v3539_v41 = vld [vmem:[%s4695_s1 + $0x600] ss:$8 sps:$4 sm:$0xff]  }
  0x57   : > { %2193 = vmatpush1.bf16.msra.mxu1 %v3464_v36  ;;  %2456 = vmatmul.mubr.bf16.gmra.mrb[8].mxu0 %v2908_v47  ;;  %v3530_v36 = vld [vmem:[%s4695_s1 + $0x1f0] ss:$8 sps:$4 sm:$0xff]   ;;  %v208_v47 = vld [vmem:[%s3904_s4 + $0xe8] sm:$0xff] }
  0x58   : > { %2485 = vmatpush1.bf16.msra.mxu0 %v3467_v38  ;;  %2194 = vmatprep.subr.bf16.mxu1 %v3472_v42  ;;  %v3538_v38 = vld [vmem:[%s4695_s1 + $0x204] ss:$8 sps:$4 sm:$0xff]  }
  0x59   : > { %2486 = vmatprep.subr.bf16.mxu0 %v3475_v44  ;;  %2173 = vmatprep.mubr.bf16.mxu1 %v2917_v52  ;;  %v196_v42 = vld [vmem:[%s3904_s4 + $0x88] sm:$0xff]  ;;  %v2878_v44 = vcombine.low %v4093_v5, %v4096_v6  ;;  %v3542_v52 = vld [vmem:[%s4695_s1 + $0x210] ss:$8 sps:$4 sm:$0xff]  }
  0x5a   : > { %2465 = vmatprep.mubr.bf16.mxu0 %v2925_v57  ;;  %v3551_v57 = vld [vmem:[%s4695_s1 + $0x620] ss:$8 sps:$4 sm:$0xff]   ;;  %v3557_v5 = vld [vmem:[%s4695_s1 + $0x630] ss:$8 sps:$4 sm:$0xff]   ;;  %v3562_v6 = vld [vmem:[%s4695_s1 + $0x244] ss:$8 sps:$4 sm:$0xff]  }
  0x5b   : > { %2195 = vmatpush1.bf16.msra.mxu1 %v3470_v45  ;;  %v204_v45 = vld [vmem:[%s3904_s4 + $0xc8] sm:$0xff] }
  0x5c   : > { %2487 = vmatpush1.bf16.msra.mxu0 %v3473_v46  ;;  %2196 = vmatprep.subr.bf16.mxu1 %v3478_v50  ;;  %v200_v46 = vld [vmem:[%s3904_s4 + $0xa8] sm:$0xff]  ;;  %v2887_v50 = vcombine.high %v196_v42, %v204_v45 }
  0x5d   : > { %2488 = vmatprep.subr.bf16.mxu0 %v3481_v51  ;;  %v2895_v51 = vcombine.high %v200_v46, %v208_v47 }
  0x5e   : > { %2174 = vmatmul.mubr.bf16.gmra.mrb[12].mxu1 %v2916_v58  ;;  %v212_v58 = vld [vmem:[%s3904_s4 + $0x108] sm:$0xff] }
  0x5f   : > { %2197 = vmatpush1.bf16.msra.mxu1 %v3476_v55  ;;  %2216 = vmatprep.mubr.bf16.mxu1 %v2871_v4  ;;  %v3553_v55 = vld [vmem:[%s4695_s1 + $0x624] ss:$8 sps:$4 sm:$0xff]   ;;  %v3554_v4 = vld [vmem:[%s4695_s1 + $0x230] ss:$8 sps:$4 sm:$0xff]  }
  0x60   : > { %2489 = vmatpush1.bf16.msra.mxu0 %v3479_v56  ;;  %2198 = vmatprep.subr.bf16.mxu1 %v3484_v59  ;;  %v3548_v56 = vld [vmem:[%s4695_s1 + $0x220] ss:$8 sps:$4 sm:$0xff]  }
  0x61   : > { %2490 = vmatprep.subr.bf16.mxu0 %v3487_v60  ;;  %2466 = vmatmul.mubr.bf16.gmra.mrb[12].mxu0 %v2924_v0  ;;  %v220_v59 = vld [vmem:[%s3904_s4 + $0x148] sm:$0xff]  ;;  %v2886_v60 = vcombine.low %v196_v42, %v204_v45  ;;  %v3556_v0 = vld [vmem:[%s4695_s1 + $0x234] ss:$8 sps:$4 sm:$0xff]   ;;  %v3593_v45 = vld [vmem:[%s4695_s1 + $0x690] ss:$8 sps:$4 sm:$0xff]  }
  0x62   : > { %2508 = vmatprep.mubr.bf16.mxu0 %v2879_v7  ;;  %v3565_v7 = vld [vmem:[%s4695_s1 + $0x644] ss:$8 sps:$4 sm:$0xff]   ;;  %v3592_v42 = vld [vmem:[%s4695_s1 + $0x294] ss:$8 sps:$4 sm:$0xff]  }
  0x63   : > { %2199 = vmatpush1.bf16.msra.mxu1 %v3482_v61  ;;  %v2894_v61 = vcombine.low %v200_v46, %v208_v47  ;;  %v3598_v46 = vld [vmem:[%s4695_s1 + $0x2a4] ss:$8 sps:$4 sm:$0xff]  }
  0x64   : > { %2491 = vmatpush1.bf16.msra.mxu0 %v3485_v62  ;;  %2200 = vmatprep.subr.bf16.mxu1 %v3490_v2  ;;  %v216_v62 = vld [vmem:[%s3904_s4 + $0x128] sm:$0xff]  ;;  %v2903_v2 = vcombine.high %v212_v58, %v220_v59 }
  0x65   : > { %2492 = vmatprep.subr.bf16.mxu0 %v3493_v3  ;;  %v2911_v3 = vcombine.high %v216_v62, %v224_v63  ;;  %v3601_v47 = vld [vmem:[%s4695_s1 + $0x6a4] ss:$8 sps:$4 sm:$0xff]  }
  0x67   : > { %2201 = vmatpush1.bf16.msra.mxu1 %v3488_v8  ;;  %v3560_v8 = vld [vmem:[%s4695_s1 + $0x240] ss:$8 sps:$4 sm:$0xff]  }
  0x68   : > { %2493 = vmatpush1.bf16.msra.mxu0 %v3491_v9  ;;  %2202 = vmatprep.subr.bf16.mxu1 %v3496_v10  ;;  %v3563_v9 = vld [vmem:[%s4695_s1 + $0x640] ss:$8 sps:$4 sm:$0xff]  }
  0x69   : > { %2494 = vmatprep.subr.bf16.mxu0 %v3499_v11  ;;  %v228_v10 = vld [vmem:[%s3904_s4 + $0x188] sm:$0xff] }
  0x6a   : > { %v236_v11 = vld [vmem:[%s3904_s4 + $0x1c8] sm:$0xff] }
  0x6b   : > { %2203 = vmatpush1.bf16.msra.mxu1 %v3494_v12  ;;  %v2902_v12 = vcombine.low %v212_v58, %v220_v59  ;;  %v3616_v58 = vld [vmem:[%s4695_s1 + $0x2d4] ss:$8 sps:$4 sm:$0xff]  }
  0x6c   : > { %2495 = vmatpush1.bf16.msra.mxu0 %v3497_v13  ;;  %2204 = vmatprep.subr.bf16.mxu1 %v3502_v14  ;;  %v2910_v13 = vcombine.low %v216_v62, %v224_v63  ;;  %v232_v14 = vld [vmem:[%s3904_s4 + $0x1a8] sm:$0xff]  ;;  %v3619_v59 = vld [vmem:[%s4695_s1 + $0x6d4] ss:$8 sps:$4 sm:$0xff]  }
  0x6d   : > { %2496 = vmatprep.subr.bf16.mxu0 %v3505_v15  ;;  %v240_v15 = vld [vmem:[%s3904_s4 + $0x1e8] sm:$0xff] }
  0x6e   : > { %v3622_v62 = vld [vmem:[%s4695_s1 + $0x2e4] ss:$8 sps:$4 sm:$0xff]  }
  0x6f   : > { %2205 = vmatpush1.bf16.msra.mxu1 %v3500_v16  ;;  %v3568_v16 = vld [vmem:[%s4695_s1 + $0x254] ss:$8 sps:$4 sm:$0xff]   ;;  %v3625_v63 = vld [vmem:[%s4695_s1 + $0x6e4] ss:$8 sps:$4 sm:$0xff]  }
  0x70   : > { %2497 = vmatpush1.bf16.msra.mxu0 %v3503_v17  ;;  %2206 = vmatprep.subr.bf16.mxu1 %v3508_v18  ;;  %v3571_v17 = vld [vmem:[%s4695_s1 + $0x654] ss:$8 sps:$4 sm:$0xff]   ;;  %v2919_v18 = vcombine.high %v228_v10, %v236_v11 }
  0x71   : > { %2498 = vmatprep.subr.bf16.mxu0 %v3511_v19  ;;  %v2927_v19 = vcombine.high %v232_v14, %v240_v15 }
  0x73   : > { %2207 = vmatpush1.bf16.msra.mxu1 %v3506_v20  ;;  %v3566_v20 = vld [vmem:[%s4695_s1 + $0x250] ss:$8 sps:$4 sm:$0xff]  }
  0x74   : > { %2499 = vmatpush1.bf16.msra.mxu0 %v3509_v21  ;;  %2208 = vmatprep.subr.bf16.mxu1 %v3514_v22  ;;  %v3569_v21 = vld [vmem:[%s4695_s1 + $0x650] ss:$8 sps:$4 sm:$0xff]   ;;  %v3574_v22 = vld [vmem:[%s4695_s1 + $0x264] ss:$8 sps:$4 sm:$0xff]  }
  0x75   : > { %2500 = vmatprep.subr.bf16.mxu0 %v3517_v23  ;;  %v3577_v23 = vld [vmem:[%s4695_s1 + $0x664] ss:$8 sps:$4 sm:$0xff]  }
  0x77   : > { %2209 = vmatpush1.bf16.msra.mxu1 %v3512_v24  ;;  %v3572_v24 = vld [vmem:[%s4695_s1 + $0x260] ss:$8 sps:$4 sm:$0xff]  }
  0x78   : > { %2501 = vmatpush1.bf16.msra.mxu0 %v3515_v25  ;;  %2210 = vmatprep.subr.bf16.mxu1 %v3520_v26  ;;  %v3575_v25 = vld [vmem:[%s4695_s1 + $0x660] ss:$8 sps:$4 sm:$0xff]   ;;  %v4291_v26 = vld [vmem:[%s3904_s4 + $0x10] sm:$0xff] }
  0x79   : > { %2502 = vmatprep.subr.bf16.mxu0 %v3523_v27  ;;  %v4294_v27 = vld [vmem:[%s3904_s4 + $0x50] sm:$0xff] }
  0x7b   : > { %2211 = vmatpush1.bf16.msra.mxu1 %v3518_v28  ;;  %v2918_v28 = vcombine.low %v228_v10, %v236_v11  ;;  %v205_v11 = vld [vmem:[%s3904_s4 + $0xd0] sm:$0xff] }
  0x7c   : > { %2503 = vmatpush1.bf16.msra.mxu0 %v3521_v29  ;;  %2212 = vmatprep.subr.bf16.mxu1 %v3526_v30  ;;  %v2926_v29 = vcombine.low %v232_v14, %v240_v15  ;;  %v4297_v30 = vld [vmem:[%s3904_s4 + $0x30] sm:$0xff]  ;;  %v3632_v14 = vld [vmem:[%s4695_s1 + $0x300] ss:$8 sps:$4 sm:$0xff]  }
  0x7d   : > { %2504 = vmatprep.subr.bf16.mxu0 %v3529_v31  ;;  %v4300_v31 = vld [vmem:[%s3904_s4 + $0x70] sm:$0xff]  ;;  %v3635_v15 = vld [vmem:[%s4695_s1 + $0x700] ss:$8 sps:$4 sm:$0xff]  }
  0x7e   : > { %v2880_v10 = vcombine.low %v4297_v30, %v4300_v31 }
  0x7f   : > { %2213 = vmatpush1.bf16.msra.mxu1 %v3524_v32  ;;  %v3580_v32 = vld [vmem:[%s4695_s1 + $0x274] ss:$8 sps:$4 sm:$0xff]  }
  0x80   : > { %2505 = vmatpush1.bf16.msra.mxu0 %v3527_v33  ;;  %2214 = vmatprep.subr.bf16.mxu1 %v3532_v34  ;;  %v3583_v33 = vld [vmem:[%s4695_s1 + $0x674] ss:$8 sps:$4 sm:$0xff]   ;;  %v2873_v34 = vcombine.high %v4291_v26, %v4294_v27 }
  0x81   : > { %2506 = vmatprep.subr.bf16.mxu0 %v3535_v35  ;;  %v2881_v35 = vcombine.high %v4297_v30, %v4300_v31  ;;  %v3644_v30 = vld [vmem:[%s4695_s1 + $0x320] ss:$8 sps:$4 sm:$0xff]  }
  0x82   : > { %v3647_v31 = vld [vmem:[%s4695_s1 + $0x720] ss:$8 sps:$4 sm:$0xff]  }
  0x83   : > { %2215 = vmatpush1.bf16.msra.mxu1 %v3530_v36  ;;  %v3578_v36 = vld [vmem:[%s4695_s1 + $0x270] ss:$8 sps:$4 sm:$0xff]  }
  0x84   : > { %2507 = vmatpush1.bf16.msra.mxu0 %v3533_v37  ;;  %2257 = vmatprep.subr.bf16.mxu1 %v3538_v38  ;;  %v3581_v37 = vld [vmem:[%s4695_s1 + $0x670] ss:$8 sps:$4 sm:$0xff]   ;;  %v3586_v38 = vld [vmem:[%s4695_s1 + $0x284] ss:$8 sps:$4 sm:$0xff]  }
  0x85   : > { %2549 = vmatprep.subr.bf16.mxu0 %v3541_v39  ;;  %v3589_v39 = vld [vmem:[%s4695_s1 + $0x684] ss:$8 sps:$4 sm:$0xff]  }
  0x86   : > { %2217 = vmatmul.mubr.bf16.vlgmr.msra.gmra.mrb[0].mxu1 %v2870_v43  ;;  %v3595_v43 = vld [vmem:[%s4695_s1 + $0x694] ss:$8 sps:$4 sm:$0xff]  }
  0x87   : > { %2509 = vmatmul.mubr.bf16.vlgmr.msra.gmra.mrb[0].mxu0 %v2878_v44  ;;  %2258 = vmatpush1.bf16.msra.mxu1 %v3536_v40  ;;  %v3584_v40 = vld [vmem:[%s4695_s1 + $0x280] ss:$8 sps:$4 sm:$0xff]   ;;  %v3590_v44 = vld [vmem:[%s4695_s1 + $0x290] ss:$8 sps:$4 sm:$0xff]  }
  0x88   : > { %2550 = vmatpush1.bf16.msra.mxu0 %v3539_v41  ;;  %2259 = vmatprep.subr.bf16.mxu1 %v3544_v48  ;;  %v3587_v41 = vld [vmem:[%s4695_s1 + $0x680] ss:$8 sps:$4 sm:$0xff]  }
  0x89   : > { %2551 = vmatprep.subr.bf16.mxu0 %v3547_v49  ;;  %2226 = vmatprep.mubr.bf16.mxu1 %v2887_v50  ;;  %v3596_v48 = vld [vmem:[%s4695_s1 + $0x2a0] ss:$8 sps:$4 sm:$0xff]   ;;  %v3604_v50 = vld [vmem:[%s4695_s1 + $0x2b4] ss:$8 sps:$4 sm:$0xff]  }
  0x8a   : > { %2518 = vmatprep.mubr.bf16.mxu0 %v2895_v51  ;;  %v3599_v49 = vld [vmem:[%s4695_s1 + $0x6a0] ss:$8 sps:$4 sm:$0xff]   ;;  %v3607_v51 = vld [vmem:[%s4695_s1 + $0x6b4] ss:$8 sps:$4 sm:$0xff]  }
  0x8b   : > { %2260 = vmatpush1.bf16.msra.mxu1 %v3542_v52  ;;  %v3602_v52 = vld [vmem:[%s4695_s1 + $0x2b0] ss:$8 sps:$4 sm:$0xff]  }
  0x8c   : > { %2552 = vmatpush1.bf16.msra.mxu0 %v3545_v53  ;;  %2261 = vmatprep.subr.bf16.mxu1 %v3550_v54  ;;  %v3605_v53 = vld [vmem:[%s4695_s1 + $0x6b0] ss:$8 sps:$4 sm:$0xff]   ;;  %v3610_v54 = vld [vmem:[%s4695_s1 + $0x2c4] ss:$8 sps:$4 sm:$0xff]  }
  0x8d   : > { %2553 = vmatprep.subr.bf16.mxu0 %v3553_v55  ;;  %v3613_v55 = vld [vmem:[%s4695_s1 + $0x6c4] ss:$8 sps:$4 sm:$0xff]  }
  0x8e   : > { %2227 = vmatmul.mubr.bf16.gmra.mrb[4].mxu1 %v2886_v60  ;;  %v3614_v60 = vld [vmem:[%s4695_s1 + $0x2d0] ss:$8 sps:$4 sm:$0xff]  }
  0x8f   : > { %2519 = vmatmul.mubr.bf16.gmra.mrb[4].mxu0 %v2894_v61  ;;  %2262 = vmatpush1.bf16.msra.mxu1 %v3548_v56  ;;  %v3608_v56 = vld [vmem:[%s4695_s1 + $0x2c0] ss:$8 sps:$4 sm:$0xff]   ;;  %v3617_v61 = vld [vmem:[%s4695_s1 + $0x6d0] ss:$8 sps:$4 sm:$0xff]  }
  0x90   : > { %2554 = vmatpush1.bf16.msra.mxu0 %v3551_v57  ;;  %2263 = vmatprep.subr.bf16.mxu1 %v3556_v0  ;;  %v3611_v57 = vld [vmem:[%s4695_s1 + $0x6c0] ss:$8 sps:$4 sm:$0xff]  }
  0x91   : > { %2555 = vmatprep.subr.bf16.mxu0 %v3559_v1  ;;  %2236 = vmatprep.mubr.bf16.mxu1 %v2903_v2  ;;  %v3620_v0 = vld [vmem:[%s4695_s1 + $0x2e0] ss:$8 sps:$4 sm:$0xff]   ;;  %v3628_v2 = vld [vmem:[%s4695_s1 + $0x2f4] ss:$8 sps:$4 sm:$0xff]  }
  0x92   : > { %2528 = vmatprep.mubr.bf16.mxu0 %v2911_v3  ;;  %v3623_v1 = vld [vmem:[%s4695_s1 + $0x6e0] ss:$8 sps:$4 sm:$0xff]   ;;  %v3631_v3 = vld [vmem:[%s4695_s1 + $0x6f4] ss:$8 sps:$4 sm:$0xff]  }
  0x93   : > { %2264 = vmatpush1.bf16.msra.mxu1 %v3554_v4  ;;  %v3626_v4 = vld [vmem:[%s4695_s1 + $0x2f0] ss:$8 sps:$4 sm:$0xff]  }
  0x94   : > { %2556 = vmatpush1.bf16.msra.mxu0 %v3557_v5  ;;  %2265 = vmatprep.subr.bf16.mxu1 %v3562_v6  ;;  %v3629_v5 = vld [vmem:[%s4695_s1 + $0x6f0] ss:$8 sps:$4 sm:$0xff]   ;;  %v3634_v6 = vld [vmem:[%s4695_s1 + $0x304] ss:$8 sps:$4 sm:$0xff]  }
  0x95   : > { %2557 = vmatprep.subr.bf16.mxu0 %v3565_v7  ;;  %v3637_v7 = vld [vmem:[%s4695_s1 + $0x704] ss:$8 sps:$4 sm:$0xff]  }
  0x96   : > { %2237 = vmatmul.mubr.bf16.gmra.mrb[8].mxu1 %v2902_v12  ;;  %v201_v12 = vld [vmem:[%s3904_s4 + $0xb0] sm:$0xff] }
  0x97   : > { %2529 = vmatmul.mubr.bf16.gmra.mrb[8].mxu0 %v2910_v13  ;;  %2266 = vmatpush1.bf16.msra.mxu1 %v3560_v8  ;;  %v197_v8 = vld [vmem:[%s3904_s4 + $0x90] sm:$0xff] }
  0x98   : > { %2558 = vmatpush1.bf16.msra.mxu0 %v3563_v9  ;;  %2267 = vmatprep.subr.bf16.mxu1 %v3568_v16  ;;  %v2872_v9 = vcombine.low %v4291_v26, %v4294_v27  ;;  %v209_v13 = vld [vmem:[%s3904_s4 + $0xf0] sm:$0xff] }
  0x99   : > { %2559 = vmatprep.subr.bf16.mxu0 %v3571_v17  ;;  %2246 = vmatprep.mubr.bf16.mxu1 %v2919_v18  ;;  %v3640_v16 = vld [vmem:[%s4695_s1 + $0x314] ss:$8 sps:$4 sm:$0xff]   ;;  %v2889_v18 = vcombine.high %v197_v8, %v205_v11  ;;  %v2896_v26 = vcombine.low %v201_v12, %v209_v13 }
  0x9a   : > { %2538 = vmatprep.mubr.bf16.mxu0 %v2927_v19  ;;  %v3643_v17 = vld [vmem:[%s4695_s1 + $0x714] ss:$8 sps:$4 sm:$0xff]   ;;  %v2897_v19 = vcombine.high %v201_v12, %v209_v13  ;;  %v3686_v12 = vld [vmem:[%s4695_s1 + $0x390] ss:$8 sps:$4 sm:$0xff]  }
  0x9b   : > { %2268 = vmatpush1.bf16.msra.mxu1 %v3566_v20  ;;  %v3638_v20 = vld [vmem:[%s4695_s1 + $0x310] ss:$8 sps:$4 sm:$0xff]  }
  0x9c   : > { %2560 = vmatpush1.bf16.msra.mxu0 %v3569_v21  ;;  %2269 = vmatprep.subr.bf16.mxu1 %v3574_v22  ;;  %v3641_v21 = vld [vmem:[%s4695_s1 + $0x710] ss:$8 sps:$4 sm:$0xff]   ;;  %v3646_v22 = vld [vmem:[%s4695_s1 + $0x324] ss:$8 sps:$4 sm:$0xff]  }
  0x9d   : > { %2561 = vmatprep.subr.bf16.mxu0 %v3577_v23  ;;  %v3649_v23 = vld [vmem:[%s4695_s1 + $0x724] ss:$8 sps:$4 sm:$0xff]   ;;  %v221_v27 = vld [vmem:[%s3904_s4 + $0x150] sm:$0xff] }
  0x9e   : > { %2247 = vmatmul.mubr.bf16.gmra.mrb[12].mxu1 %v2918_v28  ;;  %v217_v28 = vld [vmem:[%s3904_s4 + $0x130] sm:$0xff] }
  0x9f   : > { %2539 = vmatmul.mubr.bf16.gmra.mrb[12].mxu0 %v2926_v29  ;;  %2270 = vmatpush1.bf16.msra.mxu1 %v3572_v24  ;;  %v213_v24 = vld [vmem:[%s3904_s4 + $0x110] sm:$0xff] }
  0xa0   : > { %2562 = vmatpush1.bf16.msra.mxu0 %v3575_v25  ;;  %2271 = vmatprep.subr.bf16.mxu1 %v3580_v32  ;;  %v2888_v25 = vcombine.low %v197_v8, %v205_v11  ;;  %v225_v29 = vld [vmem:[%s3904_s4 + $0x170] sm:$0xff]  ;;  %v3680_v8 = vld [vmem:[%s4695_s1 + $0x380] ss:$8 sps:$4 sm:$0xff]  }
  0xa1   : > { %2563 = vmatprep.subr.bf16.mxu0 %v3583_v33  ;;  %2289 = vmatprep.mubr.bf16.mxu1 %v2873_v34  ;;  %v3652_v32 = vld [vmem:[%s4695_s1 + $0x334] ss:$8 sps:$4 sm:$0xff]   ;;  %v2905_v34 = vcombine.high %v213_v24, %v221_v27  ;;  %v3689_v13 = vld [vmem:[%s4695_s1 + $0x790] ss:$8 sps:$4 sm:$0xff]  }
  0xa2   : > { %2581 = vmatprep.mubr.bf16.mxu0 %v2881_v35  ;;  %v3655_v33 = vld [vmem:[%s4695_s1 + $0x734] ss:$8 sps:$4 sm:$0xff]   ;;  %v2913_v35 = vcombine.high %v217_v28, %v225_v29 }
  0xa3   : > { %2272 = vmatpush1.bf16.msra.mxu1 %v3578_v36  ;;  %v3650_v36 = vld [vmem:[%s4695_s1 + $0x330] ss:$8 sps:$4 sm:$0xff]   ;;  %v3691_v11 = vld [vmem:[%s4695_s1 + $0x794] ss:$8 sps:$4 sm:$0xff]  }
  0xa4   : > { %2564 = vmatpush1.bf16.msra.mxu0 %v3581_v37  ;;  %2273 = vmatprep.subr.bf16.mxu1 %v3586_v38  ;;  %v3653_v37 = vld [vmem:[%s4695_s1 + $0x730] ss:$8 sps:$4 sm:$0xff]   ;;  %v3658_v38 = vld [vmem:[%s4695_s1 + $0x344] ss:$8 sps:$4 sm:$0xff]  }
  0xa5   : > { %2565 = vmatprep.subr.bf16.mxu0 %v3589_v39  ;;  %v3661_v39 = vld [vmem:[%s4695_s1 + $0x744] ss:$8 sps:$4 sm:$0xff]  }
  0xa7   : > { %2274 = vmatpush1.bf16.msra.mxu1 %v3584_v40  ;;  %v229_v40 = vld [vmem:[%s3904_s4 + $0x190] sm:$0xff] }
  0xa8   : > { %2566 = vmatpush1.bf16.msra.mxu0 %v3587_v41  ;;  %2275 = vmatprep.subr.bf16.mxu1 %v3592_v42  ;;  %v2904_v41 = vcombine.low %v213_v24, %v221_v27  ;;  %v2912_v42 = vcombine.low %v217_v28, %v225_v29  ;;  %v3704_v24 = vld [vmem:[%s4695_s1 + $0x3c0] ss:$8 sps:$4 sm:$0xff]   ;;  %v3715_v27 = vld [vmem:[%s4695_s1 + $0x7d4] ss:$8 sps:$4 sm:$0xff]   ;;  %v3710_v28 = vld [vmem:[%s4695_s1 + $0x3d0] ss:$8 sps:$4 sm:$0xff]  }
  0xa9   : > { %2567 = vmatprep.subr.bf16.mxu0 %v3595_v43  ;;  %v237_v43 = vld [vmem:[%s3904_s4 + $0x1d0] sm:$0xff] }
  0xaa   : > { %v3713_v29 = vld [vmem:[%s4695_s1 + $0x7d0] ss:$8 sps:$4 sm:$0xff]  }
  0xab   : > { %2276 = vmatpush1.bf16.msra.mxu1 %v3590_v44  ;;  %v233_v44 = vld [vmem:[%s3904_s4 + $0x1b0] sm:$0xff] }
  0xac   : > { %2568 = vmatpush1.bf16.msra.mxu0 %v3593_v45  ;;  %2277 = vmatprep.subr.bf16.mxu1 %v3598_v46  ;;  %v241_v45 = vld [vmem:[%s3904_s4 + $0x1f0] sm:$0xff]  ;;  %v3656_v46 = vld [vmem:[%s4695_s1 + $0x340] ss:$8 sps:$4 sm:$0xff]  }
  0xad   : > { %2569 = vmatprep.subr.bf16.mxu0 %v3601_v47  ;;  %v3659_v47 = vld [vmem:[%s4695_s1 + $0x740] ss:$8 sps:$4 sm:$0xff]  }
  0xaf   : > { %2278 = vmatpush1.bf16.msra.mxu1 %v3596_v48  ;;  %v3664_v48 = vld [vmem:[%s4695_s1 + $0x354] ss:$8 sps:$4 sm:$0xff]  }
  0xb0   : > { %2570 = vmatpush1.bf16.msra.mxu0 %v3599_v49  ;;  %2279 = vmatprep.subr.bf16.mxu1 %v3604_v50  ;;  %v3667_v49 = vld [vmem:[%s4695_s1 + $0x754] ss:$8 sps:$4 sm:$0xff]   ;;  %v2921_v50 = vcombine.high %v229_v40, %v237_v43 }
  0xb1   : > { %2571 = vmatprep.subr.bf16.mxu0 %v3607_v51  ;;  %v2929_v51 = vcombine.high %v233_v44, %v241_v45 }
  0xb3   : > { %2280 = vmatpush1.bf16.msra.mxu1 %v3602_v52  ;;  %v3662_v52 = vld [vmem:[%s4695_s1 + $0x350] ss:$8 sps:$4 sm:$0xff]  }
  0xb4   : > { %2572 = vmatpush1.bf16.msra.mxu0 %v3605_v53  ;;  %2281 = vmatprep.subr.bf16.mxu1 %v3610_v54  ;;  %v3665_v53 = vld [vmem:[%s4695_s1 + $0x750] ss:$8 sps:$4 sm:$0xff]   ;;  %v3670_v54 = vld [vmem:[%s4695_s1 + $0x364] ss:$8 sps:$4 sm:$0xff]  }
  0xb5   : > { %2573 = vmatprep.subr.bf16.mxu0 %v3613_v55  ;;  %v3673_v55 = vld [vmem:[%s4695_s1 + $0x764] ss:$8 sps:$4 sm:$0xff]  }
  0xb7   : > { %2282 = vmatpush1.bf16.msra.mxu1 %v3608_v56  ;;  %v4509_v56 = vld [vmem:[%s3904_s4 + $0x18] sm:$0xff] }
  0xb8   : > { %2574 = vmatpush1.bf16.msra.mxu0 %v3611_v57  ;;  %2283 = vmatprep.subr.bf16.mxu1 %v3616_v58  ;;  %v2920_v57 = vcombine.low %v229_v40, %v237_v43  ;;  %v2928_v58 = vcombine.low %v233_v44, %v241_v45  ;;  %v202_v40 = vld [vmem:[%s3904_s4 + $0xb8] sm:$0xff] }
  0xb9   : > { %2575 = vmatprep.subr.bf16.mxu0 %v3619_v59  ;;  %v4512_v59 = vld [vmem:[%s3904_s4 + $0x58] sm:$0xff] }
  0xbb   : > { %2284 = vmatpush1.bf16.msra.mxu1 %v3614_v60  ;;  %v4515_v60 = vld [vmem:[%s3904_s4 + $0x38] sm:$0xff] }
  0xbc   : > { %2576 = vmatpush1.bf16.msra.mxu0 %v3617_v61  ;;  %2285 = vmatprep.subr.bf16.mxu1 %v3622_v62  ;;  %v4518_v61 = vld [vmem:[%s3904_s4 + $0x78] sm:$0xff]  ;;  %v3668_v62 = vld [vmem:[%s4695_s1 + $0x360] ss:$8 sps:$4 sm:$0xff]  }
  0xbd   : > { %2577 = vmatprep.subr.bf16.mxu0 %v3625_v63  ;;  %v3671_v63 = vld [vmem:[%s4695_s1 + $0x760] ss:$8 sps:$4 sm:$0xff]   ;;  %v2882_v43 = vcombine.low %v4515_v60, %v4518_v61 }
  0xbf   : > { %2286 = vmatpush1.bf16.msra.mxu1 %v3620_v0  ;;  %v3676_v0 = vld [vmem:[%s4695_s1 + $0x374] ss:$8 sps:$4 sm:$0xff]  }
  0xc0   : > { %2578 = vmatpush1.bf16.msra.mxu0 %v3623_v1  ;;  %2287 = vmatprep.subr.bf16.mxu1 %v3628_v2  ;;  %v3679_v1 = vld [vmem:[%s4695_s1 + $0x774] ss:$8 sps:$4 sm:$0xff]   ;;  %v2875_v2 = vcombine.high %v4509_v56, %v4512_v59 }
  0xc1   : > { %2579 = vmatprep.subr.bf16.mxu0 %v3631_v3  ;;  %v2883_v3 = vcombine.high %v4515_v60, %v4518_v61 }
  0xc3   : > { %2288 = vmatpush1.bf16.msra.mxu1 %v3626_v4  ;;  %v3674_v4 = vld [vmem:[%s4695_s1 + $0x370] ss:$8 sps:$4 sm:$0xff]  }
  0xc4   : > { %2580 = vmatpush1.bf16.msra.mxu0 %v3629_v5  ;;  %2330 = vmatprep.subr.bf16.mxu1 %v3634_v6  ;;  %v3677_v5 = vld [vmem:[%s4695_s1 + $0x770] ss:$8 sps:$4 sm:$0xff]   ;;  %v3682_v6 = vld [vmem:[%s4695_s1 + $0x384] ss:$8 sps:$4 sm:$0xff]  }
  0xc5   : > { %2622 = vmatprep.subr.bf16.mxu0 %v3637_v7  ;;  %v3685_v7 = vld [vmem:[%s4695_s1 + $0x784] ss:$8 sps:$4 sm:$0xff]  }
  0xc6   : > { %2290 = vmatmul.mubr.bf16.vlgmr.msra.gmra.mrb[0].mxu1 %v2872_v9  ;;  %v3683_v9 = vld [vmem:[%s4695_s1 + $0x780] ss:$8 sps:$4 sm:$0xff]  }
  0xc7   : > { %2582 = vmatmul.mubr.bf16.vlgmr.msra.gmra.mrb[0].mxu0 %v2880_v10  ;;  %2331 = vmatpush1.bf16.msra.mxu1 %v3632_v14  ;;  %v3688_v10 = vld [vmem:[%s4695_s1 + $0x394] ss:$8 sps:$4 sm:$0xff]   ;;  %v3694_v14 = vld [vmem:[%s4695_s1 + $0x3a4] ss:$8 sps:$4 sm:$0xff]  }
  0xc8   : > { %2623 = vmatpush1.bf16.msra.mxu0 %v3635_v15  ;;  %2332 = vmatprep.subr.bf16.mxu1 %v3640_v16  ;;  %v3697_v15 = vld [vmem:[%s4695_s1 + $0x7a4] ss:$8 sps:$4 sm:$0xff]   ;;  %v3692_v16 = vld [vmem:[%s4695_s1 + $0x3a0] ss:$8 sps:$4 sm:$0xff]  }
  0xc9   : > { %2624 = vmatprep.subr.bf16.mxu0 %v3643_v17  ;;  %2299 = vmatprep.mubr.bf16.mxu1 %v2889_v18  ;;  %v3695_v17 = vld [vmem:[%s4695_s1 + $0x7a0] ss:$8 sps:$4 sm:$0xff]   ;;  %v3700_v18 = vld [vmem:[%s4695_s1 + $0x3b4] ss:$8 sps:$4 sm:$0xff]  }
  0xca   : > { %2591 = vmatprep.mubr.bf16.mxu0 %v2897_v19  ;;  %v3703_v19 = vld [vmem:[%s4695_s1 + $0x7b4] ss:$8 sps:$4 sm:$0xff]  }
  0xcb   : > { %2333 = vmatpush1.bf16.msra.mxu1 %v3638_v20  ;;  %v3698_v20 = vld [vmem:[%s4695_s1 + $0x3b0] ss:$8 sps:$4 sm:$0xff]  }
  0xcc   : > { %2625 = vmatpush1.bf16.msra.mxu0 %v3641_v21  ;;  %2334 = vmatprep.subr.bf16.mxu1 %v3646_v22  ;;  %v3701_v21 = vld [vmem:[%s4695_s1 + $0x7b0] ss:$8 sps:$4 sm:$0xff]   ;;  %v3706_v22 = vld [vmem:[%s4695_s1 + $0x3c4] ss:$8 sps:$4 sm:$0xff]  }
  0xcd   : > { %2626 = vmatprep.subr.bf16.mxu0 %v3649_v23  ;;  %v3709_v23 = vld [vmem:[%s4695_s1 + $0x7c4] ss:$8 sps:$4 sm:$0xff]  }
  0xce   : > { %2300 = vmatmul.mubr.bf16.gmra.mrb[4].mxu1 %v2888_v25  ;;  %v3707_v25 = vld [vmem:[%s4695_s1 + $0x7c0] ss:$8 sps:$4 sm:$0xff]  }
  0xcf   : > { %2592 = vmatmul.mubr.bf16.gmra.mrb[4].mxu0 %v2896_v26  ;;  %2335 = vmatpush1.bf16.msra.mxu1 %v3644_v30  ;;  %v3712_v26 = vld [vmem:[%s4695_s1 + $0x3d4] ss:$8 sps:$4 sm:$0xff]   ;;  %v3718_v30 = vld [vmem:[%s4695_s1 + $0x3e4] ss:$8 sps:$4 sm:$0xff]  }
  0xd0   : > { %2627 = vmatpush1.bf16.msra.mxu0 %v3647_v31  ;;  %2336 = vmatprep.subr.bf16.mxu1 %v3652_v32  ;;  %v3721_v31 = vld [vmem:[%s4695_s1 + $0x7e4] ss:$8 sps:$4 sm:$0xff]   ;;  %v3716_v32 = vld [vmem:[%s4695_s1 + $0x3e0] ss:$8 sps:$4 sm:$0xff]  }
  0xd1   : > { %2628 = vmatprep.subr.bf16.mxu0 %v3655_v33  ;;  %2309 = vmatprep.mubr.bf16.mxu1 %v2905_v34  ;;  %v3719_v33 = vld [vmem:[%s4695_s1 + $0x7e0] ss:$8 sps:$4 sm:$0xff]   ;;  %v3724_v34 = vld [vmem:[%s4695_s1 + $0x3f4] ss:$8 sps:$4 sm:$0xff]  }
  0xd2   : > { %2601 = vmatprep.mubr.bf16.mxu0 %v2913_v35  ;;  %v3727_v35 = vld [vmem:[%s4695_s1 + $0x7f4] ss:$8 sps:$4 sm:$0xff]  }
  0xd3   : > { %2337 = vmatpush1.bf16.msra.mxu1 %v3650_v36  ;;  %v3722_v36 = vld [vmem:[%s4695_s1 + $0x3f0] ss:$8 sps:$4 sm:$0xff]  }
  0xd4   : > { %2629 = vmatpush1.bf16.msra.mxu0 %v3653_v37  ;;  %2338 = vmatprep.subr.bf16.mxu1 %v3658_v38  ;;  %v3725_v37 = vld [vmem:[%s4695_s1 + $0x7f0] ss:$8 sps:$4 sm:$0xff]  }
  0xd5   : > { %2630 = vmatprep.subr.bf16.mxu0 %v3661_v39  ;;  %v198_v38 = vld [vmem:[%s3904_s4 + $0x98] sm:$0xff] }
  0xd6   : > { %2310 = vmatmul.mubr.bf16.gmra.mrb[8].mxu1 %v2904_v41  ;;  %v206_v39 = vld [vmem:[%s3904_s4 + $0xd8] sm:$0xff] }
  0xd7   : > { %2602 = vmatmul.mubr.bf16.gmra.mrb[8].mxu0 %v2912_v42  ;;  %2339 = vmatpush1.bf16.msra.mxu1 %v3656_v46  ;;  %v210_v41 = vld [vmem:[%s3904_s4 + $0xf8] sm:$0xff]  ;;  %v2874_v42 = vcombine.low %v4509_v56, %v4512_v59  ;;  %v2891_v44 = vcombine.high %v198_v38, %v206_v39 }
  0xd8   : > { %2631 = vmatpush1.bf16.msra.mxu0 %v3659_v47  ;;  %2340 = vmatprep.subr.bf16.mxu1 %v3664_v48  ;;  %v2899_v45 = vcombine.high %v202_v40, %v210_v41  ;;  %v214_v46 = vld [vmem:[%s3904_s4 + $0x118] sm:$0xff] }
  0xd9   : > { %2632 = vmatprep.subr.bf16.mxu0 %v3667_v49  ;;  %2319 = vmatprep.mubr.bf16.mxu1 %v2921_v50  ;;  %v222_v47 = vld [vmem:[%s3904_s4 + $0x158] sm:$0xff]  ;;  %v2890_v50 = vcombine.low %v198_v38, %v206_v39 }
  0xda   : > { %2611 = vmatprep.mubr.bf16.mxu0 %v2929_v51  ;;  %v218_v48 = vld [vmem:[%s3904_s4 + $0x138] sm:$0xff]  ;;  %v2898_v51 = vcombine.low %v202_v40, %v210_v41 }
  0xdb   : > { %2341 = vmatpush1.bf16.msra.mxu1 %v3662_v52  ;;  %v226_v49 = vld [vmem:[%s3904_s4 + $0x178] sm:$0xff]  ;;  %v2907_v52 = vcombine.high %v214_v46, %v222_v47 }
  0xdc   : > { %2633 = vmatpush1.bf16.msra.mxu0 %v3665_v53  ;;  %2342 = vmatprep.subr.bf16.mxu1 %v3670_v54  ;;  %v2915_v53 = vcombine.high %v218_v48, %v226_v49  ;;  %v230_v54 = vld [vmem:[%s3904_s4 + $0x198] sm:$0xff]  ;;  %v2914_v59 = vcombine.low %v218_v48, %v226_v49 }
  0xdd   : > { %2634 = vmatprep.subr.bf16.mxu0 %v3673_v55  ;;  %v238_v55 = vld [vmem:[%s3904_s4 + $0x1d8] sm:$0xff] }
  0xde   : > { %2320 = vmatmul.mubr.bf16.gmra.mrb[12].mxu1 %v2920_v57  ;;  %v234_v56 = vld [vmem:[%s3904_s4 + $0x1b8] sm:$0xff]  ;;  %v2923_v60 = vcombine.high %v230_v54, %v238_v55 }
  0xdf   : > { %2612 = vmatmul.mubr.bf16.gmra.mrb[12].mxu0 %v2928_v58  ;;  %2343 = vmatpush1.bf16.msra.mxu1 %v3668_v62  ;;  %v242_v57 = vld [vmem:[%s3904_s4 + $0x1f8] sm:$0xff]  ;;  %v2906_v58 = vcombine.low %v214_v46, %v222_v47  ;;  %v2922_v62 = vcombine.low %v230_v54, %v238_v55  ;;  %s3199_s4 = sshll.u32 %s4699_s24, 3 }
  0xe0   : > { %2635 = vmatpush1.bf16.msra.mxu0 %v3671_v63  ;;  %2344 = vmatprep.subr.bf16.mxu1 %v3676_v0  ;;  %v2931_v61 = vcombine.high %v234_v56, %v242_v57  ;;  %v2930_v63 = vcombine.low %v234_v56, %v242_v57  ;;  %v501_v0 = vlaneseq  ;;  %s4669_s27 = scalar_lea.vmem %s4697_s3, %s3199_s4 }
  0xe1   : > { %2636 = vmatprep.subr.bf16.mxu0 %v3679_v1  ;;  %2362 = vmatprep.mubr.bf16.mxu1 %v2875_v2 }
  0xe2   : > { %2654 = vmatprep.mubr.bf16.mxu0 %v2883_v3  ;;  %v502_v1 = vshrl.u32 %v501_v0, 7  ;;  %v499_v3 = vld [vmem:[%s4696_s2] sm:$0x3] }
  0xe3   : > { %2345 = vmatpush1.bf16.msra.mxu1 %v3674_v4 }
  0xe4   : > { %2637 = vmatpush1.bf16.msra.mxu0 %v3677_v5  ;;  %2346 = vmatprep.subr.bf16.mxu1 %v3682_v6  ;;  %v503_v2 = vsub.s32 0, %v502_v1  ;;  %v507_v4 = vsub.s32 1, %v502_v1 }
  0xe5   : > { %2638 = vmatprep.subr.bf16.mxu0 %v3685_v7 }
  0xe6   : > { %v4657_v5 = vrot.slane %v499_v3, %v503_v2  ;;  %v4659_v6 = vrot.slane %v499_v3, %v507_v4 }
  0xe7   : > { %2347 = vmatpush1.bf16.msra.mxu1 %v3680_v8 }
  0xe8   : > { %2639 = vmatpush1.bf16.msra.mxu0 %v3683_v9  ;;  %2348 = vmatprep.subr.bf16.mxu1 %v3688_v10 }
  0xe9   : > { %2640 = vmatprep.subr.bf16.mxu0 %v3691_v11 }
  0xeb   : > { %2349 = vmatpush1.bf16.msra.mxu1 %v3686_v12 }
  0xec   : > { %2641 = vmatpush1.bf16.msra.mxu0 %v3689_v13  ;;  %2350 = vmatprep.subr.bf16.mxu1 %v3694_v14 }
  0xed   : > { %2642 = vmatprep.subr.bf16.mxu0 %v3697_v15 }
  0xef   : > { %2351 = vmatpush1.bf16.msra.mxu1 %v3692_v16 }
  0xf0   : > { %2643 = vmatpush1.bf16.msra.mxu0 %v3695_v17  ;;  %2352 = vmatprep.subr.bf16.mxu1 %v3700_v18 }
  0xf1   : > { %2644 = vmatprep.subr.bf16.mxu0 %v3703_v19 }
  0xf3   : > { %2353 = vmatpush1.bf16.msra.mxu1 %v3698_v20 }
  0xf4   : > { %2645 = vmatpush1.bf16.msra.mxu0 %v3701_v21  ;;  %2354 = vmatprep.subr.bf16.mxu1 %v3706_v22 }
  0xf5   : > { %2646 = vmatprep.subr.bf16.mxu0 %v3709_v23 }
  0xf7   : > { %2355 = vmatpush1.bf16.msra.mxu1 %v3704_v24 }
  0xf8   : > { %2647 = vmatpush1.bf16.msra.mxu0 %v3707_v25  ;;  %2356 = vmatprep.subr.bf16.mxu1 %v3712_v26 }
  0xf9   : > { %2648 = vmatprep.subr.bf16.mxu0 %v3715_v27 }
  0xfb   : > { %2357 = vmatpush1.bf16.msra.mxu1 %v3710_v28 }
  0xfc   : > { %2649 = vmatpush1.bf16.msra.mxu0 %v3713_v29  ;;  %2358 = vmatprep.subr.bf16.mxu1 %v3718_v30 }
  0xfd   : > { %2650 = vmatprep.subr.bf16.mxu0 %v3721_v31 }
  0xff   : > { %2359 = vmatpush1.bf16.msra.mxu1 %v3716_v32 }
 0x100   : > { %2651 = vmatpush1.bf16.msra.mxu0 %v3719_v33  ;;  %2360 = vmatprep.subr.bf16.mxu1 %v3724_v34 }
 0x101   : > { %2652 = vmatprep.subr.bf16.mxu0 %v3727_v35 }
 0x103   : > { %2361 = vmatpush1.bf16.msra.mxu1 %v3722_v36 }
 0x104   : > { %2653 = vmatpush1.bf16.msra.mxu0 %v3725_v37 }
 0x106   : > { %2363 = vmatmul.mubr.bf16.vlgmr.msra.gmra.mrb[0].mxu1 %v2874_v42 }
 0x107   : > { %2655 = vmatmul.mubr.bf16.vlgmr.msra.gmra.mrb[0].mxu0 %v2882_v43  ;;  %2372 = vmatprep.mubr.bf16.mxu1 %v2891_v44 }
 0x108   : > { %2664 = vmatprep.mubr.bf16.mxu0 %v2899_v45 }
 0x10e   : > { %2373 = vmatmul.mubr.bf16.gmra.mrb[4].mxu1 %v2890_v50 }
 0x10f   : > { %2665 = vmatmul.mubr.bf16.gmra.mrb[4].mxu0 %v2898_v51  ;;  %2382 = vmatprep.mubr.bf16.mxu1 %v2907_v52 }
 0x110   : > { %2674 = vmatprep.mubr.bf16.mxu0 %v2915_v53 }
 0x116   : > { %2383 = vmatmul.mubr.bf16.gmra.mrb[8].mxu1 %v2906_v58 }
 0x117   : > { %2675 = vmatmul.mubr.bf16.gmra.mrb[8].mxu0 %v2914_v59  ;;  %2392 = vmatprep.mubr.bf16.mxu1 %v2923_v60 }
 0x118   : > { %2684 = vmatprep.mubr.bf16.mxu0 %v2931_v61 }
 0x11e   : > { %2393 = vmatmul.mubr.bf16.gmra.mrb[12].mxu1 %v2922_v62 }
 0x11f   : > { %2685 = vmatmul.mubr.bf16.gmra.mrb[12].mxu0 %v2930_v63 }
 0x1d9   : > { %v2364_v7 = vpop.f32.mrb[0].mxu1 }
 0x1da   : > { %v2656_v8 = vpop.f32.mrb[0].mxu0  ;;  %v3208_v9 = vadd.f32 %v2364_v7, %v4657_v5  ;;  %v2366_v10 = vpop.f32.mrb[1].mxu1 }
 0x1db   : > { %v2658_v11 = vpop.f32.mrb[1].mxu0  ;;  %v3210_v12 = vadd.f32 %v2366_v10, %v4659_v6  ;;  %v2368_v13 = vpop.f32.mrb[2].mxu1 }
 0x1dc   : > { %v2660_v14 = vpop.f32.mrb[2].mxu0  ;;  %v3209_v15 = vadd.f32 %v3208_v9, %v2656_v8  ;;  %v3212_v16 = vadd.f32 %v2368_v13, %v4657_v5  ;;  %v2370_v17 = vpop.f32.mrb[3].mxu1 }
 0x1dd   : > { %v2662_v18 = vpop.f32.mrb[3].mxu0  ;;  %v3211_v19 = vadd.f32 %v3210_v12, %v2658_v11  ;;  %v3214_v20 = vadd.f32 %v2370_v17, %v4659_v6 }
 0x1de   : > { %vm2695_vm0 = vcmp.gt.f32.partialorder %v3209_v15, 0.0  ;;  %v2711_v21 = vmul.f32 0.2, %v3209_v15  ;;  %v3213_v22 = vadd.f32 %v3212_v16, %v2660_v14 }
 0x1df   : > { %vm2696_vm1 = vcmp.gt.f32.partialorder %v3211_v19, 0.0  ;;  %v2712_v23 = vmul.f32 0.2, %v3211_v19  ;;  %v3215_v24 = vadd.f32 %v3214_v20, %v2662_v18 }
 0x1e0   : > { %v2727_v25 = vsel %vm2695_vm0, %v3209_v15, %v2711_v21  ;;  %vm2697_vm2 = vcmp.gt.f32.partialorder %v3213_v22, 0.0  ;;  %v2713_v26 = vmul.f32 0.2, %v3213_v22 }
 0x1e1   : > { %v2728_v27 = vsel %vm2696_vm1, %v3211_v19, %v2712_v23  ;;  %vm2698_vm3 = vcmp.gt.f32.partialorder %v3215_v24, 0.0  ;;  %v2714_v28 = vmul.f32 0.2, %v3215_v24  ;;  %v2374_v29 = vpop.f32.mrb[4].mxu1 }
 0x1e2   : > { %v2666_v30 = vpop.f32.mrb[4].mxu0  ;;  %v3200_v31 = vpack.c.bf16 %v2728_v27, %v2727_v25  ;;  %v2729_v32 = vsel %vm2697_vm2, %v3213_v22, %v2713_v26  ;;  %v3216_v33 = vadd.f32 %v2374_v29, %v4657_v5  ;;  %v2376_v34 = vpop.f32.mrb[5].mxu1 }
 0x1e3   : > { %v2668_v35 = vpop.f32.mrb[5].mxu0  ;;  %v2730_v36 = vsel %vm2698_vm3, %v3215_v24, %v2714_v28  ;;  %v3218_v37 = vadd.f32 %v2376_v34, %v4659_v6  ;;  %v2378_v38 = vpop.f32.mrb[6].mxu1 }
 0x1e4   : > { %v2670_v39 = vpop.f32.mrb[6].mxu0  ;;  %2791 = vst [vmem:[%s4669_s27] sm:$0xff] %v3200_v31  ;;  %v3201_v40 = vpack.c.bf16 %v2730_v36, %v2729_v32  ;;  %v3217_v41 = vadd.f32 %v3216_v33, %v2666_v30  ;;  %v3220_v42 = vadd.f32 %v2378_v38, %v4657_v5  ;;  %v2380_v43 = vpop.f32.mrb[7].mxu1 }
 0x1e5   : > { %v2672_v44 = vpop.f32.mrb[7].mxu0  ;;  %v3219_v45 = vadd.f32 %v3218_v37, %v2668_v35  ;;  %v3222_v46 = vadd.f32 %v2380_v43, %v4659_v6 }
 0x1e6   : > { %2792 = vst [vmem:[%s4669_s27 + $0x8] sm:$0xff] %v3201_v40  ;;  %vm2699_vm4 = vcmp.gt.f32.partialorder %v3217_v41, 0.0  ;;  %v2715_v47 = vmul.f32 0.2, %v3217_v41  ;;  %v3221_v48 = vadd.f32 %v3220_v42, %v2670_v39 }
 0x1e7   : > { %vm2700_vm5 = vcmp.gt.f32.partialorder %v3219_v45, 0.0  ;;  %v2716_v49 = vmul.f32 0.2, %v3219_v45  ;;  %v3223_v50 = vadd.f32 %v3222_v46, %v2672_v44 }
 0x1e8   : > { %v2731_v51 = vsel %vm2699_vm4, %v3217_v41, %v2715_v47  ;;  %vm2701_vm6 = vcmp.gt.f32.partialorder %v3221_v48, 0.0  ;;  %v2717_v52 = vmul.f32 0.2, %v3221_v48 }
 0x1e9   : > { %v2732_v53 = vsel %vm2700_vm5, %v3219_v45, %v2716_v49  ;;  %vm2702_vm7 = vcmp.gt.f32.partialorder %v3223_v50, 0.0  ;;  %v2718_v54 = vmul.f32 0.2, %v3223_v50  ;;  %v2384_v55 = vpop.f32.mrb[8].mxu1 }
 0x1ea   : > { %v2676_v56 = vpop.f32.mrb[8].mxu0  ;;  %v3202_v57 = vpack.c.bf16 %v2732_v53, %v2731_v51  ;;  %v2733_v58 = vsel %vm2701_vm6, %v3221_v48, %v2717_v52  ;;  %v3224_v59 = vadd.f32 %v2384_v55, %v4657_v5  ;;  %v2386_v60 = vpop.f32.mrb[9].mxu1 }
 0x1eb   : > { %v2678_v61 = vpop.f32.mrb[9].mxu0  ;;  %v2734_v62 = vsel %vm2702_vm7, %v3223_v50, %v2718_v54  ;;  %v3226_v63 = vadd.f32 %v2386_v60, %v4659_v6  ;;  %v2388_v0 = vpop.f32.mrb[10].mxu1 }
 0x1ec   : > { %v2680_v1 = vpop.f32.mrb[10].mxu0  ;;  %2793 = vst [vmem:[%s4669_s27 + $0x10] sm:$0xff] %v3202_v57  ;;  %v3203_v2 = vpack.c.bf16 %v2734_v62, %v2733_v58  ;;  %v3225_v3 = vadd.f32 %v3224_v59, %v2676_v56  ;;  %v3228_v4 = vadd.f32 %v2388_v0, %v4657_v5  ;;  %v2390_v7 = vpop.f32.mrb[11].mxu1 }
 0x1ed   : > { %v2682_v8 = vpop.f32.mrb[11].mxu0  ;;  %v3227_v9 = vadd.f32 %v3226_v63, %v2678_v61  ;;  %v3230_v10 = vadd.f32 %v2390_v7, %v4659_v6 }
 0x1ee   : > { %2794 = vst [vmem:[%s4669_s27 + $0x18] sm:$0xff] %v3203_v2  ;;  %vm2703_vm8 = vcmp.gt.f32.partialorder %v3225_v3, 0.0  ;;  %v2719_v11 = vmul.f32 0.2, %v3225_v3  ;;  %v3229_v12 = vadd.f32 %v3228_v4, %v2680_v1 }
 0x1ef   : > { %vm2704_vm9 = vcmp.gt.f32.partialorder %v3227_v9, 0.0  ;;  %v2720_v13 = vmul.f32 0.2, %v3227_v9  ;;  %v3231_v14 = vadd.f32 %v3230_v10, %v2682_v8 }
 0x1f0   : > { %v2735_v15 = vsel %vm2703_vm8, %v3225_v3, %v2719_v11  ;;  %vm2705_vm10 = vcmp.gt.f32.partialorder %v3229_v12, 0.0  ;;  %v2721_v16 = vmul.f32 0.2, %v3229_v12 }
 0x1f1   : > { %v2736_v17 = vsel %vm2704_vm9, %v3227_v9, %v2720_v13  ;;  %vm2706_vm11 = vcmp.gt.f32.partialorder %v3231_v14, 0.0  ;;  %v2722_v18 = vmul.f32 0.2, %v3231_v14  ;;  %v2394_v19 = vpop.f32.mrb[12].mxu1 }
 0x1f2   : > { %v2686_v20 = vpop.f32.mrb[12].mxu0  ;;  %v3204_v21 = vpack.c.bf16 %v2736_v17, %v2735_v15  ;;  %v2737_v22 = vsel %vm2705_vm10, %v3229_v12, %v2721_v16  ;;  %v3232_v23 = vadd.f32 %v2394_v19, %v4657_v5  ;;  %v2396_v24 = vpop.f32.mrb[13].mxu1 }
 0x1f3   : > { %v2688_v25 = vpop.f32.mrb[13].mxu0  ;;  %v2738_v26 = vsel %vm2706_vm11, %v3231_v14, %v2722_v18  ;;  %v3234_v27 = vadd.f32 %v2396_v24, %v4659_v6  ;;  %v2398_v28 = vpop.f32.mrb[14].mxu1 }
 0x1f4   : > { %v2690_v29 = vpop.f32.mrb[14].mxu0  ;;  %2795 = vst [vmem:[%s4669_s27 + $0x20] sm:$0xff] %v3204_v21  ;;  %v3205_v30 = vpack.c.bf16 %v2738_v26, %v2737_v22  ;;  %v3233_v31 = vadd.f32 %v3232_v23, %v2686_v20  ;;  %v3236_v32 = vadd.f32 %v2398_v28, %v4657_v5  ;;  %v2400_v33 = vpop.f32.mrb[15].mxu1 }
 0x1f5   : > { %v2692_v34 = vpop.f32.mrb[15].mxu0  ;;  %v3235_v35 = vadd.f32 %v3234_v27, %v2688_v25  ;;  %v3238_v36 = vadd.f32 %v2400_v33, %v4659_v6 }
 0x1f6   : > { %2796 = vst [vmem:[%s4669_s27 + $0x28] sm:$0xff] %v3205_v30  ;;  %vm2707_vm12 = vcmp.gt.f32.partialorder %v3233_v31, 0.0  ;;  %v2723_v37 = vmul.f32 0.2, %v3233_v31  ;;  %v3237_v38 = vadd.f32 %v3236_v32, %v2690_v29 }
 0x1f7   : > { %vm2708_vm13 = vcmp.gt.f32.partialorder %v3235_v35, 0.0  ;;  %v2724_v39 = vmul.f32 0.2, %v3235_v35  ;;  %v3239_v40 = vadd.f32 %v3238_v36, %v2692_v34 }
 0x1f8   : > { %v2739_v41 = vsel %vm2707_vm12, %v3233_v31, %v2723_v37  ;;  %vm2709_vm14 = vcmp.gt.f32.partialorder %v3237_v38, 0.0  ;;  %v2725_v42 = vmul.f32 0.2, %v3237_v38 }
 0x1f9   : > { %v2740_v43 = vsel %vm2708_vm13, %v3235_v35, %v2724_v39  ;;  %vm2710_vm15 = vcmp.gt.f32.partialorder %v3239_v40, 0.0  ;;  %v2726_v5 = vmul.f32 0.2, %v3239_v40 }
 0x1fa   : > { %v3206_v44 = vpack.c.bf16 %v2740_v43, %v2739_v41  ;;  %v2741_v45 = vsel %vm2709_vm14, %v3237_v38, %v2725_v42 }
 0x1fb   : > { %v2742_v46 = vsel %vm2710_vm15, %v3239_v40, %v2726_v5 }
 0x1fc   : > { %2797 = vst [vmem:[%s4669_s27 + $0x30] sm:$0xff] %v3206_v44  ;;  %v3207_v6 = vpack.c.bf16 %v2742_v46, %v2741_v45 }
 0x1fe   : > { %2798 = vst [vmem:[%s4669_s27 + $0x38] sm:$0xff] %v3207_v6 }
 0x1ff PF: > { %s13_s12 = sadd.s32 1, %s3734_s12  }
 0x200   : > { %p10_p4 = scmp.ge.s32.totalorder %s13_s12, 4  }
 0x202   :  { %12 = sbr.rel (!%p10_p4) target bundleno = 1 (0x1), region = 62 }

// kernel: discriminator_forward.9
= control target key start
LH: loop header
LB: loop body
LE: loop exit
PB: predicated region body
PF: predicated region fallthrough
CT: control target
= control target key end

     0   :  { %s10850_s20 = smov 0   ;;  %s14127_s0 = inlined_call_operand.vmem [shape: bf16[32,4096], index: 0, kind: input, shape index: {}]   ;;  %s14128_s1 = inlined_call_operand.vmem [shape: bf16[4096,512], index: 1, kind: input, shape index: {}]   ;;  %s14129_s2 = inlined_call_operand.vmem [shape: f32[1,512], index: 2, kind: input, shape index: {}]   ;;  %s14130_s3 = inlined_call_operand.vmem [shape: f32[16,512], index: 3, kind: input, shape index: {}]   ;;  %s14131_s4 = inlined_call_operand.<no memory space> [shape: f32[1,1], index: 4, kind: input, shape index: {}]   ;;  %s14132_s5 = inlined_call_operand.vmem [shape: f32[2,1,1], index: 5, kind: output, shape index: {}]  }
   0x1   :  { %v10_v0 = vstv %s14131_s4 }
   0x2   :  { %11 = vst [vmem:[#allocation2] sm:$0x1] %v10_v0 }
   0x3 LB: > { %s10856_s21 = sadd.s32 4294967295, %s10815_s20   ;;  %p8074_p0 = scmp.ge.s32.totalorder %s10815_s20, 1  ;;  %s10815_s20 = sphi %s10850_s20, %s17_s20  }
   0x4   : > { %p191_p1 = scmp.lt.s32.totalorder %s10815_s20, 3 }
   0x6   : > { %p192_p2 = pnand %p8074_p0, %p191_p1 }
   0x7   : > { %v9273_v1 = vld [vmem:[%s14128_s1 + $0x4] ss:$16 sps:$4 sm:$0xff] (!%p192_p2)   ;;  %v9275_v2 = vld [vmem:[%s14128_s1 + $0xc] ss:$16 sps:$4 sm:$0xff] (!%p192_p2)   ;;  %v9277_v3 = vld [vmem:[%s14128_s1] ss:$16 sps:$4 sm:$0xff] (!%p192_p2)  }
   0x8   : > { %195 = sbr.rel (%p192_p2) target bundleno = 1423 (0x58f), region = 40  ;;  %6586 = vmatprep.subr.bf16.mxu0 (!%p192_p2), %v9273_v1  ;;  %v9278_v4 = vld [vmem:[%s14128_s1 + $0x8] ss:$16 sps:$4 sm:$0xff] (!%p192_p2)   ;;  %7274 = vmatprep.subr.bf16.mxu1 (!%p192_p2), %v9275_v2  ;;  %v9279_v5 = vld [vmem:[%s14128_s1 + $0x24] ss:$16 sps:$4 sm:$0xff] (!%p192_p2)   ;;  %s8075_s8 = sshll.u32 (!%p192_p2), %s10856_s21, 1 }
   0x9   : > { %6587 = vmatpush1.bf16.msra.mxu0 (!%p192_p2), %v9277_v3  ;;  %7275 = vmatpush1.bf16.msra.mxu1 (!%p192_p2), %v9278_v4  ;;  %v9281_v6 = vld [vmem:[%s14128_s1 + $0x2c] ss:$16 sps:$4 sm:$0xff] (!%p192_p2)   ;;  %v9283_v7 = vld [vmem:[%s14128_s1 + $0x20] ss:$16 sps:$4 sm:$0xff] (!%p192_p2)   ;;  %v9284_v8 = vld [vmem:[%s14128_s1 + $0x28] ss:$16 sps:$4 sm:$0xff] (!%p192_p2)  }
   0xa   : > { %6588 = vmatprep.subr.bf16.mxu0 (!%p192_p2), %v9279_v5  ;;  %7276 = vmatprep.subr.bf16.mxu1 (!%p192_p2), %v9281_v6  ;;  %v9285_v9 = vld [vmem:[%s14128_s1 + $0x44] ss:$16 sps:$4 sm:$0xff] (!%p192_p2)   ;;  %v9287_v10 = vld [vmem:[%s14128_s1 + $0x4c] ss:$16 sps:$4 sm:$0xff] (!%p192_p2)   ;;  %v9289_v11 = vld [vmem:[%s14128_s1 + $0x40] ss:$16 sps:$4 sm:$0xff] (!%p192_p2)  }
   0xb   : > { %v9290_v12 = vld [vmem:[%s14128_s1 + $0x48] ss:$16 sps:$4 sm:$0xff] (!%p192_p2)   ;;  %v9291_v13 = vld [vmem:[%s14128_s1 + $0x64] ss:$16 sps:$4 sm:$0xff] (!%p192_p2)   ;;  %v9293_v14 = vld [vmem:[%s14128_s1 + $0x6c] ss:$16 sps:$4 sm:$0xff] (!%p192_p2)  }
   0xc   : > { %v9295_v15 = vld [vmem:[%s14128_s1 + $0x60] ss:$16 sps:$4 sm:$0xff] (!%p192_p2)   ;;  %v9296_v16 = vld [vmem:[%s14128_s1 + $0x68] ss:$16 sps:$4 sm:$0xff] (!%p192_p2)   ;;  %v9297_v17 = vld [vmem:[%s14128_s1 + $0x84] ss:$16 sps:$4 sm:$0xff] (!%p192_p2)  }
   0xd   : > { %6589 = vmatpush1.bf16.msra.mxu0 (!%p192_p2), %v9283_v7  ;;  %7277 = vmatpush1.bf16.msra.mxu1 (!%p192_p2), %v9284_v8  ;;  %v9299_v18 = vld [vmem:[%s14128_s1 + $0x8c] ss:$16 sps:$4 sm:$0xff] (!%p192_p2)   ;;  %v9301_v19 = vld [vmem:[%s14128_s1 + $0x80] ss:$16 sps:$4 sm:$0xff] (!%p192_p2)   ;;  %v9302_v20 = vld [vmem:[%s14128_s1 + $0x88] ss:$16 sps:$4 sm:$0xff] (!%p192_p2)  }
   0xe   : > { %6590 = vmatprep.subr.bf16.mxu0 (!%p192_p2), %v9285_v9  ;;  %7278 = vmatprep.subr.bf16.mxu1 (!%p192_p2), %v9287_v10  ;;  %v9303_v21 = vld [vmem:[%s14128_s1 + $0xa4] ss:$16 sps:$4 sm:$0xff] (!%p192_p2)   ;;  %v9305_v22 = vld [vmem:[%s14128_s1 + $0xac] ss:$16 sps:$4 sm:$0xff] (!%p192_p2)   ;;  %v9307_v23 = vld [vmem:[%s14128_s1 + $0xa0] ss:$16 sps:$4 sm:$0xff] (!%p192_p2)  }
   0xf   : > { %v9308_v24 = vld [vmem:[%s14128_s1 + $0xa8] ss:$16 sps:$4 sm:$0xff]   ;;  %v9309_v25 = vld [vmem:[%s14128_s1 + $0xc4] ss:$16 sps:$4 sm:$0xff]   ;;  %v9311_v26 = vld [vmem:[%s14128_s1 + $0xcc] ss:$16 sps:$4 sm:$0xff]  }
  0x10   : > { %v9313_v27 = vld [vmem:[%s14128_s1 + $0xc0] ss:$16 sps:$4 sm:$0xff]   ;;  %v9314_v28 = vld [vmem:[%s14128_s1 + $0xc8] ss:$16 sps:$4 sm:$0xff]   ;;  %v9315_v29 = vld [vmem:[%s14128_s1 + $0xe4] ss:$16 sps:$4 sm:$0xff]  }
  0x11   : > { %6591 = vmatpush1.bf16.msra.mxu0 %v9289_v11  ;;  %7279 = vmatpush1.bf16.msra.mxu1 %v9290_v12  ;;  %v9317_v30 = vld [vmem:[%s14128_s1 + $0xec] ss:$16 sps:$4 sm:$0xff]   ;;  %v9319_v31 = vld [vmem:[%s14128_s1 + $0xe0] ss:$16 sps:$4 sm:$0xff]   ;;  %v9320_v32 = vld [vmem:[%s14128_s1 + $0xe8] ss:$16 sps:$4 sm:$0xff]  }
  0x12   : > { %6592 = vmatprep.subr.bf16.mxu0 %v9291_v13  ;;  %7280 = vmatprep.subr.bf16.mxu1 %v9293_v14  ;;  %v9321_v33 = vld [vmem:[%s14128_s1 + $0x104] ss:$16 sps:$4 sm:$0xff]   ;;  %p219_p3 = scmp.lt.s32.totalorder %s8075_s8, 3  ;;  %v9323_v34 = vld [vmem:[%s14128_s1 + $0x10c] ss:$16 sps:$4 sm:$0xff]   ;;  %p225_p4 = scmp.lt.s32.totalorder %s10856_s21, 1 }
  0x13   : > { %v9325_v35 = vld [vmem:[%s14128_s1 + $0x100] ss:$16 sps:$4 sm:$0xff]   ;;  %v9326_v36 = vld [vmem:[%s14128_s1 + $0x108] ss:$16 sps:$4 sm:$0xff]   ;;  %v9327_v37 = vld [vmem:[%s14128_s1 + $0x124] ss:$16 sps:$4 sm:$0xff]  }
  0x14   : > { %s14134_s8 = smov (!%p219_p3, %s8075_s8), 3  ;;  %v9329_v38 = vld [vmem:[%s14128_s1 + $0x12c] ss:$16 sps:$4 sm:$0xff]   ;;  %v9331_v39 = vld [vmem:[%s14128_s1 + $0x120] ss:$16 sps:$4 sm:$0xff]   ;;  %s14136_s21 = smov (!%p225_p4, %s10856_s21), 1 }
  0x15   : > { %6593 = vmatpush1.bf16.msra.mxu0 %v9295_v15  ;;  %7281 = vmatpush1.bf16.msra.mxu1 %v9296_v16  ;;  %v9332_v40 = vld [vmem:[%s14128_s1 + $0x128] ss:$16 sps:$4 sm:$0xff]   ;;  %v9333_v41 = vld [vmem:[%s14128_s1 + $0x144] ss:$16 sps:$4 sm:$0xff]   ;;  %s9136_s7 = sshll.u32 %s14134_s8, 7  ;;  %s227_s13 = scalar_lea.vmem %s14132_s5, %s14136_s21  ;;  %vm8021_vm8 = vcmask 0  }
  0x16   : > { %6594 = vmatprep.subr.bf16.mxu0 %v9297_v17  ;;  %7282 = vmatprep.subr.bf16.mxu1 %v9299_v18  ;;  %v9335_v42 = vld [vmem:[%s14128_s1 + $0x14c] ss:$16 sps:$4 sm:$0xff]   ;;  %v9337_v43 = vld [vmem:[%s14128_s1 + $0x140] ss:$16 sps:$4 sm:$0xff]   ;;  %v9338_v44 = vld [vmem:[%s14128_s1 + $0x148] ss:$16 sps:$4 sm:$0xff]   ;;  %s10996_s17 = scalar_lea.vmem %s14127_s0, %s9136_s7 }
  0x17   : > { %v9339_v45 = vld [vmem:[%s14128_s1 + $0x164] ss:$16 sps:$4 sm:$0xff]   ;;  %v9341_v46 = vld [vmem:[%s14128_s1 + $0x16c] ss:$16 sps:$4 sm:$0xff]   ;;  %v9343_v49 = vld [vmem:[%s14128_s1 + $0x160] ss:$16 sps:$4 sm:$0xff]  }
  0x18   : > { %v228_v47 = vld [vmem:[%s10996_s17] sm:$0xff]  ;;  %v9344_v50 = vld [vmem:[%s14128_s1 + $0x168] ss:$16 sps:$4 sm:$0xff]   ;;  %v9347_v53 = vld [vmem:[%s14128_s1 + $0x18c] ss:$16 sps:$4 sm:$0xff]  }
  0x19   : > { %6595 = vmatpush1.bf16.msra.mxu0 %v9301_v19  ;;  %7283 = vmatpush1.bf16.msra.mxu1 %v9302_v20  ;;  %v244_v48 = vld [vmem:[%s10996_s17 + $0x80] sm:$0xff]  ;;  %v9350_v55 = vld [vmem:[%s14128_s1 + $0x188] ss:$16 sps:$4 sm:$0xff]   ;;  %v9353_v57 = vld [vmem:[%s14128_s1 + $0x1ac] ss:$16 sps:$4 sm:$0xff]  }
  0x1a   : > { %6596 = vmatprep.subr.bf16.mxu0 %v9303_v21  ;;  %7284 = vmatprep.subr.bf16.mxu1 %v9305_v22  ;;  %v8079_v51 = vcombine.high %v228_v47, %v244_v48  ;;  %v9345_v52 = vld [vmem:[%s14128_s1 + $0x184] ss:$16 sps:$4 sm:$0xff]   ;;  %v9349_v54 = vld [vmem:[%s14128_s1 + $0x180] ss:$16 sps:$4 sm:$0xff]   ;;  %v9356_v59 = vld [vmem:[%s14128_s1 + $0x1a8] ss:$16 sps:$4 sm:$0xff]   ;;  %v8078_v6 = vcombine.low %v228_v47, %v244_v48 }
  0x1b   : > { %v9351_v56 = vld [vmem:[%s14128_s1 + $0x1a4] ss:$16 sps:$4 sm:$0xff]   ;;  %v9355_v58 = vld [vmem:[%s14128_s1 + $0x1a0] ss:$16 sps:$4 sm:$0xff]   ;;  %v9359_v61 = vld [vmem:[%s14128_s1 + $0x1cc] ss:$16 sps:$4 sm:$0xff]  }
  0x1c   : > { %6618 = vmatprep.mubr.bf16.mxu0 %v8079_v51  ;;  %7306 = vmatprep.mubr.bf16.mxu1 %v8079_v51  ;;  %v9357_v60 = vld [vmem:[%s14128_s1 + $0x1c4] ss:$16 sps:$4 sm:$0xff]   ;;  %v9361_v62 = vld [vmem:[%s14128_s1 + $0x1c0] ss:$16 sps:$4 sm:$0xff]   ;;  %v9362_v63 = vld [vmem:[%s14128_s1 + $0x1c8] ss:$16 sps:$4 sm:$0xff]  }
  0x1d   : > { %6597 = vmatpush1.bf16.msra.mxu0 %v9307_v23  ;;  %7285 = vmatpush1.bf16.msra.mxu1 %v9308_v24  ;;  %v9363_v0 = vld [vmem:[%s14128_s1 + $0x1e4] ss:$16 sps:$4 sm:$0xff]   ;;  %v9365_v1 = vld [vmem:[%s14128_s1 + $0x1ec] ss:$16 sps:$4 sm:$0xff]   ;;  %v9367_v2 = vld [vmem:[%s14128_s1 + $0x1e0] ss:$16 sps:$4 sm:$0xff]  }
  0x1e   : > { %6598 = vmatprep.subr.bf16.mxu0 %v9309_v25  ;;  %7286 = vmatprep.subr.bf16.mxu1 %v9311_v26  ;;  %v9368_v3 = vld [vmem:[%s14128_s1 + $0x1e8] ss:$16 sps:$4 sm:$0xff]   ;;  %v9371_v4 = vld [vmem:[%s14128_s1 + $0x204] ss:$16 sps:$4 sm:$0xff]   ;;  %v9374_v5 = vld [vmem:[%s14128_s1 + $0x20c] ss:$16 sps:$4 sm:$0xff]  }
  0x1f   : > { %v9369_v7 = vld [vmem:[%s14128_s1 + $0x200] ss:$16 sps:$4 sm:$0xff]   ;;  %v9372_v8 = vld [vmem:[%s14128_s1 + $0x208] ss:$16 sps:$4 sm:$0xff]   ;;  %v9377_v9 = vld [vmem:[%s14128_s1 + $0x224] ss:$16 sps:$4 sm:$0xff]  }
  0x20   : > { %v9380_v10 = vld [vmem:[%s14128_s1 + $0x22c] ss:$16 sps:$4 sm:$0xff]   ;;  %v9375_v11 = vld [vmem:[%s14128_s1 + $0x220] ss:$16 sps:$4 sm:$0xff]   ;;  %v9378_v12 = vld [vmem:[%s14128_s1 + $0x228] ss:$16 sps:$4 sm:$0xff]  }
  0x21   : > { %6599 = vmatpush1.bf16.msra.mxu0 %v9313_v27  ;;  %7287 = vmatpush1.bf16.msra.mxu1 %v9314_v28  ;;  %v9383_v13 = vld [vmem:[%s14128_s1 + $0x244] ss:$16 sps:$4 sm:$0xff]   ;;  %v9386_v14 = vld [vmem:[%s14128_s1 + $0x24c] ss:$16 sps:$4 sm:$0xff]   ;;  %v9381_v15 = vld [vmem:[%s14128_s1 + $0x240] ss:$16 sps:$4 sm:$0xff]  }
  0x22   : > { %6600 = vmatprep.subr.bf16.mxu0 %v9315_v29  ;;  %7288 = vmatprep.subr.bf16.mxu1 %v9317_v30  ;;  %v9384_v16 = vld [vmem:[%s14128_s1 + $0x248] ss:$16 sps:$4 sm:$0xff]   ;;  %v9389_v17 = vld [vmem:[%s14128_s1 + $0x264] ss:$16 sps:$4 sm:$0xff]   ;;  %v9392_v18 = vld [vmem:[%s14128_s1 + $0x26c] ss:$16 sps:$4 sm:$0xff]  }
  0x23   : > { %v9387_v19 = vld [vmem:[%s14128_s1 + $0x260] ss:$16 sps:$4 sm:$0xff]   ;;  %v9390_v20 = vld [vmem:[%s14128_s1 + $0x268] ss:$16 sps:$4 sm:$0xff]   ;;  %v9395_v21 = vld [vmem:[%s14128_s1 + $0x284] ss:$16 sps:$4 sm:$0xff]  }
  0x24   : > { %v9398_v22 = vld [vmem:[%s14128_s1 + $0x28c] ss:$16 sps:$4 sm:$0xff]   ;;  %v9393_v23 = vld [vmem:[%s14128_s1 + $0x280] ss:$16 sps:$4 sm:$0xff]   ;;  %v9396_v24 = vld [vmem:[%s14128_s1 + $0x288] ss:$16 sps:$4 sm:$0xff]  }
  0x25   : > { %6601 = vmatpush1.bf16.msra.mxu0 %v9319_v31  ;;  %7289 = vmatpush1.bf16.msra.mxu1 %v9320_v32  ;;  %v9401_v25 = vld [vmem:[%s14128_s1 + $0x2a4] ss:$16 sps:$4 sm:$0xff]   ;;  %v9404_v26 = vld [vmem:[%s14128_s1 + $0x2ac] ss:$16 sps:$4 sm:$0xff]   ;;  %v9399_v27 = vld [vmem:[%s14128_s1 + $0x2a0] ss:$16 sps:$4 sm:$0xff]  }
  0x26   : > { %6602 = vmatprep.subr.bf16.mxu0 %v9321_v33  ;;  %7290 = vmatprep.subr.bf16.mxu1 %v9323_v34  ;;  %v9402_v28 = vld [vmem:[%s14128_s1 + $0x2a8] ss:$16 sps:$4 sm:$0xff]   ;;  %v9407_v29 = vld [vmem:[%s14128_s1 + $0x2c4] ss:$16 sps:$4 sm:$0xff]   ;;  %v9410_v30 = vld [vmem:[%s14128_s1 + $0x2cc] ss:$16 sps:$4 sm:$0xff]  }
  0x27   : > { %v11139_v31 = vld [vmem:[%s10996_s17 + $0x8] sm:$0xff]  ;;  %v9405_v33 = vld [vmem:[%s14128_s1 + $0x2c0] ss:$16 sps:$4 sm:$0xff]   ;;  %v9431_v48 = vld [vmem:[%s14128_s1 + $0x344] ss:$16 sps:$4 sm:$0xff]  }
  0x28   : > { %v11142_v32 = vld [vmem:[%s10996_s17 + $0x88] sm:$0xff] }
  0x29   : > { %6603 = vmatpush1.bf16.msra.mxu0 %v9325_v35  ;;  %7291 = vmatpush1.bf16.msra.mxu1 %v9326_v36  ;;  %v9408_v34 = vld [vmem:[%s14128_s1 + $0x2c8] ss:$16 sps:$4 sm:$0xff]   ;;  %v8081_v35 = vcombine.high %v11139_v31, %v11142_v32  ;;  %v9413_v36 = vld [vmem:[%s14128_s1 + $0x2e4] ss:$16 sps:$4 sm:$0xff]  }
  0x2a   : > { %6604 = vmatprep.subr.bf16.mxu0 %v9327_v37  ;;  %7292 = vmatprep.subr.bf16.mxu1 %v9329_v38  ;;  %v9416_v37 = vld [vmem:[%s14128_s1 + $0x2ec] ss:$16 sps:$4 sm:$0xff]   ;;  %v9411_v38 = vld [vmem:[%s14128_s1 + $0x2e0] ss:$16 sps:$4 sm:$0xff]   ;;  %v9426_v47 = vld [vmem:[%s14128_s1 + $0x328] ss:$16 sps:$4 sm:$0xff]  }
  0x2b   : > { %v9432_v51 = vld [vmem:[%s14128_s1 + $0x348] ss:$16 sps:$4 sm:$0xff]  }
  0x2d   : > { %6605 = vmatpush1.bf16.msra.mxu0 %v9331_v39  ;;  %7293 = vmatpush1.bf16.msra.mxu1 %v9332_v40  ;;  %v9414_v39 = vld [vmem:[%s14128_s1 + $0x2e8] ss:$16 sps:$4 sm:$0xff]   ;;  %v9419_v40 = vld [vmem:[%s14128_s1 + $0x304] ss:$16 sps:$4 sm:$0xff]  }
  0x2e   : > { %6606 = vmatprep.subr.bf16.mxu0 %v9333_v41  ;;  %7294 = vmatprep.subr.bf16.mxu1 %v9335_v42  ;;  %v9422_v41 = vld [vmem:[%s14128_s1 + $0x30c] ss:$16 sps:$4 sm:$0xff]   ;;  %v9417_v42 = vld [vmem:[%s14128_s1 + $0x300] ss:$16 sps:$4 sm:$0xff]  }
  0x31   : > { %6607 = vmatpush1.bf16.msra.mxu0 %v9337_v43  ;;  %7295 = vmatpush1.bf16.msra.mxu1 %v9338_v44  ;;  %v9420_v43 = vld [vmem:[%s14128_s1 + $0x308] ss:$16 sps:$4 sm:$0xff]   ;;  %v9425_v44 = vld [vmem:[%s14128_s1 + $0x324] ss:$16 sps:$4 sm:$0xff]  }
  0x32   : > { %6608 = vmatprep.subr.bf16.mxu0 %v9339_v45  ;;  %7296 = vmatprep.subr.bf16.mxu1 %v9341_v46  ;;  %v9428_v45 = vld [vmem:[%s14128_s1 + $0x32c] ss:$16 sps:$4 sm:$0xff]   ;;  %v9423_v46 = vld [vmem:[%s14128_s1 + $0x320] ss:$16 sps:$4 sm:$0xff]  }
  0x35   : > { %6609 = vmatpush1.bf16.msra.mxu0 %v9343_v49  ;;  %7297 = vmatpush1.bf16.msra.mxu1 %v9344_v50  ;;  %v9434_v49 = vld [vmem:[%s14128_s1 + $0x34c] ss:$16 sps:$4 sm:$0xff]   ;;  %v9429_v50 = vld [vmem:[%s14128_s1 + $0x340] ss:$16 sps:$4 sm:$0xff]  }
  0x36   : > { %6610 = vmatprep.subr.bf16.mxu0 %v9345_v52  ;;  %7298 = vmatprep.subr.bf16.mxu1 %v9347_v53  ;;  %v9437_v52 = vld [vmem:[%s14128_s1 + $0x364] ss:$16 sps:$4 sm:$0xff]   ;;  %v9440_v53 = vld [vmem:[%s14128_s1 + $0x36c] ss:$16 sps:$4 sm:$0xff]  }
  0x39   : > { %6611 = vmatpush1.bf16.msra.mxu0 %v9349_v54  ;;  %7299 = vmatpush1.bf16.msra.mxu1 %v9350_v55  ;;  %v9435_v54 = vld [vmem:[%s14128_s1 + $0x360] ss:$16 sps:$4 sm:$0xff]   ;;  %v9438_v55 = vld [vmem:[%s14128_s1 + $0x368] ss:$16 sps:$4 sm:$0xff]  }
  0x3a   : > { %6612 = vmatprep.subr.bf16.mxu0 %v9351_v56  ;;  %7300 = vmatprep.subr.bf16.mxu1 %v9353_v57  ;;  %v9443_v56 = vld [vmem:[%s14128_s1 + $0x384] ss:$16 sps:$4 sm:$0xff]   ;;  %v9446_v57 = vld [vmem:[%s14128_s1 + $0x38c] ss:$16 sps:$4 sm:$0xff]  }
  0x3d   : > { %6613 = vmatpush1.bf16.msra.mxu0 %v9355_v58  ;;  %7301 = vmatpush1.bf16.msra.mxu1 %v9356_v59  ;;  %v9441_v58 = vld [vmem:[%s14128_s1 + $0x380] ss:$16 sps:$4 sm:$0xff]   ;;  %v9444_v59 = vld [vmem:[%s14128_s1 + $0x388] ss:$16 sps:$4 sm:$0xff]  }
  0x3e   : > { %6614 = vmatprep.subr.bf16.mxu0 %v9357_v60  ;;  %7302 = vmatprep.subr.bf16.mxu1 %v9359_v61  ;;  %v9449_v60 = vld [vmem:[%s14128_s1 + $0x3a4] ss:$16 sps:$4 sm:$0xff]   ;;  %v9452_v61 = vld [vmem:[%s14128_s1 + $0x3ac] ss:$16 sps:$4 sm:$0xff]  }
  0x41   : > { %6615 = vmatpush1.bf16.msra.mxu0 %v9361_v62  ;;  %7303 = vmatpush1.bf16.msra.mxu1 %v9362_v63  ;;  %v9447_v62 = vld [vmem:[%s14128_s1 + $0x3a0] ss:$16 sps:$4 sm:$0xff]   ;;  %v9450_v63 = vld [vmem:[%s14128_s1 + $0x3a8] ss:$16 sps:$4 sm:$0xff]  }
  0x42   : > { %6616 = vmatprep.subr.bf16.mxu0 %v9363_v0  ;;  %7304 = vmatprep.subr.bf16.mxu1 %v9365_v1  ;;  %v9455_v0 = vld [vmem:[%s14128_s1 + $0x3c4] ss:$16 sps:$4 sm:$0xff]   ;;  %v9458_v1 = vld [vmem:[%s14128_s1 + $0x3cc] ss:$16 sps:$4 sm:$0xff]  }
  0x45   : > { %6617 = vmatpush1.bf16.msra.mxu0 %v9367_v2  ;;  %7305 = vmatpush1.bf16.msra.mxu1 %v9368_v3  ;;  %v9453_v2 = vld [vmem:[%s14128_s1 + $0x3c0] ss:$16 sps:$4 sm:$0xff]   ;;  %v9456_v3 = vld [vmem:[%s14128_s1 + $0x3c8] ss:$16 sps:$4 sm:$0xff]  }
  0x46   : > { %6629 = vmatprep.subr.bf16.mxu0 %v9371_v4  ;;  %7317 = vmatprep.subr.bf16.mxu1 %v9374_v5  ;;  %v9461_v4 = vld [vmem:[%s14128_s1 + $0x3e4] ss:$16 sps:$4 sm:$0xff]   ;;  %v9464_v5 = vld [vmem:[%s14128_s1 + $0x3ec] ss:$16 sps:$4 sm:$0xff]  }
  0x48   : > { %6619 = vmatmul.mubr.bf16.vlgmr.msra.gmra.mrb[0].mxu0 %v8078_v6  ;;  %7307 = vmatmul.mubr.bf16.vlgmr.msra.gmra.mrb[0].mxu1 %v8078_v6  ;;  %v9459_v6 = vld [vmem:[%s14128_s1 + $0x3e0] ss:$16 sps:$4 sm:$0xff]  }
  0x49   : > { %6630 = vmatpush1.bf16.msra.mxu0 %v9369_v7  ;;  %7318 = vmatpush1.bf16.msra.mxu1 %v9372_v8  ;;  %v9462_v7 = vld [vmem:[%s14128_s1 + $0x3e8] ss:$16 sps:$4 sm:$0xff]   ;;  %v9467_v8 = vld [vmem:[%s14128_s1 + $0x404] ss:$16 sps:$4 sm:$0xff]  }
  0x4a   : > { %6631 = vmatprep.subr.bf16.mxu0 %v9377_v9  ;;  %7319 = vmatprep.subr.bf16.mxu1 %v9380_v10  ;;  %v9470_v9 = vld [vmem:[%s14128_s1 + $0x40c] ss:$16 sps:$4 sm:$0xff]   ;;  %v8080_v10 = vcombine.low %v11139_v31, %v11142_v32  ;;  %v9492_v31 = vld [vmem:[%s14128_s1 + $0x488] ss:$16 sps:$4 sm:$0xff]   ;;  %v9497_v32 = vld [vmem:[%s14128_s1 + $0x4a4] ss:$16 sps:$4 sm:$0xff]  }
  0x4b   : > { %6661 = vmatprep.mubr.bf16.mxu0 %v8081_v35  ;;  %7349 = vmatprep.mubr.bf16.mxu1 %v8081_v35  ;;  %v9498_v35 = vld [vmem:[%s14128_s1 + $0x4a8] ss:$16 sps:$4 sm:$0xff]  }
  0x4d   : > { %6632 = vmatpush1.bf16.msra.mxu0 %v9375_v11  ;;  %7320 = vmatpush1.bf16.msra.mxu1 %v9378_v12  ;;  %v9465_v11 = vld [vmem:[%s14128_s1 + $0x400] ss:$16 sps:$4 sm:$0xff]   ;;  %v9468_v12 = vld [vmem:[%s14128_s1 + $0x408] ss:$16 sps:$4 sm:$0xff]  }
  0x4e   : > { %6633 = vmatprep.subr.bf16.mxu0 %v9383_v13  ;;  %7321 = vmatprep.subr.bf16.mxu1 %v9386_v14  ;;  %v9473_v13 = vld [vmem:[%s14128_s1 + $0x424] ss:$16 sps:$4 sm:$0xff]   ;;  %v9476_v14 = vld [vmem:[%s14128_s1 + $0x42c] ss:$16 sps:$4 sm:$0xff]  }
  0x51   : > { %6634 = vmatpush1.bf16.msra.mxu0 %v9381_v15  ;;  %7322 = vmatpush1.bf16.msra.mxu1 %v9384_v16  ;;  %v11281_v15 = vld [vmem:[%s10996_s17 + $0x10] sm:$0xff] }
  0x52   : > { %6635 = vmatprep.subr.bf16.mxu0 %v9389_v17  ;;  %7323 = vmatprep.subr.bf16.mxu1 %v9392_v18  ;;  %v11284_v16 = vld [vmem:[%s10996_s17 + $0x90] sm:$0xff] }
  0x53   : > { %v8083_v17 = vcombine.high %v11281_v15, %v11284_v16  ;;  %v9471_v18 = vld [vmem:[%s14128_s1 + $0x420] ss:$16 sps:$4 sm:$0xff]  }
  0x55   : > { %6636 = vmatpush1.bf16.msra.mxu0 %v9387_v19  ;;  %7324 = vmatpush1.bf16.msra.mxu1 %v9390_v20  ;;  %v9474_v19 = vld [vmem:[%s14128_s1 + $0x428] ss:$16 sps:$4 sm:$0xff]   ;;  %v9479_v20 = vld [vmem:[%s14128_s1 + $0x444] ss:$16 sps:$4 sm:$0xff]  }
  0x56   : > { %6637 = vmatprep.subr.bf16.mxu0 %v9395_v21  ;;  %7325 = vmatprep.subr.bf16.mxu1 %v9398_v22  ;;  %v9482_v21 = vld [vmem:[%s14128_s1 + $0x44c] ss:$16 sps:$4 sm:$0xff]   ;;  %v9477_v22 = vld [vmem:[%s14128_s1 + $0x440] ss:$16 sps:$4 sm:$0xff]  }
  0x59   : > { %6638 = vmatpush1.bf16.msra.mxu0 %v9393_v23  ;;  %7326 = vmatpush1.bf16.msra.mxu1 %v9396_v24  ;;  %v9480_v23 = vld [vmem:[%s14128_s1 + $0x448] ss:$16 sps:$4 sm:$0xff]   ;;  %v9485_v24 = vld [vmem:[%s14128_s1 + $0x464] ss:$16 sps:$4 sm:$0xff]  }
  0x5a   : > { %6639 = vmatprep.subr.bf16.mxu0 %v9401_v25  ;;  %7327 = vmatprep.subr.bf16.mxu1 %v9404_v26  ;;  %v9488_v25 = vld [vmem:[%s14128_s1 + $0x46c] ss:$16 sps:$4 sm:$0xff]   ;;  %v9483_v26 = vld [vmem:[%s14128_s1 + $0x460] ss:$16 sps:$4 sm:$0xff]  }
  0x5d   : > { %6640 = vmatpush1.bf16.msra.mxu0 %v9399_v27  ;;  %7328 = vmatpush1.bf16.msra.mxu1 %v9402_v28  ;;  %v9486_v27 = vld [vmem:[%s14128_s1 + $0x468] ss:$16 sps:$4 sm:$0xff]   ;;  %v9491_v28 = vld [vmem:[%s14128_s1 + $0x484] ss:$16 sps:$4 sm:$0xff]  }
  0x5e   : > { %6641 = vmatprep.subr.bf16.mxu0 %v9407_v29  ;;  %7329 = vmatprep.subr.bf16.mxu1 %v9410_v30  ;;  %v9494_v29 = vld [vmem:[%s14128_s1 + $0x48c] ss:$16 sps:$4 sm:$0xff]   ;;  %v9489_v30 = vld [vmem:[%s14128_s1 + $0x480] ss:$16 sps:$4 sm:$0xff]  }
  0x61   : > { %6642 = vmatpush1.bf16.msra.mxu0 %v9405_v33  ;;  %7330 = vmatpush1.bf16.msra.mxu1 %v9408_v34  ;;  %v9500_v33 = vld [vmem:[%s14128_s1 + $0x4ac] ss:$16 sps:$4 sm:$0xff]   ;;  %v9495_v34 = vld [vmem:[%s14128_s1 + $0x4a0] ss:$16 sps:$4 sm:$0xff]  }
  0x62   : > { %6643 = vmatprep.subr.bf16.mxu0 %v9413_v36  ;;  %7331 = vmatprep.subr.bf16.mxu1 %v9416_v37  ;;  %v9503_v36 = vld [vmem:[%s14128_s1 + $0x4c4] ss:$16 sps:$4 sm:$0xff]   ;;  %v9506_v37 = vld [vmem:[%s14128_s1 + $0x4cc] ss:$16 sps:$4 sm:$0xff]  }
  0x65   : > { %6644 = vmatpush1.bf16.msra.mxu0 %v9411_v38  ;;  %7332 = vmatpush1.bf16.msra.mxu1 %v9414_v39  ;;  %v9501_v38 = vld [vmem:[%s14128_s1 + $0x4c0] ss:$16 sps:$4 sm:$0xff]   ;;  %v9504_v39 = vld [vmem:[%s14128_s1 + $0x4c8] ss:$16 sps:$4 sm:$0xff]  }
  0x66   : > { %6645 = vmatprep.subr.bf16.mxu0 %v9419_v40  ;;  %7333 = vmatprep.subr.bf16.mxu1 %v9422_v41  ;;  %v9509_v40 = vld [vmem:[%s14128_s1 + $0x4e4] ss:$16 sps:$4 sm:$0xff]   ;;  %v9512_v41 = vld [vmem:[%s14128_s1 + $0x4ec] ss:$16 sps:$4 sm:$0xff]  }
  0x69   : > { %6646 = vmatpush1.bf16.msra.mxu0 %v9417_v42  ;;  %7334 = vmatpush1.bf16.msra.mxu1 %v9420_v43  ;;  %v9507_v42 = vld [vmem:[%s14128_s1 + $0x4e0] ss:$16 sps:$4 sm:$0xff]   ;;  %v9510_v43 = vld [vmem:[%s14128_s1 + $0x4e8] ss:$16 sps:$4 sm:$0xff]  }
  0x6a   : > { %6647 = vmatprep.subr.bf16.mxu0 %v9425_v44  ;;  %7335 = vmatprep.subr.bf16.mxu1 %v9428_v45  ;;  %v9515_v44 = vld [vmem:[%s14128_s1 + $0x504] ss:$16 sps:$4 sm:$0xff]   ;;  %v9518_v45 = vld [vmem:[%s14128_s1 + $0x50c] ss:$16 sps:$4 sm:$0xff]  }
  0x6d   : > { %6648 = vmatpush1.bf16.msra.mxu0 %v9423_v46  ;;  %7336 = vmatpush1.bf16.msra.mxu1 %v9426_v47  ;;  %v9513_v46 = vld [vmem:[%s14128_s1 + $0x500] ss:$16 sps:$4 sm:$0xff]   ;;  %v9516_v47 = vld [vmem:[%s14128_s1 + $0x508] ss:$16 sps:$4 sm:$0xff]  }
  0x6e   : > { %6649 = vmatprep.subr.bf16.mxu0 %v9431_v48  ;;  %7337 = vmatprep.subr.bf16.mxu1 %v9434_v49  ;;  %v9521_v48 = vld [vmem:[%s14128_s1 + $0x524] ss:$16 sps:$4 sm:$0xff]   ;;  %v9524_v49 = vld [vmem:[%s14128_s1 + $0x52c] ss:$16 sps:$4 sm:$0xff]  }
  0x71   : > { %6650 = vmatpush1.bf16.msra.mxu0 %v9429_v50  ;;  %7338 = vmatpush1.bf16.msra.mxu1 %v9432_v51  ;;  %v9519_v50 = vld [vmem:[%s14128_s1 + $0x520] ss:$16 sps:$4 sm:$0xff]   ;;  %v9522_v51 = vld [vmem:[%s14128_s1 + $0x528] ss:$16 sps:$4 sm:$0xff]  }
  0x72   : > { %6651 = vmatprep.subr.bf16.mxu0 %v9437_v52  ;;  %7339 = vmatprep.subr.bf16.mxu1 %v9440_v53  ;;  %v9527_v52 = vld [vmem:[%s14128_s1 + $0x544] ss:$16 sps:$4 sm:$0xff]   ;;  %v9530_v53 = vld [vmem:[%s14128_s1 + $0x54c] ss:$16 sps:$4 sm:$0xff]  }
  0x75   : > { %6652 = vmatpush1.bf16.msra.mxu0 %v9435_v54  ;;  %7340 = vmatpush1.bf16.msra.mxu1 %v9438_v55  ;;  %v9525_v54 = vld [vmem:[%s14128_s1 + $0x540] ss:$16 sps:$4 sm:$0xff]   ;;  %v9528_v55 = vld [vmem:[%s14128_s1 + $0x548] ss:$16 sps:$4 sm:$0xff]  }
  0x76   : > { %6653 = vmatprep.subr.bf16.mxu0 %v9443_v56  ;;  %7341 = vmatprep.subr.bf16.mxu1 %v9446_v57  ;;  %v9533_v56 = vld [vmem:[%s14128_s1 + $0x564] ss:$16 sps:$4 sm:$0xff]   ;;  %v9536_v57 = vld [vmem:[%s14128_s1 + $0x56c] ss:$16 sps:$4 sm:$0xff]  }
  0x79   : > { %6654 = vmatpush1.bf16.msra.mxu0 %v9441_v58  ;;  %7342 = vmatpush1.bf16.msra.mxu1 %v9444_v59  ;;  %v9531_v58 = vld [vmem:[%s14128_s1 + $0x560] ss:$16 sps:$4 sm:$0xff]   ;;  %v9534_v59 = vld [vmem:[%s14128_s1 + $0x568] ss:$16 sps:$4 sm:$0xff]  }
  0x7a   : > { %6655 = vmatprep.subr.bf16.mxu0 %v9449_v60  ;;  %7343 = vmatprep.subr.bf16.mxu1 %v9452_v61  ;;  %v9539_v60 = vld [vmem:[%s14128_s1 + $0x584] ss:$16 sps:$4 sm:$0xff]   ;;  %v9542_v61 = vld [vmem:[%s14128_s1 + $0x58c] ss:$16 sps:$4 sm:$0xff]  }
  0x7d   : > { %6656 = vmatpush1.bf16.msra.mxu0 %v9447_v62  ;;  %7344 = vmatpush1.bf16.msra.mxu1 %v9450_v63  ;;  %v9537_v62 = vld [vmem:[%s14128_s1 + $0x580] ss:$16 sps:$4 sm:$0xff]   ;;  %v9540_v63 = vld [vmem:[%s14128_s1 + $0x588] ss:$16 sps:$4 sm:$0xff]  }
  0x7e   : > { %6657 = vmatprep.subr.bf16.mxu0 %v9455_v0  ;;  %7345 = vmatprep.subr.bf16.mxu1 %v9458_v1  ;;  %v9545_v0 = vld [vmem:[%s14128_s1 + $0x5a4] ss:$16 sps:$4 sm:$0xff]   ;;  %v9548_v1 = vld [vmem:[%s14128_s1 + $0x5ac] ss:$16 sps:$4 sm:$0xff]  }
  0x81   : > { %6658 = vmatpush1.bf16.msra.mxu0 %v9453_v2  ;;  %7346 = vmatpush1.bf16.msra.mxu1 %v9456_v3  ;;  %v9543_v2 = vld [vmem:[%s14128_s1 + $0x5a0] ss:$16 sps:$4 sm:$0xff]   ;;  %v9546_v3 = vld [vmem:[%s14128_s1 + $0x5a8] ss:$16 sps:$4 sm:$0xff]  }
  0x82   : > { %6659 = vmatprep.subr.bf16.mxu0 %v9461_v4  ;;  %7347 = vmatprep.subr.bf16.mxu1 %v9464_v5  ;;  %v9551_v4 = vld [vmem:[%s14128_s1 + $0x5c4] ss:$16 sps:$4 sm:$0xff]   ;;  %v9554_v5 = vld [vmem:[%s14128_s1 + $0x5cc] ss:$16 sps:$4 sm:$0xff]  }
  0x85   : > { %6660 = vmatpush1.bf16.msra.mxu0 %v9459_v6  ;;  %7348 = vmatpush1.bf16.msra.mxu1 %v9462_v7  ;;  %v9549_v6 = vld [vmem:[%s14128_s1 + $0x5c0] ss:$16 sps:$4 sm:$0xff]   ;;  %v9552_v7 = vld [vmem:[%s14128_s1 + $0x5c8] ss:$16 sps:$4 sm:$0xff]  }
  0x86   : > { %6672 = vmatprep.subr.bf16.mxu0 %v9467_v8  ;;  %7360 = vmatprep.subr.bf16.mxu1 %v9470_v9  ;;  %v9557_v8 = vld [vmem:[%s14128_s1 + $0x5e4] ss:$16 sps:$4 sm:$0xff]   ;;  %v9560_v9 = vld [vmem:[%s14128_s1 + $0x5ec] ss:$16 sps:$4 sm:$0xff]  }
  0x88   : > { %6662 = vmatmul.mubr.bf16.vlgmr.msra.gmra.mrb[0].mxu0 %v8080_v10  ;;  %7350 = vmatmul.mubr.bf16.vlgmr.msra.gmra.mrb[0].mxu1 %v8080_v10  ;;  %v9555_v10 = vld [vmem:[%s14128_s1 + $0x5e0] ss:$16 sps:$4 sm:$0xff]  }
  0x89   : > { %6673 = vmatpush1.bf16.msra.mxu0 %v9465_v11  ;;  %7361 = vmatpush1.bf16.msra.mxu1 %v9468_v12  ;;  %v9558_v11 = vld [vmem:[%s14128_s1 + $0x5e8] ss:$16 sps:$4 sm:$0xff]   ;;  %v9563_v12 = vld [vmem:[%s14128_s1 + $0x604] ss:$16 sps:$4 sm:$0xff]  }
  0x8a   : > { %6674 = vmatprep.subr.bf16.mxu0 %v9473_v13  ;;  %7362 = vmatprep.subr.bf16.mxu1 %v9476_v14  ;;  %v9566_v13 = vld [vmem:[%s14128_s1 + $0x60c] ss:$16 sps:$4 sm:$0xff]   ;;  %v9561_v14 = vld [vmem:[%s14128_s1 + $0x600] ss:$16 sps:$4 sm:$0xff]  }
  0x8b   : > { %6704 = vmatprep.mubr.bf16.mxu0 %v8083_v17  ;;  %7392 = vmatprep.mubr.bf16.mxu1 %v8083_v17  ;;  %v9564_v17 = vld [vmem:[%s14128_s1 + $0x608] ss:$16 sps:$4 sm:$0xff]  }
  0x8d   : > { %6675 = vmatpush1.bf16.msra.mxu0 %v9471_v18  ;;  %7363 = vmatpush1.bf16.msra.mxu1 %v9474_v19  ;;  %v8082_v18 = vcombine.low %v11281_v15, %v11284_v16  ;;  %v11477_v19 = vld [vmem:[%s10996_s17 + $0x18] sm:$0xff]  ;;  %v9567_v15 = vld [vmem:[%s14128_s1 + $0x620] ss:$16 sps:$4 sm:$0xff]  }
  0x8e   : > { %6676 = vmatprep.subr.bf16.mxu0 %v9479_v20  ;;  %7364 = vmatprep.subr.bf16.mxu1 %v9482_v21  ;;  %v11480_v20 = vld [vmem:[%s10996_s17 + $0x98] sm:$0xff]  ;;  %v9569_v21 = vld [vmem:[%s14128_s1 + $0x624] ss:$16 sps:$4 sm:$0xff]  }
  0x8f   : > { %v9570_v16 = vld [vmem:[%s14128_s1 + $0x628] ss:$16 sps:$4 sm:$0xff]  }
  0x91   : > { %6677 = vmatpush1.bf16.msra.mxu0 %v9477_v22  ;;  %7365 = vmatpush1.bf16.msra.mxu1 %v9480_v23  ;;  %v9572_v22 = vld [vmem:[%s14128_s1 + $0x62c] ss:$16 sps:$4 sm:$0xff]   ;;  %v8085_v23 = vcombine.high %v11477_v19, %v11480_v20 }
  0x92   : > { %6678 = vmatprep.subr.bf16.mxu0 %v9485_v24  ;;  %7366 = vmatprep.subr.bf16.mxu1 %v9488_v25  ;;  %v9575_v24 = vld [vmem:[%s14128_s1 + $0x644] ss:$16 sps:$4 sm:$0xff]   ;;  %v9578_v25 = vld [vmem:[%s14128_s1 + $0x64c] ss:$16 sps:$4 sm:$0xff]  }
  0x95   : > { %6679 = vmatpush1.bf16.msra.mxu0 %v9483_v26  ;;  %7367 = vmatpush1.bf16.msra.mxu1 %v9486_v27  ;;  %v9573_v26 = vld [vmem:[%s14128_s1 + $0x640] ss:$16 sps:$4 sm:$0xff]   ;;  %v9576_v27 = vld [vmem:[%s14128_s1 + $0x648] ss:$16 sps:$4 sm:$0xff]  }
  0x96   : > { %6680 = vmatprep.subr.bf16.mxu0 %v9491_v28  ;;  %7368 = vmatprep.subr.bf16.mxu1 %v9494_v29  ;;  %v9581_v28 = vld [vmem:[%s14128_s1 + $0x664] ss:$16 sps:$4 sm:$0xff]   ;;  %v9584_v29 = vld [vmem:[%s14128_s1 + $0x66c] ss:$16 sps:$4 sm:$0xff]  }
  0x99   : > { %6681 = vmatpush1.bf16.msra.mxu0 %v9489_v30  ;;  %7369 = vmatpush1.bf16.msra.mxu1 %v9492_v31  ;;  %v9579_v30 = vld [vmem:[%s14128_s1 + $0x660] ss:$16 sps:$4 sm:$0xff]   ;;  %v9582_v31 = vld [vmem:[%s14128_s1 + $0x668] ss:$16 sps:$4 sm:$0xff]  }
  0x9a   : > { %6682 = vmatprep.subr.bf16.mxu0 %v9497_v32  ;;  %7370 = vmatprep.subr.bf16.mxu1 %v9500_v33  ;;  %v9587_v32 = vld [vmem:[%s14128_s1 + $0x684] ss:$16 sps:$4 sm:$0xff]   ;;  %v9590_v33 = vld [vmem:[%s14128_s1 + $0x68c] ss:$16 sps:$4 sm:$0xff]  }
  0x9d   : > { %6683 = vmatpush1.bf16.msra.mxu0 %v9495_v34  ;;  %7371 = vmatpush1.bf16.msra.mxu1 %v9498_v35  ;;  %v9585_v34 = vld [vmem:[%s14128_s1 + $0x680] ss:$16 sps:$4 sm:$0xff]   ;;  %v9588_v35 = vld [vmem:[%s14128_s1 + $0x688] ss:$16 sps:$4 sm:$0xff]  }
  0x9e   : > { %6684 = vmatprep.subr.bf16.mxu0 %v9503_v36  ;;  %7372 = vmatprep.subr.bf16.mxu1 %v9506_v37  ;;  %v9593_v36 = vld [vmem:[%s14128_s1 + $0x6a4] ss:$16 sps:$4 sm:$0xff]   ;;  %v9596_v37 = vld [vmem:[%s14128_s1 + $0x6ac] ss:$16 sps:$4 sm:$0xff]  }
  0xa1   : > { %6685 = vmatpush1.bf16.msra.mxu0 %v9501_v38  ;;  %7373 = vmatpush1.bf16.msra.mxu1 %v9504_v39  ;;  %v9591_v38 = vld [vmem:[%s14128_s1 + $0x6a0] ss:$16 sps:$4 sm:$0xff]   ;;  %v9594_v39 = vld [vmem:[%s14128_s1 + $0x6a8] ss:$16 sps:$4 sm:$0xff]  }
  0xa2   : > { %6686 = vmatprep.subr.bf16.mxu0 %v9509_v40  ;;  %7374 = vmatprep.subr.bf16.mxu1 %v9512_v41  ;;  %v9599_v40 = vld [vmem:[%s14128_s1 + $0x6c4] ss:$16 sps:$4 sm:$0xff]   ;;  %v9602_v41 = vld [vmem:[%s14128_s1 + $0x6cc] ss:$16 sps:$4 sm:$0xff]  }
  0xa5   : > { %6687 = vmatpush1.bf16.msra.mxu0 %v9507_v42  ;;  %7375 = vmatpush1.bf16.msra.mxu1 %v9510_v43  ;;  %v9597_v42 = vld [vmem:[%s14128_s1 + $0x6c0] ss:$16 sps:$4 sm:$0xff]   ;;  %v9600_v43 = vld [vmem:[%s14128_s1 + $0x6c8] ss:$16 sps:$4 sm:$0xff]  }
  0xa6   : > { %6688 = vmatprep.subr.bf16.mxu0 %v9515_v44  ;;  %7376 = vmatprep.subr.bf16.mxu1 %v9518_v45  ;;  %v9605_v44 = vld [vmem:[%s14128_s1 + $0x6e4] ss:$16 sps:$4 sm:$0xff]   ;;  %v9608_v45 = vld [vmem:[%s14128_s1 + $0x6ec] ss:$16 sps:$4 sm:$0xff]  }
  0xa9   : > { %6689 = vmatpush1.bf16.msra.mxu0 %v9513_v46  ;;  %7377 = vmatpush1.bf16.msra.mxu1 %v9516_v47  ;;  %v9603_v46 = vld [vmem:[%s14128_s1 + $0x6e0] ss:$16 sps:$4 sm:$0xff]   ;;  %v9606_v47 = vld [vmem:[%s14128_s1 + $0x6e8] ss:$16 sps:$4 sm:$0xff]  }
  0xaa   : > { %6690 = vmatprep.subr.bf16.mxu0 %v9521_v48  ;;  %7378 = vmatprep.subr.bf16.mxu1 %v9524_v49  ;;  %v9611_v48 = vld [vmem:[%s14128_s1 + $0x704] ss:$16 sps:$4 sm:$0xff]   ;;  %v9614_v49 = vld [vmem:[%s14128_s1 + $0x70c] ss:$16 sps:$4 sm:$0xff]  }
  0xad   : > { %6691 = vmatpush1.bf16.msra.mxu0 %v9519_v50  ;;  %7379 = vmatpush1.bf16.msra.mxu1 %v9522_v51  ;;  %v9609_v50 = vld [vmem:[%s14128_s1 + $0x700] ss:$16 sps:$4 sm:$0xff]   ;;  %v9612_v51 = vld [vmem:[%s14128_s1 + $0x708] ss:$16 sps:$4 sm:$0xff]  }
  0xae   : > { %6692 = vmatprep.subr.bf16.mxu0 %v9527_v52  ;;  %7380 = vmatprep.subr.bf16.mxu1 %v9530_v53  ;;  %v9617_v52 = vld [vmem:[%s14128_s1 + $0x724] ss:$16 sps:$4 sm:$0xff]   ;;  %v9620_v53 = vld [vmem:[%s14128_s1 + $0x72c] ss:$16 sps:$4 sm:$0xff]  }
  0xb1   : > { %6693 = vmatpush1.bf16.msra.mxu0 %v9525_v54  ;;  %7381 = vmatpush1.bf16.msra.mxu1 %v9528_v55  ;;  %v9615_v54 = vld [vmem:[%s14128_s1 + $0x720] ss:$16 sps:$4 sm:$0xff]   ;;  %v9618_v55 = vld [vmem:[%s14128_s1 + $0x728] ss:$16 sps:$4 sm:$0xff]  }
  0xb2   : > { %6694 = vmatprep.subr.bf16.mxu0 %v9533_v56  ;;  %7382 = vmatprep.subr.bf16.mxu1 %v9536_v57  ;;  %v9623_v56 = vld [vmem:[%s14128_s1 + $0x744] ss:$16 sps:$4 sm:$0xff]   ;;  %v9626_v57 = vld [vmem:[%s14128_s1 + $0x74c] ss:$16 sps:$4 sm:$0xff]  }
  0xb5   : > { %6695 = vmatpush1.bf16.msra.mxu0 %v9531_v58  ;;  %7383 = vmatpush1.bf16.msra.mxu1 %v9534_v59  ;;  %v9621_v58 = vld [vmem:[%s14128_s1 + $0x740] ss:$16 sps:$4 sm:$0xff]   ;;  %v9624_v59 = vld [vmem:[%s14128_s1 + $0x748] ss:$16 sps:$4 sm:$0xff]  }
  0xb6   : > { %6696 = vmatprep.subr.bf16.mxu0 %v9539_v60  ;;  %7384 = vmatprep.subr.bf16.mxu1 %v9542_v61  ;;  %v9629_v60 = vld [vmem:[%s14128_s1 + $0x764] ss:$16 sps:$4 sm:$0xff]   ;;  %v9632_v61 = vld [vmem:[%s14128_s1 + $0x76c] ss:$16 sps:$4 sm:$0xff]  }
  0xb9   : > { %6697 = vmatpush1.bf16.msra.mxu0 %v9537_v62  ;;  %7385 = vmatpush1.bf16.msra.mxu1 %v9540_v63  ;;  %v9627_v62 = vld [vmem:[%s14128_s1 + $0x760] ss:$16 sps:$4 sm:$0xff]   ;;  %v9630_v63 = vld [vmem:[%s14128_s1 + $0x768] ss:$16 sps:$4 sm:$0xff]  }
  0xba   : > { %6698 = vmatprep.subr.bf16.mxu0 %v9545_v0  ;;  %7386 = vmatprep.subr.bf16.mxu1 %v9548_v1  ;;  %v9635_v0 = vld [vmem:[%s14128_s1 + $0x784] ss:$16 sps:$4 sm:$0xff]   ;;  %v9638_v1 = vld [vmem:[%s14128_s1 + $0x78c] ss:$16 sps:$4 sm:$0xff]  }
  0xbd   : > { %6699 = vmatpush1.bf16.msra.mxu0 %v9543_v2  ;;  %7387 = vmatpush1.bf16.msra.mxu1 %v9546_v3  ;;  %v9633_v2 = vld [vmem:[%s14128_s1 + $0x780] ss:$16 sps:$4 sm:$0xff]   ;;  %v9636_v3 = vld [vmem:[%s14128_s1 + $0x788] ss:$16 sps:$4 sm:$0xff]  }
  0xbe   : > { %6700 = vmatprep.subr.bf16.mxu0 %v9551_v4  ;;  %7388 = vmatprep.subr.bf16.mxu1 %v9554_v5  ;;  %v9641_v4 = vld [vmem:[%s14128_s1 + $0x7a4] ss:$16 sps:$4 sm:$0xff]   ;;  %v9644_v5 = vld [vmem:[%s14128_s1 + $0x7ac] ss:$16 sps:$4 sm:$0xff]  }
  0xc1   : > { %6701 = vmatpush1.bf16.msra.mxu0 %v9549_v6  ;;  %7389 = vmatpush1.bf16.msra.mxu1 %v9552_v7  ;;  %v9639_v6 = vld [vmem:[%s14128_s1 + $0x7a0] ss:$16 sps:$4 sm:$0xff]   ;;  %v9642_v7 = vld [vmem:[%s14128_s1 + $0x7a8] ss:$16 sps:$4 sm:$0xff]  }
  0xc2   : > { %6702 = vmatprep.subr.bf16.mxu0 %v9557_v8  ;;  %7390 = vmatprep.subr.bf16.mxu1 %v9560_v9  ;;  %v9647_v8 = vld [vmem:[%s14128_s1 + $0x7c4] ss:$16 sps:$4 sm:$0xff]   ;;  %v9650_v9 = vld [vmem:[%s14128_s1 + $0x7cc] ss:$16 sps:$4 sm:$0xff]  }
  0xc5   : > { %6703 = vmatpush1.bf16.msra.mxu0 %v9555_v10  ;;  %7391 = vmatpush1.bf16.msra.mxu1 %v9558_v11  ;;  %v9645_v10 = vld [vmem:[%s14128_s1 + $0x7c0] ss:$16 sps:$4 sm:$0xff]   ;;  %v9648_v11 = vld [vmem:[%s14128_s1 + $0x7c8] ss:$16 sps:$4 sm:$0xff]  }
  0xc6   : > { %6715 = vmatprep.subr.bf16.mxu0 %v9563_v12  ;;  %7403 = vmatprep.subr.bf16.mxu1 %v9566_v13  ;;  %v9653_v12 = vld [vmem:[%s14128_s1 + $0x7e4] ss:$16 sps:$4 sm:$0xff]   ;;  %v9656_v13 = vld [vmem:[%s14128_s1 + $0x7ec] ss:$16 sps:$4 sm:$0xff]  }
  0xc8   : > { %6705 = vmatmul.mubr.bf16.vlgmr.msra.gmra.mrb[0].mxu0 %v8082_v18  ;;  %7393 = vmatmul.mubr.bf16.vlgmr.msra.gmra.mrb[0].mxu1 %v8082_v18  ;;  %v9659_v18 = vld [vmem:[%s14128_s1 + $0x804] ss:$16 sps:$4 sm:$0xff]  }
  0xc9   : > { %6716 = vmatpush1.bf16.msra.mxu0 %v9561_v14  ;;  %7404 = vmatpush1.bf16.msra.mxu1 %v9564_v17  ;;  %v9651_v14 = vld [vmem:[%s14128_s1 + $0x7e0] ss:$16 sps:$4 sm:$0xff]   ;;  %v9654_v17 = vld [vmem:[%s14128_s1 + $0x7e8] ss:$16 sps:$4 sm:$0xff]  }
  0xca   : > { %6717 = vmatprep.subr.bf16.mxu0 %v9569_v21  ;;  %7405 = vmatprep.subr.bf16.mxu1 %v9572_v22  ;;  %v9662_v21 = vld [vmem:[%s14128_s1 + $0x80c] ss:$16 sps:$4 sm:$0xff]   ;;  %v11671_v22 = vld [vmem:[%s10996_s17 + $0x20] sm:$0xff] }
  0xcb   : > { %6747 = vmatprep.mubr.bf16.mxu0 %v8085_v23  ;;  %7435 = vmatprep.mubr.bf16.mxu1 %v8085_v23  ;;  %v8084_v23 = vcombine.low %v11477_v19, %v11480_v20  ;;  %v9668_v19 = vld [vmem:[%s14128_s1 + $0x82c] ss:$16 sps:$4 sm:$0xff]  }
  0xcd   : > { %6718 = vmatpush1.bf16.msra.mxu0 %v9567_v15  ;;  %7406 = vmatpush1.bf16.msra.mxu1 %v9570_v16  ;;  %v11676_v15 = vld [vmem:[%s10996_s17 + $0xa0] sm:$0xff] }
  0xce   : > { %6719 = vmatprep.subr.bf16.mxu0 %v9575_v24  ;;  %7407 = vmatprep.subr.bf16.mxu1 %v9578_v25  ;;  %v9657_v16 = vld [vmem:[%s14128_s1 + $0x800] ss:$16 sps:$4 sm:$0xff]   ;;  %v9660_v24 = vld [vmem:[%s14128_s1 + $0x808] ss:$16 sps:$4 sm:$0xff]   ;;  %v9665_v25 = vld [vmem:[%s14128_s1 + $0x824] ss:$16 sps:$4 sm:$0xff]   ;;  %v8087_v20 = vcombine.high %v11671_v22, %v11676_v15 }
  0xd1   : > { %6720 = vmatpush1.bf16.msra.mxu0 %v9573_v26  ;;  %7408 = vmatpush1.bf16.msra.mxu1 %v9576_v27  ;;  %v9663_v26 = vld [vmem:[%s14128_s1 + $0x820] ss:$16 sps:$4 sm:$0xff]   ;;  %v9666_v27 = vld [vmem:[%s14128_s1 + $0x828] ss:$16 sps:$4 sm:$0xff]  }
  0xd2   : > { %6721 = vmatprep.subr.bf16.mxu0 %v9581_v28  ;;  %7409 = vmatprep.subr.bf16.mxu1 %v9584_v29  ;;  %v9671_v28 = vld [vmem:[%s14128_s1 + $0x844] ss:$16 sps:$4 sm:$0xff]   ;;  %v9674_v29 = vld [vmem:[%s14128_s1 + $0x84c] ss:$16 sps:$4 sm:$0xff]  }
  0xd5   : > { %6722 = vmatpush1.bf16.msra.mxu0 %v9579_v30  ;;  %7410 = vmatpush1.bf16.msra.mxu1 %v9582_v31  ;;  %v9669_v30 = vld [vmem:[%s14128_s1 + $0x840] ss:$16 sps:$4 sm:$0xff]   ;;  %v9672_v31 = vld [vmem:[%s14128_s1 + $0x848] ss:$16 sps:$4 sm:$0xff]  }
  0xd6   : > { %6723 = vmatprep.subr.bf16.mxu0 %v9587_v32  ;;  %7411 = vmatprep.subr.bf16.mxu1 %v9590_v33  ;;  %v9677_v32 = vld [vmem:[%s14128_s1 + $0x864] ss:$16 sps:$4 sm:$0xff]   ;;  %v9680_v33 = vld [vmem:[%s14128_s1 + $0x86c] ss:$16 sps:$4 sm:$0xff]  }
  0xd9   : > { %6724 = vmatpush1.bf16.msra.mxu0 %v9585_v34  ;;  %7412 = vmatpush1.bf16.msra.mxu1 %v9588_v35  ;;  %v9675_v34 = vld [vmem:[%s14128_s1 + $0x860] ss:$16 sps:$4 sm:$0xff]   ;;  %v9678_v35 = vld [vmem:[%s14128_s1 + $0x868] ss:$16 sps:$4 sm:$0xff]  }
  0xda   : > { %6725 = vmatprep.subr.bf16.mxu0 %v9593_v36  ;;  %7413 = vmatprep.subr.bf16.mxu1 %v9596_v37  ;;  %v9683_v36 = vld [vmem:[%s14128_s1 + $0x884] ss:$16 sps:$4 sm:$0xff]   ;;  %v9686_v37 = vld [vmem:[%s14128_s1 + $0x88c] ss:$16 sps:$4 sm:$0xff]  }
  0xdd   : > { %6726 = vmatpush1.bf16.msra.mxu0 %v9591_v38  ;;  %7414 = vmatpush1.bf16.msra.mxu1 %v9594_v39  ;;  %v9681_v38 = vld [vmem:[%s14128_s1 + $0x880] ss:$16 sps:$4 sm:$0xff]   ;;  %v9684_v39 = vld [vmem:[%s14128_s1 + $0x888] ss:$16 sps:$4 sm:$0xff]  }
  0xde   : > { %6727 = vmatprep.subr.bf16.mxu0 %v9599_v40  ;;  %7415 = vmatprep.subr.bf16.mxu1 %v9602_v41  ;;  %v9689_v40 = vld [vmem:[%s14128_s1 + $0x8a4] ss:$16 sps:$4 sm:$0xff]   ;;  %v9692_v41 = vld [vmem:[%s14128_s1 + $0x8ac] ss:$16 sps:$4 sm:$0xff]  }
  0xe1   : > { %6728 = vmatpush1.bf16.msra.mxu0 %v9597_v42  ;;  %7416 = vmatpush1.bf16.msra.mxu1 %v9600_v43  ;;  %v9687_v42 = vld [vmem:[%s14128_s1 + $0x8a0] ss:$16 sps:$4 sm:$0xff]   ;;  %v9690_v43 = vld [vmem:[%s14128_s1 + $0x8a8] ss:$16 sps:$4 sm:$0xff]  }
  0xe2   : > { %6729 = vmatprep.subr.bf16.mxu0 %v9605_v44  ;;  %7417 = vmatprep.subr.bf16.mxu1 %v9608_v45  ;;  %v9695_v44 = vld [vmem:[%s14128_s1 + $0x8c4] ss:$16 sps:$4 sm:$0xff]   ;;  %v9698_v45 = vld [vmem:[%s14128_s1 + $0x8cc] ss:$16 sps:$4 sm:$0xff]  }
  0xe5   : > { %6730 = vmatpush1.bf16.msra.mxu0 %v9603_v46  ;;  %7418 = vmatpush1.bf16.msra.mxu1 %v9606_v47  ;;  %v9693_v46 = vld [vmem:[%s14128_s1 + $0x8c0] ss:$16 sps:$4 sm:$0xff]   ;;  %v9696_v47 = vld [vmem:[%s14128_s1 + $0x8c8] ss:$16 sps:$4 sm:$0xff]  }
  0xe6   : > { %6731 = vmatprep.subr.bf16.mxu0 %v9611_v48  ;;  %7419 = vmatprep.subr.bf16.mxu1 %v9614_v49  ;;  %v9701_v48 = vld [vmem:[%s14128_s1 + $0x8e4] ss:$16 sps:$4 sm:$0xff]   ;;  %v9704_v49 = vld [vmem:[%s14128_s1 + $0x8ec] ss:$16 sps:$4 sm:$0xff]  }
  0xe9   : > { %6732 = vmatpush1.bf16.msra.mxu0 %v9609_v50  ;;  %7420 = vmatpush1.bf16.msra.mxu1 %v9612_v51  ;;  %v9699_v50 = vld [vmem:[%s14128_s1 + $0x8e0] ss:$16 sps:$4 sm:$0xff]   ;;  %v9702_v51 = vld [vmem:[%s14128_s1 + $0x8e8] ss:$16 sps:$4 sm:$0xff]  }
  0xea   : > { %6733 = vmatprep.subr.bf16.mxu0 %v9617_v52  ;;  %7421 = vmatprep.subr.bf16.mxu1 %v9620_v53  ;;  %v9707_v52 = vld [vmem:[%s14128_s1 + $0x904] ss:$16 sps:$4 sm:$0xff]   ;;  %v9710_v53 = vld [vmem:[%s14128_s1 + $0x90c] ss:$16 sps:$4 sm:$0xff]  }
  0xed   : > { %6734 = vmatpush1.bf16.msra.mxu0 %v9615_v54  ;;  %7422 = vmatpush1.bf16.msra.mxu1 %v9618_v55  ;;  %v9705_v54 = vld [vmem:[%s14128_s1 + $0x900] ss:$16 sps:$4 sm:$0xff]   ;;  %v9708_v55 = vld [vmem:[%s14128_s1 + $0x908] ss:$16 sps:$4 sm:$0xff]  }
  0xee   : > { %6735 = vmatprep.subr.bf16.mxu0 %v9623_v56  ;;  %7423 = vmatprep.subr.bf16.mxu1 %v9626_v57  ;;  %v9713_v56 = vld [vmem:[%s14128_s1 + $0x924] ss:$16 sps:$4 sm:$0xff]   ;;  %v9716_v57 = vld [vmem:[%s14128_s1 + $0x92c] ss:$16 sps:$4 sm:$0xff]  }
  0xf1   : > { %6736 = vmatpush1.bf16.msra.mxu0 %v9621_v58  ;;  %7424 = vmatpush1.bf16.msra.mxu1 %v9624_v59  ;;  %v9711_v58 = vld [vmem:[%s14128_s1 + $0x920] ss:$16 sps:$4 sm:$0xff]   ;;  %v9714_v59 = vld [vmem:[%s14128_s1 + $0x928] ss:$16 sps:$4 sm:$0xff]  }
  0xf2   : > { %6737 = vmatprep.subr.bf16.mxu0 %v9629_v60  ;;  %7425 = vmatprep.subr.bf16.mxu1 %v9632_v61  ;;  %v9719_v60 = vld [vmem:[%s14128_s1 + $0x944] ss:$16 sps:$4 sm:$0xff]   ;;  %v9722_v61 = vld [vmem:[%s14128_s1 + $0x94c] ss:$16 sps:$4 sm:$0xff]  }
  0xf5   : > { %6738 = vmatpush1.bf16.msra.mxu0 %v9627_v62  ;;  %7426 = vmatpush1.bf16.msra.mxu1 %v9630_v63  ;;  %v9717_v62 = vld [vmem:[%s14128_s1 + $0x940] ss:$16 sps:$4 sm:$0xff]   ;;  %v9720_v63 = vld [vmem:[%s14128_s1 + $0x948] ss:$16 sps:$4 sm:$0xff]  }
  0xf6   : > { %6739 = vmatprep.subr.bf16.mxu0 %v9635_v0  ;;  %7427 = vmatprep.subr.bf16.mxu1 %v9638_v1  ;;  %v9725_v0 = vld [vmem:[%s14128_s1 + $0x964] ss:$16 sps:$4 sm:$0xff]   ;;  %v9728_v1 = vld [vmem:[%s14128_s1 + $0x96c] ss:$16 sps:$4 sm:$0xff]  }
  0xf9   : > { %6740 = vmatpush1.bf16.msra.mxu0 %v9633_v2  ;;  %7428 = vmatpush1.bf16.msra.mxu1 %v9636_v3  ;;  %v9723_v2 = vld [vmem:[%s14128_s1 + $0x960] ss:$16 sps:$4 sm:$0xff]   ;;  %v9726_v3 = vld [vmem:[%s14128_s1 + $0x968] ss:$16 sps:$4 sm:$0xff]  }
  0xfa   : > { %6741 = vmatprep.subr.bf16.mxu0 %v9641_v4  ;;  %7429 = vmatprep.subr.bf16.mxu1 %v9644_v5  ;;  %v9731_v4 = vld [vmem:[%s14128_s1 + $0x984] ss:$16 sps:$4 sm:$0xff]   ;;  %v9734_v5 = vld [vmem:[%s14128_s1 + $0x98c] ss:$16 sps:$4 sm:$0xff]  }
  0xfd   : > { %6742 = vmatpush1.bf16.msra.mxu0 %v9639_v6  ;;  %7430 = vmatpush1.bf16.msra.mxu1 %v9642_v7  ;;  %v9729_v6 = vld [vmem:[%s14128_s1 + $0x980] ss:$16 sps:$4 sm:$0xff]   ;;  %v9732_v7 = vld [vmem:[%s14128_s1 + $0x988] ss:$16 sps:$4 sm:$0xff]  }
  0xfe   : > { %6743 = vmatprep.subr.bf16.mxu0 %v9647_v8  ;;  %7431 = vmatprep.subr.bf16.mxu1 %v9650_v9  ;;  %v9737_v8 = vld [vmem:[%s14128_s1 + $0x9a4] ss:$16 sps:$4 sm:$0xff]   ;;  %v9740_v9 = vld [vmem:[%s14128_s1 + $0x9ac] ss:$16 sps:$4 sm:$0xff]  }
 0x101   : > { %6744 = vmatpush1.bf16.msra.mxu0 %v9645_v10  ;;  %7432 = vmatpush1.bf16.msra.mxu1 %v9648_v11  ;;  %v9735_v10 = vld [vmem:[%s14128_s1 + $0x9a0] ss:$16 sps:$4 sm:$0xff]   ;;  %v9738_v11 = vld [vmem:[%s14128_s1 + $0x9a8] ss:$16 sps:$4 sm:$0xff]  }
 0x102   : > { %6745 = vmatprep.subr.bf16.mxu0 %v9653_v12  ;;  %7433 = vmatprep.subr.bf16.mxu1 %v9656_v13  ;;  %v9743_v12 = vld [vmem:[%s14128_s1 + $0x9c4] ss:$16 sps:$4 sm:$0xff]   ;;  %v9746_v13 = vld [vmem:[%s14128_s1 + $0x9cc] ss:$16 sps:$4 sm:$0xff]  }
 0x105   : > { %6746 = vmatpush1.bf16.msra.mxu0 %v9651_v14  ;;  %7434 = vmatpush1.bf16.msra.mxu1 %v9654_v17  ;;  %v9741_v14 = vld [vmem:[%s14128_s1 + $0x9c0] ss:$16 sps:$4 sm:$0xff]   ;;  %v9744_v17 = vld [vmem:[%s14128_s1 + $0x9c8] ss:$16 sps:$4 sm:$0xff]  }
 0x106   : > { %6758 = vmatprep.subr.bf16.mxu0 %v9659_v18  ;;  %7446 = vmatprep.subr.bf16.mxu1 %v9662_v21  ;;  %v9749_v18 = vld [vmem:[%s14128_s1 + $0x9e4] ss:$16 sps:$4 sm:$0xff]   ;;  %v9752_v21 = vld [vmem:[%s14128_s1 + $0x9ec] ss:$16 sps:$4 sm:$0xff]  }
 0x108   : > { %6748 = vmatmul.mubr.bf16.vlgmr.msra.gmra.mrb[0].mxu0 %v8084_v23  ;;  %7436 = vmatmul.mubr.bf16.vlgmr.msra.gmra.mrb[0].mxu1 %v8084_v23  ;;  %v9747_v23 = vld [vmem:[%s14128_s1 + $0x9e0] ss:$16 sps:$4 sm:$0xff]  }
 0x109   : > { %6759 = vmatpush1.bf16.msra.mxu0 %v9657_v16  ;;  %7447 = vmatpush1.bf16.msra.mxu1 %v9660_v24  ;;  %v9750_v16 = vld [vmem:[%s14128_s1 + $0x9e8] ss:$16 sps:$4 sm:$0xff]   ;;  %v9755_v24 = vld [vmem:[%s14128_s1 + $0xa04] ss:$16 sps:$4 sm:$0xff]  }
 0x10a   : > { %6760 = vmatprep.subr.bf16.mxu0 %v9665_v25  ;;  %7448 = vmatprep.subr.bf16.mxu1 %v9668_v19  ;;  %v9758_v25 = vld [vmem:[%s14128_s1 + $0xa0c] ss:$16 sps:$4 sm:$0xff]  }
 0x10b   : > { %6790 = vmatprep.mubr.bf16.mxu0 %v8087_v20  ;;  %7478 = vmatprep.mubr.bf16.mxu1 %v8087_v20  ;;  %v11873_v19 = vld [vmem:[%s10996_s17 + $0x28] sm:$0xff] }
 0x10c   : > { %v11876_v20 = vld [vmem:[%s10996_s17 + $0xa8] sm:$0xff] }
 0x10d   : > { %6761 = vmatpush1.bf16.msra.mxu0 %v9663_v26  ;;  %7449 = vmatpush1.bf16.msra.mxu1 %v9666_v27  ;;  %v8086_v26 = vcombine.low %v11671_v22, %v11676_v15  ;;  %v9753_v27 = vld [vmem:[%s14128_s1 + $0xa00] ss:$16 sps:$4 sm:$0xff]   ;;  %v9764_v22 = vld [vmem:[%s14128_s1 + $0xa2c] ss:$16 sps:$4 sm:$0xff]   ;;  %v8089_v15 = vcombine.high %v11873_v19, %v11876_v20 }
 0x10e   : > { %6762 = vmatprep.subr.bf16.mxu0 %v9671_v28  ;;  %7450 = vmatprep.subr.bf16.mxu1 %v9674_v29  ;;  %v9756_v28 = vld [vmem:[%s14128_s1 + $0xa08] ss:$16 sps:$4 sm:$0xff]   ;;  %v9761_v29 = vld [vmem:[%s14128_s1 + $0xa24] ss:$16 sps:$4 sm:$0xff]  }
 0x111   : > { %6763 = vmatpush1.bf16.msra.mxu0 %v9669_v30  ;;  %7451 = vmatpush1.bf16.msra.mxu1 %v9672_v31  ;;  %v9759_v30 = vld [vmem:[%s14128_s1 + $0xa20] ss:$16 sps:$4 sm:$0xff]   ;;  %v9762_v31 = vld [vmem:[%s14128_s1 + $0xa28] ss:$16 sps:$4 sm:$0xff]  }
 0x112   : > { %6764 = vmatprep.subr.bf16.mxu0 %v9677_v32  ;;  %7452 = vmatprep.subr.bf16.mxu1 %v9680_v33  ;;  %v9767_v32 = vld [vmem:[%s14128_s1 + $0xa44] ss:$16 sps:$4 sm:$0xff]   ;;  %v9770_v33 = vld [vmem:[%s14128_s1 + $0xa4c] ss:$16 sps:$4 sm:$0xff]  }
 0x115   : > { %6765 = vmatpush1.bf16.msra.mxu0 %v9675_v34  ;;  %7453 = vmatpush1.bf16.msra.mxu1 %v9678_v35  ;;  %v9765_v34 = vld [vmem:[%s14128_s1 + $0xa40] ss:$16 sps:$4 sm:$0xff]   ;;  %v9768_v35 = vld [vmem:[%s14128_s1 + $0xa48] ss:$16 sps:$4 sm:$0xff]  }
 0x116   : > { %6766 = vmatprep.subr.bf16.mxu0 %v9683_v36  ;;  %7454 = vmatprep.subr.bf16.mxu1 %v9686_v37  ;;  %v9773_v36 = vld [vmem:[%s14128_s1 + $0xa64] ss:$16 sps:$4 sm:$0xff]   ;;  %v9776_v37 = vld [vmem:[%s14128_s1 + $0xa6c] ss:$16 sps:$4 sm:$0xff]  }
 0x119   : > { %6767 = vmatpush1.bf16.msra.mxu0 %v9681_v38  ;;  %7455 = vmatpush1.bf16.msra.mxu1 %v9684_v39  ;;  %v9771_v38 = vld [vmem:[%s14128_s1 + $0xa60] ss:$16 sps:$4 sm:$0xff]   ;;  %v9774_v39 = vld [vmem:[%s14128_s1 + $0xa68] ss:$16 sps:$4 sm:$0xff]  }
 0x11a   : > { %6768 = vmatprep.subr.bf16.mxu0 %v9689_v40  ;;  %7456 = vmatprep.subr.bf16.mxu1 %v9692_v41  ;;  %v9779_v40 = vld [vmem:[%s14128_s1 + $0xa84] ss:$16 sps:$4 sm:$0xff]   ;;  %v9782_v41 = vld [vmem:[%s14128_s1 + $0xa8c] ss:$16 sps:$4 sm:$0xff]  }
 0x11d   : > { %6769 = vmatpush1.bf16.msra.mxu0 %v9687_v42  ;;  %7457 = vmatpush1.bf16.msra.mxu1 %v9690_v43  ;;  %v9777_v42 = vld [vmem:[%s14128_s1 + $0xa80] ss:$16 sps:$4 sm:$0xff]   ;;  %v9780_v43 = vld [vmem:[%s14128_s1 + $0xa88] ss:$16 sps:$4 sm:$0xff]  }
 0x11e   : > { %6770 = vmatprep.subr.bf16.mxu0 %v9695_v44  ;;  %7458 = vmatprep.subr.bf16.mxu1 %v9698_v45  ;;  %v9785_v44 = vld [vmem:[%s14128_s1 + $0xaa4] ss:$16 sps:$4 sm:$0xff]   ;;  %v9788_v45 = vld [vmem:[%s14128_s1 + $0xaac] ss:$16 sps:$4 sm:$0xff]  }
 0x121   : > { %6771 = vmatpush1.bf16.msra.mxu0 %v9693_v46  ;;  %7459 = vmatpush1.bf16.msra.mxu1 %v9696_v47  ;;  %v9783_v46 = vld [vmem:[%s14128_s1 + $0xaa0] ss:$16 sps:$4 sm:$0xff]   ;;  %v9786_v47 = vld [vmem:[%s14128_s1 + $0xaa8] ss:$16 sps:$4 sm:$0xff]  }
 0x122   : > { %6772 = vmatprep.subr.bf16.mxu0 %v9701_v48  ;;  %7460 = vmatprep.subr.bf16.mxu1 %v9704_v49  ;;  %v9791_v48 = vld [vmem:[%s14128_s1 + $0xac4] ss:$16 sps:$4 sm:$0xff]   ;;  %v9794_v49 = vld [vmem:[%s14128_s1 + $0xacc] ss:$16 sps:$4 sm:$0xff]  }
 0x125   : > { %6773 = vmatpush1.bf16.msra.mxu0 %v9699_v50  ;;  %7461 = vmatpush1.bf16.msra.mxu1 %v9702_v51  ;;  %v9789_v50 = vld [vmem:[%s14128_s1 + $0xac0] ss:$16 sps:$4 sm:$0xff]   ;;  %v9792_v51 = vld [vmem:[%s14128_s1 + $0xac8] ss:$16 sps:$4 sm:$0xff]  }
 0x126   : > { %6774 = vmatprep.subr.bf16.mxu0 %v9707_v52  ;;  %7462 = vmatprep.subr.bf16.mxu1 %v9710_v53  ;;  %v9797_v52 = vld [vmem:[%s14128_s1 + $0xae4] ss:$16 sps:$4 sm:$0xff]   ;;  %v9800_v53 = vld [vmem:[%s14128_s1 + $0xaec] ss:$16 sps:$4 sm:$0xff]  }
 0x129   : > { %6775 = vmatpush1.bf16.msra.mxu0 %v9705_v54  ;;  %7463 = vmatpush1.bf16.msra.mxu1 %v9708_v55  ;;  %v9795_v54 = vld [vmem:[%s14128_s1 + $0xae0] ss:$16 sps:$4 sm:$0xff]   ;;  %v9798_v55 = vld [vmem:[%s14128_s1 + $0xae8] ss:$16 sps:$4 sm:$0xff]  }
 0x12a   : > { %6776 = vmatprep.subr.bf16.mxu0 %v9713_v56  ;;  %7464 = vmatprep.subr.bf16.mxu1 %v9716_v57  ;;  %v9803_v56 = vld [vmem:[%s14128_s1 + $0xb04] ss:$16 sps:$4 sm:$0xff]   ;;  %v9806_v57 = vld [vmem:[%s14128_s1 + $0xb0c] ss:$16 sps:$4 sm:$0xff]  }
 0x12d   : > { %6777 = vmatpush1.bf16.msra.mxu0 %v9711_v58  ;;  %7465 = vmatpush1.bf16.msra.mxu1 %v9714_v59  ;;  %v9801_v58 = vld [vmem:[%s14128_s1 + $0xb00] ss:$16 sps:$4 sm:$0xff]   ;;  %v9804_v59 = vld [vmem:[%s14128_s1 + $0xb08] ss:$16 sps:$4 sm:$0xff]  }
 0x12e   : > { %6778 = vmatprep.subr.bf16.mxu0 %v9719_v60  ;;  %7466 = vmatprep.subr.bf16.mxu1 %v9722_v61  ;;  %v9809_v60 = vld [vmem:[%s14128_s1 + $0xb24] ss:$16 sps:$4 sm:$0xff]   ;;  %v9812_v61 = vld [vmem:[%s14128_s1 + $0xb2c] ss:$16 sps:$4 sm:$0xff]  }
 0x131   : > { %6779 = vmatpush1.bf16.msra.mxu0 %v9717_v62  ;;  %7467 = vmatpush1.bf16.msra.mxu1 %v9720_v63  ;;  %v9807_v62 = vld [vmem:[%s14128_s1 + $0xb20] ss:$16 sps:$4 sm:$0xff]   ;;  %v9810_v63 = vld [vmem:[%s14128_s1 + $0xb28] ss:$16 sps:$4 sm:$0xff]  }
 0x132   : > { %6780 = vmatprep.subr.bf16.mxu0 %v9725_v0  ;;  %7468 = vmatprep.subr.bf16.mxu1 %v9728_v1  ;;  %v9815_v0 = vld [vmem:[%s14128_s1 + $0xb44] ss:$16 sps:$4 sm:$0xff]   ;;  %v9818_v1 = vld [vmem:[%s14128_s1 + $0xb4c] ss:$16 sps:$4 sm:$0xff]  }
 0x135   : > { %6781 = vmatpush1.bf16.msra.mxu0 %v9723_v2  ;;  %7469 = vmatpush1.bf16.msra.mxu1 %v9726_v3  ;;  %v9813_v2 = vld [vmem:[%s14128_s1 + $0xb40] ss:$16 sps:$4 sm:$0xff]   ;;  %v9816_v3 = vld [vmem:[%s14128_s1 + $0xb48] ss:$16 sps:$4 sm:$0xff]  }
 0x136   : > { %6782 = vmatprep.subr.bf16.mxu0 %v9731_v4  ;;  %7470 = vmatprep.subr.bf16.mxu1 %v9734_v5  ;;  %v9821_v4 = vld [vmem:[%s14128_s1 + $0xb64] ss:$16 sps:$4 sm:$0xff]   ;;  %v9824_v5 = vld [vmem:[%s14128_s1 + $0xb6c] ss:$16 sps:$4 sm:$0xff]  }
 0x139   : > { %6783 = vmatpush1.bf16.msra.mxu0 %v9729_v6  ;;  %7471 = vmatpush1.bf16.msra.mxu1 %v9732_v7  ;;  %v9819_v6 = vld [vmem:[%s14128_s1 + $0xb60] ss:$16 sps:$4 sm:$0xff]   ;;  %v9822_v7 = vld [vmem:[%s14128_s1 + $0xb68] ss:$16 sps:$4 sm:$0xff]  }
 0x13a   : > { %6784 = vmatprep.subr.bf16.mxu0 %v9737_v8  ;;  %7472 = vmatprep.subr.bf16.mxu1 %v9740_v9  ;;  %v9827_v8 = vld [vmem:[%s14128_s1 + $0xb84] ss:$16 sps:$4 sm:$0xff]   ;;  %v9830_v9 = vld [vmem:[%s14128_s1 + $0xb8c] ss:$16 sps:$4 sm:$0xff]  }
 0x13d   : > { %6785 = vmatpush1.bf16.msra.mxu0 %v9735_v10  ;;  %7473 = vmatpush1.bf16.msra.mxu1 %v9738_v11  ;;  %v9825_v10 = vld [vmem:[%s14128_s1 + $0xb80] ss:$16 sps:$4 sm:$0xff]   ;;  %v9828_v11 = vld [vmem:[%s14128_s1 + $0xb88] ss:$16 sps:$4 sm:$0xff]  }
 0x13e   : > { %6786 = vmatprep.subr.bf16.mxu0 %v9743_v12  ;;  %7474 = vmatprep.subr.bf16.mxu1 %v9746_v13  ;;  %v9833_v12 = vld [vmem:[%s14128_s1 + $0xba4] ss:$16 sps:$4 sm:$0xff]   ;;  %v9836_v13 = vld [vmem:[%s14128_s1 + $0xbac] ss:$16 sps:$4 sm:$0xff]  }
 0x141   : > { %6787 = vmatpush1.bf16.msra.mxu0 %v9741_v14  ;;  %7475 = vmatpush1.bf16.msra.mxu1 %v9744_v17  ;;  %v9831_v14 = vld [vmem:[%s14128_s1 + $0xba0] ss:$16 sps:$4 sm:$0xff]   ;;  %v9834_v17 = vld [vmem:[%s14128_s1 + $0xba8] ss:$16 sps:$4 sm:$0xff]  }
 0x142   : > { %6788 = vmatprep.subr.bf16.mxu0 %v9749_v18  ;;  %7476 = vmatprep.subr.bf16.mxu1 %v9752_v21  ;;  %v9839_v18 = vld [vmem:[%s14128_s1 + $0xbc4] ss:$16 sps:$4 sm:$0xff]   ;;  %v9842_v21 = vld [vmem:[%s14128_s1 + $0xbcc] ss:$16 sps:$4 sm:$0xff]  }
 0x145   : > { %6789 = vmatpush1.bf16.msra.mxu0 %v9747_v23  ;;  %7477 = vmatpush1.bf16.msra.mxu1 %v9750_v16  ;;  %v9837_v23 = vld [vmem:[%s14128_s1 + $0xbc0] ss:$16 sps:$4 sm:$0xff]   ;;  %v9840_v16 = vld [vmem:[%s14128_s1 + $0xbc8] ss:$16 sps:$4 sm:$0xff]  }
 0x146   : > { %6801 = vmatprep.subr.bf16.mxu0 %v9755_v24  ;;  %7489 = vmatprep.subr.bf16.mxu1 %v9758_v25  ;;  %v9845_v24 = vld [vmem:[%s14128_s1 + $0xbe4] ss:$16 sps:$4 sm:$0xff]   ;;  %v9848_v25 = vld [vmem:[%s14128_s1 + $0xbec] ss:$16 sps:$4 sm:$0xff]  }
 0x148   : > { %6791 = vmatmul.mubr.bf16.vlgmr.msra.gmra.mrb[0].mxu0 %v8086_v26  ;;  %7479 = vmatmul.mubr.bf16.vlgmr.msra.gmra.mrb[0].mxu1 %v8086_v26  ;;  %v9843_v26 = vld [vmem:[%s14128_s1 + $0xbe0] ss:$16 sps:$4 sm:$0xff]  }
 0x149   : > { %6802 = vmatpush1.bf16.msra.mxu0 %v9753_v27  ;;  %7490 = vmatpush1.bf16.msra.mxu1 %v9756_v28  ;;  %v9846_v27 = vld [vmem:[%s14128_s1 + $0xbe8] ss:$16 sps:$4 sm:$0xff]   ;;  %v9851_v28 = vld [vmem:[%s14128_s1 + $0xc04] ss:$16 sps:$4 sm:$0xff]  }
 0x14a   : > { %6803 = vmatprep.subr.bf16.mxu0 %v9761_v29  ;;  %7491 = vmatprep.subr.bf16.mxu1 %v9764_v22  ;;  %v9854_v29 = vld [vmem:[%s14128_s1 + $0xc0c] ss:$16 sps:$4 sm:$0xff]   ;;  %v12075_v22 = vld [vmem:[%s10996_s17 + $0x30] sm:$0xff] }
 0x14b   : > { %6833 = vmatprep.mubr.bf16.mxu0 %v8089_v15  ;;  %7521 = vmatprep.mubr.bf16.mxu1 %v8089_v15  ;;  %v12078_v15 = vld [vmem:[%s10996_s17 + $0xb0] sm:$0xff] }
 0x14d   : > { %6804 = vmatpush1.bf16.msra.mxu0 %v9759_v30  ;;  %7492 = vmatpush1.bf16.msra.mxu1 %v9762_v31  ;;  %v8088_v30 = vcombine.low %v11873_v19, %v11876_v20  ;;  %v9849_v31 = vld [vmem:[%s14128_s1 + $0xc00] ss:$16 sps:$4 sm:$0xff]   ;;  %v9860_v19 = vld [vmem:[%s14128_s1 + $0xc2c] ss:$16 sps:$4 sm:$0xff]   ;;  %v8091_v20 = vcombine.high %v12075_v22, %v12078_v15 }
 0x14e   : > { %6805 = vmatprep.subr.bf16.mxu0 %v9767_v32  ;;  %7493 = vmatprep.subr.bf16.mxu1 %v9770_v33  ;;  %v9852_v32 = vld [vmem:[%s14128_s1 + $0xc08] ss:$16 sps:$4 sm:$0xff]   ;;  %v9857_v33 = vld [vmem:[%s14128_s1 + $0xc24] ss:$16 sps:$4 sm:$0xff]  }
 0x151   : > { %6806 = vmatpush1.bf16.msra.mxu0 %v9765_v34  ;;  %7494 = vmatpush1.bf16.msra.mxu1 %v9768_v35  ;;  %v9855_v34 = vld [vmem:[%s14128_s1 + $0xc20] ss:$16 sps:$4 sm:$0xff]   ;;  %v9858_v35 = vld [vmem:[%s14128_s1 + $0xc28] ss:$16 sps:$4 sm:$0xff]  }
 0x152   : > { %6807 = vmatprep.subr.bf16.mxu0 %v9773_v36  ;;  %7495 = vmatprep.subr.bf16.mxu1 %v9776_v37  ;;  %v9863_v36 = vld [vmem:[%s14128_s1 + $0xc44] ss:$16 sps:$4 sm:$0xff]   ;;  %v9866_v37 = vld [vmem:[%s14128_s1 + $0xc4c] ss:$16 sps:$4 sm:$0xff]  }
 0x155   : > { %6808 = vmatpush1.bf16.msra.mxu0 %v9771_v38  ;;  %7496 = vmatpush1.bf16.msra.mxu1 %v9774_v39  ;;  %v9861_v38 = vld [vmem:[%s14128_s1 + $0xc40] ss:$16 sps:$4 sm:$0xff]   ;;  %v9864_v39 = vld [vmem:[%s14128_s1 + $0xc48] ss:$16 sps:$4 sm:$0xff]  }
 0x156   : > { %6809 = vmatprep.subr.bf16.mxu0 %v9779_v40  ;;  %7497 = vmatprep.subr.bf16.mxu1 %v9782_v41  ;;  %v9869_v40 = vld [vmem:[%s14128_s1 + $0xc64] ss:$16 sps:$4 sm:$0xff]   ;;  %v9872_v41 = vld [vmem:[%s14128_s1 + $0xc6c] ss:$16 sps:$4 sm:$0xff]  }
 0x159   : > { %6810 = vmatpush1.bf16.msra.mxu0 %v9777_v42  ;;  %7498 = vmatpush1.bf16.msra.mxu1 %v9780_v43  ;;  %v9867_v42 = vld [vmem:[%s14128_s1 + $0xc60] ss:$16 sps:$4 sm:$0xff]   ;;  %v9870_v43 = vld [vmem:[%s14128_s1 + $0xc68] ss:$16 sps:$4 sm:$0xff]  }
 0x15a   : > { %6811 = vmatprep.subr.bf16.mxu0 %v9785_v44  ;;  %7499 = vmatprep.subr.bf16.mxu1 %v9788_v45  ;;  %v9875_v44 = vld [vmem:[%s14128_s1 + $0xc84] ss:$16 sps:$4 sm:$0xff]   ;;  %v9878_v45 = vld [vmem:[%s14128_s1 + $0xc8c] ss:$16 sps:$4 sm:$0xff]  }
 0x15d   : > { %6812 = vmatpush1.bf16.msra.mxu0 %v9783_v46  ;;  %7500 = vmatpush1.bf16.msra.mxu1 %v9786_v47  ;;  %v9873_v46 = vld [vmem:[%s14128_s1 + $0xc80] ss:$16 sps:$4 sm:$0xff]   ;;  %v9876_v47 = vld [vmem:[%s14128_s1 + $0xc88] ss:$16 sps:$4 sm:$0xff]  }
 0x15e   : > { %6813 = vmatprep.subr.bf16.mxu0 %v9791_v48  ;;  %7501 = vmatprep.subr.bf16.mxu1 %v9794_v49  ;;  %v9881_v48 = vld [vmem:[%s14128_s1 + $0xca4] ss:$16 sps:$4 sm:$0xff]   ;;  %v9884_v49 = vld [vmem:[%s14128_s1 + $0xcac] ss:$16 sps:$4 sm:$0xff]  }
 0x161   : > { %6814 = vmatpush1.bf16.msra.mxu0 %v9789_v50  ;;  %7502 = vmatpush1.bf16.msra.mxu1 %v9792_v51  ;;  %v9879_v50 = vld [vmem:[%s14128_s1 + $0xca0] ss:$16 sps:$4 sm:$0xff]   ;;  %v9882_v51 = vld [vmem:[%s14128_s1 + $0xca8] ss:$16 sps:$4 sm:$0xff]  }
 0x162   : > { %6815 = vmatprep.subr.bf16.mxu0 %v9797_v52  ;;  %7503 = vmatprep.subr.bf16.mxu1 %v9800_v53  ;;  %v9887_v52 = vld [vmem:[%s14128_s1 + $0xcc4] ss:$16 sps:$4 sm:$0xff]   ;;  %v9890_v53 = vld [vmem:[%s14128_s1 + $0xccc] ss:$16 sps:$4 sm:$0xff]  }
 0x165   : > { %6816 = vmatpush1.bf16.msra.mxu0 %v9795_v54  ;;  %7504 = vmatpush1.bf16.msra.mxu1 %v9798_v55  ;;  %v9885_v54 = vld [vmem:[%s14128_s1 + $0xcc0] ss:$16 sps:$4 sm:$0xff]   ;;  %v9888_v55 = vld [vmem:[%s14128_s1 + $0xcc8] ss:$16 sps:$4 sm:$0xff]  }
 0x166   : > { %6817 = vmatprep.subr.bf16.mxu0 %v9803_v56  ;;  %7505 = vmatprep.subr.bf16.mxu1 %v9806_v57  ;;  %v9893_v56 = vld [vmem:[%s14128_s1 + $0xce4] ss:$16 sps:$4 sm:$0xff]   ;;  %v9896_v57 = vld [vmem:[%s14128_s1 + $0xcec] ss:$16 sps:$4 sm:$0xff]  }
 0x169   : > { %6818 = vmatpush1.bf16.msra.mxu0 %v9801_v58  ;;  %7506 = vmatpush1.bf16.msra.mxu1 %v9804_v59  ;;  %v9891_v58 = vld [vmem:[%s14128_s1 + $0xce0] ss:$16 sps:$4 sm:$0xff]   ;;  %v9894_v59 = vld [vmem:[%s14128_s1 + $0xce8] ss:$16 sps:$4 sm:$0xff]  }
 0x16a   : > { %6819 = vmatprep.subr.bf16.mxu0 %v9809_v60  ;;  %7507 = vmatprep.subr.bf16.mxu1 %v9812_v61  ;;  %v9899_v60 = vld [vmem:[%s14128_s1 + $0xd04] ss:$16 sps:$4 sm:$0xff]   ;;  %v9902_v61 = vld [vmem:[%s14128_s1 + $0xd0c] ss:$16 sps:$4 sm:$0xff]  }
 0x16d   : > { %6820 = vmatpush1.bf16.msra.mxu0 %v9807_v62  ;;  %7508 = vmatpush1.bf16.msra.mxu1 %v9810_v63  ;;  %v9897_v62 = vld [vmem:[%s14128_s1 + $0xd00] ss:$16 sps:$4 sm:$0xff]   ;;  %v9900_v63 = vld [vmem:[%s14128_s1 + $0xd08] ss:$16 sps:$4 sm:$0xff]  }
 0x16e   : > { %6821 = vmatprep.subr.bf16.mxu0 %v9815_v0  ;;  %7509 = vmatprep.subr.bf16.mxu1 %v9818_v1  ;;  %v9905_v0 = vld [vmem:[%s14128_s1 + $0xd24] ss:$16 sps:$4 sm:$0xff]   ;;  %v9908_v1 = vld [vmem:[%s14128_s1 + $0xd2c] ss:$16 sps:$4 sm:$0xff]  }
 0x171   : > { %6822 = vmatpush1.bf16.msra.mxu0 %v9813_v2  ;;  %7510 = vmatpush1.bf16.msra.mxu1 %v9816_v3  ;;  %v9903_v2 = vld [vmem:[%s14128_s1 + $0xd20] ss:$16 sps:$4 sm:$0xff]   ;;  %v9906_v3 = vld [vmem:[%s14128_s1 + $0xd28] ss:$16 sps:$4 sm:$0xff]  }
 0x172   : > { %6823 = vmatprep.subr.bf16.mxu0 %v9821_v4  ;;  %7511 = vmatprep.subr.bf16.mxu1 %v9824_v5  ;;  %v9911_v4 = vld [vmem:[%s14128_s1 + $0xd44] ss:$16 sps:$4 sm:$0xff]   ;;  %v9914_v5 = vld [vmem:[%s14128_s1 + $0xd4c] ss:$16 sps:$4 sm:$0xff]  }
 0x175   : > { %6824 = vmatpush1.bf16.msra.mxu0 %v9819_v6  ;;  %7512 = vmatpush1.bf16.msra.mxu1 %v9822_v7  ;;  %v9909_v6 = vld [vmem:[%s14128_s1 + $0xd40] ss:$16 sps:$4 sm:$0xff]   ;;  %v9912_v7 = vld [vmem:[%s14128_s1 + $0xd48] ss:$16 sps:$4 sm:$0xff]  }
 0x176   : > { %6825 = vmatprep.subr.bf16.mxu0 %v9827_v8  ;;  %7513 = vmatprep.subr.bf16.mxu1 %v9830_v9  ;;  %v9917_v8 = vld [vmem:[%s14128_s1 + $0xd64] ss:$16 sps:$4 sm:$0xff]   ;;  %v9920_v9 = vld [vmem:[%s14128_s1 + $0xd6c] ss:$16 sps:$4 sm:$0xff]  }
 0x179   : > { %6826 = vmatpush1.bf16.msra.mxu0 %v9825_v10  ;;  %7514 = vmatpush1.bf16.msra.mxu1 %v9828_v11  ;;  %v9915_v10 = vld [vmem:[%s14128_s1 + $0xd60] ss:$16 sps:$4 sm:$0xff]   ;;  %v9918_v11 = vld [vmem:[%s14128_s1 + $0xd68] ss:$16 sps:$4 sm:$0xff]  }
 0x17a   : > { %6827 = vmatprep.subr.bf16.mxu0 %v9833_v12  ;;  %7515 = vmatprep.subr.bf16.mxu1 %v9836_v13  ;;  %v9923_v12 = vld [vmem:[%s14128_s1 + $0xd84] ss:$16 sps:$4 sm:$0xff]   ;;  %v9926_v13 = vld [vmem:[%s14128_s1 + $0xd8c] ss:$16 sps:$4 sm:$0xff]  }
 0x17d   : > { %6828 = vmatpush1.bf16.msra.mxu0 %v9831_v14  ;;  %7516 = vmatpush1.bf16.msra.mxu1 %v9834_v17  ;;  %v9921_v14 = vld [vmem:[%s14128_s1 + $0xd80] ss:$16 sps:$4 sm:$0xff]   ;;  %v9924_v17 = vld [vmem:[%s14128_s1 + $0xd88] ss:$16 sps:$4 sm:$0xff]  }
 0x17e   : > { %6829 = vmatprep.subr.bf16.mxu0 %v9839_v18  ;;  %7517 = vmatprep.subr.bf16.mxu1 %v9842_v21  ;;  %v9929_v18 = vld [vmem:[%s14128_s1 + $0xda4] ss:$16 sps:$4 sm:$0xff]   ;;  %v9932_v21 = vld [vmem:[%s14128_s1 + $0xdac] ss:$16 sps:$4 sm:$0xff]  }
 0x181   : > { %6830 = vmatpush1.bf16.msra.mxu0 %v9837_v23  ;;  %7518 = vmatpush1.bf16.msra.mxu1 %v9840_v16  ;;  %v9927_v23 = vld [vmem:[%s14128_s1 + $0xda0] ss:$16 sps:$4 sm:$0xff]   ;;  %v9930_v16 = vld [vmem:[%s14128_s1 + $0xda8] ss:$16 sps:$4 sm:$0xff]  }
 0x182   : > { %6831 = vmatprep.subr.bf16.mxu0 %v9845_v24  ;;  %7519 = vmatprep.subr.bf16.mxu1 %v9848_v25  ;;  %v9935_v24 = vld [vmem:[%s14128_s1 + $0xdc4] ss:$16 sps:$4 sm:$0xff]   ;;  %v9938_v25 = vld [vmem:[%s14128_s1 + $0xdcc] ss:$16 sps:$4 sm:$0xff]  }
 0x185   : > { %6832 = vmatpush1.bf16.msra.mxu0 %v9843_v26  ;;  %7520 = vmatpush1.bf16.msra.mxu1 %v9846_v27  ;;  %v9933_v26 = vld [vmem:[%s14128_s1 + $0xdc0] ss:$16 sps:$4 sm:$0xff]   ;;  %v9936_v27 = vld [vmem:[%s14128_s1 + $0xdc8] ss:$16 sps:$4 sm:$0xff]  }
 0x186   : > { %6844 = vmatprep.subr.bf16.mxu0 %v9851_v28  ;;  %7532 = vmatprep.subr.bf16.mxu1 %v9854_v29  ;;  %v9941_v28 = vld [vmem:[%s14128_s1 + $0xde4] ss:$16 sps:$4 sm:$0xff]   ;;  %v9944_v29 = vld [vmem:[%s14128_s1 + $0xdec] ss:$16 sps:$4 sm:$0xff]  }
 0x188   : > { %6834 = vmatmul.mubr.bf16.vlgmr.msra.gmra.mrb[0].mxu0 %v8088_v30  ;;  %7522 = vmatmul.mubr.bf16.vlgmr.msra.gmra.mrb[0].mxu1 %v8088_v30  ;;  %v9939_v30 = vld [vmem:[%s14128_s1 + $0xde0] ss:$16 sps:$4 sm:$0xff]  }
 0x189   : > { %6845 = vmatpush1.bf16.msra.mxu0 %v9849_v31  ;;  %7533 = vmatpush1.bf16.msra.mxu1 %v9852_v32  ;;  %v9942_v31 = vld [vmem:[%s14128_s1 + $0xde8] ss:$16 sps:$4 sm:$0xff]   ;;  %v9947_v32 = vld [vmem:[%s14128_s1 + $0xe04] ss:$16 sps:$4 sm:$0xff]  }
 0x18a   : > { %6846 = vmatprep.subr.bf16.mxu0 %v9857_v33  ;;  %7534 = vmatprep.subr.bf16.mxu1 %v9860_v19  ;;  %v9950_v33 = vld [vmem:[%s14128_s1 + $0xe0c] ss:$16 sps:$4 sm:$0xff]  }
 0x18b   : > { %6876 = vmatprep.mubr.bf16.mxu0 %v8091_v20  ;;  %7564 = vmatprep.mubr.bf16.mxu1 %v8091_v20  ;;  %v12277_v19 = vld [vmem:[%s10996_s17 + $0x38] sm:$0xff] }
 0x18c   : > { %v12280_v20 = vld [vmem:[%s10996_s17 + $0xb8] sm:$0xff] }
 0x18d   : > { %6847 = vmatpush1.bf16.msra.mxu0 %v9855_v34  ;;  %7535 = vmatpush1.bf16.msra.mxu1 %v9858_v35  ;;  %v8090_v34 = vcombine.low %v12075_v22, %v12078_v15  ;;  %v9945_v35 = vld [vmem:[%s14128_s1 + $0xe00] ss:$16 sps:$4 sm:$0xff]   ;;  %v9956_v22 = vld [vmem:[%s14128_s1 + $0xe2c] ss:$16 sps:$4 sm:$0xff]   ;;  %v8093_v15 = vcombine.high %v12277_v19, %v12280_v20 }
 0x18e   : > { %6848 = vmatprep.subr.bf16.mxu0 %v9863_v36  ;;  %7536 = vmatprep.subr.bf16.mxu1 %v9866_v37  ;;  %v9948_v36 = vld [vmem:[%s14128_s1 + $0xe08] ss:$16 sps:$4 sm:$0xff]   ;;  %v9953_v37 = vld [vmem:[%s14128_s1 + $0xe24] ss:$16 sps:$4 sm:$0xff]  }
 0x191   : > { %6849 = vmatpush1.bf16.msra.mxu0 %v9861_v38  ;;  %7537 = vmatpush1.bf16.msra.mxu1 %v9864_v39  ;;  %v9951_v38 = vld [vmem:[%s14128_s1 + $0xe20] ss:$16 sps:$4 sm:$0xff]   ;;  %v9954_v39 = vld [vmem:[%s14128_s1 + $0xe28] ss:$16 sps:$4 sm:$0xff]  }
 0x192   : > { %6850 = vmatprep.subr.bf16.mxu0 %v9869_v40  ;;  %7538 = vmatprep.subr.bf16.mxu1 %v9872_v41  ;;  %v9959_v40 = vld [vmem:[%s14128_s1 + $0xe44] ss:$16 sps:$4 sm:$0xff]   ;;  %v9962_v41 = vld [vmem:[%s14128_s1 + $0xe4c] ss:$16 sps:$4 sm:$0xff]  }
 0x195   : > { %6851 = vmatpush1.bf16.msra.mxu0 %v9867_v42  ;;  %7539 = vmatpush1.bf16.msra.mxu1 %v9870_v43  ;;  %v9957_v42 = vld [vmem:[%s14128_s1 + $0xe40] ss:$16 sps:$4 sm:$0xff]   ;;  %v9960_v43 = vld [vmem:[%s14128_s1 + $0xe48] ss:$16 sps:$4 sm:$0xff]  }
 0x196   : > { %6852 = vmatprep.subr.bf16.mxu0 %v9875_v44  ;;  %7540 = vmatprep.subr.bf16.mxu1 %v9878_v45  ;;  %v9965_v44 = vld [vmem:[%s14128_s1 + $0xe64] ss:$16 sps:$4 sm:$0xff]   ;;  %v9968_v45 = vld [vmem:[%s14128_s1 + $0xe6c] ss:$16 sps:$4 sm:$0xff]  }
 0x199   : > { %6853 = vmatpush1.bf16.msra.mxu0 %v9873_v46  ;;  %7541 = vmatpush1.bf16.msra.mxu1 %v9876_v47  ;;  %v9963_v46 = vld [vmem:[%s14128_s1 + $0xe60] ss:$16 sps:$4 sm:$0xff]   ;;  %v9966_v47 = vld [vmem:[%s14128_s1 + $0xe68] ss:$16 sps:$4 sm:$0xff]  }
 0x19a   : > { %6854 = vmatprep.subr.bf16.mxu0 %v9881_v48  ;;  %7542 = vmatprep.subr.bf16.mxu1 %v9884_v49  ;;  %v9971_v48 = vld [vmem:[%s14128_s1 + $0xe84] ss:$16 sps:$4 sm:$0xff]   ;;  %v9974_v49 = vld [vmem:[%s14128_s1 + $0xe8c] ss:$16 sps:$4 sm:$0xff]  }
 0x19d   : > { %6855 = vmatpush1.bf16.msra.mxu0 %v9879_v50  ;;  %7543 = vmatpush1.bf16.msra.mxu1 %v9882_v51  ;;  %v9969_v50 = vld [vmem:[%s14128_s1 + $0xe80] ss:$16 sps:$4 sm:$0xff]   ;;  %v9972_v51 = vld [vmem:[%s14128_s1 + $0xe88] ss:$16 sps:$4 sm:$0xff]  }
 0x19e   : > { %6856 = vmatprep.subr.bf16.mxu0 %v9887_v52  ;;  %7544 = vmatprep.subr.bf16.mxu1 %v9890_v53  ;;  %v9977_v52 = vld [vmem:[%s14128_s1 + $0xea4] ss:$16 sps:$4 sm:$0xff]   ;;  %v9980_v53 = vld [vmem:[%s14128_s1 + $0xeac] ss:$16 sps:$4 sm:$0xff]  }
 0x1a1   : > { %6857 = vmatpush1.bf16.msra.mxu0 %v9885_v54  ;;  %7545 = vmatpush1.bf16.msra.mxu1 %v9888_v55  ;;  %v9975_v54 = vld [vmem:[%s14128_s1 + $0xea0] ss:$16 sps:$4 sm:$0xff]   ;;  %v9978_v55 = vld [vmem:[%s14128_s1 + $0xea8] ss:$16 sps:$4 sm:$0xff]  }
 0x1a2   : > { %6858 = vmatprep.subr.bf16.mxu0 %v9893_v56  ;;  %7546 = vmatprep.subr.bf16.mxu1 %v9896_v57  ;;  %v9983_v56 = vld [vmem:[%s14128_s1 + $0xec4] ss:$16 sps:$4 sm:$0xff]   ;;  %v9986_v57 = vld [vmem:[%s14128_s1 + $0xecc] ss:$16 sps:$4 sm:$0xff]  }
 0x1a5   : > { %6859 = vmatpush1.bf16.msra.mxu0 %v9891_v58  ;;  %7547 = vmatpush1.bf16.msra.mxu1 %v9894_v59  ;;  %v9981_v58 = vld [vmem:[%s14128_s1 + $0xec0] ss:$16 sps:$4 sm:$0xff]   ;;  %v9984_v59 = vld [vmem:[%s14128_s1 + $0xec8] ss:$16 sps:$4 sm:$0xff]  }
 0x1a6   : > { %6860 = vmatprep.subr.bf16.mxu0 %v9899_v60  ;;  %7548 = vmatprep.subr.bf16.mxu1 %v9902_v61  ;;  %v9989_v60 = vld [vmem:[%s14128_s1 + $0xee4] ss:$16 sps:$4 sm:$0xff]   ;;  %v9992_v61 = vld [vmem:[%s14128_s1 + $0xeec] ss:$16 sps:$4 sm:$0xff]  }
 0x1a9   : > { %6861 = vmatpush1.bf16.msra.mxu0 %v9897_v62  ;;  %7549 = vmatpush1.bf16.msra.mxu1 %v9900_v63  ;;  %v9987_v62 = vld [vmem:[%s14128_s1 + $0xee0] ss:$16 sps:$4 sm:$0xff]   ;;  %v9990_v63 = vld [vmem:[%s14128_s1 + $0xee8] ss:$16 sps:$4 sm:$0xff]  }
 0x1aa   : > { %6862 = vmatprep.subr.bf16.mxu0 %v9905_v0  ;;  %7550 = vmatprep.subr.bf16.mxu1 %v9908_v1  ;;  %v9995_v0 = vld [vmem:[%s14128_s1 + $0xf04] ss:$16 sps:$4 sm:$0xff]   ;;  %v9998_v1 = vld [vmem:[%s14128_s1 + $0xf0c] ss:$16 sps:$4 sm:$0xff]  }
 0x1ad   : > { %6863 = vmatpush1.bf16.msra.mxu0 %v9903_v2  ;;  %7551 = vmatpush1.bf16.msra.mxu1 %v9906_v3  ;;  %v9993_v2 = vld [vmem:[%s14128_s1 + $0xf00] ss:$16 sps:$4 sm:$0xff]   ;;  %v9996_v3 = vld [vmem:[%s14128_s1 + $0xf08] ss:$16 sps:$4 sm:$0xff]  }
 0x1ae   : > { %6864 = vmatprep.subr.bf16.mxu0 %v9911_v4  ;;  %7552 = vmatprep.subr.bf16.mxu1 %v9914_v5  ;;  %v10001_v4 = vld [vmem:[%s14128_s1 + $0xf24] ss:$16 sps:$4 sm:$0xff]   ;;  %v10004_v5 = vld [vmem:[%s14128_s1 + $0xf2c] ss:$16 sps:$4 sm:$0xff]  }
 0x1b1   : > { %6865 = vmatpush1.bf16.msra.mxu0 %v9909_v6  ;;  %7553 = vmatpush1.bf16.msra.mxu1 %v9912_v7  ;;  %v9999_v6 = vld [vmem:[%s14128_s1 + $0xf20] ss:$16 sps:$4 sm:$0xff]   ;;  %v10002_v7 = vld [vmem:[%s14128_s1 + $0xf28] ss:$16 sps:$4 sm:$0xff]  }
 0x1b2   : > { %6866 = vmatprep.subr.bf16.mxu0 %v9917_v8  ;;  %7554 = vmatprep.subr.bf16.mxu1 %v9920_v9  ;;  %v10007_v8 = vld [vmem:[%s14128_s1 + $0xf44] ss:$16 sps:$4 sm:$0xff]   ;;  %v10010_v9 = vld [vmem:[%s14128_s1 + $0xf4c] ss:$16 sps:$4 sm:$0xff]  }
 0x1b5   : > { %6867 = vmatpush1.bf16.msra.mxu0 %v9915_v10  ;;  %7555 = vmatpush1.bf16.msra.mxu1 %v9918_v11  ;;  %v10005_v10 = vld [vmem:[%s14128_s1 + $0xf40] ss:$16 sps:$4 sm:$0xff]   ;;  %v10008_v11 = vld [vmem:[%s14128_s1 + $0xf48] ss:$16 sps:$4 sm:$0xff]  }
 0x1b6   : > { %6868 = vmatprep.subr.bf16.mxu0 %v9923_v12  ;;  %7556 = vmatprep.subr.bf16.mxu1 %v9926_v13  ;;  %v10013_v12 = vld [vmem:[%s14128_s1 + $0xf64] ss:$16 sps:$4 sm:$0xff]   ;;  %v10016_v13 = vld [vmem:[%s14128_s1 + $0xf6c] ss:$16 sps:$4 sm:$0xff]  }
 0x1b9   : > { %6869 = vmatpush1.bf16.msra.mxu0 %v9921_v14  ;;  %7557 = vmatpush1.bf16.msra.mxu1 %v9924_v17  ;;  %v10011_v14 = vld [vmem:[%s14128_s1 + $0xf60] ss:$16 sps:$4 sm:$0xff]   ;;  %v10014_v17 = vld [vmem:[%s14128_s1 + $0xf68] ss:$16 sps:$4 sm:$0xff]  }
 0x1ba   : > { %6870 = vmatprep.subr.bf16.mxu0 %v9929_v18  ;;  %7558 = vmatprep.subr.bf16.mxu1 %v9932_v21  ;;  %v10019_v18 = vld [vmem:[%s14128_s1 + $0xf84] ss:$16 sps:$4 sm:$0xff]   ;;  %v10022_v21 = vld [vmem:[%s14128_s1 + $0xf8c] ss:$16 sps:$4 sm:$0xff]  }
 0x1bd   : > { %6871 = vmatpush1.bf16.msra.mxu0 %v9927_v23  ;;  %7559 = vmatpush1.bf16.msra.mxu1 %v9930_v16  ;;  %v10017_v23 = vld [vmem:[%s14128_s1 + $0xf80] ss:$16 sps:$4 sm:$0xff]   ;;  %v10020_v16 = vld [vmem:[%s14128_s1 + $0xf88] ss:$16 sps:$4 sm:$0xff]  }
 0x1be   : > { %6872 = vmatprep.subr.bf16.mxu0 %v9935_v24  ;;  %7560 = vmatprep.subr.bf16.mxu1 %v9938_v25  ;;  %v10025_v24 = vld [vmem:[%s14128_s1 + $0xfa4] ss:$16 sps:$4 sm:$0xff]   ;;  %v10028_v25 = vld [vmem:[%s14128_s1 + $0xfac] ss:$16 sps:$4 sm:$0xff]  }
 0x1c1   : > { %6873 = vmatpush1.bf16.msra.mxu0 %v9933_v26  ;;  %7561 = vmatpush1.bf16.msra.mxu1 %v9936_v27  ;;  %v10023_v26 = vld [vmem:[%s14128_s1 + $0xfa0] ss:$16 sps:$4 sm:$0xff]   ;;  %v10026_v27 = vld [vmem:[%s14128_s1 + $0xfa8] ss:$16 sps:$4 sm:$0xff]  }
 0x1c2   : > { %6874 = vmatprep.subr.bf16.mxu0 %v9941_v28  ;;  %7562 = vmatprep.subr.bf16.mxu1 %v9944_v29  ;;  %v10031_v28 = vld [vmem:[%s14128_s1 + $0xfc4] ss:$16 sps:$4 sm:$0xff]   ;;  %v10034_v29 = vld [vmem:[%s14128_s1 + $0xfcc] ss:$16 sps:$4 sm:$0xff]  }
 0x1c5   : > { %6875 = vmatpush1.bf16.msra.mxu0 %v9939_v30  ;;  %7563 = vmatpush1.bf16.msra.mxu1 %v9942_v31  ;;  %v10029_v30 = vld [vmem:[%s14128_s1 + $0xfc0] ss:$16 sps:$4 sm:$0xff]   ;;  %v10032_v31 = vld [vmem:[%s14128_s1 + $0xfc8] ss:$16 sps:$4 sm:$0xff]  }
 0x1c6   : > { %6887 = vmatprep.subr.bf16.mxu0 %v9947_v32  ;;  %7575 = vmatprep.subr.bf16.mxu1 %v9950_v33  ;;  %v10037_v32 = vld [vmem:[%s14128_s1 + $0xfe4] ss:$16 sps:$4 sm:$0xff]   ;;  %v10040_v33 = vld [vmem:[%s14128_s1 + $0xfec] ss:$16 sps:$4 sm:$0xff]  }
 0x1c8   : > { %6877 = vmatmul.mubr.bf16.vlgmr.msra.gmra.mrb[0].mxu0 %v8090_v34  ;;  %7565 = vmatmul.mubr.bf16.vlgmr.msra.gmra.mrb[0].mxu1 %v8090_v34  ;;  %v10035_v34 = vld [vmem:[%s14128_s1 + $0xfe0] ss:$16 sps:$4 sm:$0xff]  }
 0x1c9   : > { %6888 = vmatpush1.bf16.msra.mxu0 %v9945_v35  ;;  %7576 = vmatpush1.bf16.msra.mxu1 %v9948_v36  ;;  %v10038_v35 = vld [vmem:[%s14128_s1 + $0xfe8] ss:$16 sps:$4 sm:$0xff]   ;;  %v10043_v36 = vld [vmem:[%s14128_s1 + $0x1004] ss:$16 sps:$4 sm:$0xff]  }
 0x1ca   : > { %6889 = vmatprep.subr.bf16.mxu0 %v9953_v37  ;;  %7577 = vmatprep.subr.bf16.mxu1 %v9956_v22  ;;  %v10046_v37 = vld [vmem:[%s14128_s1 + $0x100c] ss:$16 sps:$4 sm:$0xff]   ;;  %v12479_v22 = vld [vmem:[%s10996_s17 + $0x40] sm:$0xff] }
 0x1cb   : > { %6919 = vmatprep.mubr.bf16.mxu0 %v8093_v15  ;;  %7607 = vmatprep.mubr.bf16.mxu1 %v8093_v15  ;;  %v12482_v15 = vld [vmem:[%s10996_s17 + $0xc0] sm:$0xff] }
 0x1cd   : > { %6890 = vmatpush1.bf16.msra.mxu0 %v9951_v38  ;;  %7578 = vmatpush1.bf16.msra.mxu1 %v9954_v39  ;;  %v8092_v38 = vcombine.low %v12277_v19, %v12280_v20  ;;  %v10041_v39 = vld [vmem:[%s14128_s1 + $0x1000] ss:$16 sps:$4 sm:$0xff]   ;;  %v10052_v19 = vld [vmem:[%s14128_s1 + $0x102c] ss:$16 sps:$4 sm:$0xff]   ;;  %v8095_v20 = vcombine.high %v12479_v22, %v12482_v15 }
 0x1ce   : > { %6891 = vmatprep.subr.bf16.mxu0 %v9959_v40  ;;  %7579 = vmatprep.subr.bf16.mxu1 %v9962_v41  ;;  %v10044_v40 = vld [vmem:[%s14128_s1 + $0x1008] ss:$16 sps:$4 sm:$0xff]   ;;  %v10049_v41 = vld [vmem:[%s14128_s1 + $0x1024] ss:$16 sps:$4 sm:$0xff]  }
 0x1d1   : > { %6892 = vmatpush1.bf16.msra.mxu0 %v9957_v42  ;;  %7580 = vmatpush1.bf16.msra.mxu1 %v9960_v43  ;;  %v10047_v42 = vld [vmem:[%s14128_s1 + $0x1020] ss:$16 sps:$4 sm:$0xff]   ;;  %v10050_v43 = vld [vmem:[%s14128_s1 + $0x1028] ss:$16 sps:$4 sm:$0xff]  }
 0x1d2   : > { %6893 = vmatprep.subr.bf16.mxu0 %v9965_v44  ;;  %7581 = vmatprep.subr.bf16.mxu1 %v9968_v45  ;;  %v10055_v44 = vld [vmem:[%s14128_s1 + $0x1044] ss:$16 sps:$4 sm:$0xff]   ;;  %v10058_v45 = vld [vmem:[%s14128_s1 + $0x104c] ss:$16 sps:$4 sm:$0xff]  }
 0x1d5   : > { %6894 = vmatpush1.bf16.msra.mxu0 %v9963_v46  ;;  %7582 = vmatpush1.bf16.msra.mxu1 %v9966_v47  ;;  %v10053_v46 = vld [vmem:[%s14128_s1 + $0x1040] ss:$16 sps:$4 sm:$0xff]   ;;  %v10056_v47 = vld [vmem:[%s14128_s1 + $0x1048] ss:$16 sps:$4 sm:$0xff]  }
 0x1d6   : > { %6895 = vmatprep.subr.bf16.mxu0 %v9971_v48  ;;  %7583 = vmatprep.subr.bf16.mxu1 %v9974_v49  ;;  %v10061_v48 = vld [vmem:[%s14128_s1 + $0x1064] ss:$16 sps:$4 sm:$0xff]   ;;  %v10064_v49 = vld [vmem:[%s14128_s1 + $0x106c] ss:$16 sps:$4 sm:$0xff]  }
 0x1d9   : > { %6896 = vmatpush1.bf16.msra.mxu0 %v9969_v50  ;;  %7584 = vmatpush1.bf16.msra.mxu1 %v9972_v51  ;;  %v10059_v50 = vld [vmem:[%s14128_s1 + $0x1060] ss:$16 sps:$4 sm:$0xff]   ;;  %v10062_v51 = vld [vmem:[%s14128_s1 + $0x1068] ss:$16 sps:$4 sm:$0xff]  }
 0x1da   : > { %6897 = vmatprep.subr.bf16.mxu0 %v9977_v52  ;;  %7585 = vmatprep.subr.bf16.mxu1 %v9980_v53  ;;  %v10067_v52 = vld [vmem:[%s14128_s1 + $0x1084] ss:$16 sps:$4 sm:$0xff]   ;;  %v10070_v53 = vld [vmem:[%s14128_s1 + $0x108c] ss:$16 sps:$4 sm:$0xff]  }
 0x1dd   : > { %6898 = vmatpush1.bf16.msra.mxu0 %v9975_v54  ;;  %7586 = vmatpush1.bf16.msra.mxu1 %v9978_v55  ;;  %v10065_v54 = vld [vmem:[%s14128_s1 + $0x1080] ss:$16 sps:$4 sm:$0xff]   ;;  %v10068_v55 = vld [vmem:[%s14128_s1 + $0x1088] ss:$16 sps:$4 sm:$0xff]  }
 0x1de   : > { %6899 = vmatprep.subr.bf16.mxu0 %v9983_v56  ;;  %7587 = vmatprep.subr.bf16.mxu1 %v9986_v57  ;;  %v10073_v56 = vld [vmem:[%s14128_s1 + $0x10a4] ss:$16 sps:$4 sm:$0xff]   ;;  %v10076_v57 = vld [vmem:[%s14128_s1 + $0x10ac] ss:$16 sps:$4 sm:$0xff]  }
 0x1e1   : > { %6900 = vmatpush1.bf16.msra.mxu0 %v9981_v58  ;;  %7588 = vmatpush1.bf16.msra.mxu1 %v9984_v59  ;;  %v10071_v58 = vld [vmem:[%s14128_s1 + $0x10a0] ss:$16 sps:$4 sm:$0xff]   ;;  %v10074_v59 = vld [vmem:[%s14128_s1 + $0x10a8] ss:$16 sps:$4 sm:$0xff]  }
 0x1e2   : > { %6901 = vmatprep.subr.bf16.mxu0 %v9989_v60  ;;  %7589 = vmatprep.subr.bf16.mxu1 %v9992_v61  ;;  %v10079_v60 = vld [vmem:[%s14128_s1 + $0x10c4] ss:$16 sps:$4 sm:$0xff]   ;;  %v10082_v61 = vld [vmem:[%s14128_s1 + $0x10cc] ss:$16 sps:$4 sm:$0xff]  }
 0x1e5   : > { %6902 = vmatpush1.bf16.msra.mxu0 %v9987_v62  ;;  %7590 = vmatpush1.bf16.msra.mxu1 %v9990_v63  ;;  %v10077_v62 = vld [vmem:[%s14128_s1 + $0x10c0] ss:$16 sps:$4 sm:$0xff]   ;;  %v10080_v63 = vld [vmem:[%s14128_s1 + $0x10c8] ss:$16 sps:$4 sm:$0xff]  }
 0x1e6   : > { %6903 = vmatprep.subr.bf16.mxu0 %v9995_v0  ;;  %7591 = vmatprep.subr.bf16.mxu1 %v9998_v1  ;;  %v10085_v0 = vld [vmem:[%s14128_s1 + $0x10e4] ss:$16 sps:$4 sm:$0xff]   ;;  %v10088_v1 = vld [vmem:[%s14128_s1 + $0x10ec] ss:$16 sps:$4 sm:$0xff]  }
 0x1e9   : > { %6904 = vmatpush1.bf16.msra.mxu0 %v9993_v2  ;;  %7592 = vmatpush1.bf16.msra.mxu1 %v9996_v3  ;;  %v10083_v2 = vld [vmem:[%s14128_s1 + $0x10e0] ss:$16 sps:$4 sm:$0xff]   ;;  %v10086_v3 = vld [vmem:[%s14128_s1 + $0x10e8] ss:$16 sps:$4 sm:$0xff]  }
 0x1ea   : > { %6905 = vmatprep.subr.bf16.mxu0 %v10001_v4  ;;  %7593 = vmatprep.subr.bf16.mxu1 %v10004_v5  ;;  %v10091_v4 = vld [vmem:[%s14128_s1 + $0x1104] ss:$16 sps:$4 sm:$0xff]   ;;  %v10094_v5 = vld [vmem:[%s14128_s1 + $0x110c] ss:$16 sps:$4 sm:$0xff]  }
 0x1ed   : > { %6906 = vmatpush1.bf16.msra.mxu0 %v9999_v6  ;;  %7594 = vmatpush1.bf16.msra.mxu1 %v10002_v7  ;;  %v10089_v6 = vld [vmem:[%s14128_s1 + $0x1100] ss:$16 sps:$4 sm:$0xff]   ;;  %v10092_v7 = vld [vmem:[%s14128_s1 + $0x1108] ss:$16 sps:$4 sm:$0xff]  }
 0x1ee   : > { %6907 = vmatprep.subr.bf16.mxu0 %v10007_v8  ;;  %7595 = vmatprep.subr.bf16.mxu1 %v10010_v9  ;;  %v10097_v8 = vld [vmem:[%s14128_s1 + $0x1124] ss:$16 sps:$4 sm:$0xff]   ;;  %v10100_v9 = vld [vmem:[%s14128_s1 + $0x112c] ss:$16 sps:$4 sm:$0xff]  }
 0x1f1   : > { %6908 = vmatpush1.bf16.msra.mxu0 %v10005_v10  ;;  %7596 = vmatpush1.bf16.msra.mxu1 %v10008_v11  ;;  %v10095_v10 = vld [vmem:[%s14128_s1 + $0x1120] ss:$16 sps:$4 sm:$0xff]   ;;  %v10098_v11 = vld [vmem:[%s14128_s1 + $0x1128] ss:$16 sps:$4 sm:$0xff]  }
 0x1f2   : > { %6909 = vmatprep.subr.bf16.mxu0 %v10013_v12  ;;  %7597 = vmatprep.subr.bf16.mxu1 %v10016_v13  ;;  %v10103_v12 = vld [vmem:[%s14128_s1 + $0x1144] ss:$16 sps:$4 sm:$0xff]   ;;  %v10106_v13 = vld [vmem:[%s14128_s1 + $0x114c] ss:$16 sps:$4 sm:$0xff]  }
 0x1f5   : > { %6910 = vmatpush1.bf16.msra.mxu0 %v10011_v14  ;;  %7598 = vmatpush1.bf16.msra.mxu1 %v10014_v17  ;;  %v10101_v14 = vld [vmem:[%s14128_s1 + $0x1140] ss:$16 sps:$4 sm:$0xff]   ;;  %v10104_v17 = vld [vmem:[%s14128_s1 + $0x1148] ss:$16 sps:$4 sm:$0xff]  }
 0x1f6   : > { %6911 = vmatprep.subr.bf16.mxu0 %v10019_v18  ;;  %7599 = vmatprep.subr.bf16.mxu1 %v10022_v21  ;;  %v10109_v18 = vld [vmem:[%s14128_s1 + $0x1164] ss:$16 sps:$4 sm:$0xff]   ;;  %v10112_v21 = vld [vmem:[%s14128_s1 + $0x116c] ss:$16 sps:$4 sm:$0xff]  }
 0x1f9   : > { %6912 = vmatpush1.bf16.msra.mxu0 %v10017_v23  ;;  %7600 = vmatpush1.bf16.msra.mxu1 %v10020_v16  ;;  %v10107_v23 = vld [vmem:[%s14128_s1 + $0x1160] ss:$16 sps:$4 sm:$0xff]   ;;  %v10110_v16 = vld [vmem:[%s14128_s1 + $0x1168] ss:$16 sps:$4 sm:$0xff]  }
 0x1fa   : > { %6913 = vmatprep.subr.bf16.mxu0 %v10025_v24  ;;  %7601 = vmatprep.subr.bf16.mxu1 %v10028_v25  ;;  %v10115_v24 = vld [vmem:[%s14128_s1 + $0x1184] ss:$16 sps:$4 sm:$0xff]   ;;  %v10118_v25 = vld [vmem:[%s14128_s1 + $0x118c] ss:$16 sps:$4 sm:$0xff]  }
 0x1fd   : > { %6914 = vmatpush1.bf16.msra.mxu0 %v10023_v26  ;;  %7602 = vmatpush1.bf16.msra.mxu1 %v10026_v27  ;;  %v10113_v26 = vld [vmem:[%s14128_s1 + $0x1180] ss:$16 sps:$4 sm:$0xff]   ;;  %v10116_v27 = vld [vmem:[%s14128_s1 + $0x1188] ss:$16 sps:$4 sm:$0xff]  }
 0x1fe   : > { %6915 = vmatprep.subr.bf16.mxu0 %v10031_v28  ;;  %7603 = vmatprep.subr.bf16.mxu1 %v10034_v29  ;;  %v10121_v28 = vld [vmem:[%s14128_s1 + $0x11a4] ss:$16 sps:$4 sm:$0xff]   ;;  %v10124_v29 = vld [vmem:[%s14128_s1 + $0x11ac] ss:$16 sps:$4 sm:$0xff]  }
 0x201   : > { %6916 = vmatpush1.bf16.msra.mxu0 %v10029_v30  ;;  %7604 = vmatpush1.bf16.msra.mxu1 %v10032_v31  ;;  %v10119_v30 = vld [vmem:[%s14128_s1 + $0x11a0] ss:$16 sps:$4 sm:$0xff]   ;;  %v10122_v31 = vld [vmem:[%s14128_s1 + $0x11a8] ss:$16 sps:$4 sm:$0xff]  }
 0x202   : > { %6917 = vmatprep.subr.bf16.mxu0 %v10037_v32  ;;  %7605 = vmatprep.subr.bf16.mxu1 %v10040_v33  ;;  %v10127_v32 = vld [vmem:[%s14128_s1 + $0x11c4] ss:$16 sps:$4 sm:$0xff]   ;;  %v10130_v33 = vld [vmem:[%s14128_s1 + $0x11cc] ss:$16 sps:$4 sm:$0xff]  }
 0x205   : > { %6918 = vmatpush1.bf16.msra.mxu0 %v10035_v34  ;;  %7606 = vmatpush1.bf16.msra.mxu1 %v10038_v35  ;;  %v10125_v34 = vld [vmem:[%s14128_s1 + $0x11c0] ss:$16 sps:$4 sm:$0xff]   ;;  %v10128_v35 = vld [vmem:[%s14128_s1 + $0x11c8] ss:$16 sps:$4 sm:$0xff]  }
 0x206   : > { %6930 = vmatprep.subr.bf16.mxu0 %v10043_v36  ;;  %7618 = vmatprep.subr.bf16.mxu1 %v10046_v37  ;;  %v10133_v36 = vld [vmem:[%s14128_s1 + $0x11e4] ss:$16 sps:$4 sm:$0xff]   ;;  %v10136_v37 = vld [vmem:[%s14128_s1 + $0x11ec] ss:$16 sps:$4 sm:$0xff]  }
 0x208   : > { %6920 = vmatmul.mubr.bf16.vlgmr.msra.gmra.mrb[0].mxu0 %v8092_v38  ;;  %7608 = vmatmul.mubr.bf16.vlgmr.msra.gmra.mrb[0].mxu1 %v8092_v38  ;;  %v10131_v38 = vld [vmem:[%s14128_s1 + $0x11e0] ss:$16 sps:$4 sm:$0xff]  }
 0x209   : > { %6931 = vmatpush1.bf16.msra.mxu0 %v10041_v39  ;;  %7619 = vmatpush1.bf16.msra.mxu1 %v10044_v40  ;;  %v10134_v39 = vld [vmem:[%s14128_s1 + $0x11e8] ss:$16 sps:$4 sm:$0xff]   ;;  %v10139_v40 = vld [vmem:[%s14128_s1 + $0x1204] ss:$16 sps:$4 sm:$0xff]  }
 0x20a   : > { %6932 = vmatprep.subr.bf16.mxu0 %v10049_v41  ;;  %7620 = vmatprep.subr.bf16.mxu1 %v10052_v19  ;;  %v10142_v41 = vld [vmem:[%s14128_s1 + $0x120c] ss:$16 sps:$4 sm:$0xff]  }
 0x20b   : > { %6962 = vmatprep.mubr.bf16.mxu0 %v8095_v20  ;;  %7650 = vmatprep.mubr.bf16.mxu1 %v8095_v20  ;;  %v12681_v19 = vld [vmem:[%s10996_s17 + $0x48] sm:$0xff] }
 0x20c   : > { %v12684_v20 = vld [vmem:[%s10996_s17 + $0xc8] sm:$0xff] }
 0x20d   : > { %6933 = vmatpush1.bf16.msra.mxu0 %v10047_v42  ;;  %7621 = vmatpush1.bf16.msra.mxu1 %v10050_v43  ;;  %v8094_v42 = vcombine.low %v12479_v22, %v12482_v15  ;;  %v10137_v43 = vld [vmem:[%s14128_s1 + $0x1200] ss:$16 sps:$4 sm:$0xff]   ;;  %v10148_v22 = vld [vmem:[%s14128_s1 + $0x122c] ss:$16 sps:$4 sm:$0xff]   ;;  %v8097_v15 = vcombine.high %v12681_v19, %v12684_v20 }
 0x20e   : > { %6934 = vmatprep.subr.bf16.mxu0 %v10055_v44  ;;  %7622 = vmatprep.subr.bf16.mxu1 %v10058_v45  ;;  %v10140_v44 = vld [vmem:[%s14128_s1 + $0x1208] ss:$16 sps:$4 sm:$0xff]   ;;  %v10145_v45 = vld [vmem:[%s14128_s1 + $0x1224] ss:$16 sps:$4 sm:$0xff]  }
 0x211   : > { %6935 = vmatpush1.bf16.msra.mxu0 %v10053_v46  ;;  %7623 = vmatpush1.bf16.msra.mxu1 %v10056_v47  ;;  %v10143_v46 = vld [vmem:[%s14128_s1 + $0x1220] ss:$16 sps:$4 sm:$0xff]   ;;  %v10146_v47 = vld [vmem:[%s14128_s1 + $0x1228] ss:$16 sps:$4 sm:$0xff]  }
 0x212   : > { %6936 = vmatprep.subr.bf16.mxu0 %v10061_v48  ;;  %7624 = vmatprep.subr.bf16.mxu1 %v10064_v49  ;;  %v10151_v48 = vld [vmem:[%s14128_s1 + $0x1244] ss:$16 sps:$4 sm:$0xff]   ;;  %v10154_v49 = vld [vmem:[%s14128_s1 + $0x124c] ss:$16 sps:$4 sm:$0xff]  }
 0x215   : > { %6937 = vmatpush1.bf16.msra.mxu0 %v10059_v50  ;;  %7625 = vmatpush1.bf16.msra.mxu1 %v10062_v51  ;;  %v10149_v50 = vld [vmem:[%s14128_s1 + $0x1240] ss:$16 sps:$4 sm:$0xff]   ;;  %v10152_v51 = vld [vmem:[%s14128_s1 + $0x1248] ss:$16 sps:$4 sm:$0xff]  }
 0x216   : > { %6938 = vmatprep.subr.bf16.mxu0 %v10067_v52  ;;  %7626 = vmatprep.subr.bf16.mxu1 %v10070_v53  ;;  %v10157_v52 = vld [vmem:[%s14128_s1 + $0x1264] ss:$16 sps:$4 sm:$0xff]   ;;  %v10160_v53 = vld [vmem:[%s14128_s1 + $0x126c] ss:$16 sps:$4 sm:$0xff]  }
 0x219   : > { %6939 = vmatpush1.bf16.msra.mxu0 %v10065_v54  ;;  %7627 = vmatpush1.bf16.msra.mxu1 %v10068_v55  ;;  %v10155_v54 = vld [vmem:[%s14128_s1 + $0x1260] ss:$16 sps:$4 sm:$0xff]   ;;  %v10158_v55 = vld [vmem:[%s14128_s1 + $0x1268] ss:$16 sps:$4 sm:$0xff]  }
 0x21a   : > { %6940 = vmatprep.subr.bf16.mxu0 %v10073_v56  ;;  %7628 = vmatprep.subr.bf16.mxu1 %v10076_v57  ;;  %v10163_v56 = vld [vmem:[%s14128_s1 + $0x1284] ss:$16 sps:$4 sm:$0xff]   ;;  %v10166_v57 = vld [vmem:[%s14128_s1 + $0x128c] ss:$16 sps:$4 sm:$0xff]  }
 0x21d   : > { %6941 = vmatpush1.bf16.msra.mxu0 %v10071_v58  ;;  %7629 = vmatpush1.bf16.msra.mxu1 %v10074_v59  ;;  %v10161_v58 = vld [vmem:[%s14128_s1 + $0x1280] ss:$16 sps:$4 sm:$0xff]   ;;  %v10164_v59 = vld [vmem:[%s14128_s1 + $0x1288] ss:$16 sps:$4 sm:$0xff]  }
 0x21e   : > { %6942 = vmatprep.subr.bf16.mxu0 %v10079_v60  ;;  %7630 = vmatprep.subr.bf16.mxu1 %v10082_v61  ;;  %v10169_v60 = vld [vmem:[%s14128_s1 + $0x12a4] ss:$16 sps:$4 sm:$0xff]   ;;  %v10172_v61 = vld [vmem:[%s14128_s1 + $0x12ac] ss:$16 sps:$4 sm:$0xff]  }
 0x221   : > { %6943 = vmatpush1.bf16.msra.mxu0 %v10077_v62  ;;  %7631 = vmatpush1.bf16.msra.mxu1 %v10080_v63  ;;  %v10167_v62 = vld [vmem:[%s14128_s1 + $0x12a0] ss:$16 sps:$4 sm:$0xff]   ;;  %v10170_v63 = vld [vmem:[%s14128_s1 + $0x12a8] ss:$16 sps:$4 sm:$0xff]  }
 0x222   : > { %6944 = vmatprep.subr.bf16.mxu0 %v10085_v0  ;;  %7632 = vmatprep.subr.bf16.mxu1 %v10088_v1  ;;  %v10175_v0 = vld [vmem:[%s14128_s1 + $0x12c4] ss:$16 sps:$4 sm:$0xff]   ;;  %v10178_v1 = vld [vmem:[%s14128_s1 + $0x12cc] ss:$16 sps:$4 sm:$0xff]  }
 0x225   : > { %6945 = vmatpush1.bf16.msra.mxu0 %v10083_v2  ;;  %7633 = vmatpush1.bf16.msra.mxu1 %v10086_v3  ;;  %v10173_v2 = vld [vmem:[%s14128_s1 + $0x12c0] ss:$16 sps:$4 sm:$0xff]   ;;  %v10176_v3 = vld [vmem:[%s14128_s1 + $0x12c8] ss:$16 sps:$4 sm:$0xff]  }
 0x226   : > { %6946 = vmatprep.subr.bf16.mxu0 %v10091_v4  ;;  %7634 = vmatprep.subr.bf16.mxu1 %v10094_v5  ;;  %v10181_v4 = vld [vmem:[%s14128_s1 + $0x12e4] ss:$16 sps:$4 sm:$0xff]   ;;  %v10184_v5 = vld [vmem:[%s14128_s1 + $0x12ec] ss:$16 sps:$4 sm:$0xff]  }
 0x229   : > { %6947 = vmatpush1.bf16.msra.mxu0 %v10089_v6  ;;  %7635 = vmatpush1.bf16.msra.mxu1 %v10092_v7  ;;  %v10179_v6 = vld [vmem:[%s14128_s1 + $0x12e0] ss:$16 sps:$4 sm:$0xff]   ;;  %v10182_v7 = vld [vmem:[%s14128_s1 + $0x12e8] ss:$16 sps:$4 sm:$0xff]  }
 0x22a   : > { %6948 = vmatprep.subr.bf16.mxu0 %v10097_v8  ;;  %7636 = vmatprep.subr.bf16.mxu1 %v10100_v9  ;;  %v10187_v8 = vld [vmem:[%s14128_s1 + $0x1304] ss:$16 sps:$4 sm:$0xff]   ;;  %v10190_v9 = vld [vmem:[%s14128_s1 + $0x130c] ss:$16 sps:$4 sm:$0xff]  }
 0x22d   : > { %6949 = vmatpush1.bf16.msra.mxu0 %v10095_v10  ;;  %7637 = vmatpush1.bf16.msra.mxu1 %v10098_v11  ;;  %v10185_v10 = vld [vmem:[%s14128_s1 + $0x1300] ss:$16 sps:$4 sm:$0xff]   ;;  %v10188_v11 = vld [vmem:[%s14128_s1 + $0x1308] ss:$16 sps:$4 sm:$0xff]  }
 0x22e   : > { %6950 = vmatprep.subr.bf16.mxu0 %v10103_v12  ;;  %7638 = vmatprep.subr.bf16.mxu1 %v10106_v13  ;;  %v10193_v12 = vld [vmem:[%s14128_s1 + $0x1324] ss:$16 sps:$4 sm:$0xff]   ;;  %v10196_v13 = vld [vmem:[%s14128_s1 + $0x132c] ss:$16 sps:$4 sm:$0xff]  }
 0x231   : > { %6951 = vmatpush1.bf16.msra.mxu0 %v10101_v14  ;;  %7639 = vmatpush1.bf16.msra.mxu1 %v10104_v17  ;;  %v10191_v14 = vld [vmem:[%s14128_s1 + $0x1320] ss:$16 sps:$4 sm:$0xff]   ;;  %v10194_v17 = vld [vmem:[%s14128_s1 + $0x1328] ss:$16 sps:$4 sm:$0xff]  }
 0x232   : > { %6952 = vmatprep.subr.bf16.mxu0 %v10109_v18  ;;  %7640 = vmatprep.subr.bf16.mxu1 %v10112_v21  ;;  %v10199_v18 = vld [vmem:[%s14128_s1 + $0x1344] ss:$16 sps:$4 sm:$0xff]   ;;  %v10202_v21 = vld [vmem:[%s14128_s1 + $0x134c] ss:$16 sps:$4 sm:$0xff]  }
 0x235   : > { %6953 = vmatpush1.bf16.msra.mxu0 %v10107_v23  ;;  %7641 = vmatpush1.bf16.msra.mxu1 %v10110_v16  ;;  %v10197_v23 = vld [vmem:[%s14128_s1 + $0x1340] ss:$16 sps:$4 sm:$0xff]   ;;  %v10200_v16 = vld [vmem:[%s14128_s1 + $0x1348] ss:$16 sps:$4 sm:$0xff]  }
 0x236   : > { %6954 = vmatprep.subr.bf16.mxu0 %v10115_v24  ;;  %7642 = vmatprep.subr.bf16.mxu1 %v10118_v25  ;;  %v10205_v24 = vld [vmem:[%s14128_s1 + $0x1364] ss:$16 sps:$4 sm:$0xff]   ;;  %v10208_v25 = vld [vmem:[%s14128_s1 + $0x136c] ss:$16 sps:$4 sm:$0xff]  }
 0x239   : > { %6955 = vmatpush1.bf16.msra.mxu0 %v10113_v26  ;;  %7643 = vmatpush1.bf16.msra.mxu1 %v10116_v27  ;;  %v10203_v26 = vld [vmem:[%s14128_s1 + $0x1360] ss:$16 sps:$4 sm:$0xff]   ;;  %v10206_v27 = vld [vmem:[%s14128_s1 + $0x1368] ss:$16 sps:$4 sm:$0xff]  }
 0x23a   : > { %6956 = vmatprep.subr.bf16.mxu0 %v10121_v28  ;;  %7644 = vmatprep.subr.bf16.mxu1 %v10124_v29  ;;  %v10211_v28 = vld [vmem:[%s14128_s1 + $0x1384] ss:$16 sps:$4 sm:$0xff]   ;;  %v10214_v29 = vld [vmem:[%s14128_s1 + $0x138c] ss:$16 sps:$4 sm:$0xff]  }
 0x23d   : > { %6957 = vmatpush1.bf16.msra.mxu0 %v10119_v30  ;;  %7645 = vmatpush1.bf16.msra.mxu1 %v10122_v31  ;;  %v10209_v30 = vld [vmem:[%s14128_s1 + $0x1380] ss:$16 sps:$4 sm:$0xff]   ;;  %v10212_v31 = vld [vmem:[%s14128_s1 + $0x1388] ss:$16 sps:$4 sm:$0xff]  }
 0x23e   : > { %6958 = vmatprep.subr.bf16.mxu0 %v10127_v32  ;;  %7646 = vmatprep.subr.bf16.mxu1 %v10130_v33  ;;  %v10217_v32 = vld [vmem:[%s14128_s1 + $0x13a4] ss:$16 sps:$4 sm:$0xff]   ;;  %v10220_v33 = vld [vmem:[%s14128_s1 + $0x13ac] ss:$16 sps:$4 sm:$0xff]  }
 0x241   : > { %6959 = vmatpush1.bf16.msra.mxu0 %v10125_v34  ;;  %7647 = vmatpush1.bf16.msra.mxu1 %v10128_v35  ;;  %v10215_v34 = vld [vmem:[%s14128_s1 + $0x13a0] ss:$16 sps:$4 sm:$0xff]   ;;  %v10218_v35 = vld [vmem:[%s14128_s1 + $0x13a8] ss:$16 sps:$4 sm:$0xff]  }
 0x242   : > { %6960 = vmatprep.subr.bf16.mxu0 %v10133_v36  ;;  %7648 = vmatprep.subr.bf16.mxu1 %v10136_v37  ;;  %v10223_v36 = vld [vmem:[%s14128_s1 + $0x13c4] ss:$16 sps:$4 sm:$0xff]   ;;  %v10226_v37 = vld [vmem:[%s14128_s1 + $0x13cc] ss:$16 sps:$4 sm:$0xff]  }
 0x245   : > { %6961 = vmatpush1.bf16.msra.mxu0 %v10131_v38  ;;  %7649 = vmatpush1.bf16.msra.mxu1 %v10134_v39  ;;  %v10221_v38 = vld [vmem:[%s14128_s1 + $0x13c0] ss:$16 sps:$4 sm:$0xff]   ;;  %v10224_v39 = vld [vmem:[%s14128_s1 + $0x13c8] ss:$16 sps:$4 sm:$0xff]  }
 0x246   : > { %6973 = vmatprep.subr.bf16.mxu0 %v10139_v40  ;;  %7661 = vmatprep.subr.bf16.mxu1 %v10142_v41  ;;  %v10229_v40 = vld [vmem:[%s14128_s1 + $0x13e4] ss:$16 sps:$4 sm:$0xff]   ;;  %v10232_v41 = vld [vmem:[%s14128_s1 + $0x13ec] ss:$16 sps:$4 sm:$0xff]  }
 0x248   : > { %6963 = vmatmul.mubr.bf16.vlgmr.msra.gmra.mrb[0].mxu0 %v8094_v42  ;;  %7651 = vmatmul.mubr.bf16.vlgmr.msra.gmra.mrb[0].mxu1 %v8094_v42  ;;  %v10227_v42 = vld [vmem:[%s14128_s1 + $0x13e0] ss:$16 sps:$4 sm:$0xff]  }
 0x249   : > { %6974 = vmatpush1.bf16.msra.mxu0 %v10137_v43  ;;  %7662 = vmatpush1.bf16.msra.mxu1 %v10140_v44  ;;  %v10230_v43 = vld [vmem:[%s14128_s1 + $0x13e8] ss:$16 sps:$4 sm:$0xff]   ;;  %v10235_v44 = vld [vmem:[%s14128_s1 + $0x1404] ss:$16 sps:$4 sm:$0xff]  }
 0x24a   : > { %6975 = vmatprep.subr.bf16.mxu0 %v10145_v45  ;;  %7663 = vmatprep.subr.bf16.mxu1 %v10148_v22  ;;  %v10238_v45 = vld [vmem:[%s14128_s1 + $0x140c] ss:$16 sps:$4 sm:$0xff]   ;;  %v8096_v22 = vcombine.low %v12681_v19, %v12684_v20  ;;  %v10241_v19 = vld [vmem:[%s14128_s1 + $0x1424] ss:$16 sps:$4 sm:$0xff]  }
 0x24b   : > { %7005 = vmatprep.mubr.bf16.mxu0 %v8097_v15  ;;  %7693 = vmatprep.mubr.bf16.mxu1 %v8097_v15  ;;  %v12885_v15 = vld [vmem:[%s10996_s17 + $0x50] sm:$0xff]  ;;  %v10244_v20 = vld [vmem:[%s14128_s1 + $0x142c] ss:$16 sps:$4 sm:$0xff]  }
 0x24d   : > { %6976 = vmatpush1.bf16.msra.mxu0 %v10143_v46  ;;  %7664 = vmatpush1.bf16.msra.mxu1 %v10146_v47  ;;  %v12888_v46 = vld [vmem:[%s10996_s17 + $0xd0] sm:$0xff] }
 0x24e   : > { %6977 = vmatprep.subr.bf16.mxu0 %v10151_v48  ;;  %7665 = vmatprep.subr.bf16.mxu1 %v10154_v49  ;;  %v10233_v47 = vld [vmem:[%s14128_s1 + $0x1400] ss:$16 sps:$4 sm:$0xff]   ;;  %v10236_v48 = vld [vmem:[%s14128_s1 + $0x1408] ss:$16 sps:$4 sm:$0xff]   ;;  %v8099_v49 = vcombine.high %v12885_v15, %v12888_v46 }
 0x251   : > { %6978 = vmatpush1.bf16.msra.mxu0 %v10149_v50  ;;  %7666 = vmatpush1.bf16.msra.mxu1 %v10152_v51  ;;  %v10239_v50 = vld [vmem:[%s14128_s1 + $0x1420] ss:$16 sps:$4 sm:$0xff]   ;;  %v10242_v51 = vld [vmem:[%s14128_s1 + $0x1428] ss:$16 sps:$4 sm:$0xff]  }
 0x252   : > { %6979 = vmatprep.subr.bf16.mxu0 %v10157_v52  ;;  %7667 = vmatprep.subr.bf16.mxu1 %v10160_v53  ;;  %v10247_v52 = vld [vmem:[%s14128_s1 + $0x1444] ss:$16 sps:$4 sm:$0xff]   ;;  %v10250_v53 = vld [vmem:[%s14128_s1 + $0x144c] ss:$16 sps:$4 sm:$0xff]  }
 0x255   : > { %6980 = vmatpush1.bf16.msra.mxu0 %v10155_v54  ;;  %7668 = vmatpush1.bf16.msra.mxu1 %v10158_v55  ;;  %v10245_v54 = vld [vmem:[%s14128_s1 + $0x1440] ss:$16 sps:$4 sm:$0xff]   ;;  %v10248_v55 = vld [vmem:[%s14128_s1 + $0x1448] ss:$16 sps:$4 sm:$0xff]  }
 0x256   : > { %6981 = vmatprep.subr.bf16.mxu0 %v10163_v56  ;;  %7669 = vmatprep.subr.bf16.mxu1 %v10166_v57  ;;  %v10253_v56 = vld [vmem:[%s14128_s1 + $0x1464] ss:$16 sps:$4 sm:$0xff]   ;;  %v10256_v57 = vld [vmem:[%s14128_s1 + $0x146c] ss:$16 sps:$4 sm:$0xff]  }
 0x259   : > { %6982 = vmatpush1.bf16.msra.mxu0 %v10161_v58  ;;  %7670 = vmatpush1.bf16.msra.mxu1 %v10164_v59  ;;  %v10251_v58 = vld [vmem:[%s14128_s1 + $0x1460] ss:$16 sps:$4 sm:$0xff]   ;;  %v10254_v59 = vld [vmem:[%s14128_s1 + $0x1468] ss:$16 sps:$4 sm:$0xff]  }
 0x25a   : > { %6983 = vmatprep.subr.bf16.mxu0 %v10169_v60  ;;  %7671 = vmatprep.subr.bf16.mxu1 %v10172_v61  ;;  %v10259_v60 = vld [vmem:[%s14128_s1 + $0x1484] ss:$16 sps:$4 sm:$0xff]   ;;  %v10262_v61 = vld [vmem:[%s14128_s1 + $0x148c] ss:$16 sps:$4 sm:$0xff]  }
 0x25d   : > { %6984 = vmatpush1.bf16.msra.mxu0 %v10167_v62  ;;  %7672 = vmatpush1.bf16.msra.mxu1 %v10170_v63  ;;  %v10257_v62 = vld [vmem:[%s14128_s1 + $0x1480] ss:$16 sps:$4 sm:$0xff]   ;;  %v10260_v63 = vld [vmem:[%s14128_s1 + $0x1488] ss:$16 sps:$4 sm:$0xff]  }
 0x25e   : > { %6985 = vmatprep.subr.bf16.mxu0 %v10175_v0  ;;  %7673 = vmatprep.subr.bf16.mxu1 %v10178_v1  ;;  %v10265_v0 = vld [vmem:[%s14128_s1 + $0x14a4] ss:$16 sps:$4 sm:$0xff]   ;;  %v10268_v1 = vld [vmem:[%s14128_s1 + $0x14ac] ss:$16 sps:$4 sm:$0xff]  }
 0x261   : > { %6986 = vmatpush1.bf16.msra.mxu0 %v10173_v2  ;;  %7674 = vmatpush1.bf16.msra.mxu1 %v10176_v3  ;;  %v10263_v2 = vld [vmem:[%s14128_s1 + $0x14a0] ss:$16 sps:$4 sm:$0xff]   ;;  %v10266_v3 = vld [vmem:[%s14128_s1 + $0x14a8] ss:$16 sps:$4 sm:$0xff]  }
 0x262   : > { %6987 = vmatprep.subr.bf16.mxu0 %v10181_v4  ;;  %7675 = vmatprep.subr.bf16.mxu1 %v10184_v5  ;;  %v10271_v4 = vld [vmem:[%s14128_s1 + $0x14c4] ss:$16 sps:$4 sm:$0xff]   ;;  %v10274_v5 = vld [vmem:[%s14128_s1 + $0x14cc] ss:$16 sps:$4 sm:$0xff]  }
 0x265   : > { %6988 = vmatpush1.bf16.msra.mxu0 %v10179_v6  ;;  %7676 = vmatpush1.bf16.msra.mxu1 %v10182_v7  ;;  %v10269_v6 = vld [vmem:[%s14128_s1 + $0x14c0] ss:$16 sps:$4 sm:$0xff]   ;;  %v10272_v7 = vld [vmem:[%s14128_s1 + $0x14c8] ss:$16 sps:$4 sm:$0xff]  }
 0x266   : > { %6989 = vmatprep.subr.bf16.mxu0 %v10187_v8  ;;  %7677 = vmatprep.subr.bf16.mxu1 %v10190_v9  ;;  %v10277_v8 = vld [vmem:[%s14128_s1 + $0x14e4] ss:$16 sps:$4 sm:$0xff]   ;;  %v10280_v9 = vld [vmem:[%s14128_s1 + $0x14ec] ss:$16 sps:$4 sm:$0xff]  }
 0x269   : > { %6990 = vmatpush1.bf16.msra.mxu0 %v10185_v10  ;;  %7678 = vmatpush1.bf16.msra.mxu1 %v10188_v11  ;;  %v10275_v10 = vld [vmem:[%s14128_s1 + $0x14e0] ss:$16 sps:$4 sm:$0xff]   ;;  %v10278_v11 = vld [vmem:[%s14128_s1 + $0x14e8] ss:$16 sps:$4 sm:$0xff]  }
 0x26a   : > { %6991 = vmatprep.subr.bf16.mxu0 %v10193_v12  ;;  %7679 = vmatprep.subr.bf16.mxu1 %v10196_v13  ;;  %v10283_v12 = vld [vmem:[%s14128_s1 + $0x1504] ss:$16 sps:$4 sm:$0xff]   ;;  %v10286_v13 = vld [vmem:[%s14128_s1 + $0x150c] ss:$16 sps:$4 sm:$0xff]  }
 0x26d   : > { %6992 = vmatpush1.bf16.msra.mxu0 %v10191_v14  ;;  %7680 = vmatpush1.bf16.msra.mxu1 %v10194_v17  ;;  %v10281_v14 = vld [vmem:[%s14128_s1 + $0x1500] ss:$16 sps:$4 sm:$0xff]   ;;  %v10284_v17 = vld [vmem:[%s14128_s1 + $0x1508] ss:$16 sps:$4 sm:$0xff]  }
 0x26e   : > { %6993 = vmatprep.subr.bf16.mxu0 %v10199_v18  ;;  %7681 = vmatprep.subr.bf16.mxu1 %v10202_v21  ;;  %v10289_v18 = vld [vmem:[%s14128_s1 + $0x1524] ss:$16 sps:$4 sm:$0xff]   ;;  %v10292_v21 = vld [vmem:[%s14128_s1 + $0x152c] ss:$16 sps:$4 sm:$0xff]  }
 0x271   : > { %6994 = vmatpush1.bf16.msra.mxu0 %v10197_v23  ;;  %7682 = vmatpush1.bf16.msra.mxu1 %v10200_v16  ;;  %v10287_v23 = vld [vmem:[%s14128_s1 + $0x1520] ss:$16 sps:$4 sm:$0xff]   ;;  %v10290_v16 = vld [vmem:[%s14128_s1 + $0x1528] ss:$16 sps:$4 sm:$0xff]  }
 0x272   : > { %6995 = vmatprep.subr.bf16.mxu0 %v10205_v24  ;;  %7683 = vmatprep.subr.bf16.mxu1 %v10208_v25  ;;  %v10295_v24 = vld [vmem:[%s14128_s1 + $0x1544] ss:$16 sps:$4 sm:$0xff]   ;;  %v10298_v25 = vld [vmem:[%s14128_s1 + $0x154c] ss:$16 sps:$4 sm:$0xff]  }
 0x275   : > { %6996 = vmatpush1.bf16.msra.mxu0 %v10203_v26  ;;  %7684 = vmatpush1.bf16.msra.mxu1 %v10206_v27  ;;  %v10293_v26 = vld [vmem:[%s14128_s1 + $0x1540] ss:$16 sps:$4 sm:$0xff]   ;;  %v10296_v27 = vld [vmem:[%s14128_s1 + $0x1548] ss:$16 sps:$4 sm:$0xff]  }
 0x276   : > { %6997 = vmatprep.subr.bf16.mxu0 %v10211_v28  ;;  %7685 = vmatprep.subr.bf16.mxu1 %v10214_v29  ;;  %v10301_v28 = vld [vmem:[%s14128_s1 + $0x1564] ss:$16 sps:$4 sm:$0xff]   ;;  %v10304_v29 = vld [vmem:[%s14128_s1 + $0x156c] ss:$16 sps:$4 sm:$0xff]  }
 0x279   : > { %6998 = vmatpush1.bf16.msra.mxu0 %v10209_v30  ;;  %7686 = vmatpush1.bf16.msra.mxu1 %v10212_v31  ;;  %v10299_v30 = vld [vmem:[%s14128_s1 + $0x1560] ss:$16 sps:$4 sm:$0xff]   ;;  %v10302_v31 = vld [vmem:[%s14128_s1 + $0x1568] ss:$16 sps:$4 sm:$0xff]  }
 0x27a   : > { %6999 = vmatprep.subr.bf16.mxu0 %v10217_v32  ;;  %7687 = vmatprep.subr.bf16.mxu1 %v10220_v33  ;;  %v10307_v32 = vld [vmem:[%s14128_s1 + $0x1584] ss:$16 sps:$4 sm:$0xff]   ;;  %v10310_v33 = vld [vmem:[%s14128_s1 + $0x158c] ss:$16 sps:$4 sm:$0xff]  }
 0x27d   : > { %7000 = vmatpush1.bf16.msra.mxu0 %v10215_v34  ;;  %7688 = vmatpush1.bf16.msra.mxu1 %v10218_v35  ;;  %v10305_v34 = vld [vmem:[%s14128_s1 + $0x1580] ss:$16 sps:$4 sm:$0xff]   ;;  %v10308_v35 = vld [vmem:[%s14128_s1 + $0x1588] ss:$16 sps:$4 sm:$0xff]  }
 0x27e   : > { %7001 = vmatprep.subr.bf16.mxu0 %v10223_v36  ;;  %7689 = vmatprep.subr.bf16.mxu1 %v10226_v37  ;;  %v10313_v36 = vld [vmem:[%s14128_s1 + $0x15a4] ss:$16 sps:$4 sm:$0xff]   ;;  %v10316_v37 = vld [vmem:[%s14128_s1 + $0x15ac] ss:$16 sps:$4 sm:$0xff]  }
 0x281   : > { %7002 = vmatpush1.bf16.msra.mxu0 %v10221_v38  ;;  %7690 = vmatpush1.bf16.msra.mxu1 %v10224_v39  ;;  %v10311_v38 = vld [vmem:[%s14128_s1 + $0x15a0] ss:$16 sps:$4 sm:$0xff]   ;;  %v10314_v39 = vld [vmem:[%s14128_s1 + $0x15a8] ss:$16 sps:$4 sm:$0xff]  }
 0x282   : > { %7003 = vmatprep.subr.bf16.mxu0 %v10229_v40  ;;  %7691 = vmatprep.subr.bf16.mxu1 %v10232_v41  ;;  %v10319_v40 = vld [vmem:[%s14128_s1 + $0x15c4] ss:$16 sps:$4 sm:$0xff]   ;;  %v10322_v41 = vld [vmem:[%s14128_s1 + $0x15cc] ss:$16 sps:$4 sm:$0xff]  }
 0x285   : > { %7004 = vmatpush1.bf16.msra.mxu0 %v10227_v42  ;;  %7692 = vmatpush1.bf16.msra.mxu1 %v10230_v43  ;;  %v10317_v42 = vld [vmem:[%s14128_s1 + $0x15c0] ss:$16 sps:$4 sm:$0xff]   ;;  %v10320_v43 = vld [vmem:[%s14128_s1 + $0x15c8] ss:$16 sps:$4 sm:$0xff]  }
 0x286   : > { %7016 = vmatprep.subr.bf16.mxu0 %v10235_v44  ;;  %7704 = vmatprep.subr.bf16.mxu1 %v10238_v45  ;;  %v10325_v44 = vld [vmem:[%s14128_s1 + $0x15e4] ss:$16 sps:$4 sm:$0xff]   ;;  %v10328_v45 = vld [vmem:[%s14128_s1 + $0x15ec] ss:$16 sps:$4 sm:$0xff]  }
 0x288   : > { %7006 = vmatmul.mubr.bf16.vlgmr.msra.gmra.mrb[0].mxu0 %v8096_v22  ;;  %7694 = vmatmul.mubr.bf16.vlgmr.msra.gmra.mrb[0].mxu1 %v8096_v22  ;;  %v10323_v22 = vld [vmem:[%s14128_s1 + $0x15e0] ss:$16 sps:$4 sm:$0xff]  }
 0x289   : > { %7017 = vmatpush1.bf16.msra.mxu0 %v10233_v47  ;;  %7705 = vmatpush1.bf16.msra.mxu1 %v10236_v48  ;;  %v10326_v47 = vld [vmem:[%s14128_s1 + $0x15e8] ss:$16 sps:$4 sm:$0xff]   ;;  %v10331_v48 = vld [vmem:[%s14128_s1 + $0x1604] ss:$16 sps:$4 sm:$0xff]  }
 0x28a   : > { %7018 = vmatprep.subr.bf16.mxu0 %v10241_v19  ;;  %7706 = vmatprep.subr.bf16.mxu1 %v10244_v20  ;;  %v10334_v19 = vld [vmem:[%s14128_s1 + $0x160c] ss:$16 sps:$4 sm:$0xff]   ;;  %v8098_v20 = vcombine.low %v12885_v15, %v12888_v46  ;;  %v10337_v15 = vld [vmem:[%s14128_s1 + $0x1624] ss:$16 sps:$4 sm:$0xff]  }
 0x28b   : > { %7048 = vmatprep.mubr.bf16.mxu0 %v8099_v49  ;;  %7736 = vmatprep.mubr.bf16.mxu1 %v8099_v49  ;;  %v13087_v49 = vld [vmem:[%s10996_s17 + $0x58] sm:$0xff] }
 0x28c   : > { %v10340_v46 = vld [vmem:[%s14128_s1 + $0x162c] ss:$16 sps:$4 sm:$0xff]  }
 0x28d   : > { %7019 = vmatpush1.bf16.msra.mxu0 %v10239_v50  ;;  %7707 = vmatpush1.bf16.msra.mxu1 %v10242_v51  ;;  %v13090_v50 = vld [vmem:[%s10996_s17 + $0xd8] sm:$0xff]  ;;  %v10329_v51 = vld [vmem:[%s14128_s1 + $0x1600] ss:$16 sps:$4 sm:$0xff]  }
 0x28e   : > { %7020 = vmatprep.subr.bf16.mxu0 %v10247_v52  ;;  %7708 = vmatprep.subr.bf16.mxu1 %v10250_v53  ;;  %v10332_v52 = vld [vmem:[%s14128_s1 + $0x1608] ss:$16 sps:$4 sm:$0xff]   ;;  %v8101_v53 = vcombine.high %v13087_v49, %v13090_v50 }
 0x291   : > { %7021 = vmatpush1.bf16.msra.mxu0 %v10245_v54  ;;  %7709 = vmatpush1.bf16.msra.mxu1 %v10248_v55  ;;  %v10335_v54 = vld [vmem:[%s14128_s1 + $0x1620] ss:$16 sps:$4 sm:$0xff]   ;;  %v10338_v55 = vld [vmem:[%s14128_s1 + $0x1628] ss:$16 sps:$4 sm:$0xff]  }
 0x292   : > { %7022 = vmatprep.subr.bf16.mxu0 %v10253_v56  ;;  %7710 = vmatprep.subr.bf16.mxu1 %v10256_v57  ;;  %v10343_v56 = vld [vmem:[%s14128_s1 + $0x1644] ss:$16 sps:$4 sm:$0xff]   ;;  %v10346_v57 = vld [vmem:[%s14128_s1 + $0x164c] ss:$16 sps:$4 sm:$0xff]  }
 0x295   : > { %7023 = vmatpush1.bf16.msra.mxu0 %v10251_v58  ;;  %7711 = vmatpush1.bf16.msra.mxu1 %v10254_v59  ;;  %v10341_v58 = vld [vmem:[%s14128_s1 + $0x1640] ss:$16 sps:$4 sm:$0xff]   ;;  %v10344_v59 = vld [vmem:[%s14128_s1 + $0x1648] ss:$16 sps:$4 sm:$0xff]  }
 0x296   : > { %7024 = vmatprep.subr.bf16.mxu0 %v10259_v60  ;;  %7712 = vmatprep.subr.bf16.mxu1 %v10262_v61  ;;  %v10349_v60 = vld [vmem:[%s14128_s1 + $0x1664] ss:$16 sps:$4 sm:$0xff]   ;;  %v10352_v61 = vld [vmem:[%s14128_s1 + $0x166c] ss:$16 sps:$4 sm:$0xff]  }
 0x299   : > { %7025 = vmatpush1.bf16.msra.mxu0 %v10257_v62  ;;  %7713 = vmatpush1.bf16.msra.mxu1 %v10260_v63  ;;  %v10347_v62 = vld [vmem:[%s14128_s1 + $0x1660] ss:$16 sps:$4 sm:$0xff]   ;;  %v10350_v63 = vld [vmem:[%s14128_s1 + $0x1668] ss:$16 sps:$4 sm:$0xff]  }
 0x29a   : > { %7026 = vmatprep.subr.bf16.mxu0 %v10265_v0  ;;  %7714 = vmatprep.subr.bf16.mxu1 %v10268_v1  ;;  %v10355_v0 = vld [vmem:[%s14128_s1 + $0x1684] ss:$16 sps:$4 sm:$0xff]   ;;  %v10358_v1 = vld [vmem:[%s14128_s1 + $0x168c] ss:$16 sps:$4 sm:$0xff]  }
 0x29d   : > { %7027 = vmatpush1.bf16.msra.mxu0 %v10263_v2  ;;  %7715 = vmatpush1.bf16.msra.mxu1 %v10266_v3  ;;  %v10353_v2 = vld [vmem:[%s14128_s1 + $0x1680] ss:$16 sps:$4 sm:$0xff]   ;;  %v10356_v3 = vld [vmem:[%s14128_s1 + $0x1688] ss:$16 sps:$4 sm:$0xff]  }
 0x29e   : > { %7028 = vmatprep.subr.bf16.mxu0 %v10271_v4  ;;  %7716 = vmatprep.subr.bf16.mxu1 %v10274_v5  ;;  %v10361_v4 = vld [vmem:[%s14128_s1 + $0x16a4] ss:$16 sps:$4 sm:$0xff]   ;;  %v10364_v5 = vld [vmem:[%s14128_s1 + $0x16ac] ss:$16 sps:$4 sm:$0xff]  }
 0x2a1   : > { %7029 = vmatpush1.bf16.msra.mxu0 %v10269_v6  ;;  %7717 = vmatpush1.bf16.msra.mxu1 %v10272_v7  ;;  %v10359_v6 = vld [vmem:[%s14128_s1 + $0x16a0] ss:$16 sps:$4 sm:$0xff]   ;;  %v10362_v7 = vld [vmem:[%s14128_s1 + $0x16a8] ss:$16 sps:$4 sm:$0xff]  }
 0x2a2   : > { %7030 = vmatprep.subr.bf16.mxu0 %v10277_v8  ;;  %7718 = vmatprep.subr.bf16.mxu1 %v10280_v9  ;;  %v10367_v8 = vld [vmem:[%s14128_s1 + $0x16c4] ss:$16 sps:$4 sm:$0xff]   ;;  %v10370_v9 = vld [vmem:[%s14128_s1 + $0x16cc] ss:$16 sps:$4 sm:$0xff]  }
 0x2a5   : > { %7031 = vmatpush1.bf16.msra.mxu0 %v10275_v10  ;;  %7719 = vmatpush1.bf16.msra.mxu1 %v10278_v11  ;;  %v10365_v10 = vld [vmem:[%s14128_s1 + $0x16c0] ss:$16 sps:$4 sm:$0xff]   ;;  %v10368_v11 = vld [vmem:[%s14128_s1 + $0x16c8] ss:$16 sps:$4 sm:$0xff]  }
 0x2a6   : > { %7032 = vmatprep.subr.bf16.mxu0 %v10283_v12  ;;  %7720 = vmatprep.subr.bf16.mxu1 %v10286_v13  ;;  %v10373_v12 = vld [vmem:[%s14128_s1 + $0x16e4] ss:$16 sps:$4 sm:$0xff]   ;;  %v10376_v13 = vld [vmem:[%s14128_s1 + $0x16ec] ss:$16 sps:$4 sm:$0xff]  }
 0x2a9   : > { %7033 = vmatpush1.bf16.msra.mxu0 %v10281_v14  ;;  %7721 = vmatpush1.bf16.msra.mxu1 %v10284_v17  ;;  %v10371_v14 = vld [vmem:[%s14128_s1 + $0x16e0] ss:$16 sps:$4 sm:$0xff]   ;;  %v10374_v17 = vld [vmem:[%s14128_s1 + $0x16e8] ss:$16 sps:$4 sm:$0xff]  }
 0x2aa   : > { %7034 = vmatprep.subr.bf16.mxu0 %v10289_v18  ;;  %7722 = vmatprep.subr.bf16.mxu1 %v10292_v21  ;;  %v10379_v18 = vld [vmem:[%s14128_s1 + $0x1704] ss:$16 sps:$4 sm:$0xff]   ;;  %v10382_v21 = vld [vmem:[%s14128_s1 + $0x170c] ss:$16 sps:$4 sm:$0xff]  }
 0x2ad   : > { %7035 = vmatpush1.bf16.msra.mxu0 %v10287_v23  ;;  %7723 = vmatpush1.bf16.msra.mxu1 %v10290_v16  ;;  %v10377_v23 = vld [vmem:[%s14128_s1 + $0x1700] ss:$16 sps:$4 sm:$0xff]   ;;  %v10380_v16 = vld [vmem:[%s14128_s1 + $0x1708] ss:$16 sps:$4 sm:$0xff]  }
 0x2ae   : > { %7036 = vmatprep.subr.bf16.mxu0 %v10295_v24  ;;  %7724 = vmatprep.subr.bf16.mxu1 %v10298_v25  ;;  %v10385_v24 = vld [vmem:[%s14128_s1 + $0x1724] ss:$16 sps:$4 sm:$0xff]   ;;  %v10388_v25 = vld [vmem:[%s14128_s1 + $0x172c] ss:$16 sps:$4 sm:$0xff]  }
 0x2b1   : > { %7037 = vmatpush1.bf16.msra.mxu0 %v10293_v26  ;;  %7725 = vmatpush1.bf16.msra.mxu1 %v10296_v27  ;;  %v10383_v26 = vld [vmem:[%s14128_s1 + $0x1720] ss:$16 sps:$4 sm:$0xff]   ;;  %v10386_v27 = vld [vmem:[%s14128_s1 + $0x1728] ss:$16 sps:$4 sm:$0xff]  }
 0x2b2   : > { %7038 = vmatprep.subr.bf16.mxu0 %v10301_v28  ;;  %7726 = vmatprep.subr.bf16.mxu1 %v10304_v29  ;;  %v10391_v28 = vld [vmem:[%s14128_s1 + $0x1744] ss:$16 sps:$4 sm:$0xff]   ;;  %v10394_v29 = vld [vmem:[%s14128_s1 + $0x174c] ss:$16 sps:$4 sm:$0xff]  }
 0x2b5   : > { %7039 = vmatpush1.bf16.msra.mxu0 %v10299_v30  ;;  %7727 = vmatpush1.bf16.msra.mxu1 %v10302_v31  ;;  %v10389_v30 = vld [vmem:[%s14128_s1 + $0x1740] ss:$16 sps:$4 sm:$0xff]   ;;  %v10392_v31 = vld [vmem:[%s14128_s1 + $0x1748] ss:$16 sps:$4 sm:$0xff]  }
 0x2b6   : > { %7040 = vmatprep.subr.bf16.mxu0 %v10307_v32  ;;  %7728 = vmatprep.subr.bf16.mxu1 %v10310_v33  ;;  %v10397_v32 = vld [vmem:[%s14128_s1 + $0x1764] ss:$16 sps:$4 sm:$0xff]   ;;  %v10400_v33 = vld [vmem:[%s14128_s1 + $0x176c] ss:$16 sps:$4 sm:$0xff]  }
 0x2b9   : > { %7041 = vmatpush1.bf16.msra.mxu0 %v10305_v34  ;;  %7729 = vmatpush1.bf16.msra.mxu1 %v10308_v35  ;;  %v10395_v34 = vld [vmem:[%s14128_s1 + $0x1760] ss:$16 sps:$4 sm:$0xff]   ;;  %v10398_v35 = vld [vmem:[%s14128_s1 + $0x1768] ss:$16 sps:$4 sm:$0xff]  }
 0x2ba   : > { %7042 = vmatprep.subr.bf16.mxu0 %v10313_v36  ;;  %7730 = vmatprep.subr.bf16.mxu1 %v10316_v37  ;;  %v10403_v36 = vld [vmem:[%s14128_s1 + $0x1784] ss:$16 sps:$4 sm:$0xff]   ;;  %v10406_v37 = vld [vmem:[%s14128_s1 + $0x178c] ss:$16 sps:$4 sm:$0xff]  }
 0x2bd   : > { %7043 = vmatpush1.bf16.msra.mxu0 %v10311_v38  ;;  %7731 = vmatpush1.bf16.msra.mxu1 %v10314_v39  ;;  %v10401_v38 = vld [vmem:[%s14128_s1 + $0x1780] ss:$16 sps:$4 sm:$0xff]   ;;  %v10404_v39 = vld [vmem:[%s14128_s1 + $0x1788] ss:$16 sps:$4 sm:$0xff]  }
 0x2be   : > { %7044 = vmatprep.subr.bf16.mxu0 %v10319_v40  ;;  %7732 = vmatprep.subr.bf16.mxu1 %v10322_v41  ;;  %v10409_v40 = vld [vmem:[%s14128_s1 + $0x17a4] ss:$16 sps:$4 sm:$0xff]   ;;  %v10412_v41 = vld [vmem:[%s14128_s1 + $0x17ac] ss:$16 sps:$4 sm:$0xff]  }
 0x2c1   : > { %7045 = vmatpush1.bf16.msra.mxu0 %v10317_v42  ;;  %7733 = vmatpush1.bf16.msra.mxu1 %v10320_v43  ;;  %v10407_v42 = vld [vmem:[%s14128_s1 + $0x17a0] ss:$16 sps:$4 sm:$0xff]   ;;  %v10410_v43 = vld [vmem:[%s14128_s1 + $0x17a8] ss:$16 sps:$4 sm:$0xff]  }
 0x2c2   : > { %7046 = vmatprep.subr.bf16.mxu0 %v10325_v44  ;;  %7734 = vmatprep.subr.bf16.mxu1 %v10328_v45  ;;  %v10415_v44 = vld [vmem:[%s14128_s1 + $0x17c4] ss:$16 sps:$4 sm:$0xff]   ;;  %v10418_v45 = vld [vmem:[%s14128_s1 + $0x17cc] ss:$16 sps:$4 sm:$0xff]  }
 0x2c5   : > { %7047 = vmatpush1.bf16.msra.mxu0 %v10323_v22  ;;  %7735 = vmatpush1.bf16.msra.mxu1 %v10326_v47  ;;  %v10413_v22 = vld [vmem:[%s14128_s1 + $0x17c0] ss:$16 sps:$4 sm:$0xff]   ;;  %v10416_v47 = vld [vmem:[%s14128_s1 + $0x17c8] ss:$16 sps:$4 sm:$0xff]  }
 0x2c6   : > { %7059 = vmatprep.subr.bf16.mxu0 %v10331_v48  ;;  %7747 = vmatprep.subr.bf16.mxu1 %v10334_v19  ;;  %v10421_v48 = vld [vmem:[%s14128_s1 + $0x17e4] ss:$16 sps:$4 sm:$0xff]   ;;  %v10424_v19 = vld [vmem:[%s14128_s1 + $0x17ec] ss:$16 sps:$4 sm:$0xff]  }
 0x2c8   : > { %7049 = vmatmul.mubr.bf16.vlgmr.msra.gmra.mrb[0].mxu0 %v8098_v20  ;;  %7737 = vmatmul.mubr.bf16.vlgmr.msra.gmra.mrb[0].mxu1 %v8098_v20  ;;  %v10419_v20 = vld [vmem:[%s14128_s1 + $0x17e0] ss:$16 sps:$4 sm:$0xff]  }
 0x2c9   : > { %7060 = vmatpush1.bf16.msra.mxu0 %v10329_v51  ;;  %7748 = vmatpush1.bf16.msra.mxu1 %v10332_v52  ;;  %v10422_v51 = vld [vmem:[%s14128_s1 + $0x17e8] ss:$16 sps:$4 sm:$0xff]   ;;  %v10427_v52 = vld [vmem:[%s14128_s1 + $0x1804] ss:$16 sps:$4 sm:$0xff]  }
 0x2ca   : > { %7061 = vmatprep.subr.bf16.mxu0 %v10337_v15  ;;  %7749 = vmatprep.subr.bf16.mxu1 %v10340_v46  ;;  %v10430_v15 = vld [vmem:[%s14128_s1 + $0x180c] ss:$16 sps:$4 sm:$0xff]   ;;  %v8100_v46 = vcombine.low %v13087_v49, %v13090_v50  ;;  %v10433_v49 = vld [vmem:[%s14128_s1 + $0x1824] ss:$16 sps:$4 sm:$0xff]  }
 0x2cb   : > { %7091 = vmatprep.mubr.bf16.mxu0 %v8101_v53  ;;  %7779 = vmatprep.mubr.bf16.mxu1 %v8101_v53  ;;  %v13289_v53 = vld [vmem:[%s10996_s17 + $0x60] sm:$0xff]  ;;  %v10436_v50 = vld [vmem:[%s14128_s1 + $0x182c] ss:$16 sps:$4 sm:$0xff]  }
 0x2cd   : > { %7062 = vmatpush1.bf16.msra.mxu0 %v10335_v54  ;;  %7750 = vmatpush1.bf16.msra.mxu1 %v10338_v55  ;;  %v13292_v54 = vld [vmem:[%s10996_s17 + $0xe0] sm:$0xff] }
 0x2ce   : > { %7063 = vmatprep.subr.bf16.mxu0 %v10343_v56  ;;  %7751 = vmatprep.subr.bf16.mxu1 %v10346_v57  ;;  %v10425_v55 = vld [vmem:[%s14128_s1 + $0x1800] ss:$16 sps:$4 sm:$0xff]   ;;  %v10428_v56 = vld [vmem:[%s14128_s1 + $0x1808] ss:$16 sps:$4 sm:$0xff]   ;;  %v8103_v57 = vcombine.high %v13289_v53, %v13292_v54 }
 0x2d1   : > { %7064 = vmatpush1.bf16.msra.mxu0 %v10341_v58  ;;  %7752 = vmatpush1.bf16.msra.mxu1 %v10344_v59  ;;  %v10431_v58 = vld [vmem:[%s14128_s1 + $0x1820] ss:$16 sps:$4 sm:$0xff]   ;;  %v10434_v59 = vld [vmem:[%s14128_s1 + $0x1828] ss:$16 sps:$4 sm:$0xff]  }
 0x2d2   : > { %7065 = vmatprep.subr.bf16.mxu0 %v10349_v60  ;;  %7753 = vmatprep.subr.bf16.mxu1 %v10352_v61  ;;  %v10439_v60 = vld [vmem:[%s14128_s1 + $0x1844] ss:$16 sps:$4 sm:$0xff]   ;;  %v10442_v61 = vld [vmem:[%s14128_s1 + $0x184c] ss:$16 sps:$4 sm:$0xff]  }
 0x2d5   : > { %7066 = vmatpush1.bf16.msra.mxu0 %v10347_v62  ;;  %7754 = vmatpush1.bf16.msra.mxu1 %v10350_v63  ;;  %v10437_v62 = vld [vmem:[%s14128_s1 + $0x1840] ss:$16 sps:$4 sm:$0xff]   ;;  %v10440_v63 = vld [vmem:[%s14128_s1 + $0x1848] ss:$16 sps:$4 sm:$0xff]  }
 0x2d6   : > { %7067 = vmatprep.subr.bf16.mxu0 %v10355_v0  ;;  %7755 = vmatprep.subr.bf16.mxu1 %v10358_v1  ;;  %v10445_v0 = vld [vmem:[%s14128_s1 + $0x1864] ss:$16 sps:$4 sm:$0xff]   ;;  %v10448_v1 = vld [vmem:[%s14128_s1 + $0x186c] ss:$16 sps:$4 sm:$0xff]  }
 0x2d9   : > { %7068 = vmatpush1.bf16.msra.mxu0 %v10353_v2  ;;  %7756 = vmatpush1.bf16.msra.mxu1 %v10356_v3  ;;  %v10443_v2 = vld [vmem:[%s14128_s1 + $0x1860] ss:$16 sps:$4 sm:$0xff]   ;;  %v10446_v3 = vld [vmem:[%s14128_s1 + $0x1868] ss:$16 sps:$4 sm:$0xff]  }
 0x2da   : > { %7069 = vmatprep.subr.bf16.mxu0 %v10361_v4  ;;  %7757 = vmatprep.subr.bf16.mxu1 %v10364_v5  ;;  %v10451_v4 = vld [vmem:[%s14128_s1 + $0x1884] ss:$16 sps:$4 sm:$0xff]   ;;  %v10454_v5 = vld [vmem:[%s14128_s1 + $0x188c] ss:$16 sps:$4 sm:$0xff]  }
 0x2dd   : > { %7070 = vmatpush1.bf16.msra.mxu0 %v10359_v6  ;;  %7758 = vmatpush1.bf16.msra.mxu1 %v10362_v7  ;;  %v10449_v6 = vld [vmem:[%s14128_s1 + $0x1880] ss:$16 sps:$4 sm:$0xff]   ;;  %v10452_v7 = vld [vmem:[%s14128_s1 + $0x1888] ss:$16 sps:$4 sm:$0xff]  }
 0x2de   : > { %7071 = vmatprep.subr.bf16.mxu0 %v10367_v8  ;;  %7759 = vmatprep.subr.bf16.mxu1 %v10370_v9  ;;  %v10457_v8 = vld [vmem:[%s14128_s1 + $0x18a4] ss:$16 sps:$4 sm:$0xff]   ;;  %v10460_v9 = vld [vmem:[%s14128_s1 + $0x18ac] ss:$16 sps:$4 sm:$0xff]  }
 0x2e1   : > { %7072 = vmatpush1.bf16.msra.mxu0 %v10365_v10  ;;  %7760 = vmatpush1.bf16.msra.mxu1 %v10368_v11  ;;  %v10455_v10 = vld [vmem:[%s14128_s1 + $0x18a0] ss:$16 sps:$4 sm:$0xff]   ;;  %v10458_v11 = vld [vmem:[%s14128_s1 + $0x18a8] ss:$16 sps:$4 sm:$0xff]  }
 0x2e2   : > { %7073 = vmatprep.subr.bf16.mxu0 %v10373_v12  ;;  %7761 = vmatprep.subr.bf16.mxu1 %v10376_v13  ;;  %v10463_v12 = vld [vmem:[%s14128_s1 + $0x18c4] ss:$16 sps:$4 sm:$0xff]   ;;  %v10466_v13 = vld [vmem:[%s14128_s1 + $0x18cc] ss:$16 sps:$4 sm:$0xff]  }
 0x2e5   : > { %7074 = vmatpush1.bf16.msra.mxu0 %v10371_v14  ;;  %7762 = vmatpush1.bf16.msra.mxu1 %v10374_v17  ;;  %v10461_v14 = vld [vmem:[%s14128_s1 + $0x18c0] ss:$16 sps:$4 sm:$0xff]   ;;  %v10464_v17 = vld [vmem:[%s14128_s1 + $0x18c8] ss:$16 sps:$4 sm:$0xff]  }
 0x2e6   : > { %7075 = vmatprep.subr.bf16.mxu0 %v10379_v18  ;;  %7763 = vmatprep.subr.bf16.mxu1 %v10382_v21  ;;  %v10469_v18 = vld [vmem:[%s14128_s1 + $0x18e4] ss:$16 sps:$4 sm:$0xff]   ;;  %v10472_v21 = vld [vmem:[%s14128_s1 + $0x18ec] ss:$16 sps:$4 sm:$0xff]  }
 0x2e9   : > { %7076 = vmatpush1.bf16.msra.mxu0 %v10377_v23  ;;  %7764 = vmatpush1.bf16.msra.mxu1 %v10380_v16  ;;  %v10467_v23 = vld [vmem:[%s14128_s1 + $0x18e0] ss:$16 sps:$4 sm:$0xff]   ;;  %v10470_v16 = vld [vmem:[%s14128_s1 + $0x18e8] ss:$16 sps:$4 sm:$0xff]  }
 0x2ea   : > { %7077 = vmatprep.subr.bf16.mxu0 %v10385_v24  ;;  %7765 = vmatprep.subr.bf16.mxu1 %v10388_v25  ;;  %v10475_v24 = vld [vmem:[%s14128_s1 + $0x1904] ss:$16 sps:$4 sm:$0xff]   ;;  %v10478_v25 = vld [vmem:[%s14128_s1 + $0x190c] ss:$16 sps:$4 sm:$0xff]  }
 0x2ed   : > { %7078 = vmatpush1.bf16.msra.mxu0 %v10383_v26  ;;  %7766 = vmatpush1.bf16.msra.mxu1 %v10386_v27  ;;  %v10473_v26 = vld [vmem:[%s14128_s1 + $0x1900] ss:$16 sps:$4 sm:$0xff]   ;;  %v10476_v27 = vld [vmem:[%s14128_s1 + $0x1908] ss:$16 sps:$4 sm:$0xff]  }
 0x2ee   : > { %7079 = vmatprep.subr.bf16.mxu0 %v10391_v28  ;;  %7767 = vmatprep.subr.bf16.mxu1 %v10394_v29  ;;  %v10481_v28 = vld [vmem:[%s14128_s1 + $0x1924] ss:$16 sps:$4 sm:$0xff]   ;;  %v10484_v29 = vld [vmem:[%s14128_s1 + $0x192c] ss:$16 sps:$4 sm:$0xff]  }
 0x2f1   : > { %7080 = vmatpush1.bf16.msra.mxu0 %v10389_v30  ;;  %7768 = vmatpush1.bf16.msra.mxu1 %v10392_v31  ;;  %v10479_v30 = vld [vmem:[%s14128_s1 + $0x1920] ss:$16 sps:$4 sm:$0xff]   ;;  %v10482_v31 = vld [vmem:[%s14128_s1 + $0x1928] ss:$16 sps:$4 sm:$0xff]  }
 0x2f2   : > { %7081 = vmatprep.subr.bf16.mxu0 %v10397_v32  ;;  %7769 = vmatprep.subr.bf16.mxu1 %v10400_v33  ;;  %v10487_v32 = vld [vmem:[%s14128_s1 + $0x1944] ss:$16 sps:$4 sm:$0xff]   ;;  %v10490_v33 = vld [vmem:[%s14128_s1 + $0x194c] ss:$16 sps:$4 sm:$0xff]  }
 0x2f5   : > { %7082 = vmatpush1.bf16.msra.mxu0 %v10395_v34  ;;  %7770 = vmatpush1.bf16.msra.mxu1 %v10398_v35  ;;  %v10485_v34 = vld [vmem:[%s14128_s1 + $0x1940] ss:$16 sps:$4 sm:$0xff]   ;;  %v10488_v35 = vld [vmem:[%s14128_s1 + $0x1948] ss:$16 sps:$4 sm:$0xff]  }
 0x2f6   : > { %7083 = vmatprep.subr.bf16.mxu0 %v10403_v36  ;;  %7771 = vmatprep.subr.bf16.mxu1 %v10406_v37  ;;  %v10493_v36 = vld [vmem:[%s14128_s1 + $0x1964] ss:$16 sps:$4 sm:$0xff]   ;;  %v10496_v37 = vld [vmem:[%s14128_s1 + $0x196c] ss:$16 sps:$4 sm:$0xff]  }
 0x2f9   : > { %7084 = vmatpush1.bf16.msra.mxu0 %v10401_v38  ;;  %7772 = vmatpush1.bf16.msra.mxu1 %v10404_v39  ;;  %v10491_v38 = vld [vmem:[%s14128_s1 + $0x1960] ss:$16 sps:$4 sm:$0xff]   ;;  %v10494_v39 = vld [vmem:[%s14128_s1 + $0x1968] ss:$16 sps:$4 sm:$0xff]  }
 0x2fa   : > { %7085 = vmatprep.subr.bf16.mxu0 %v10409_v40  ;;  %7773 = vmatprep.subr.bf16.mxu1 %v10412_v41  ;;  %v10499_v40 = vld [vmem:[%s14128_s1 + $0x1984] ss:$16 sps:$4 sm:$0xff]   ;;  %v10502_v41 = vld [vmem:[%s14128_s1 + $0x198c] ss:$16 sps:$4 sm:$0xff]  }
 0x2fd   : > { %7086 = vmatpush1.bf16.msra.mxu0 %v10407_v42  ;;  %7774 = vmatpush1.bf16.msra.mxu1 %v10410_v43  ;;  %v10497_v42 = vld [vmem:[%s14128_s1 + $0x1980] ss:$16 sps:$4 sm:$0xff]   ;;  %v10500_v43 = vld [vmem:[%s14128_s1 + $0x1988] ss:$16 sps:$4 sm:$0xff]  }
 0x2fe   : > { %7087 = vmatprep.subr.bf16.mxu0 %v10415_v44  ;;  %7775 = vmatprep.subr.bf16.mxu1 %v10418_v45  ;;  %v10505_v44 = vld [vmem:[%s14128_s1 + $0x19a4] ss:$16 sps:$4 sm:$0xff]   ;;  %v10508_v45 = vld [vmem:[%s14128_s1 + $0x19ac] ss:$16 sps:$4 sm:$0xff]  }
 0x301   : > { %7088 = vmatpush1.bf16.msra.mxu0 %v10413_v22  ;;  %7776 = vmatpush1.bf16.msra.mxu1 %v10416_v47  ;;  %v10503_v22 = vld [vmem:[%s14128_s1 + $0x19a0] ss:$16 sps:$4 sm:$0xff]   ;;  %v10506_v47 = vld [vmem:[%s14128_s1 + $0x19a8] ss:$16 sps:$4 sm:$0xff]  }
 0x302   : > { %7089 = vmatprep.subr.bf16.mxu0 %v10421_v48  ;;  %7777 = vmatprep.subr.bf16.mxu1 %v10424_v19  ;;  %v10511_v48 = vld [vmem:[%s14128_s1 + $0x19c4] ss:$16 sps:$4 sm:$0xff]   ;;  %v10514_v19 = vld [vmem:[%s14128_s1 + $0x19cc] ss:$16 sps:$4 sm:$0xff]  }
 0x305   : > { %7090 = vmatpush1.bf16.msra.mxu0 %v10419_v20  ;;  %7778 = vmatpush1.bf16.msra.mxu1 %v10422_v51  ;;  %v10509_v20 = vld [vmem:[%s14128_s1 + $0x19c0] ss:$16 sps:$4 sm:$0xff]   ;;  %v10512_v51 = vld [vmem:[%s14128_s1 + $0x19c8] ss:$16 sps:$4 sm:$0xff]  }
 0x306   : > { %7102 = vmatprep.subr.bf16.mxu0 %v10427_v52  ;;  %7790 = vmatprep.subr.bf16.mxu1 %v10430_v15  ;;  %v10517_v52 = vld [vmem:[%s14128_s1 + $0x19e4] ss:$16 sps:$4 sm:$0xff]   ;;  %v10520_v15 = vld [vmem:[%s14128_s1 + $0x19ec] ss:$16 sps:$4 sm:$0xff]  }
 0x308   : > { %7092 = vmatmul.mubr.bf16.vlgmr.msra.gmra.mrb[0].mxu0 %v8100_v46  ;;  %7780 = vmatmul.mubr.bf16.vlgmr.msra.gmra.mrb[0].mxu1 %v8100_v46  ;;  %v10515_v46 = vld [vmem:[%s14128_s1 + $0x19e0] ss:$16 sps:$4 sm:$0xff]  }
 0x309   : > { %7103 = vmatpush1.bf16.msra.mxu0 %v10425_v55  ;;  %7791 = vmatpush1.bf16.msra.mxu1 %v10428_v56  ;;  %v10518_v55 = vld [vmem:[%s14128_s1 + $0x19e8] ss:$16 sps:$4 sm:$0xff]   ;;  %v10523_v56 = vld [vmem:[%s14128_s1 + $0x1a04] ss:$16 sps:$4 sm:$0xff]  }
 0x30a   : > { %7104 = vmatprep.subr.bf16.mxu0 %v10433_v49  ;;  %7792 = vmatprep.subr.bf16.mxu1 %v10436_v50  ;;  %v10526_v49 = vld [vmem:[%s14128_s1 + $0x1a0c] ss:$16 sps:$4 sm:$0xff]   ;;  %v8102_v50 = vcombine.low %v13289_v53, %v13292_v54  ;;  %v10529_v53 = vld [vmem:[%s14128_s1 + $0x1a24] ss:$16 sps:$4 sm:$0xff]  }
 0x30b   : > { %7134 = vmatprep.mubr.bf16.mxu0 %v8103_v57  ;;  %7822 = vmatprep.mubr.bf16.mxu1 %v8103_v57  ;;  %v13491_v57 = vld [vmem:[%s10996_s17 + $0x68] sm:$0xff] }
 0x30c   : > { %v10532_v54 = vld [vmem:[%s14128_s1 + $0x1a2c] ss:$16 sps:$4 sm:$0xff]  }
 0x30d   : > { %7105 = vmatpush1.bf16.msra.mxu0 %v10431_v58  ;;  %7793 = vmatpush1.bf16.msra.mxu1 %v10434_v59  ;;  %v13494_v58 = vld [vmem:[%s10996_s17 + $0xe8] sm:$0xff]  ;;  %v10521_v59 = vld [vmem:[%s14128_s1 + $0x1a00] ss:$16 sps:$4 sm:$0xff]  }
 0x30e   : > { %7106 = vmatprep.subr.bf16.mxu0 %v10439_v60  ;;  %7794 = vmatprep.subr.bf16.mxu1 %v10442_v61  ;;  %v10524_v60 = vld [vmem:[%s14128_s1 + $0x1a08] ss:$16 sps:$4 sm:$0xff]   ;;  %v8105_v61 = vcombine.high %v13491_v57, %v13494_v58 }
 0x311   : > { %7107 = vmatpush1.bf16.msra.mxu0 %v10437_v62  ;;  %7795 = vmatpush1.bf16.msra.mxu1 %v10440_v63  ;;  %v10527_v62 = vld [vmem:[%s14128_s1 + $0x1a20] ss:$16 sps:$4 sm:$0xff]   ;;  %v10530_v63 = vld [vmem:[%s14128_s1 + $0x1a28] ss:$16 sps:$4 sm:$0xff]  }
 0x312   : > { %7108 = vmatprep.subr.bf16.mxu0 %v10445_v0  ;;  %7796 = vmatprep.subr.bf16.mxu1 %v10448_v1  ;;  %v10535_v0 = vld [vmem:[%s14128_s1 + $0x1a44] ss:$16 sps:$4 sm:$0xff]   ;;  %v10538_v1 = vld [vmem:[%s14128_s1 + $0x1a4c] ss:$16 sps:$4 sm:$0xff]  }
 0x315   : > { %7109 = vmatpush1.bf16.msra.mxu0 %v10443_v2  ;;  %7797 = vmatpush1.bf16.msra.mxu1 %v10446_v3  ;;  %v10533_v2 = vld [vmem:[%s14128_s1 + $0x1a40] ss:$16 sps:$4 sm:$0xff]   ;;  %v10536_v3 = vld [vmem:[%s14128_s1 + $0x1a48] ss:$16 sps:$4 sm:$0xff]  }
 0x316   : > { %7110 = vmatprep.subr.bf16.mxu0 %v10451_v4  ;;  %7798 = vmatprep.subr.bf16.mxu1 %v10454_v5  ;;  %v10541_v4 = vld [vmem:[%s14128_s1 + $0x1a64] ss:$16 sps:$4 sm:$0xff]   ;;  %v10544_v5 = vld [vmem:[%s14128_s1 + $0x1a6c] ss:$16 sps:$4 sm:$0xff]  }
 0x319   : > { %7111 = vmatpush1.bf16.msra.mxu0 %v10449_v6  ;;  %7799 = vmatpush1.bf16.msra.mxu1 %v10452_v7  ;;  %v10539_v6 = vld [vmem:[%s14128_s1 + $0x1a60] ss:$16 sps:$4 sm:$0xff]   ;;  %v10542_v7 = vld [vmem:[%s14128_s1 + $0x1a68] ss:$16 sps:$4 sm:$0xff]  }
 0x31a   : > { %7112 = vmatprep.subr.bf16.mxu0 %v10457_v8  ;;  %7800 = vmatprep.subr.bf16.mxu1 %v10460_v9  ;;  %v10547_v8 = vld [vmem:[%s14128_s1 + $0x1a84] ss:$16 sps:$4 sm:$0xff]   ;;  %v10550_v9 = vld [vmem:[%s14128_s1 + $0x1a8c] ss:$16 sps:$4 sm:$0xff]  }
 0x31d   : > { %7113 = vmatpush1.bf16.msra.mxu0 %v10455_v10  ;;  %7801 = vmatpush1.bf16.msra.mxu1 %v10458_v11  ;;  %v10545_v10 = vld [vmem:[%s14128_s1 + $0x1a80] ss:$16 sps:$4 sm:$0xff]   ;;  %v10548_v11 = vld [vmem:[%s14128_s1 + $0x1a88] ss:$16 sps:$4 sm:$0xff]  }
 0x31e   : > { %7114 = vmatprep.subr.bf16.mxu0 %v10463_v12  ;;  %7802 = vmatprep.subr.bf16.mxu1 %v10466_v13  ;;  %v10553_v12 = vld [vmem:[%s14128_s1 + $0x1aa4] ss:$16 sps:$4 sm:$0xff]   ;;  %v10556_v13 = vld [vmem:[%s14128_s1 + $0x1aac] ss:$16 sps:$4 sm:$0xff]  }
 0x321   : > { %7115 = vmatpush1.bf16.msra.mxu0 %v10461_v14  ;;  %7803 = vmatpush1.bf16.msra.mxu1 %v10464_v17  ;;  %v10551_v14 = vld [vmem:[%s14128_s1 + $0x1aa0] ss:$16 sps:$4 sm:$0xff]   ;;  %v10554_v17 = vld [vmem:[%s14128_s1 + $0x1aa8] ss:$16 sps:$4 sm:$0xff]  }
 0x322   : > { %7116 = vmatprep.subr.bf16.mxu0 %v10469_v18  ;;  %7804 = vmatprep.subr.bf16.mxu1 %v10472_v21  ;;  %v10559_v18 = vld [vmem:[%s14128_s1 + $0x1ac4] ss:$16 sps:$4 sm:$0xff]   ;;  %v10562_v21 = vld [vmem:[%s14128_s1 + $0x1acc] ss:$16 sps:$4 sm:$0xff]  }
 0x325   : > { %7117 = vmatpush1.bf16.msra.mxu0 %v10467_v23  ;;  %7805 = vmatpush1.bf16.msra.mxu1 %v10470_v16  ;;  %v10557_v23 = vld [vmem:[%s14128_s1 + $0x1ac0] ss:$16 sps:$4 sm:$0xff]   ;;  %v10560_v16 = vld [vmem:[%s14128_s1 + $0x1ac8] ss:$16 sps:$4 sm:$0xff]  }
 0x326   : > { %7118 = vmatprep.subr.bf16.mxu0 %v10475_v24  ;;  %7806 = vmatprep.subr.bf16.mxu1 %v10478_v25  ;;  %v10565_v24 = vld [vmem:[%s14128_s1 + $0x1ae4] ss:$16 sps:$4 sm:$0xff]   ;;  %v10568_v25 = vld [vmem:[%s14128_s1 + $0x1aec] ss:$16 sps:$4 sm:$0xff]  }
 0x329   : > { %7119 = vmatpush1.bf16.msra.mxu0 %v10473_v26  ;;  %7807 = vmatpush1.bf16.msra.mxu1 %v10476_v27  ;;  %v10563_v26 = vld [vmem:[%s14128_s1 + $0x1ae0] ss:$16 sps:$4 sm:$0xff]   ;;  %v10566_v27 = vld [vmem:[%s14128_s1 + $0x1ae8] ss:$16 sps:$4 sm:$0xff]  }
 0x32a   : > { %7120 = vmatprep.subr.bf16.mxu0 %v10481_v28  ;;  %7808 = vmatprep.subr.bf16.mxu1 %v10484_v29  ;;  %v10571_v28 = vld [vmem:[%s14128_s1 + $0x1b04] ss:$16 sps:$4 sm:$0xff]   ;;  %v10574_v29 = vld [vmem:[%s14128_s1 + $0x1b0c] ss:$16 sps:$4 sm:$0xff]  }
 0x32d   : > { %7121 = vmatpush1.bf16.msra.mxu0 %v10479_v30  ;;  %7809 = vmatpush1.bf16.msra.mxu1 %v10482_v31  ;;  %v10569_v30 = vld [vmem:[%s14128_s1 + $0x1b00] ss:$16 sps:$4 sm:$0xff]   ;;  %v10572_v31 = vld [vmem:[%s14128_s1 + $0x1b08] ss:$16 sps:$4 sm:$0xff]  }
 0x32e   : > { %7122 = vmatprep.subr.bf16.mxu0 %v10487_v32  ;;  %7810 = vmatprep.subr.bf16.mxu1 %v10490_v33  ;;  %v10577_v32 = vld [vmem:[%s14128_s1 + $0x1b24] ss:$16 sps:$4 sm:$0xff]   ;;  %v10580_v33 = vld [vmem:[%s14128_s1 + $0x1b2c] ss:$16 sps:$4 sm:$0xff]  }
 0x331   : > { %7123 = vmatpush1.bf16.msra.mxu0 %v10485_v34  ;;  %7811 = vmatpush1.bf16.msra.mxu1 %v10488_v35  ;;  %v10575_v34 = vld [vmem:[%s14128_s1 + $0x1b20] ss:$16 sps:$4 sm:$0xff]   ;;  %v10578_v35 = vld [vmem:[%s14128_s1 + $0x1b28] ss:$16 sps:$4 sm:$0xff]  }
 0x332   : > { %7124 = vmatprep.subr.bf16.mxu0 %v10493_v36  ;;  %7812 = vmatprep.subr.bf16.mxu1 %v10496_v37  ;;  %v10583_v36 = vld [vmem:[%s14128_s1 + $0x1b44] ss:$16 sps:$4 sm:$0xff]   ;;  %v10586_v37 = vld [vmem:[%s14128_s1 + $0x1b4c] ss:$16 sps:$4 sm:$0xff]  }
 0x335   : > { %7125 = vmatpush1.bf16.msra.mxu0 %v10491_v38  ;;  %7813 = vmatpush1.bf16.msra.mxu1 %v10494_v39  ;;  %v10581_v38 = vld [vmem:[%s14128_s1 + $0x1b40] ss:$16 sps:$4 sm:$0xff]   ;;  %v10584_v39 = vld [vmem:[%s14128_s1 + $0x1b48] ss:$16 sps:$4 sm:$0xff]  }
 0x336   : > { %7126 = vmatprep.subr.bf16.mxu0 %v10499_v40  ;;  %7814 = vmatprep.subr.bf16.mxu1 %v10502_v41  ;;  %v10589_v40 = vld [vmem:[%s14128_s1 + $0x1b64] ss:$16 sps:$4 sm:$0xff]   ;;  %v10592_v41 = vld [vmem:[%s14128_s1 + $0x1b6c] ss:$16 sps:$4 sm:$0xff]  }
 0x339   : > { %7127 = vmatpush1.bf16.msra.mxu0 %v10497_v42  ;;  %7815 = vmatpush1.bf16.msra.mxu1 %v10500_v43  ;;  %v10587_v42 = vld [vmem:[%s14128_s1 + $0x1b60] ss:$16 sps:$4 sm:$0xff]   ;;  %v10590_v43 = vld [vmem:[%s14128_s1 + $0x1b68] ss:$16 sps:$4 sm:$0xff]  }
 0x33a   : > { %7128 = vmatprep.subr.bf16.mxu0 %v10505_v44  ;;  %7816 = vmatprep.subr.bf16.mxu1 %v10508_v45  ;;  %v10595_v44 = vld [vmem:[%s14128_s1 + $0x1b84] ss:$16 sps:$4 sm:$0xff]   ;;  %v10598_v45 = vld [vmem:[%s14128_s1 + $0x1b8c] ss:$16 sps:$4 sm:$0xff]  }
 0x33d   : > { %7129 = vmatpush1.bf16.msra.mxu0 %v10503_v22  ;;  %7817 = vmatpush1.bf16.msra.mxu1 %v10506_v47  ;;  %v10593_v22 = vld [vmem:[%s14128_s1 + $0x1b80] ss:$16 sps:$4 sm:$0xff]   ;;  %v10596_v47 = vld [vmem:[%s14128_s1 + $0x1b88] ss:$16 sps:$4 sm:$0xff]  }
 0x33e   : > { %7130 = vmatprep.subr.bf16.mxu0 %v10511_v48  ;;  %7818 = vmatprep.subr.bf16.mxu1 %v10514_v19  ;;  %v10601_v48 = vld [vmem:[%s14128_s1 + $0x1ba4] ss:$16 sps:$4 sm:$0xff]   ;;  %v10604_v19 = vld [vmem:[%s14128_s1 + $0x1bac] ss:$16 sps:$4 sm:$0xff]  }
 0x341   : > { %7131 = vmatpush1.bf16.msra.mxu0 %v10509_v20  ;;  %7819 = vmatpush1.bf16.msra.mxu1 %v10512_v51  ;;  %v10599_v20 = vld [vmem:[%s14128_s1 + $0x1ba0] ss:$16 sps:$4 sm:$0xff]   ;;  %v10602_v51 = vld [vmem:[%s14128_s1 + $0x1ba8] ss:$16 sps:$4 sm:$0xff]  }
 0x342   : > { %7132 = vmatprep.subr.bf16.mxu0 %v10517_v52  ;;  %7820 = vmatprep.subr.bf16.mxu1 %v10520_v15  ;;  %v10607_v52 = vld [vmem:[%s14128_s1 + $0x1bc4] ss:$16 sps:$4 sm:$0xff]   ;;  %v10610_v15 = vld [vmem:[%s14128_s1 + $0x1bcc] ss:$16 sps:$4 sm:$0xff]  }
 0x345   : > { %7133 = vmatpush1.bf16.msra.mxu0 %v10515_v46  ;;  %7821 = vmatpush1.bf16.msra.mxu1 %v10518_v55  ;;  %v10605_v46 = vld [vmem:[%s14128_s1 + $0x1bc0] ss:$16 sps:$4 sm:$0xff]   ;;  %v10608_v55 = vld [vmem:[%s14128_s1 + $0x1bc8] ss:$16 sps:$4 sm:$0xff]  }
 0x346   : > { %7145 = vmatprep.subr.bf16.mxu0 %v10523_v56  ;;  %7833 = vmatprep.subr.bf16.mxu1 %v10526_v49  ;;  %v10613_v56 = vld [vmem:[%s14128_s1 + $0x1be4] ss:$16 sps:$4 sm:$0xff]   ;;  %v10616_v49 = vld [vmem:[%s14128_s1 + $0x1bec] ss:$16 sps:$4 sm:$0xff]  }
 0x348   : > { %7135 = vmatmul.mubr.bf16.vlgmr.msra.gmra.mrb[0].mxu0 %v8102_v50  ;;  %7823 = vmatmul.mubr.bf16.vlgmr.msra.gmra.mrb[0].mxu1 %v8102_v50  ;;  %v10611_v50 = vld [vmem:[%s14128_s1 + $0x1be0] ss:$16 sps:$4 sm:$0xff]  }
 0x349   : > { %7146 = vmatpush1.bf16.msra.mxu0 %v10521_v59  ;;  %7834 = vmatpush1.bf16.msra.mxu1 %v10524_v60  ;;  %v10614_v59 = vld [vmem:[%s14128_s1 + $0x1be8] ss:$16 sps:$4 sm:$0xff]   ;;  %v10619_v60 = vld [vmem:[%s14128_s1 + $0x1c04] ss:$16 sps:$4 sm:$0xff]  }
 0x34a   : > { %7147 = vmatprep.subr.bf16.mxu0 %v10529_v53  ;;  %7835 = vmatprep.subr.bf16.mxu1 %v10532_v54  ;;  %v10622_v53 = vld [vmem:[%s14128_s1 + $0x1c0c] ss:$16 sps:$4 sm:$0xff]   ;;  %v8104_v54 = vcombine.low %v13491_v57, %v13494_v58  ;;  %v10625_v57 = vld [vmem:[%s14128_s1 + $0x1c24] ss:$16 sps:$4 sm:$0xff]  }
 0x34b   : > { %7177 = vmatprep.mubr.bf16.mxu0 %v8105_v61  ;;  %7865 = vmatprep.mubr.bf16.mxu1 %v8105_v61  ;;  %v13693_v61 = vld [vmem:[%s10996_s17 + $0x70] sm:$0xff]  ;;  %v10628_v58 = vld [vmem:[%s14128_s1 + $0x1c2c] ss:$16 sps:$4 sm:$0xff]  }
 0x34d   : > { %7148 = vmatpush1.bf16.msra.mxu0 %v10527_v62  ;;  %7836 = vmatpush1.bf16.msra.mxu1 %v10530_v63  ;;  %v13696_v62 = vld [vmem:[%s10996_s17 + $0xf0] sm:$0xff] }
 0x34e   : > { %7149 = vmatprep.subr.bf16.mxu0 %v10535_v0  ;;  %7837 = vmatprep.subr.bf16.mxu1 %v10538_v1  ;;  %v10617_v63 = vld [vmem:[%s14128_s1 + $0x1c00] ss:$16 sps:$4 sm:$0xff]   ;;  %v10620_v0 = vld [vmem:[%s14128_s1 + $0x1c08] ss:$16 sps:$4 sm:$0xff]   ;;  %v8107_v1 = vcombine.high %v13693_v61, %v13696_v62 }
 0x351   : > { %7150 = vmatpush1.bf16.msra.mxu0 %v10533_v2  ;;  %7838 = vmatpush1.bf16.msra.mxu1 %v10536_v3  ;;  %v10623_v2 = vld [vmem:[%s14128_s1 + $0x1c20] ss:$16 sps:$4 sm:$0xff]   ;;  %v10626_v3 = vld [vmem:[%s14128_s1 + $0x1c28] ss:$16 sps:$4 sm:$0xff]  }
 0x352   : > { %7151 = vmatprep.subr.bf16.mxu0 %v10541_v4  ;;  %7839 = vmatprep.subr.bf16.mxu1 %v10544_v5  ;;  %v10631_v4 = vld [vmem:[%s14128_s1 + $0x1c44] ss:$16 sps:$4 sm:$0xff]   ;;  %v10634_v5 = vld [vmem:[%s14128_s1 + $0x1c4c] ss:$16 sps:$4 sm:$0xff]  }
 0x355   : > { %7152 = vmatpush1.bf16.msra.mxu0 %v10539_v6  ;;  %7840 = vmatpush1.bf16.msra.mxu1 %v10542_v7  ;;  %v10629_v6 = vld [vmem:[%s14128_s1 + $0x1c40] ss:$16 sps:$4 sm:$0xff]   ;;  %v10632_v7 = vld [vmem:[%s14128_s1 + $0x1c48] ss:$16 sps:$4 sm:$0xff]  }
 0x356   : > { %7153 = vmatprep.subr.bf16.mxu0 %v10547_v8  ;;  %7841 = vmatprep.subr.bf16.mxu1 %v10550_v9  ;;  %v10637_v8 = vld [vmem:[%s14128_s1 + $0x1c64] ss:$16 sps:$4 sm:$0xff]   ;;  %v10640_v9 = vld [vmem:[%s14128_s1 + $0x1c6c] ss:$16 sps:$4 sm:$0xff]  }
 0x359   : > { %7154 = vmatpush1.bf16.msra.mxu0 %v10545_v10  ;;  %7842 = vmatpush1.bf16.msra.mxu1 %v10548_v11  ;;  %v10635_v10 = vld [vmem:[%s14128_s1 + $0x1c60] ss:$16 sps:$4 sm:$0xff]   ;;  %v10638_v11 = vld [vmem:[%s14128_s1 + $0x1c68] ss:$16 sps:$4 sm:$0xff]  }
 0x35a   : > { %7155 = vmatprep.subr.bf16.mxu0 %v10553_v12  ;;  %7843 = vmatprep.subr.bf16.mxu1 %v10556_v13  ;;  %v10643_v12 = vld [vmem:[%s14128_s1 + $0x1c84] ss:$16 sps:$4 sm:$0xff]   ;;  %v10646_v13 = vld [vmem:[%s14128_s1 + $0x1c8c] ss:$16 sps:$4 sm:$0xff]  }
 0x35d   : > { %7156 = vmatpush1.bf16.msra.mxu0 %v10551_v14  ;;  %7844 = vmatpush1.bf16.msra.mxu1 %v10554_v17  ;;  %v10641_v14 = vld [vmem:[%s14128_s1 + $0x1c80] ss:$16 sps:$4 sm:$0xff]   ;;  %v10644_v17 = vld [vmem:[%s14128_s1 + $0x1c88] ss:$16 sps:$4 sm:$0xff]  }
 0x35e   : > { %7157 = vmatprep.subr.bf16.mxu0 %v10559_v18  ;;  %7845 = vmatprep.subr.bf16.mxu1 %v10562_v21  ;;  %v10649_v18 = vld [vmem:[%s14128_s1 + $0x1ca4] ss:$16 sps:$4 sm:$0xff]   ;;  %v10652_v21 = vld [vmem:[%s14128_s1 + $0x1cac] ss:$16 sps:$4 sm:$0xff]  }
 0x361   : > { %7158 = vmatpush1.bf16.msra.mxu0 %v10557_v23  ;;  %7846 = vmatpush1.bf16.msra.mxu1 %v10560_v16  ;;  %v10647_v23 = vld [vmem:[%s14128_s1 + $0x1ca0] ss:$16 sps:$4 sm:$0xff]   ;;  %v10650_v16 = vld [vmem:[%s14128_s1 + $0x1ca8] ss:$16 sps:$4 sm:$0xff]  }
 0x362   : > { %7159 = vmatprep.subr.bf16.mxu0 %v10565_v24  ;;  %7847 = vmatprep.subr.bf16.mxu1 %v10568_v25  ;;  %v10655_v24 = vld [vmem:[%s14128_s1 + $0x1cc4] ss:$16 sps:$4 sm:$0xff]   ;;  %v10658_v25 = vld [vmem:[%s14128_s1 + $0x1ccc] ss:$16 sps:$4 sm:$0xff]  }
 0x365   : > { %7160 = vmatpush1.bf16.msra.mxu0 %v10563_v26  ;;  %7848 = vmatpush1.bf16.msra.mxu1 %v10566_v27  ;;  %v10653_v26 = vld [vmem:[%s14128_s1 + $0x1cc0] ss:$16 sps:$4 sm:$0xff]   ;;  %v10656_v27 = vld [vmem:[%s14128_s1 + $0x1cc8] ss:$16 sps:$4 sm:$0xff]  }
 0x366   : > { %7161 = vmatprep.subr.bf16.mxu0 %v10571_v28  ;;  %7849 = vmatprep.subr.bf16.mxu1 %v10574_v29  ;;  %v10661_v28 = vld [vmem:[%s14128_s1 + $0x1ce4] ss:$16 sps:$4 sm:$0xff]   ;;  %v10664_v29 = vld [vmem:[%s14128_s1 + $0x1cec] ss:$16 sps:$4 sm:$0xff]  }
 0x369   : > { %7162 = vmatpush1.bf16.msra.mxu0 %v10569_v30  ;;  %7850 = vmatpush1.bf16.msra.mxu1 %v10572_v31  ;;  %v10659_v30 = vld [vmem:[%s14128_s1 + $0x1ce0] ss:$16 sps:$4 sm:$0xff]   ;;  %v10662_v31 = vld [vmem:[%s14128_s1 + $0x1ce8] ss:$16 sps:$4 sm:$0xff]  }
 0x36a   : > { %7163 = vmatprep.subr.bf16.mxu0 %v10577_v32  ;;  %7851 = vmatprep.subr.bf16.mxu1 %v10580_v33  ;;  %v10667_v32 = vld [vmem:[%s14128_s1 + $0x1d04] ss:$16 sps:$4 sm:$0xff]   ;;  %v10670_v33 = vld [vmem:[%s14128_s1 + $0x1d0c] ss:$16 sps:$4 sm:$0xff]  }
 0x36d   : > { %7164 = vmatpush1.bf16.msra.mxu0 %v10575_v34  ;;  %7852 = vmatpush1.bf16.msra.mxu1 %v10578_v35  ;;  %v10665_v34 = vld [vmem:[%s14128_s1 + $0x1d00] ss:$16 sps:$4 sm:$0xff]   ;;  %v10668_v35 = vld [vmem:[%s14128_s1 + $0x1d08] ss:$16 sps:$4 sm:$0xff]  }
 0x36e   : > { %7165 = vmatprep.subr.bf16.mxu0 %v10583_v36  ;;  %7853 = vmatprep.subr.bf16.mxu1 %v10586_v37  ;;  %v10673_v36 = vld [vmem:[%s14128_s1 + $0x1d24] ss:$16 sps:$4 sm:$0xff]   ;;  %v10676_v37 = vld [vmem:[%s14128_s1 + $0x1d2c] ss:$16 sps:$4 sm:$0xff]  }
 0x371   : > { %7166 = vmatpush1.bf16.msra.mxu0 %v10581_v38  ;;  %7854 = vmatpush1.bf16.msra.mxu1 %v10584_v39  ;;  %v10671_v38 = vld [vmem:[%s14128_s1 + $0x1d20] ss:$16 sps:$4 sm:$0xff]   ;;  %v10674_v39 = vld [vmem:[%s14128_s1 + $0x1d28] ss:$16 sps:$4 sm:$0xff]  }
 0x372   : > { %7167 = vmatprep.subr.bf16.mxu0 %v10589_v40  ;;  %7855 = vmatprep.subr.bf16.mxu1 %v10592_v41  ;;  %v10679_v40 = vld [vmem:[%s14128_s1 + $0x1d44] ss:$16 sps:$4 sm:$0xff]   ;;  %v10682_v41 = vld [vmem:[%s14128_s1 + $0x1d4c] ss:$16 sps:$4 sm:$0xff]  }
 0x375   : > { %7168 = vmatpush1.bf16.msra.mxu0 %v10587_v42  ;;  %7856 = vmatpush1.bf16.msra.mxu1 %v10590_v43  ;;  %v10677_v42 = vld [vmem:[%s14128_s1 + $0x1d40] ss:$16 sps:$4 sm:$0xff]   ;;  %v10680_v43 = vld [vmem:[%s14128_s1 + $0x1d48] ss:$16 sps:$4 sm:$0xff]  }
 0x376   : > { %7169 = vmatprep.subr.bf16.mxu0 %v10595_v44  ;;  %7857 = vmatprep.subr.bf16.mxu1 %v10598_v45  ;;  %v10685_v44 = vld [vmem:[%s14128_s1 + $0x1d64] ss:$16 sps:$4 sm:$0xff]   ;;  %v10688_v45 = vld [vmem:[%s14128_s1 + $0x1d6c] ss:$16 sps:$4 sm:$0xff]  }
 0x379   : > { %7170 = vmatpush1.bf16.msra.mxu0 %v10593_v22  ;;  %7858 = vmatpush1.bf16.msra.mxu1 %v10596_v47  ;;  %v10683_v22 = vld [vmem:[%s14128_s1 + $0x1d60] ss:$16 sps:$4 sm:$0xff]   ;;  %v10686_v47 = vld [vmem:[%s14128_s1 + $0x1d68] ss:$16 sps:$4 sm:$0xff]  }
 0x37a   : > { %7171 = vmatprep.subr.bf16.mxu0 %v10601_v48  ;;  %7859 = vmatprep.subr.bf16.mxu1 %v10604_v19  ;;  %v10691_v48 = vld [vmem:[%s14128_s1 + $0x1d84] ss:$16 sps:$4 sm:$0xff]   ;;  %v10694_v19 = vld [vmem:[%s14128_s1 + $0x1d8c] ss:$16 sps:$4 sm:$0xff]  }
 0x37d   : > { %7172 = vmatpush1.bf16.msra.mxu0 %v10599_v20  ;;  %7860 = vmatpush1.bf16.msra.mxu1 %v10602_v51  ;;  %v10689_v20 = vld [vmem:[%s14128_s1 + $0x1d80] ss:$16 sps:$4 sm:$0xff]   ;;  %v10692_v51 = vld [vmem:[%s14128_s1 + $0x1d88] ss:$16 sps:$4 sm:$0xff]  }
 0x37e   : > { %7173 = vmatprep.subr.bf16.mxu0 %v10607_v52  ;;  %7861 = vmatprep.subr.bf16.mxu1 %v10610_v15  ;;  %v10697_v52 = vld [vmem:[%s14128_s1 + $0x1da4] ss:$16 sps:$4 sm:$0xff]   ;;  %v10700_v15 = vld [vmem:[%s14128_s1 + $0x1dac] ss:$16 sps:$4 sm:$0xff]  }
 0x381   : > { %7174 = vmatpush1.bf16.msra.mxu0 %v10605_v46  ;;  %7862 = vmatpush1.bf16.msra.mxu1 %v10608_v55  ;;  %v10695_v46 = vld [vmem:[%s14128_s1 + $0x1da0] ss:$16 sps:$4 sm:$0xff]   ;;  %v10698_v55 = vld [vmem:[%s14128_s1 + $0x1da8] ss:$16 sps:$4 sm:$0xff]  }
 0x382   : > { %7175 = vmatprep.subr.bf16.mxu0 %v10613_v56  ;;  %7863 = vmatprep.subr.bf16.mxu1 %v10616_v49  ;;  %v10703_v56 = vld [vmem:[%s14128_s1 + $0x1dc4] ss:$16 sps:$4 sm:$0xff]   ;;  %v10706_v49 = vld [vmem:[%s14128_s1 + $0x1dcc] ss:$16 sps:$4 sm:$0xff]  }
 0x385   : > { %7176 = vmatpush1.bf16.msra.mxu0 %v10611_v50  ;;  %7864 = vmatpush1.bf16.msra.mxu1 %v10614_v59  ;;  %v10701_v50 = vld [vmem:[%s14128_s1 + $0x1dc0] ss:$16 sps:$4 sm:$0xff]   ;;  %v10704_v59 = vld [vmem:[%s14128_s1 + $0x1dc8] ss:$16 sps:$4 sm:$0xff]  }
 0x386   : > { %7188 = vmatprep.subr.bf16.mxu0 %v10619_v60  ;;  %7876 = vmatprep.subr.bf16.mxu1 %v10622_v53  ;;  %v10709_v60 = vld [vmem:[%s14128_s1 + $0x1de4] ss:$16 sps:$4 sm:$0xff]   ;;  %v10712_v53 = vld [vmem:[%s14128_s1 + $0x1dec] ss:$16 sps:$4 sm:$0xff]  }
 0x388   : > { %7178 = vmatmul.mubr.bf16.vlgmr.msra.gmra.mrb[0].mxu0 %v8104_v54  ;;  %7866 = vmatmul.mubr.bf16.vlgmr.msra.gmra.mrb[0].mxu1 %v8104_v54  ;;  %v10707_v54 = vld [vmem:[%s14128_s1 + $0x1de0] ss:$16 sps:$4 sm:$0xff]  }
 0x389   : > { %7189 = vmatpush1.bf16.msra.mxu0 %v10617_v63  ;;  %7877 = vmatpush1.bf16.msra.mxu1 %v10620_v0  ;;  %v10710_v63 = vld [vmem:[%s14128_s1 + $0x1de8] ss:$16 sps:$4 sm:$0xff]   ;;  %v10715_v0 = vld [vmem:[%s14128_s1 + $0x1e04] ss:$16 sps:$4 sm:$0xff]  }
 0x38a   : > { %7190 = vmatprep.subr.bf16.mxu0 %v10625_v57  ;;  %7878 = vmatprep.subr.bf16.mxu1 %v10628_v58  ;;  %v10718_v57 = vld [vmem:[%s14128_s1 + $0x1e0c] ss:$16 sps:$4 sm:$0xff]   ;;  %v8106_v58 = vcombine.low %v13693_v61, %v13696_v62  ;;  %v10721_v61 = vld [vmem:[%s14128_s1 + $0x1e24] ss:$16 sps:$4 sm:$0xff]  }
 0x38b   : > { %7220 = vmatprep.mubr.bf16.mxu0 %v8107_v1  ;;  %7908 = vmatprep.mubr.bf16.mxu1 %v8107_v1  ;;  %v13895_v1 = vld [vmem:[%s10996_s17 + $0x78] sm:$0xff] }
 0x38c   : > { %v10724_v62 = vld [vmem:[%s14128_s1 + $0x1e2c] ss:$16 sps:$4 sm:$0xff]  }
 0x38d   : > { %7191 = vmatpush1.bf16.msra.mxu0 %v10623_v2  ;;  %7879 = vmatpush1.bf16.msra.mxu1 %v10626_v3  ;;  %v13898_v2 = vld [vmem:[%s10996_s17 + $0xf8] sm:$0xff]  ;;  %v10713_v3 = vld [vmem:[%s14128_s1 + $0x1e00] ss:$16 sps:$4 sm:$0xff]  }
 0x38e   : > { %7192 = vmatprep.subr.bf16.mxu0 %v10631_v4  ;;  %7880 = vmatprep.subr.bf16.mxu1 %v10634_v5  ;;  %v10716_v4 = vld [vmem:[%s14128_s1 + $0x1e08] ss:$16 sps:$4 sm:$0xff]   ;;  %v8109_v5 = vcombine.high %v13895_v1, %v13898_v2 }
 0x391   : > { %7193 = vmatpush1.bf16.msra.mxu0 %v10629_v6  ;;  %7881 = vmatpush1.bf16.msra.mxu1 %v10632_v7  ;;  %v10719_v6 = vld [vmem:[%s14128_s1 + $0x1e20] ss:$16 sps:$4 sm:$0xff]   ;;  %v10722_v7 = vld [vmem:[%s14128_s1 + $0x1e28] ss:$16 sps:$4 sm:$0xff]  }
 0x392   : > { %7194 = vmatprep.subr.bf16.mxu0 %v10637_v8  ;;  %7882 = vmatprep.subr.bf16.mxu1 %v10640_v9  ;;  %v10727_v8 = vld [vmem:[%s14128_s1 + $0x1e44] ss:$16 sps:$4 sm:$0xff]   ;;  %v10730_v9 = vld [vmem:[%s14128_s1 + $0x1e4c] ss:$16 sps:$4 sm:$0xff]  }
 0x395   : > { %7195 = vmatpush1.bf16.msra.mxu0 %v10635_v10  ;;  %7883 = vmatpush1.bf16.msra.mxu1 %v10638_v11  ;;  %v10725_v10 = vld [vmem:[%s14128_s1 + $0x1e40] ss:$16 sps:$4 sm:$0xff]   ;;  %v10728_v11 = vld [vmem:[%s14128_s1 + $0x1e48] ss:$16 sps:$4 sm:$0xff]  }
 0x396   : > { %7196 = vmatprep.subr.bf16.mxu0 %v10643_v12  ;;  %7884 = vmatprep.subr.bf16.mxu1 %v10646_v13  ;;  %v10733_v12 = vld [vmem:[%s14128_s1 + $0x1e64] ss:$16 sps:$4 sm:$0xff]   ;;  %v10736_v13 = vld [vmem:[%s14128_s1 + $0x1e6c] ss:$16 sps:$4 sm:$0xff]  }
 0x399   : > { %7197 = vmatpush1.bf16.msra.mxu0 %v10641_v14  ;;  %7885 = vmatpush1.bf16.msra.mxu1 %v10644_v17  ;;  %v10731_v14 = vld [vmem:[%s14128_s1 + $0x1e60] ss:$16 sps:$4 sm:$0xff]   ;;  %v10734_v17 = vld [vmem:[%s14128_s1 + $0x1e68] ss:$16 sps:$4 sm:$0xff]  }
 0x39a   : > { %7198 = vmatprep.subr.bf16.mxu0 %v10649_v18  ;;  %7886 = vmatprep.subr.bf16.mxu1 %v10652_v21  ;;  %v10739_v18 = vld [vmem:[%s14128_s1 + $0x1e84] ss:$16 sps:$4 sm:$0xff]   ;;  %v10742_v21 = vld [vmem:[%s14128_s1 + $0x1e8c] ss:$16 sps:$4 sm:$0xff]  }
 0x39d   : > { %7199 = vmatpush1.bf16.msra.mxu0 %v10647_v23  ;;  %7887 = vmatpush1.bf16.msra.mxu1 %v10650_v16  ;;  %v10737_v23 = vld [vmem:[%s14128_s1 + $0x1e80] ss:$16 sps:$4 sm:$0xff]   ;;  %v10740_v16 = vld [vmem:[%s14128_s1 + $0x1e88] ss:$16 sps:$4 sm:$0xff]  }
 0x39e   : > { %7200 = vmatprep.subr.bf16.mxu0 %v10655_v24  ;;  %7888 = vmatprep.subr.bf16.mxu1 %v10658_v25  ;;  %v10745_v24 = vld [vmem:[%s14128_s1 + $0x1ea4] ss:$16 sps:$4 sm:$0xff]   ;;  %v10748_v25 = vld [vmem:[%s14128_s1 + $0x1eac] ss:$16 sps:$4 sm:$0xff]  }
 0x3a1   : > { %7201 = vmatpush1.bf16.msra.mxu0 %v10653_v26  ;;  %7889 = vmatpush1.bf16.msra.mxu1 %v10656_v27  ;;  %v10743_v26 = vld [vmem:[%s14128_s1 + $0x1ea0] ss:$16 sps:$4 sm:$0xff]   ;;  %v10746_v27 = vld [vmem:[%s14128_s1 + $0x1ea8] ss:$16 sps:$4 sm:$0xff]  }
 0x3a2   : > { %7202 = vmatprep.subr.bf16.mxu0 %v10661_v28  ;;  %7890 = vmatprep.subr.bf16.mxu1 %v10664_v29  ;;  %v10751_v28 = vld [vmem:[%s14128_s1 + $0x1ec4] ss:$16 sps:$4 sm:$0xff]   ;;  %v10754_v29 = vld [vmem:[%s14128_s1 + $0x1ecc] ss:$16 sps:$4 sm:$0xff]  }
 0x3a5   : > { %7203 = vmatpush1.bf16.msra.mxu0 %v10659_v30  ;;  %7891 = vmatpush1.bf16.msra.mxu1 %v10662_v31  ;;  %v10749_v30 = vld [vmem:[%s14128_s1 + $0x1ec0] ss:$16 sps:$4 sm:$0xff]   ;;  %v10752_v31 = vld [vmem:[%s14128_s1 + $0x1ec8] ss:$16 sps:$4 sm:$0xff]  }
 0x3a6   : > { %7204 = vmatprep.subr.bf16.mxu0 %v10667_v32  ;;  %7892 = vmatprep.subr.bf16.mxu1 %v10670_v33  ;;  %v10757_v32 = vld [vmem:[%s14128_s1 + $0x1ee4] ss:$16 sps:$4 sm:$0xff]   ;;  %v10760_v33 = vld [vmem:[%s14128_s1 + $0x1eec] ss:$16 sps:$4 sm:$0xff]  }
 0x3a9   : > { %7205 = vmatpush1.bf16.msra.mxu0 %v10665_v34  ;;  %7893 = vmatpush1.bf16.msra.mxu1 %v10668_v35  ;;  %v10755_v34 = vld [vmem:[%s14128_s1 + $0x1ee0] ss:$16 sps:$4 sm:$0xff]   ;;  %v10758_v35 = vld [vmem:[%s14128_s1 + $0x1ee8] ss:$16 sps:$4 sm:$0xff]  }
 0x3aa   : > { %7206 = vmatprep.subr.bf16.mxu0 %v10673_v36  ;;  %7894 = vmatprep.subr.bf16.mxu1 %v10676_v37  ;;  %v10763_v36 = vld [vmem:[%s14128_s1 + $0x1f04] ss:$16 sps:$4 sm:$0xff]   ;;  %v10766_v37 = vld [vmem:[%s14128_s1 + $0x1f0c] ss:$16 sps:$4 sm:$0xff]  }
 0x3ad   : > { %7207 = vmatpush1.bf16.msra.mxu0 %v10671_v38  ;;  %7895 = vmatpush1.bf16.msra.mxu1 %v10674_v39  ;;  %v10761_v38 = vld [vmem:[%s14128_s1 + $0x1f00] ss:$16 sps:$4 sm:$0xff]   ;;  %v10764_v39 = vld [vmem:[%s14128_s1 + $0x1f08] ss:$16 sps:$4 sm:$0xff]  }
 0x3ae   : > { %7208 = vmatprep.subr.bf16.mxu0 %v10679_v40  ;;  %7896 = vmatprep.subr.bf16.mxu1 %v10682_v41  ;;  %v10769_v40 = vld [vmem:[%s14128_s1 + $0x1f24] ss:$16 sps:$4 sm:$0xff]   ;;  %v10772_v41 = vld [vmem:[%s14128_s1 + $0x1f2c] ss:$16 sps:$4 sm:$0xff]  }
 0x3b1   : > { %7209 = vmatpush1.bf16.msra.mxu0 %v10677_v42  ;;  %7897 = vmatpush1.bf16.msra.mxu1 %v10680_v43  ;;  %v10767_v42 = vld [vmem:[%s14128_s1 + $0x1f20] ss:$16 sps:$4 sm:$0xff]   ;;  %v10770_v43 = vld [vmem:[%s14128_s1 + $0x1f28] ss:$16 sps:$4 sm:$0xff]  }
 0x3b2   : > { %7210 = vmatprep.subr.bf16.mxu0 %v10685_v44  ;;  %7898 = vmatprep.subr.bf16.mxu1 %v10688_v45  ;;  %v10775_v44 = vld [vmem:[%s14128_s1 + $0x1f44] ss:$16 sps:$4 sm:$0xff]   ;;  %v10778_v45 = vld [vmem:[%s14128_s1 + $0x1f4c] ss:$16 sps:$4 sm:$0xff]  }
 0x3b5   : > { %7211 = vmatpush1.bf16.msra.mxu0 %v10683_v22  ;;  %7899 = vmatpush1.bf16.msra.mxu1 %v10686_v47  ;;  %v10773_v22 = vld [vmem:[%s14128_s1 + $0x1f40] ss:$16 sps:$4 sm:$0xff]   ;;  %v10776_v47 = vld [vmem:[%s14128_s1 + $0x1f48] ss:$16 sps:$4 sm:$0xff]  }
 0x3b6   : > { %7212 = vmatprep.subr.bf16.mxu0 %v10691_v48  ;;  %7900 = vmatprep.subr.bf16.mxu1 %v10694_v19  ;;  %v10781_v48 = vld [vmem:[%s14128_s1 + $0x1f64] ss:$16 sps:$4 sm:$0xff]   ;;  %v10784_v19 = vld [vmem:[%s14128_s1 + $0x1f6c] ss:$16 sps:$4 sm:$0xff]  }
 0x3b9   : > { %7213 = vmatpush1.bf16.msra.mxu0 %v10689_v20  ;;  %7901 = vmatpush1.bf16.msra.mxu1 %v10692_v51  ;;  %v10779_v20 = vld [vmem:[%s14128_s1 + $0x1f60] ss:$16 sps:$4 sm:$0xff]   ;;  %v10782_v51 = vld [vmem:[%s14128_s1 + $0x1f68] ss:$16 sps:$4 sm:$0xff]  }
 0x3ba   : > { %7214 = vmatprep.subr.bf16.mxu0 %v10697_v52  ;;  %7902 = vmatprep.subr.bf16.mxu1 %v10700_v15  ;;  %v10787_v52 = vld [vmem:[%s14128_s1 + $0x1f84] ss:$16 sps:$4 sm:$0xff]   ;;  %v10790_v15 = vld [vmem:[%s14128_s1 + $0x1f8c] ss:$16 sps:$4 sm:$0xff]  }
 0x3bd   : > { %7215 = vmatpush1.bf16.msra.mxu0 %v10695_v46  ;;  %7903 = vmatpush1.bf16.msra.mxu1 %v10698_v55  ;;  %v10785_v46 = vld [vmem:[%s14128_s1 + $0x1f80] ss:$16 sps:$4 sm:$0xff]   ;;  %v10788_v55 = vld [vmem:[%s14128_s1 + $0x1f88] ss:$16 sps:$4 sm:$0xff]  }
 0x3be   : > { %7216 = vmatprep.subr.bf16.mxu0 %v10703_v56  ;;  %7904 = vmatprep.subr.bf16.mxu1 %v10706_v49  ;;  %v10793_v56 = vld [vmem:[%s14128_s1 + $0x1fa4] ss:$16 sps:$4 sm:$0xff]   ;;  %v10796_v49 = vld [vmem:[%s14128_s1 + $0x1fac] ss:$16 sps:$4 sm:$0xff]  }
 0x3c1   : > { %7217 = vmatpush1.bf16.msra.mxu0 %v10701_v50  ;;  %7905 = vmatpush1.bf16.msra.mxu1 %v10704_v59  ;;  %v10791_v50 = vld [vmem:[%s14128_s1 + $0x1fa0] ss:$16 sps:$4 sm:$0xff]   ;;  %v10794_v59 = vld [vmem:[%s14128_s1 + $0x1fa8] ss:$16 sps:$4 sm:$0xff]  }
 0x3c2   : > { %7218 = vmatprep.subr.bf16.mxu0 %v10709_v60  ;;  %7906 = vmatprep.subr.bf16.mxu1 %v10712_v53  ;;  %v10799_v60 = vld [vmem:[%s14128_s1 + $0x1fc4] ss:$16 sps:$4 sm:$0xff]   ;;  %v10802_v53 = vld [vmem:[%s14128_s1 + $0x1fcc] ss:$16 sps:$4 sm:$0xff]  }
 0x3c5   : > { %7219 = vmatpush1.bf16.msra.mxu0 %v10707_v54  ;;  %7907 = vmatpush1.bf16.msra.mxu1 %v10710_v63  ;;  %v10797_v54 = vld [vmem:[%s14128_s1 + $0x1fc0] ss:$16 sps:$4 sm:$0xff]   ;;  %v10800_v63 = vld [vmem:[%s14128_s1 + $0x1fc8] ss:$16 sps:$4 sm:$0xff]  }
 0x3c6   : > { %7231 = vmatprep.subr.bf16.mxu0 %v10715_v0  ;;  %7919 = vmatprep.subr.bf16.mxu1 %v10718_v57  ;;  %v10805_v0 = vld [vmem:[%s14128_s1 + $0x1fe4] ss:$16 sps:$4 sm:$0xff]   ;;  %v10808_v57 = vld [vmem:[%s14128_s1 + $0x1fec] ss:$16 sps:$4 sm:$0xff]  }
 0x3c8   : > { %7221 = vmatmul.mubr.bf16.vlgmr.msra.gmra.mrb[0].mxu0 %v8106_v58  ;;  %7909 = vmatmul.mubr.bf16.vlgmr.msra.gmra.mrb[0].mxu1 %v8106_v58  ;;  %v10803_v58 = vld [vmem:[%s14128_s1 + $0x1fe0] ss:$16 sps:$4 sm:$0xff]  }
 0x3c9   : > { %7232 = vmatpush1.bf16.msra.mxu0 %v10713_v3  ;;  %7920 = vmatpush1.bf16.msra.mxu1 %v10716_v4  ;;  %v10806_v3 = vld [vmem:[%s14128_s1 + $0x1fe8] ss:$16 sps:$4 sm:$0xff]   ;;  %v8108_v4 = vcombine.low %v13895_v1, %v13898_v2 }
 0x3ca   : > { %7233 = vmatprep.subr.bf16.mxu0 %v10721_v61  ;;  %7921 = vmatprep.subr.bf16.mxu1 %v10724_v62  ;;  %v1286_v61 = vlaneseq }
 0x3cb   : > { %7263 = vmatprep.mubr.bf16.mxu0 %v8109_v5  ;;  %7951 = vmatprep.mubr.bf16.mxu1 %v8109_v5 }
 0x3cc   : > { %v1287_v62 = vshrl.u32 %v1286_v61, 7 }
 0x3cd   : > { %7234 = vmatpush1.bf16.msra.mxu0 %v10719_v6  ;;  %7922 = vmatpush1.bf16.msra.mxu1 %v10722_v7  ;;  %v1284_v7 = vld [vmem:[%s14129_s2] sm:$0xf] }
 0x3ce   : > { %7235 = vmatprep.subr.bf16.mxu0 %v10727_v8  ;;  %7923 = vmatprep.subr.bf16.mxu1 %v10730_v9  ;;  %v1288_v5 = vsub.s32 0, %v1287_v62  ;;  %v1296_v6 = vsub.s32 2, %v1287_v62  ;;  %v1292_v8 = vsub.s32 1, %v1287_v62  ;;  %v1300_v9 = vsub.s32 3, %v1287_v62 }
 0x3d1   : > { %7236 = vmatpush1.bf16.msra.mxu0 %v10725_v10  ;;  %7924 = vmatpush1.bf16.msra.mxu1 %v10728_v11  ;;  %v1289_v10 = vrot.slane %v1284_v7, %v1288_v5  ;;  %v1297_v11 = vrot.slane %v1284_v7, %v1296_v6 }
 0x3d2   : > { %7237 = vmatprep.subr.bf16.mxu0 %v10733_v12  ;;  %7925 = vmatprep.subr.bf16.mxu1 %v10736_v13  ;;  %v1293_v12 = vrot.slane %v1284_v7, %v1292_v8  ;;  %v1301_v13 = vrot.slane %v1284_v7, %v1300_v9 }
 0x3d5   : > { %7238 = vmatpush1.bf16.msra.mxu0 %v10731_v14  ;;  %7926 = vmatpush1.bf16.msra.mxu1 %v10734_v17 }
 0x3d6   : > { %7239 = vmatprep.subr.bf16.mxu0 %v10739_v18  ;;  %7927 = vmatprep.subr.bf16.mxu1 %v10742_v21 }
 0x3d9   : > { %7240 = vmatpush1.bf16.msra.mxu0 %v10737_v23  ;;  %7928 = vmatpush1.bf16.msra.mxu1 %v10740_v16 }
 0x3da   : > { %7241 = vmatprep.subr.bf16.mxu0 %v10745_v24  ;;  %7929 = vmatprep.subr.bf16.mxu1 %v10748_v25 }
 0x3dd   : > { %7242 = vmatpush1.bf16.msra.mxu0 %v10743_v26  ;;  %7930 = vmatpush1.bf16.msra.mxu1 %v10746_v27 }
 0x3de   : > { %7243 = vmatprep.subr.bf16.mxu0 %v10751_v28  ;;  %7931 = vmatprep.subr.bf16.mxu1 %v10754_v29 }
 0x3e1   : > { %7244 = vmatpush1.bf16.msra.mxu0 %v10749_v30  ;;  %7932 = vmatpush1.bf16.msra.mxu1 %v10752_v31 }
 0x3e2   : > { %7245 = vmatprep.subr.bf16.mxu0 %v10757_v32  ;;  %7933 = vmatprep.subr.bf16.mxu1 %v10760_v33 }
 0x3e5   : > { %7246 = vmatpush1.bf16.msra.mxu0 %v10755_v34  ;;  %7934 = vmatpush1.bf16.msra.mxu1 %v10758_v35  ;;  %v7986_v34 = vld [vmem:[%s14130_s3] sm:$0xff] }
 0x3e6   : > { %7247 = vmatprep.subr.bf16.mxu0 %v10763_v36  ;;  %7935 = vmatprep.subr.bf16.mxu1 %v10766_v37  ;;  %v7990_v37 = vld [vmem:[%s14130_s3 + $0x20] sm:$0xff] }
 0x3e9   : > { %7248 = vmatpush1.bf16.msra.mxu0 %v10761_v38  ;;  %7936 = vmatpush1.bf16.msra.mxu1 %v10764_v39 }
 0x3ea   : > { %7249 = vmatprep.subr.bf16.mxu0 %v10769_v40  ;;  %7937 = vmatprep.subr.bf16.mxu1 %v10772_v41  ;;  %v7987_v40 = vld [vmem:[%s14130_s3 + $0x8] sm:$0xff]  ;;  %v7988_v41 = vld [vmem:[%s14130_s3 + $0x10] sm:$0xff] }
 0x3ed   : > { %7250 = vmatpush1.bf16.msra.mxu0 %v10767_v42  ;;  %7938 = vmatpush1.bf16.msra.mxu1 %v10770_v43 }
 0x3ee   : > { %7251 = vmatprep.subr.bf16.mxu0 %v10775_v44  ;;  %7939 = vmatprep.subr.bf16.mxu1 %v10778_v45  ;;  %v7991_v45 = vld [vmem:[%s14130_s3 + $0x28] sm:$0xff] }
 0x3f1   : > { %7252 = vmatpush1.bf16.msra.mxu0 %v10773_v22  ;;  %7940 = vmatpush1.bf16.msra.mxu1 %v10776_v47 }
 0x3f2   : > { %7253 = vmatprep.subr.bf16.mxu0 %v10781_v48  ;;  %7941 = vmatprep.subr.bf16.mxu1 %v10784_v19 }
 0x3f5   : > { %7254 = vmatpush1.bf16.msra.mxu0 %v10779_v20  ;;  %7942 = vmatpush1.bf16.msra.mxu1 %v10782_v51 }
 0x3f6   : > { %7255 = vmatprep.subr.bf16.mxu0 %v10787_v52  ;;  %7943 = vmatprep.subr.bf16.mxu1 %v10790_v15 }
 0x3f9   : > { %7256 = vmatpush1.bf16.msra.mxu0 %v10785_v46  ;;  %7944 = vmatpush1.bf16.msra.mxu1 %v10788_v55  ;;  %v7989_v55 = vld [vmem:[%s14130_s3 + $0x18] sm:$0xff] }
 0x3fa   : > { %7257 = vmatprep.subr.bf16.mxu0 %v10793_v56  ;;  %7945 = vmatprep.subr.bf16.mxu1 %v10796_v49  ;;  %v7992_v56 = vld [vmem:[%s14130_s3 + $0x30] sm:$0xff] }
 0x3fd   : > { %7258 = vmatpush1.bf16.msra.mxu0 %v10791_v50  ;;  %7946 = vmatpush1.bf16.msra.mxu1 %v10794_v59 }
 0x3fe   : > { %7259 = vmatprep.subr.bf16.mxu0 %v10799_v60  ;;  %7947 = vmatprep.subr.bf16.mxu1 %v10802_v53  ;;  %v7993_v53 = vld [vmem:[%s14130_s3 + $0x38] sm:$0xff] }
 0x401   : > { %7260 = vmatpush1.bf16.msra.mxu0 %v10797_v54  ;;  %7948 = vmatpush1.bf16.msra.mxu1 %v10800_v63 }
 0x402   : > { %7261 = vmatprep.subr.bf16.mxu0 %v10805_v0  ;;  %7949 = vmatprep.subr.bf16.mxu1 %v10808_v57 }
 0x405   : > { %7262 = vmatpush1.bf16.msra.mxu0 %v10803_v58  ;;  %7950 = vmatpush1.bf16.msra.mxu1 %v10806_v3 }
 0x408   : > { %7264 = vmatmul.mubr.bf16.vlgmr.msra.gmra.mrb[0].mxu0 %v8108_v4  ;;  %7952 = vmatmul.mubr.bf16.vlgmr.msra.gmra.mrb[0].mxu1 %v8108_v4 }
 0x4db   : > { %v7265_v14 = vpop.f32.mrb[0].mxu0  ;;  %v7953_v1 = vpop.f32.mrb[0].mxu1 }
 0x4dc   : > { %v9137_v2 = vadd.f32 %v7265_v14, %v1289_v10  ;;  %v9141_v17 = vadd.f32 %v7953_v1, %v1297_v11  ;;  %v7267_v18 = vpop.f32.mrb[1].mxu0  ;;  %v7955_v21 = vpop.f32.mrb[1].mxu1 }
 0x4dd   : > { %v9138_v23 = vadd.f32 %v7267_v18, %v1293_v12  ;;  %v9142_v16 = vadd.f32 %v7955_v21, %v1301_v13  ;;  %v7269_v24 = vpop.f32.mrb[2].mxu0  ;;  %v7957_v25 = vpop.f32.mrb[2].mxu1 }
 0x4de   : > { %vm7962_vm0 = vcmp.gt.f32.partialorder %v9137_v2, 0.0  ;;  %v7970_v26 = vmul.f32 0.2, %v9137_v2  ;;  %vm7964_vm1 = vcmp.gt.f32.partialorder %v9141_v17, 0.0  ;;  %v7972_v27 = vmul.f32 0.2, %v9141_v17 }
 0x4df   : > { %vm7963_vm2 = vcmp.gt.f32.partialorder %v9138_v23, 0.0  ;;  %v7971_v28 = vmul.f32 0.2, %v9138_v23  ;;  %vm7965_vm3 = vcmp.gt.f32.partialorder %v9142_v16, 0.0  ;;  %v7973_v29 = vmul.f32 0.2, %v9142_v16 }
 0x4e0   : > { %v9139_v30 = vadd.f32 %v7269_v24, %v1289_v10  ;;  %v9143_v31 = vadd.f32 %v7957_v25, %v1297_v11  ;;  %v7271_v32 = vpop.f32.mrb[3].mxu0  ;;  %v7959_v33 = vpop.f32.mrb[3].mxu1  ;;  %v7978_v35 = vsel %vm7962_vm0, %v9137_v2, %v7970_v26  ;;  %v7980_v47 = vsel %vm7964_vm1, %v9141_v17, %v7972_v27 }
 0x4e1   : > { %v7979_v36 = vsel %vm7963_vm2, %v9138_v23, %v7971_v28  ;;  %v9140_v38 = vadd.f32 %v7271_v32, %v1293_v12  ;;  %v9144_v39 = vadd.f32 %v7959_v33, %v1301_v13  ;;  %v7994_v19 = vmul.f32 %v7986_v34, %v7978_v35  ;;  %v8019_v12 = vld [vmem:[#allocation2] sm:$0x1] }
 0x4e2   : > { %vm7966_vm4 = vcmp.gt.f32.partialorder %v9139_v30, 0.0  ;;  %v7974_v42 = vmul.f32 0.2, %v9139_v30  ;;  %vm7968_vm5 = vcmp.gt.f32.partialorder %v9143_v31, 0.0  ;;  %v7976_v43 = vmul.f32 0.2, %v9143_v31 }
 0x4e3   : > { %vm7967_vm6 = vcmp.gt.f32.partialorder %v9140_v38, 0.0  ;;  %v7975_v44 = vmul.f32 0.2, %v9140_v38  ;;  %v7977_v22 = vmul.f32 0.2, %v9144_v39  ;;  %vm7969_vm7 = vcmp.gt.f32.partialorder %v9144_v39, 0.0 }
 0x4e4   : > { %v7982_v48 = vsel %vm7966_vm4, %v9139_v30, %v7974_v42  ;;  %v7995_v20 = vmul.f32 %v7987_v40, %v7979_v36  ;;  %v7984_v52 = vsel %vm7968_vm5, %v9143_v31, %v7976_v43  ;;  %v7981_v46 = vsel %vm7965_vm3, %v9142_v16, %v7973_v29 }
 0x4e5   : > { %v7998_v51 = vmul.f32 %v7990_v37, %v7982_v48  ;;  %v7983_v15 = vsel %vm7967_vm6, %v9140_v38, %v7975_v44  ;;  %v7996_v50 = vmul.f32 %v7988_v41, %v7980_v47  ;;  %v7985_v60 = vsel %vm7969_vm7, %v9144_v39, %v7977_v22 }
 0x4e6   : > { %v7999_v49 = vmul.f32 %v7991_v45, %v7983_v15  ;;  %v8002_v59 = vadd.f32 %v7995_v20, %v7994_v19  ;;  %v7997_v54 = vmul.f32 %v7989_v55, %v7981_v46  ;;  %v8000_v0 = vmul.f32 %v7992_v56, %v7984_v52 }
 0x4e7   : > { %v8001_v3 = vmul.f32 %v7993_v53, %v7985_v60 }
 0x4e8   : > { %v8003_v63 = vadd.f32 %v8002_v59, %v7996_v50  ;;  %v8007_v57 = vadd.f32 %v7999_v49, %v7998_v51 }
 0x4ea   : > { %v8004_v58 = vadd.f32 %v8003_v63, %v7997_v54  ;;  %v8008_v4 = vadd.f32 %v8007_v57, %v8000_v0 }
 0x4ec   : > { %8005 = vadd.xlane.f32.xlu0 %v8004_v58  ;;  %v8009_v61 = vadd.f32 %v8008_v4, %v8001_v3 }
 0x4f0   : > { %8010 = vadd.xlane.f32.xlu0 %v8009_v61 }
 0x579   : > { %v8006_v62 = vpop.xlane.xlu0 %8005 }
 0x57d   : > { %v8011_v5 = vpop.xlane.xlu0 %8010 }
 0x57e   : > { %v8012_v6 = vadd.f32 %v8011_v5, %v8006_v62 }
 0x580   : > { %v8013_v7 = vrot.slane %v8012_v6, 4 }
 0x582   : > { %v8014_v8 = vadd.f32 %v8013_v7, %v8012_v6 }
 0x584   : > { %v8015_v9 = vrot.slane %v8014_v8, 2 }
 0x586   : > { %v8016_v10 = vadd.f32 %v8015_v9, %v8014_v8 }
 0x588   : > { %v8017_v11 = vrot.slane %v8016_v10, 1 }
 0x58a   : > { %v8018_v13 = vadd.f32 %v8017_v11, %v8016_v10 }
 0x58c   : > { %v8020_v14 = vadd.f32 %v8019_v12, %v8018_v13 }
 0x58e   : > { %8022 = vst.msk [vmem:[%s227_s13] sm:$0x1] %vm8021_vm8, %v8020_v14 }
 0x58f PF: > { %s17_s20 = sadd.s32 1, %s10815_s20  }
 0x590   : > { %p14_p5 = scmp.ge.s32.totalorder %s17_s20, 4  }
 0x592   :  { %16 = sbr.rel (!%p14_p5) target bundleno = 3 (0x3), region = 70 }

</bundles_post_ra>
